<compile_context>
chip_gen: v7x
topology: tpu7x:2x2x1
jax: 0.10.0
libtpu: 0.0.40
codegen_flags: <defaults>
</compile_context>

<pallas_src>
import functools

import jax
import jax.numpy as jnp
from jax.experimental import pallas as pl
from jax.experimental.pallas import tpu as pltpu  # available for CompilerParams if scaled up

BN_EPS = 1e-5
# MXU input dtype for the im2col matmuls.  bf16 halves A/W DMA bytes and lifts
# MXU throughput on v6e/v7x (accumulation stays f32 either way via
# preferred_element_type); default f32 keeps exact numerical parity with the
# f32 PyTorch reference.
MATMUL_DTYPE = jnp.float32


# ---------------------------------------------------------------------------
# Pallas kernels: fused im2col-matmul + BN(batch stats) + epilogue
# ---------------------------------------------------------------------------
def _conv_bn_act_kernel(a_ref, w_ref, g_ref, b_ref, m_ref, o_ref, *, inv_m):
    """y = A @ W ; per-channel BN from in-kernel sums ; ReLU where mask==1.

    Padded (all-zero) rows of A contribute exactly zero to the sums, so the
    statistics over the true M rows are obtained with the static 1/M factor.
    """
    y = jnp.dot(a_ref[...], w_ref[...], preferred_element_type=jnp.float32)
    mean = jnp.sum(y, axis=0, keepdims=True) * inv_m              # (1, C)
    var = jnp.sum(y * y, axis=0, keepdims=True) * inv_m - mean * mean
    inv = g_ref[...] * jax.lax.rsqrt(var + BN_EPS)
    z = y * inv + (b_ref[...] - mean * inv)
    m = m_ref[...]                                                # (1, C) 0/1
    o_ref[...] = m * jnp.maximum(z, 0.0) + (1.0 - m) * z          # masked ReLU


def _conv_bn_add_relu_kernel(a_ref, w_ref, g_ref, b_ref, r_ref, o_ref, *, inv_m):
    """y = A @ W ; per-channel BN ; + residual ; ReLU (BasicBlock conv2)."""
    y = jnp.dot(a_ref[...], w_ref[...], preferred_element_type=jnp.float32)
    mean = jnp.sum(y, axis=0, keepdims=True) * inv_m
    var = jnp.sum(y * y, axis=0, keepdims=True) * inv_m - mean * mean
    inv = g_ref[...] * jax.lax.rsqrt(var + BN_EPS)
    z = y * inv + (b_ref[...] - mean * inv)
    o_ref[...] = jnp.maximum(z + r_ref[...], 0.0)


# ---------------------------------------------------------------------------
# Pallas wrapper
# ---------------------------------------------------------------------------
def _fused_conv_bn(a, w, gamma, beta, relu_mask=None, residual=None):
    """One pallas_call: (M,K)@(K,C) + BN (batch stats) [+ residual] + act.

    Full-array VMEM blocks, no grid — everything fits comfortably in VMEM at
    this model size.  Rows are padded only to the 8-sublane minimum.
    """
    M, K = a.shape
    C = w.shape[1]
    Mp = ((M + 7) // 8) * 8
    a = a.astype(MATMUL_DTYPE)
    w = w.astype(MATMUL_DTYPE)
    if Mp != M:
        a = jnp.pad(a, ((0, Mp - M), (0, 0)))
        if residual is not None:
            residual = jnp.pad(residual, ((0, Mp - M), (0, 0)))
    g2 = gamma.reshape(1, C).astype(jnp.float32)
    b2 = beta.reshape(1, C).astype(jnp.float32)
    out_shape = jax.ShapeDtypeStruct((Mp, C), jnp.float32)
    inv_m = 1.0 / float(M)

    if residual is not None:
        out = pl.pallas_call(
            functools.partial(_conv_bn_add_relu_kernel, inv_m=inv_m),
            out_shape=out_shape,
        )(a, w, g2, b2, residual.astype(jnp.float32))
    else:
        if relu_mask is None:
            m2 = jnp.ones((1, C), jnp.float32)
        else:
            m2 = relu_mask.reshape(1, C).astype(jnp.float32)
        out = pl.pallas_call(
            functools.partial(_conv_bn_act_kernel, inv_m=inv_m),
            out_shape=out_shape,
        )(a, w, g2, b2, m2)
    return out[:M] if Mp != M else out


# ---------------------------------------------------------------------------
# XLA glue: im2col, weight folding, pooling
# ---------------------------------------------------------------------------
def _fold_weight(w_oihw):
    """PyTorch OIHW -> (kh*kw*Cin, O) im2col weight matrix."""
    O, I, kh, kw = w_oihw.shape
    return jnp.transpose(w_oihw, (2, 3, 1, 0)).reshape(kh * kw * I, O)


def _im2col(x, kh, kw, stride, padding):
    # TODO(synk): patch extraction stays in XLA (cheap at this model size);
    # folding it into the Pallas matmul via a kh*kw reduction grid axis would
    # remove the im2col HBM blowup if the model is scaled up.
    N, H, W, Cin = x.shape
    Ho = (H + 2 * padding - kh) // stride + 1
    Wo = (W + 2 * padding - kw) // stride + 1
    xp = jnp.pad(x, ((0, 0), (padding, padding), (padding, padding), (0, 0)))
    cols = []
    for i in range(kh):
        for j in range(kw):
            cols.append(xp[:, i:i + (Ho - 1) * stride + 1:stride,
                              j:j + (Wo - 1) * stride + 1:stride, :])
    a = jnp.concatenate(cols, axis=-1).reshape(N * Ho * Wo, kh * kw * Cin)
    return a, (N, Ho, Wo)


def maxpool_3x3_s2_p1(x):
    # TODO(synk): 3x3/2 maxpool kept as a fused XLA strided-max over 9 shifted
    # views; a dedicated Pallas window kernel is not worth a call at this size.
    N, H, W, C = x.shape
    Ho = (H + 2 - 3) // 2 + 1
    Wo = (W + 2 - 3) // 2 + 1
    xp = jnp.pad(x, ((0, 0), (1, 1), (1, 1), (0, 0)), constant_values=-jnp.inf)
    out = jnp.full((N, Ho, Wo, C), -jnp.inf, dtype=x.dtype)
    for i in range(3):
        for j in range(3):
            out = jnp.maximum(out, xp[:, i:i + (Ho - 1) * 2 + 1:2,
                                         j:j + (Wo - 1) * 2 + 1:2, :])
    return out


# ---------------------------------------------------------------------------
# Fused conv building blocks
# ---------------------------------------------------------------------------
def conv_bn_relu(x, w_oihw, gamma, beta, stride, padding):
    O, _, kh, kw = w_oihw.shape
    a, (N, Ho, Wo) = _im2col(x, kh, kw, stride, padding)
    y = _fused_conv_bn(a, _fold_weight(w_oihw), gamma, beta)
    return y.reshape(N, Ho, Wo, O)


def conv_bn_add_relu(x, w_oihw, gamma, beta, residual_nhwc):
    """conv2 of a BasicBlock: 3x3/s1/p1 + bn2 + residual add + ReLU, fused."""
    O = w_oihw.shape[0]
    a, (N, Ho, Wo) = _im2col(x, 3, 3, 1, 1)
    y = _fused_conv_bn(a, _fold_weight(w_oihw), gamma, beta,
                       residual=residual_nhwc.reshape(-1, O))
    return y.reshape(N, Ho, Wo, O)


def conv_bn_merged_downsample(x, w1, g1, b1, wd, gd, bd, stride):
    """conv1(3x3,stride)+bn1+relu and downsample conv1x1(stride)+bn, sharing
    one im2col matrix and one MXU matmul (weights concatenated along Cout;
    the 1x1 weight sits on the centre tap of the 3x3 im2col basis)."""
    P, Cin = w1.shape[0], w1.shape[1]
    a, (N, Ho, Wo) = _im2col(x, 3, 3, stride, 1)
    w1m = _fold_weight(w1)                                       # (9*Cin, P)
    wdm = jnp.zeros((9 * Cin, P), w1m.dtype).at[4 * Cin:5 * Cin, :].set(
        wd.reshape(P, Cin).T)                                    # centre tap
    wm = jnp.concatenate([w1m, wdm], axis=1)                     # (9*Cin, 2P)
    g = jnp.concatenate([g1, gd])
    b = jnp.concatenate([b1, bd])
    mask = jnp.concatenate([jnp.ones((P,), jnp.float32),         # ReLU on main
                            jnp.zeros((P,), jnp.float32)])       # no ReLU on id
    y = _fused_conv_bn(a, wm, g, b, relu_mask=mask)              # (M, 2P)
    out = y[:, :P].reshape(N, Ho, Wo, P)
    identity = y[:, P:].reshape(N, Ho, Wo, P)
    return out, identity


def basic_block(x, p):
    stride = p["stride"]
    if "down_w" in p:
        out, identity = conv_bn_merged_downsample(
            x, p["conv1_w"], p["bn1_g"], p["bn1_b"],
            p["down_w"], p["down_g"], p["down_b"], stride)
    else:
        identity = x
        out = conv_bn_relu(x, p["conv1_w"], p["bn1_g"], p["bn1_b"], stride, 1)
    # conv2 + bn2 + residual add + ReLU in one pallas_call
    return conv_bn_add_relu(out, p["conv2_w"], p["bn2_g"], p["bn2_b"], identity)


# ---------------------------------------------------------------------------
# Parameter init (matches PyTorch module defaults) and forward pass
# ---------------------------------------------------------------------------
def kaiming_conv(key, cout, cin, kh, kw):
    fan_out = cout * kh * kw                      # kaiming_normal_, mode=fan_out
    std = (2.0 / fan_out) ** 0.5
    return std * jax.random.normal(key, (cout, cin, kh, kw), jnp.float32)


def init_params(key, k=8, layers=(2, 2, 2, 2), num_classes=10):
    keys = iter(jax.random.split(key, 128))
    params = {"conv1_w": kaiming_conv(next(keys), k, 3, 7, 7),
              "bn1_g": jnp.ones((k,), jnp.float32),
              "bn1_b": jnp.zeros((k,), jnp.float32)}
    inplanes = k
    stages = []
    for stage_idx, (mult, nblocks) in enumerate(zip((1, 2, 4, 8), layers)):
        planes = k * mult
        first_stride = 1 if stage_idx == 0 else 2
        blocks = []
        for bidx in range(nblocks):
            s = first_stride if bidx == 0 else 1
            bp = {
                "conv1_w": kaiming_conv(next(keys), planes, inplanes, 3, 3),
                "bn1_g": jnp.ones((planes,), jnp.float32),
                "bn1_b": jnp.zeros((planes,), jnp.float32),
                "conv2_w": kaiming_conv(next(keys), planes, planes, 3, 3),
                "bn2_g": jnp.ones((planes,), jnp.float32),
                "bn2_b": jnp.zeros((planes,), jnp.float32),
                "stride": s,
            }
            if s != 1 or inplanes != planes:
                bp["down_w"] = kaiming_conv(next(keys), planes, inplanes, 1, 1)
                bp["down_g"] = jnp.ones((planes,), jnp.float32)
                bp["down_b"] = jnp.zeros((planes,), jnp.float32)
            blocks.append(bp)
            inplanes = planes
        stages.append(blocks)
    params["stages"] = stages
    # fc: PyTorch default Linear init (uniform in +-1/sqrt(fan_in))
    fan_in = 8 * k
    bound = 1.0 / (fan_in ** 0.5)
    kw_, kb_ = jax.random.split(next(keys))
    params["fc_w"] = jax.random.uniform(kw_, (num_classes, fan_in),
                                        jnp.float32, -bound, bound)
    params["fc_b"] = jax.random.uniform(kb_, (num_classes,),
                                        jnp.float32, -bound, bound)
    return params


def resnet_forward(params, x_nchw):
    x = jnp.transpose(x_nchw, (0, 2, 3, 1))               # NCHW -> NHWC (once)
    x = conv_bn_relu(x, params["conv1_w"], params["bn1_g"], params["bn1_b"],
                     stride=2, padding=3)
    x = maxpool_3x3_s2_p1(x)
    for stage in params["stages"]:
        for bp in stage:
            x = basic_block(x, bp)
    x = jnp.mean(x, axis=(1, 2))                          # AdaptiveAvgPool(1,1)
    # FC is (2,64)@(64,10): a plain XLA GEMM beats a 98%-padding MXU pallas_call.
    return x @ params["fc_w"].T + params["fc_b"][None, :]


if __name__ == "__main__":
    key = jax.random.PRNGKey(0)
    kp, kx = jax.random.split(key)
    # Small ResNet-18: width k=8 (channels 8/16/32/64), 10 classes.
    params = init_params(kp, k=8, layers=(2, 2, 2, 2), num_classes=10)
    x = jax.random.normal(kx, (2, 3, 32, 32), jnp.float32)   # NCHW like PyTorch
    # Weights are closed over as compile-time constants; strides stay Python
    # ints so the static im2col slicing works under jit.
    fwd = jax.jit(lambda inp: resnet_forward(params, inp))
    out = jax.block_until_ready(fwd(x))
    assert out.shape == (2, 10) and out.dtype == jnp.float32
    print("KERNEL_OK")
</pallas_src>

<mosaic_0001>
module attributes {stable_mosaic.version = 11 : i64} {
  func.func @_conv_bn_act_kernel(%arg0: memref<512x147xf32, #tpu.memory_space<vmem>>, %arg1: memref<147x8xf32, #tpu.memory_space<vmem>>, %arg2: memref<1x8xf32, #tpu.memory_space<vmem>>, %arg3: memref<1x8xf32, #tpu.memory_space<vmem>>, %arg4: memref<1x8xf32, #tpu.memory_space<vmem>>, %arg5: memref<512x8xf32, #tpu.memory_space<vmem>>) attributes {dimension_semantics = [], scalar_prefetch = 0 : i64, scratch_operands = 0 : i64, tpu.core_type = #tpu.core_type<tc>} {
    %c0 = arith.constant 0 : index
    %c0_0 = arith.constant 0 : index
    %0 = vector.load %arg0[%c0, %c0_0] : memref<512x147xf32, #tpu.memory_space<vmem>>, vector<512x147xf32>
    %c0_1 = arith.constant 0 : index
    %c0_2 = arith.constant 0 : index
    %1 = vector.load %arg1[%c0_1, %c0_2] : memref<147x8xf32, #tpu.memory_space<vmem>>, vector<147x8xf32>
    %cst = arith.constant dense<0.000000e+00> : vector<512x8xf32>
    %2 = tpu.matmul %0, %1, %cst {dimension_numbers = #tpu.dot_dimension_numbers<[1], [0], [0], [1], [0, 0, 1, 1], [], []>} : vector<512x147xf32>, vector<147x8xf32>, vector<512x8xf32> -> vector<512x8xf32>
    %cst_3 = arith.constant dense<0.000000e+00> : vector<8xf32>
    %3 = vector.multi_reduction <add>, %2, %cst_3 [0] : vector<512x8xf32> to vector<8xf32>
    %4 = vector.shape_cast %3 : vector<8xf32> to vector<1x8xf32>
    %cst_4 = arith.constant 0.001953125 : f32
    %5 = vector.broadcast %cst_4 : f32 to vector<1x8xf32>
    %6 = arith.mulf %4, %5 : vector<1x8xf32>
    %7 = arith.mulf %2, %2 : vector<512x8xf32>
    %cst_5 = arith.constant dense<0.000000e+00> : vector<8xf32>
    %8 = vector.multi_reduction <add>, %7, %cst_5 [0] : vector<512x8xf32> to vector<8xf32>
    %9 = vector.shape_cast %8 : vector<8xf32> to vector<1x8xf32>
    %cst_6 = arith.constant 0.001953125 : f32
    %10 = vector.broadcast %cst_6 : f32 to vector<1x8xf32>
    %11 = arith.mulf %9, %10 : vector<1x8xf32>
    %12 = arith.mulf %6, %6 : vector<1x8xf32>
    %13 = arith.subf %11, %12 : vector<1x8xf32>
    %c0_7 = arith.constant 0 : index
    %c0_8 = arith.constant 0 : index
    %14 = vector.load %arg2[%c0_7, %c0_8] : memref<1x8xf32, #tpu.memory_space<vmem>>, vector<1x8xf32>
    %cst_9 = arith.constant 9.99999974E-6 : f32
    %15 = vector.broadcast %cst_9 : f32 to vector<1x8xf32>
    %16 = arith.addf %13, %15 : vector<1x8xf32>
    %17 = math.rsqrt %16 : vector<1x8xf32>
    %18 = arith.mulf %14, %17 : vector<1x8xf32>
    %19 = vector.broadcast %18 : vector<1x8xf32> to vector<512x8xf32>
    %20 = arith.mulf %2, %19 : vector<512x8xf32>
    %c0_10 = arith.constant 0 : index
    %c0_11 = arith.constant 0 : index
    %21 = vector.load %arg3[%c0_10, %c0_11] : memref<1x8xf32, #tpu.memory_space<vmem>>, vector<1x8xf32>
    %22 = arith.mulf %6, %18 : vector<1x8xf32>
    %23 = arith.subf %21, %22 : vector<1x8xf32>
    %24 = vector.broadcast %23 : vector<1x8xf32> to vector<512x8xf32>
    %25 = arith.addf %20, %24 : vector<512x8xf32>
    %c0_12 = arith.constant 0 : index
    %c0_13 = arith.constant 0 : index
    %26 = vector.load %arg4[%c0_12, %c0_13] : memref<1x8xf32, #tpu.memory_space<vmem>>, vector<1x8xf32>
    %cst_14 = arith.constant 0.000000e+00 : f32
    %27 = vector.broadcast %cst_14 : f32 to vector<512x8xf32>
    %28 = arith.maximumf %25, %27 : vector<512x8xf32>
    %29 = vector.broadcast %26 : vector<1x8xf32> to vector<512x8xf32>
    %30 = arith.mulf %29, %28 : vector<512x8xf32>
    %cst_15 = arith.constant 1.000000e+00 : f32
    %31 = vector.broadcast %cst_15 : f32 to vector<1x8xf32>
    %32 = arith.subf %31, %26 : vector<1x8xf32>
    %33 = vector.broadcast %32 : vector<1x8xf32> to vector<512x8xf32>
    %34 = arith.mulf %33, %25 : vector<512x8xf32>
    %35 = arith.addf %30, %34 : vector<512x8xf32>
    %c0_16 = arith.constant 0 : index
    %c0_17 = arith.constant 0 : index
    %36 = vector.load %arg5[%c0_16, %c0_17] : memref<512x8xf32, #tpu.memory_space<vmem>>, vector<512x8xf32>
    tpu.vector_store %arg5[%c0_16, %c0_17], %35 {strides = array<i32>} : memref<512x8xf32, #tpu.memory_space<vmem>>, vector<512x8xf32>,
    return
  }
}

module attributes {stable_mosaic.version = 11 : i64} {
  func.func @_conv_bn_act_kernel(%arg0: memref<128x72xf32, #tpu.memory_space<vmem>>, %arg1: memref<72x8xf32, #tpu.memory_space<vmem>>, %arg2: memref<1x8xf32, #tpu.memory_space<vmem>>, %arg3: memref<1x8xf32, #tpu.memory_space<vmem>>, %arg4: memref<1x8xf32, #tpu.memory_space<vmem>>, %arg5: memref<128x8xf32, #tpu.memory_space<vmem>>) attributes {dimension_semantics = [], scalar_prefetch = 0 : i64, scratch_operands = 0 : i64, tpu.core_type = #tpu.core_type<tc>} {
    %c0 = arith.constant 0 : index
    %c0_0 = arith.constant 0 : index
    %0 = vector.load %arg0[%c0, %c0_0] : memref<128x72xf32, #tpu.memory_space<vmem>>, vector<128x72xf32>
    %c0_1 = arith.constant 0 : index
    %c0_2 = arith.constant 0 : index
    %1 = vector.load %arg1[%c0_1, %c0_2] : memref<72x8xf32, #tpu.memory_space<vmem>>, vector<72x8xf32>
    %cst = arith.constant dense<0.000000e+00> : vector<128x8xf32>
    %2 = tpu.matmul %0, %1, %cst {dimension_numbers = #tpu.dot_dimension_numbers<[1], [0], [0], [1], [0, 0, 1, 1], [], []>} : vector<128x72xf32>, vector<72x8xf32>, vector<128x8xf32> -> vector<128x8xf32>
    %cst_3 = arith.constant dense<0.000000e+00> : vector<8xf32>
    %3 = vector.multi_reduction <add>, %2, %cst_3 [0] : vector<128x8xf32> to vector<8xf32>
    %4 = vector.shape_cast %3 : vector<8xf32> to vector<1x8xf32>
    %cst_4 = arith.constant 7.812500e-03 : f32
    %5 = vector.broadcast %cst_4 : f32 to vector<1x8xf32>
    %6 = arith.mulf %4, %5 : vector<1x8xf32>
    %7 = arith.mulf %2, %2 : vector<128x8xf32>
    %cst_5 = arith.constant dense<0.000000e+00> : vector<8xf32>
    %8 = vector.multi_reduction <add>, %7, %cst_5 [0] : vector<128x8xf32> to vector<8xf32>
    %9 = vector.shape_cast %8 : vector<8xf32> to vector<1x8xf32>
    %cst_6 = arith.constant 7.812500e-03 : f32
    %10 = vector.broadcast %cst_6 : f32 to vector<1x8xf32>
    %11 = arith.mulf %9, %10 : vector<1x8xf32>
    %12 = arith.mulf %6, %6 : vector<1x8xf32>
    %13 = arith.subf %11, %12 : vector<1x8xf32>
    %c0_7 = arith.constant 0 : index
    %c0_8 = arith.constant 0 : index
    %14 = vector.load %arg2[%c0_7, %c0_8] : memref<1x8xf32, #tpu.memory_space<vmem>>, vector<1x8xf32>
    %cst_9 = arith.constant 9.99999974E-6 : f32
    %15 = vector.broadcast %cst_9 : f32 to vector<1x8xf32>
    %16 = arith.addf %13, %15 : vector<1x8xf32>
    %17 = math.rsqrt %16 : vector<1x8xf32>
    %18 = arith.mulf %14, %17 : vector<1x8xf32>
    %19 = vector.broadcast %18 : vector<1x8xf32> to vector<128x8xf32>
    %20 = arith.mulf %2, %19 : vector<128x8xf32>
    %c0_10 = arith.constant 0 : index
    %c0_11 = arith.constant 0 : index
    %21 = vector.load %arg3[%c0_10, %c0_11] : memref<1x8xf32, #tpu.memory_space<vmem>>, vector<1x8xf32>
    %22 = arith.mulf %6, %18 : vector<1x8xf32>
    %23 = arith.subf %21, %22 : vector<1x8xf32>
    %24 = vector.broadcast %23 : vector<1x8xf32> to vector<128x8xf32>
    %25 = arith.addf %20, %24 : vector<128x8xf32>
    %c0_12 = arith.constant 0 : index
    %c0_13 = arith.constant 0 : index
    %26 = vector.load %arg4[%c0_12, %c0_13] : memref<1x8xf32, #tpu.memory_space<vmem>>, vector<1x8xf32>
    %cst_14 = arith.constant 0.000000e+00 : f32
    %27 = vector.broadcast %cst_14 : f32 to vector<128x8xf32>
    %28 = arith.maximumf %25, %27 : vector<128x8xf32>
    %29 = vector.broadcast %26 : vector<1x8xf32> to vector<128x8xf32>
    %30 = arith.mulf %29, %28 : vector<128x8xf32>
    %cst_15 = arith.constant 1.000000e+00 : f32
    %31 = vector.broadcast %cst_15 : f32 to vector<1x8xf32>
    %32 = arith.subf %31, %26 : vector<1x8xf32>
    %33 = vector.broadcast %32 : vector<1x8xf32> to vector<128x8xf32>
    %34 = arith.mulf %33, %25 : vector<128x8xf32>
    %35 = arith.addf %30, %34 : vector<128x8xf32>
    %c0_16 = arith.constant 0 : index
    %c0_17 = arith.constant 0 : index
    %36 = vector.load %arg5[%c0_16, %c0_17] : memref<128x8xf32, #tpu.memory_space<vmem>>, vector<128x8xf32>
    tpu.vector_store %arg5[%c0_16, %c0_17], %35 {strides = array<i32>} : memref<128x8xf32, #tpu.memory_space<vmem>>, vector<128x8xf32>,
    return
  }
}

module attributes {stable_mosaic.version = 11 : i64} {
  func.func @_conv_bn_add_relu_kernel(%arg0: memref<128x72xf32, #tpu.memory_space<vmem>>, %arg1: memref<72x8xf32, #tpu.memory_space<vmem>>, %arg2: memref<1x8xf32, #tpu.memory_space<vmem>>, %arg3: memref<1x8xf32, #tpu.memory_space<vmem>>, %arg4: memref<128x8xf32, #tpu.memory_space<vmem>>, %arg5: memref<128x8xf32, #tpu.memory_space<vmem>>) attributes {dimension_semantics = [], scalar_prefetch = 0 : i64, scratch_operands = 0 : i64, tpu.core_type = #tpu.core_type<tc>} {
    %c0 = arith.constant 0 : index
    %c0_0 = arith.constant 0 : index
    %0 = vector.load %arg0[%c0, %c0_0] : memref<128x72xf32, #tpu.memory_space<vmem>>, vector<128x72xf32>
    %c0_1 = arith.constant 0 : index
    %c0_2 = arith.constant 0 : index
    %1 = vector.load %arg1[%c0_1, %c0_2] : memref<72x8xf32, #tpu.memory_space<vmem>>, vector<72x8xf32>
    %cst = arith.constant dense<0.000000e+00> : vector<128x8xf32>
    %2 = tpu.matmul %0, %1, %cst {dimension_numbers = #tpu.dot_dimension_numbers<[1], [0], [0], [1], [0, 0, 1, 1], [], []>} : vector<128x72xf32>, vector<72x8xf32>, vector<128x8xf32> -> vector<128x8xf32>
    %cst_3 = arith.constant dense<0.000000e+00> : vector<8xf32>
    %3 = vector.multi_reduction <add>, %2, %cst_3 [0] : vector<128x8xf32> to vector<8xf32>
    %4 = vector.shape_cast %3 : vector<8xf32> to vector<1x8xf32>
    %cst_4 = arith.constant 7.812500e-03 : f32
    %5 = vector.broadcast %cst_4 : f32 to vector<1x8xf32>
    %6 = arith.mulf %4, %5 : vector<1x8xf32>
    %7 = arith.mulf %2, %2 : vector<128x8xf32>
    %cst_5 = arith.constant dense<0.000000e+00> : vector<8xf32>
    %8 = vector.multi_reduction <add>, %7, %cst_5 [0] : vector<128x8xf32> to vector<8xf32>
    %9 = vector.shape_cast %8 : vector<8xf32> to vector<1x8xf32>
    %cst_6 = arith.constant 7.812500e-03 : f32
    %10 = vector.broadcast %cst_6 : f32 to vector<1x8xf32>
    %11 = arith.mulf %9, %10 : vector<1x8xf32>
    %12 = arith.mulf %6, %6 : vector<1x8xf32>
    %13 = arith.subf %11, %12 : vector<1x8xf32>
    %c0_7 = arith.constant 0 : index
    %c0_8 = arith.constant 0 : index
    %14 = vector.load %arg2[%c0_7, %c0_8] : memref<1x8xf32, #tpu.memory_space<vmem>>, vector<1x8xf32>
    %cst_9 = arith.constant 9.99999974E-6 : f32
    %15 = vector.broadcast %cst_9 : f32 to vector<1x8xf32>
    %16 = arith.addf %13, %15 : vector<1x8xf32>
    %17 = math.rsqrt %16 : vector<1x8xf32>
    %18 = arith.mulf %14, %17 : vector<1x8xf32>
    %19 = vector.broadcast %18 : vector<1x8xf32> to vector<128x8xf32>
    %20 = arith.mulf %2, %19 : vector<128x8xf32>
    %c0_10 = arith.constant 0 : index
    %c0_11 = arith.constant 0 : index
    %21 = vector.load %arg3[%c0_10, %c0_11] : memref<1x8xf32, #tpu.memory_space<vmem>>, vector<1x8xf32>
    %22 = arith.mulf %6, %18 : vector<1x8xf32>
    %23 = arith.subf %21, %22 : vector<1x8xf32>
    %24 = vector.broadcast %23 : vector<1x8xf32> to vector<128x8xf32>
    %25 = arith.addf %20, %24 : vector<128x8xf32>
    %c0_12 = arith.constant 0 : index
    %c0_13 = arith.constant 0 : index
    %26 = vector.load %arg4[%c0_12, %c0_13] : memref<128x8xf32, #tpu.memory_space<vmem>>, vector<128x8xf32>
    %27 = arith.addf %25, %26 : vector<128x8xf32>
    %cst_14 = arith.constant 0.000000e+00 : f32
    %28 = vector.broadcast %cst_14 : f32 to vector<128x8xf32>
    %29 = arith.maximumf %27, %28 : vector<128x8xf32>
    %c0_15 = arith.constant 0 : index
    %c0_16 = arith.constant 0 : index
    %30 = vector.load %arg5[%c0_15, %c0_16] : memref<128x8xf32, #tpu.memory_space<vmem>>, vector<128x8xf32>
    tpu.vector_store %arg5[%c0_15, %c0_16], %29 {strides = array<i32>} : memref<128x8xf32, #tpu.memory_space<vmem>>, vector<128x8xf32>,
    return
  }
}

module attributes {stable_mosaic.version = 11 : i64} {
  func.func @_conv_bn_act_kernel(%arg0: memref<32x72xf32, #tpu.memory_space<vmem>>, %arg1: memref<72x32xf32, #tpu.memory_space<vmem>>, %arg2: memref<1x32xf32, #tpu.memory_space<vmem>>, %arg3: memref<1x32xf32, #tpu.memory_space<vmem>>, %arg4: memref<1x32xf32, #tpu.memory_space<vmem>>, %arg5: memref<32x32xf32, #tpu.memory_space<vmem>>) attributes {dimension_semantics = [], scalar_prefetch = 0 : i64, scratch_operands = 0 : i64, tpu.core_type = #tpu.core_type<tc>} {
    %c0 = arith.constant 0 : index
    %c0_0 = arith.constant 0 : index
    %0 = vector.load %arg0[%c0, %c0_0] : memref<32x72xf32, #tpu.memory_space<vmem>>, vector<32x72xf32>
    %c0_1 = arith.constant 0 : index
    %c0_2 = arith.constant 0 : index
    %1 = vector.load %arg1[%c0_1, %c0_2] : memref<72x32xf32, #tpu.memory_space<vmem>>, vector<72x32xf32>
    %cst = arith.constant dense<0.000000e+00> : vector<32x32xf32>
    %2 = tpu.matmul %0, %1, %cst {dimension_numbers = #tpu.dot_dimension_numbers<[1], [0], [0], [1], [0, 0, 1, 1], [], []>} : vector<32x72xf32>, vector<72x32xf32>, vector<32x32xf32> -> vector<32x32xf32>
    %cst_3 = arith.constant dense<0.000000e+00> : vector<32xf32>
    %3 = vector.multi_reduction <add>, %2, %cst_3 [0] : vector<32x32xf32> to vector<32xf32>
    %4 = vector.shape_cast %3 : vector<32xf32> to vector<1x32xf32>
    %cst_4 = arith.constant 3.125000e-02 : f32
    %5 = vector.broadcast %cst_4 : f32 to vector<1x32xf32>
    %6 = arith.mulf %4, %5 : vector<1x32xf32>
    %7 = arith.mulf %2, %2 : vector<32x32xf32>
    %cst_5 = arith.constant dense<0.000000e+00> : vector<32xf32>
    %8 = vector.multi_reduction <add>, %7, %cst_5 [0] : vector<32x32xf32> to vector<32xf32>
    %9 = vector.shape_cast %8 : vector<32xf32> to vector<1x32xf32>
    %cst_6 = arith.constant 3.125000e-02 : f32
    %10 = vector.broadcast %cst_6 : f32 to vector<1x32xf32>
    %11 = arith.mulf %9, %10 : vector<1x32xf32>
    %12 = arith.mulf %6, %6 : vector<1x32xf32>
    %13 = arith.subf %11, %12 : vector<1x32xf32>
    %c0_7 = arith.constant 0 : index
    %c0_8 = arith.constant 0 : index
    %14 = vector.load %arg2[%c0_7, %c0_8] : memref<1x32xf32, #tpu.memory_space<vmem>>, vector<1x32xf32>
    %cst_9 = arith.constant 9.99999974E-6 : f32
    %15 = vector.broadcast %cst_9 : f32 to vector<1x32xf32>
    %16 = arith.addf %13, %15 : vector<1x32xf32>
    %17 = math.rsqrt %16 : vector<1x32xf32>
    %18 = arith.mulf %14, %17 : vector<1x32xf32>
    %19 = vector.broadcast %18 : vector<1x32xf32> to vector<32x32xf32>
    %20 = arith.mulf %2, %19 : vector<32x32xf32>
    %c0_10 = arith.constant 0 : index
    %c0_11 = arith.constant 0 : index
    %21 = vector.load %arg3[%c0_10, %c0_11] : memref<1x32xf32, #tpu.memory_space<vmem>>, vector<1x32xf32>
    %22 = arith.mulf %6, %18 : vector<1x32xf32>
    %23 = arith.subf %21, %22 : vector<1x32xf32>
    %24 = vector.broadcast %23 : vector<1x32xf32> to vector<32x32xf32>
    %25 = arith.addf %20, %24 : vector<32x32xf32>
    %c0_12 = arith.constant 0 : index
    %c0_13 = arith.constant 0 : index
    %26 = vector.load %arg4[%c0_12, %c0_13] : memref<1x32xf32, #tpu.memory_space<vmem>>, vector<1x32xf32>
    %cst_14 = arith.constant 0.000000e+00 : f32
    %27 = vector.broadcast %cst_14 : f32 to vector<32x32xf32>
    %28 = arith.maximumf %25, %27 : vector<32x32xf32>
    %29 = vector.broadcast %26 : vector<1x32xf32> to vector<32x32xf32>
    %30 = arith.mulf %29, %28 : vector<32x32xf32>
    %cst_15 = arith.constant 1.000000e+00 : f32
    %31 = vector.broadcast %cst_15 : f32 to vector<1x32xf32>
    %32 = arith.subf %31, %26 : vector<1x32xf32>
    %33 = vector.broadcast %32 : vector<1x32xf32> to vector<32x32xf32>
    %34 = arith.mulf %33, %25 : vector<32x32xf32>
    %35 = arith.addf %30, %34 : vector<32x32xf32>
    %c0_16 = arith.constant 0 : index
    %c0_17 = arith.constant 0 : index
    %36 = vector.load %arg5[%c0_16, %c0_17] : memref<32x32xf32, #tpu.memory_space<vmem>>, vector<32x32xf32>
    tpu.vector_store %arg5[%c0_16, %c0_17], %35 {strides = array<i32>} : memref<32x32xf32, #tpu.memory_space<vmem>>, vector<32x32xf32>,
    return
  }
}

module attributes {stable_mosaic.version = 11 : i64} {
  func.func @_conv_bn_add_relu_kernel(%arg0: memref<32x144xf32, #tpu.memory_space<vmem>>, %arg1: memref<144x16xf32, #tpu.memory_space<vmem>>, %arg2: memref<1x16xf32, #tpu.memory_space<vmem>>, %arg3: memref<1x16xf32, #tpu.memory_space<vmem>>, %arg4: memref<32x16xf32, #tpu.memory_space<vmem>>, %arg5: memref<32x16xf32, #tpu.memory_space<vmem>>) attributes {dimension_semantics = [], scalar_prefetch = 0 : i64, scratch_operands = 0 : i64, tpu.core_type = #tpu.core_type<tc>} {
    %c0 = arith.constant 0 : index
    %c0_0 = arith.constant 0 : index
    %0 = vector.load %arg0[%c0, %c0_0] : memref<32x144xf32, #tpu.memory_space<vmem>>, vector<32x144xf32>
    %c0_1 = arith.constant 0 : index
    %c0_2 = arith.constant 0 : index
    %1 = vector.load %arg1[%c0_1, %c0_2] : memref<144x16xf32, #tpu.memory_space<vmem>>, vector<144x16xf32>
    %cst = arith.constant dense<0.000000e+00> : vector<32x16xf32>
    %2 = tpu.matmul %0, %1, %cst {dimension_numbers = #tpu.dot_dimension_numbers<[1], [0], [0], [1], [0, 0, 1, 1], [], []>} : vector<32x144xf32>, vector<144x16xf32>, vector<32x16xf32> -> vector<32x16xf32>
    %cst_3 = arith.constant dense<0.000000e+00> : vector<16xf32>
    %3 = vector.multi_reduction <add>, %2, %cst_3 [0] : vector<32x16xf32> to vector<16xf32>
    %4 = vector.shape_cast %3 : vector<16xf32> to vector<1x16xf32>
    %cst_4 = arith.constant 3.125000e-02 : f32
    %5 = vector.broadcast %cst_4 : f32 to vector<1x16xf32>
    %6 = arith.mulf %4, %5 : vector<1x16xf32>
    %7 = arith.mulf %2, %2 : vector<32x16xf32>
    %cst_5 = arith.constant dense<0.000000e+00> : vector<16xf32>
    %8 = vector.multi_reduction <add>, %7, %cst_5 [0] : vector<32x16xf32> to vector<16xf32>
    %9 = vector.shape_cast %8 : vector<16xf32> to vector<1x16xf32>
    %cst_6 = arith.constant 3.125000e-02 : f32
    %10 = vector.broadcast %cst_6 : f32 to vector<1x16xf32>
    %11 = arith.mulf %9, %10 : vector<1x16xf32>
    %12 = arith.mulf %6, %6 : vector<1x16xf32>
    %13 = arith.subf %11, %12 : vector<1x16xf32>
    %c0_7 = arith.constant 0 : index
    %c0_8 = arith.constant 0 : index
    %14 = vector.load %arg2[%c0_7, %c0_8] : memref<1x16xf32, #tpu.memory_space<vmem>>, vector<1x16xf32>
    %cst_9 = arith.constant 9.99999974E-6 : f32
    %15 = vector.broadcast %cst_9 : f32 to vector<1x16xf32>
    %16 = arith.addf %13, %15 : vector<1x16xf32>
    %17 = math.rsqrt %16 : vector<1x16xf32>
    %18 = arith.mulf %14, %17 : vector<1x16xf32>
    %19 = vector.broadcast %18 : vector<1x16xf32> to vector<32x16xf32>
    %20 = arith.mulf %2, %19 : vector<32x16xf32>
    %c0_10 = arith.constant 0 : index
    %c0_11 = arith.constant 0 : index
    %21 = vector.load %arg3[%c0_10, %c0_11] : memref<1x16xf32, #tpu.memory_space<vmem>>, vector<1x16xf32>
    %22 = arith.mulf %6, %18 : vector<1x16xf32>
    %23 = arith.subf %21, %22 : vector<1x16xf32>
    %24 = vector.broadcast %23 : vector<1x16xf32> to vector<32x16xf32>
    %25 = arith.addf %20, %24 : vector<32x16xf32>
    %c0_12 = arith.constant 0 : index
    %c0_13 = arith.constant 0 : index
    %26 = vector.load %arg4[%c0_12, %c0_13] : memref<32x16xf32, #tpu.memory_space<vmem>>, vector<32x16xf32>
    %27 = arith.addf %25, %26 : vector<32x16xf32>
    %cst_14 = arith.constant 0.000000e+00 : f32
    %28 = vector.broadcast %cst_14 : f32 to vector<32x16xf32>
    %29 = arith.maximumf %27, %28 : vector<32x16xf32>
    %c0_15 = arith.constant 0 : index
    %c0_16 = arith.constant 0 : index
    %30 = vector.load %arg5[%c0_15, %c0_16] : memref<32x16xf32, #tpu.memory_space<vmem>>, vector<32x16xf32>
    tpu.vector_store %arg5[%c0_15, %c0_16], %29 {strides = array<i32>} : memref<32x16xf32, #tpu.memory_space<vmem>>, vector<32x16xf32>,
    return
  }
}

module attributes {stable_mosaic.version = 11 : i64} {
  func.func @_conv_bn_act_kernel(%arg0: memref<32x144xf32, #tpu.memory_space<vmem>>, %arg1: memref<144x16xf32, #tpu.memory_space<vmem>>, %arg2: memref<1x16xf32, #tpu.memory_space<vmem>>, %arg3: memref<1x16xf32, #tpu.memory_space<vmem>>, %arg4: memref<1x16xf32, #tpu.memory_space<vmem>>, %arg5: memref<32x16xf32, #tpu.memory_space<vmem>>) attributes {dimension_semantics = [], scalar_prefetch = 0 : i64, scratch_operands = 0 : i64, tpu.core_type = #tpu.core_type<tc>} {
    %c0 = arith.constant 0 : index
    %c0_0 = arith.constant 0 : index
    %0 = vector.load %arg0[%c0, %c0_0] : memref<32x144xf32, #tpu.memory_space<vmem>>, vector<32x144xf32>
    %c0_1 = arith.constant 0 : index
    %c0_2 = arith.constant 0 : index
    %1 = vector.load %arg1[%c0_1, %c0_2] : memref<144x16xf32, #tpu.memory_space<vmem>>, vector<144x16xf32>
    %cst = arith.constant dense<0.000000e+00> : vector<32x16xf32>
    %2 = tpu.matmul %0, %1, %cst {dimension_numbers = #tpu.dot_dimension_numbers<[1], [0], [0], [1], [0, 0, 1, 1], [], []>} : vector<32x144xf32>, vector<144x16xf32>, vector<32x16xf32> -> vector<32x16xf32>
    %cst_3 = arith.constant dense<0.000000e+00> : vector<16xf32>
    %3 = vector.multi_reduction <add>, %2, %cst_3 [0] : vector<32x16xf32> to vector<16xf32>
    %4 = vector.shape_cast %3 : vector<16xf32> to vector<1x16xf32>
    %cst_4 = arith.constant 3.125000e-02 : f32
    %5 = vector.broadcast %cst_4 : f32 to vector<1x16xf32>
    %6 = arith.mulf %4, %5 : vector<1x16xf32>
    %7 = arith.mulf %2, %2 : vector<32x16xf32>
    %cst_5 = arith.constant dense<0.000000e+00> : vector<16xf32>
    %8 = vector.multi_reduction <add>, %7, %cst_5 [0] : vector<32x16xf32> to vector<16xf32>
    %9 = vector.shape_cast %8 : vector<16xf32> to vector<1x16xf32>
    %cst_6 = arith.constant 3.125000e-02 : f32
    %10 = vector.broadcast %cst_6 : f32 to vector<1x16xf32>
    %11 = arith.mulf %9, %10 : vector<1x16xf32>
    %12 = arith.mulf %6, %6 : vector<1x16xf32>
    %13 = arith.subf %11, %12 : vector<1x16xf32>
    %c0_7 = arith.constant 0 : index
    %c0_8 = arith.constant 0 : index
    %14 = vector.load %arg2[%c0_7, %c0_8] : memref<1x16xf32, #tpu.memory_space<vmem>>, vector<1x16xf32>
    %cst_9 = arith.constant 9.99999974E-6 : f32
    %15 = vector.broadcast %cst_9 : f32 to vector<1x16xf32>
    %16 = arith.addf %13, %15 : vector<1x16xf32>
    %17 = math.rsqrt %16 : vector<1x16xf32>
    %18 = arith.mulf %14, %17 : vector<1x16xf32>
    %19 = vector.broadcast %18 : vector<1x16xf32> to vector<32x16xf32>
    %20 = arith.mulf %2, %19 : vector<32x16xf32>
    %c0_10 = arith.constant 0 : index
    %c0_11 = arith.constant 0 : index
    %21 = vector.load %arg3[%c0_10, %c0_11] : memref<1x16xf32, #tpu.memory_space<vmem>>, vector<1x16xf32>
    %22 = arith.mulf %6, %18 : vector<1x16xf32>
    %23 = arith.subf %21, %22 : vector<1x16xf32>
    %24 = vector.broadcast %23 : vector<1x16xf32> to vector<32x16xf32>
    %25 = arith.addf %20, %24 : vector<32x16xf32>
    %c0_12 = arith.constant 0 : index
    %c0_13 = arith.constant 0 : index
    %26 = vector.load %arg4[%c0_12, %c0_13] : memref<1x16xf32, #tpu.memory_space<vmem>>, vector<1x16xf32>
    %cst_14 = arith.constant 0.000000e+00 : f32
    %27 = vector.broadcast %cst_14 : f32 to vector<32x16xf32>
    %28 = arith.maximumf %25, %27 : vector<32x16xf32>
    %29 = vector.broadcast %26 : vector<1x16xf32> to vector<32x16xf32>
    %30 = arith.mulf %29, %28 : vector<32x16xf32>
    %cst_15 = arith.constant 1.000000e+00 : f32
    %31 = vector.broadcast %cst_15 : f32 to vector<1x16xf32>
    %32 = arith.subf %31, %26 : vector<1x16xf32>
    %33 = vector.broadcast %32 : vector<1x16xf32> to vector<32x16xf32>
    %34 = arith.mulf %33, %25 : vector<32x16xf32>
    %35 = arith.addf %30, %34 : vector<32x16xf32>
    %c0_16 = arith.constant 0 : index
    %c0_17 = arith.constant 0 : index
    %36 = vector.load %arg5[%c0_16, %c0_17] : memref<32x16xf32, #tpu.memory_space<vmem>>, vector<32x16xf32>
    tpu.vector_store %arg5[%c0_16, %c0_17], %35 {strides = array<i32>} : memref<32x16xf32, #tpu.memory_space<vmem>>, vector<32x16xf32>,
    return
  }
}

module attributes {stable_mosaic.version = 11 : i64} {
  func.func @_conv_bn_act_kernel(%arg0: memref<8x144xf32, #tpu.memory_space<vmem>>, %arg1: memref<144x64xf32, #tpu.memory_space<vmem>>, %arg2: memref<1x64xf32, #tpu.memory_space<vmem>>, %arg3: memref<1x64xf32, #tpu.memory_space<vmem>>, %arg4: memref<1x64xf32, #tpu.memory_space<vmem>>, %arg5: memref<8x64xf32, #tpu.memory_space<vmem>>) attributes {dimension_semantics = [], scalar_prefetch = 0 : i64, scratch_operands = 0 : i64, tpu.core_type = #tpu.core_type<tc>} {
    %c0 = arith.constant 0 : index
    %c0_0 = arith.constant 0 : index
    %0 = vector.load %arg0[%c0, %c0_0] : memref<8x144xf32, #tpu.memory_space<vmem>>, vector<8x144xf32>
    %c0_1 = arith.constant 0 : index
    %c0_2 = arith.constant 0 : index
    %1 = vector.load %arg1[%c0_1, %c0_2] : memref<144x64xf32, #tpu.memory_space<vmem>>, vector<144x64xf32>
    %cst = arith.constant dense<0.000000e+00> : vector<8x64xf32>
    %2 = tpu.matmul %0, %1, %cst {dimension_numbers = #tpu.dot_dimension_numbers<[1], [0], [0], [1], [0, 0, 1, 1], [], []>} : vector<8x144xf32>, vector<144x64xf32>, vector<8x64xf32> -> vector<8x64xf32>
    %cst_3 = arith.constant dense<0.000000e+00> : vector<64xf32>
    %3 = vector.multi_reduction <add>, %2, %cst_3 [0] : vector<8x64xf32> to vector<64xf32>
    %4 = vector.shape_cast %3 : vector<64xf32> to vector<1x64xf32>
    %cst_4 = arith.constant 1.250000e-01 : f32
    %5 = vector.broadcast %cst_4 : f32 to vector<1x64xf32>
    %6 = arith.mulf %4, %5 : vector<1x64xf32>
    %7 = arith.mulf %2, %2 : vector<8x64xf32>
    %cst_5 = arith.constant dense<0.000000e+00> : vector<64xf32>
    %8 = vector.multi_reduction <add>, %7, %cst_5 [0] : vector<8x64xf32> to vector<64xf32>
    %9 = vector.shape_cast %8 : vector<64xf32> to vector<1x64xf32>
    %cst_6 = arith.constant 1.250000e-01 : f32
    %10 = vector.broadcast %cst_6 : f32 to vector<1x64xf32>
    %11 = arith.mulf %9, %10 : vector<1x64xf32>
    %12 = arith.mulf %6, %6 : vector<1x64xf32>
    %13 = arith.subf %11, %12 : vector<1x64xf32>
    %c0_7 = arith.constant 0 : index
    %c0_8 = arith.constant 0 : index
    %14 = vector.load %arg2[%c0_7, %c0_8] : memref<1x64xf32, #tpu.memory_space<vmem>>, vector<1x64xf32>
    %cst_9 = arith.constant 9.99999974E-6 : f32
    %15 = vector.broadcast %cst_9 : f32 to vector<1x64xf32>
    %16 = arith.addf %13, %15 : vector<1x64xf32>
    %17 = math.rsqrt %16 : vector<1x64xf32>
    %18 = arith.mulf %14, %17 : vector<1x64xf32>
    %19 = vector.broadcast %18 : vector<1x64xf32> to vector<8x64xf32>
    %20 = arith.mulf %2, %19 : vector<8x64xf32>
    %c0_10 = arith.constant 0 : index
    %c0_11 = arith.constant 0 : index
    %21 = vector.load %arg3[%c0_10, %c0_11] : memref<1x64xf32, #tpu.memory_space<vmem>>, vector<1x64xf32>
    %22 = arith.mulf %6, %18 : vector<1x64xf32>
    %23 = arith.subf %21, %22 : vector<1x64xf32>
    %24 = vector.broadcast %23 : vector<1x64xf32> to vector<8x64xf32>
    %25 = arith.addf %20, %24 : vector<8x64xf32>
    %c0_12 = arith.constant 0 : index
    %c0_13 = arith.constant 0 : index
    %26 = vector.load %arg4[%c0_12, %c0_13] : memref<1x64xf32, #tpu.memory_space<vmem>>, vector<1x64xf32>
    %cst_14 = arith.constant 0.000000e+00 : f32
    %27 = vector.broadcast %cst_14 : f32 to vector<8x64xf32>
    %28 = arith.maximumf %25, %27 : vector<8x64xf32>
    %29 = vector.broadcast %26 : vector<1x64xf32> to vector<8x64xf32>
    %30 = arith.mulf %29, %28 : vector<8x64xf32>
    %cst_15 = arith.constant 1.000000e+00 : f32
    %31 = vector.broadcast %cst_15 : f32 to vector<1x64xf32>
    %32 = arith.subf %31, %26 : vector<1x64xf32>
    %33 = vector.broadcast %32 : vector<1x64xf32> to vector<8x64xf32>
    %34 = arith.mulf %33, %25 : vector<8x64xf32>
    %35 = arith.addf %30, %34 : vector<8x64xf32>
    %c0_16 = arith.constant 0 : index
    %c0_17 = arith.constant 0 : index
    %36 = vector.load %arg5[%c0_16, %c0_17] : memref<8x64xf32, #tpu.memory_space<vmem>>, vector<8x64xf32>
    tpu.vector_store %arg5[%c0_16, %c0_17], %35 {strides = array<i32>} : memref<8x64xf32, #tpu.memory_space<vmem>>, vector<8x64xf32>,
    return
  }
}

module attributes {stable_mosaic.version = 11 : i64} {
  func.func @_conv_bn_add_relu_kernel(%arg0: memref<8x288xf32, #tpu.memory_space<vmem>>, %arg1: memref<288x32xf32, #tpu.memory_space<vmem>>, %arg2: memref<1x32xf32, #tpu.memory_space<vmem>>, %arg3: memref<1x32xf32, #tpu.memory_space<vmem>>, %arg4: memref<8x32xf32, #tpu.memory_space<vmem>>, %arg5: memref<8x32xf32, #tpu.memory_space<vmem>>) attributes {dimension_semantics = [], scalar_prefetch = 0 : i64, scratch_operands = 0 : i64, tpu.core_type = #tpu.core_type<tc>} {
    %c0 = arith.constant 0 : index
    %c0_0 = arith.constant 0 : index
    %0 = vector.load %arg0[%c0, %c0_0] : memref<8x288xf32, #tpu.memory_space<vmem>>, vector<8x288xf32>
    %c0_1 = arith.constant 0 : index
    %c0_2 = arith.constant 0 : index
    %1 = vector.load %arg1[%c0_1, %c0_2] : memref<288x32xf32, #tpu.memory_space<vmem>>, vector<288x32xf32>
    %cst = arith.constant dense<0.000000e+00> : vector<8x32xf32>
    %2 = tpu.matmul %0, %1, %cst {dimension_numbers = #tpu.dot_dimension_numbers<[1], [0], [0], [1], [0, 0, 1, 1], [], []>} : vector<8x288xf32>, vector<288x32xf32>, vector<8x32xf32> -> vector<8x32xf32>
    %cst_3 = arith.constant dense<0.000000e+00> : vector<32xf32>
    %3 = vector.multi_reduction <add>, %2, %cst_3 [0] : vector<8x32xf32> to vector<32xf32>
    %4 = vector.shape_cast %3 : vector<32xf32> to vector<1x32xf32>
    %cst_4 = arith.constant 1.250000e-01 : f32
    %5 = vector.broadcast %cst_4 : f32 to vector<1x32xf32>
    %6 = arith.mulf %4, %5 : vector<1x32xf32>
    %7 = arith.mulf %2, %2 : vector<8x32xf32>
    %cst_5 = arith.constant dense<0.000000e+00> : vector<32xf32>
    %8 = vector.multi_reduction <add>, %7, %cst_5 [0] : vector<8x32xf32> to vector<32xf32>
    %9 = vector.shape_cast %8 : vector<32xf32> to vector<1x32xf32>
    %cst_6 = arith.constant 1.250000e-01 : f32
    %10 = vector.broadcast %cst_6 : f32 to vector<1x32xf32>
    %11 = arith.mulf %9, %10 : vector<1x32xf32>
    %12 = arith.mulf %6, %6 : vector<1x32xf32>
    %13 = arith.subf %11, %12 : vector<1x32xf32>
    %c0_7 = arith.constant 0 : index
    %c0_8 = arith.constant 0 : index
    %14 = vector.load %arg2[%c0_7, %c0_8] : memref<1x32xf32, #tpu.memory_space<vmem>>, vector<1x32xf32>
    %cst_9 = arith.constant 9.99999974E-6 : f32
    %15 = vector.broadcast %cst_9 : f32 to vector<1x32xf32>
    %16 = arith.addf %13, %15 : vector<1x32xf32>
    %17 = math.rsqrt %16 : vector<1x32xf32>
    %18 = arith.mulf %14, %17 : vector<1x32xf32>
    %19 = vector.broadcast %18 : vector<1x32xf32> to vector<8x32xf32>
    %20 = arith.mulf %2, %19 : vector<8x32xf32>
    %c0_10 = arith.constant 0 : index
    %c0_11 = arith.constant 0 : index
    %21 = vector.load %arg3[%c0_10, %c0_11] : memref<1x32xf32, #tpu.memory_space<vmem>>, vector<1x32xf32>
    %22 = arith.mulf %6, %18 : vector<1x32xf32>
    %23 = arith.subf %21, %22 : vector<1x32xf32>
    %24 = vector.broadcast %23 : vector<1x32xf32> to vector<8x32xf32>
    %25 = arith.addf %20, %24 : vector<8x32xf32>
    %c0_12 = arith.constant 0 : index
    %c0_13 = arith.constant 0 : index
    %26 = vector.load %arg4[%c0_12, %c0_13] : memref<8x32xf32, #tpu.memory_space<vmem>>, vector<8x32xf32>
    %27 = arith.addf %25, %26 : vector<8x32xf32>
    %cst_14 = arith.constant 0.000000e+00 : f32
    %28 = vector.broadcast %cst_14 : f32 to vector<8x32xf32>
    %29 = arith.maximumf %27, %28 : vector<8x32xf32>
    %c0_15 = arith.constant 0 : index
    %c0_16 = arith.constant 0 : index
    %30 = vector.load %arg5[%c0_15, %c0_16] : memref<8x32xf32, #tpu.memory_space<vmem>>, vector<8x32xf32>
    tpu.vector_store %arg5[%c0_15, %c0_16], %29 {strides = array<i32>} : memref<8x32xf32, #tpu.memory_space<vmem>>, vector<8x32xf32>,
    return
  }
}

module attributes {stable_mosaic.version = 11 : i64} {
  func.func @_conv_bn_act_kernel(%arg0: memref<8x288xf32, #tpu.memory_space<vmem>>, %arg1: memref<288x32xf32, #tpu.memory_space<vmem>>, %arg2: memref<1x32xf32, #tpu.memory_space<vmem>>, %arg3: memref<1x32xf32, #tpu.memory_space<vmem>>, %arg4: memref<1x32xf32, #tpu.memory_space<vmem>>, %arg5: memref<8x32xf32, #tpu.memory_space<vmem>>) attributes {dimension_semantics = [], scalar_prefetch = 0 : i64, scratch_operands = 0 : i64, tpu.core_type = #tpu.core_type<tc>} {
    %c0 = arith.constant 0 : index
    %c0_0 = arith.constant 0 : index
    %0 = vector.load %arg0[%c0, %c0_0] : memref<8x288xf32, #tpu.memory_space<vmem>>, vector<8x288xf32>
    %c0_1 = arith.constant 0 : index
    %c0_2 = arith.constant 0 : index
    %1 = vector.load %arg1[%c0_1, %c0_2] : memref<288x32xf32, #tpu.memory_space<vmem>>, vector<288x32xf32>
    %cst = arith.constant dense<0.000000e+00> : vector<8x32xf32>
    %2 = tpu.matmul %0, %1, %cst {dimension_numbers = #tpu.dot_dimension_numbers<[1], [0], [0], [1], [0, 0, 1, 1], [], []>} : vector<8x288xf32>, vector<288x32xf32>, vector<8x32xf32> -> vector<8x32xf32>
    %cst_3 = arith.constant dense<0.000000e+00> : vector<32xf32>
    %3 = vector.multi_reduction <add>, %2, %cst_3 [0] : vector<8x32xf32> to vector<32xf32>
    %4 = vector.shape_cast %3 : vector<32xf32> to vector<1x32xf32>
    %cst_4 = arith.constant 1.250000e-01 : f32
    %5 = vector.broadcast %cst_4 : f32 to vector<1x32xf32>
    %6 = arith.mulf %4, %5 : vector<1x32xf32>
    %7 = arith.mulf %2, %2 : vector<8x32xf32>
    %cst_5 = arith.constant dense<0.000000e+00> : vector<32xf32>
    %8 = vector.multi_reduction <add>, %7, %cst_5 [0] : vector<8x32xf32> to vector<32xf32>
    %9 = vector.shape_cast %8 : vector<32xf32> to vector<1x32xf32>
    %cst_6 = arith.constant 1.250000e-01 : f32
    %10 = vector.broadcast %cst_6 : f32 to vector<1x32xf32>
    %11 = arith.mulf %9, %10 : vector<1x32xf32>
    %12 = arith.mulf %6, %6 : vector<1x32xf32>
    %13 = arith.subf %11, %12 : vector<1x32xf32>
    %c0_7 = arith.constant 0 : index
    %c0_8 = arith.constant 0 : index
    %14 = vector.load %arg2[%c0_7, %c0_8] : memref<1x32xf32, #tpu.memory_space<vmem>>, vector<1x32xf32>
    %cst_9 = arith.constant 9.99999974E-6 : f32
    %15 = vector.broadcast %cst_9 : f32 to vector<1x32xf32>
    %16 = arith.addf %13, %15 : vector<1x32xf32>
    %17 = math.rsqrt %16 : vector<1x32xf32>
    %18 = arith.mulf %14, %17 : vector<1x32xf32>
    %19 = vector.broadcast %18 : vector<1x32xf32> to vector<8x32xf32>
    %20 = arith.mulf %2, %19 : vector<8x32xf32>
    %c0_10 = arith.constant 0 : index
    %c0_11 = arith.constant 0 : index
    %21 = vector.load %arg3[%c0_10, %c0_11] : memref<1x32xf32, #tpu.memory_space<vmem>>, vector<1x32xf32>
    %22 = arith.mulf %6, %18 : vector<1x32xf32>
    %23 = arith.subf %21, %22 : vector<1x32xf32>
    %24 = vector.broadcast %23 : vector<1x32xf32> to vector<8x32xf32>
    %25 = arith.addf %20, %24 : vector<8x32xf32>
    %c0_12 = arith.constant 0 : index
    %c0_13 = arith.constant 0 : index
    %26 = vector.load %arg4[%c0_12, %c0_13] : memref<1x32xf32, #tpu.memory_space<vmem>>, vector<1x32xf32>
    %cst_14 = arith.constant 0.000000e+00 : f32
    %27 = vector.broadcast %cst_14 : f32 to vector<8x32xf32>
    %28 = arith.maximumf %25, %27 : vector<8x32xf32>
    %29 = vector.broadcast %26 : vector<1x32xf32> to vector<8x32xf32>
    %30 = arith.mulf %29, %28 : vector<8x32xf32>
    %cst_15 = arith.constant 1.000000e+00 : f32
    %31 = vector.broadcast %cst_15 : f32 to vector<1x32xf32>
    %32 = arith.subf %31, %26 : vector<1x32xf32>
    %33 = vector.broadcast %32 : vector<1x32xf32> to vector<8x32xf32>
    %34 = arith.mulf %33, %25 : vector<8x32xf32>
    %35 = arith.addf %30, %34 : vector<8x32xf32>
    %c0_16 = arith.constant 0 : index
    %c0_17 = arith.constant 0 : index
    %36 = vector.load %arg5[%c0_16, %c0_17] : memref<8x32xf32, #tpu.memory_space<vmem>>, vector<8x32xf32>
    tpu.vector_store %arg5[%c0_16, %c0_17], %35 {strides = array<i32>} : memref<8x32xf32, #tpu.memory_space<vmem>>, vector<8x32xf32>,
    return
  }
}

module attributes {stable_mosaic.version = 11 : i64} {
  func.func @_conv_bn_act_kernel(%arg0: memref<8x288xf32, #tpu.memory_space<vmem>>, %arg1: memref<288x128xf32, #tpu.memory_space<vmem>>, %arg2: memref<1x128xf32, #tpu.memory_space<vmem>>, %arg3: memref<1x128xf32, #tpu.memory_space<vmem>>, %arg4: memref<1x128xf32, #tpu.memory_space<vmem>>, %arg5: memref<8x128xf32, #tpu.memory_space<vmem>>) attributes {dimension_semantics = [], scalar_prefetch = 0 : i64, scratch_operands = 0 : i64, tpu.core_type = #tpu.core_type<tc>} {
    %c0 = arith.constant 0 : index
    %c0_0 = arith.constant 0 : index
    %0 = vector.load %arg0[%c0, %c0_0] : memref<8x288xf32, #tpu.memory_space<vmem>>, vector<8x288xf32>
    %c0_1 = arith.constant 0 : index
    %c0_2 = arith.constant 0 : index
    %1 = vector.load %arg1[%c0_1, %c0_2] : memref<288x128xf32, #tpu.memory_space<vmem>>, vector<288x128xf32>
    %cst = arith.constant dense<0.000000e+00> : vector<8x128xf32>
    %2 = tpu.matmul %0, %1, %cst {dimension_numbers = #tpu.dot_dimension_numbers<[1], [0], [0], [1], [0, 0, 1, 1], [], []>} : vector<8x288xf32>, vector<288x128xf32>, vector<8x128xf32> -> vector<8x128xf32>
    %cst_3 = arith.constant dense<0.000000e+00> : vector<128xf32>
    %3 = vector.multi_reduction <add>, %2, %cst_3 [0] : vector<8x128xf32> to vector<128xf32>
    %4 = vector.shape_cast %3 : vector<128xf32> to vector<1x128xf32>
    %cst_4 = arith.constant 5.000000e-01 : f32
    %5 = vector.broadcast %cst_4 : f32 to vector<1x128xf32>
    %6 = arith.mulf %4, %5 : vector<1x128xf32>
    %7 = arith.mulf %2, %2 : vector<8x128xf32>
    %cst_5 = arith.constant dense<0.000000e+00> : vector<128xf32>
    %8 = vector.multi_reduction <add>, %7, %cst_5 [0] : vector<8x128xf32> to vector<128xf32>
    %9 = vector.shape_cast %8 : vector<128xf32> to vector<1x128xf32>
    %cst_6 = arith.constant 5.000000e-01 : f32
    %10 = vector.broadcast %cst_6 : f32 to vector<1x128xf32>
    %11 = arith.mulf %9, %10 : vector<1x128xf32>
    %12 = arith.mulf %6, %6 : vector<1x128xf32>
    %13 = arith.subf %11, %12 : vector<1x128xf32>
    %c0_7 = arith.constant 0 : index
    %c0_8 = arith.constant 0 : index
    %14 = vector.load %arg2[%c0_7, %c0_8] : memref<1x128xf32, #tpu.memory_space<vmem>>, vector<1x128xf32>
    %cst_9 = arith.constant 9.99999974E-6 : f32
    %15 = vector.broadcast %cst_9 : f32 to vector<1x128xf32>
    %16 = arith.addf %13, %15 : vector<1x128xf32>
    %17 = math.rsqrt %16 : vector<1x128xf32>
    %18 = arith.mulf %14, %17 : vector<1x128xf32>
    %19 = vector.broadcast %18 : vector<1x128xf32> to vector<8x128xf32>
    %20 = arith.mulf %2, %19 : vector<8x128xf32>
    %c0_10 = arith.constant 0 : index
    %c0_11 = arith.constant 0 : index
    %21 = vector.load %arg3[%c0_10, %c0_11] : memref<1x128xf32, #tpu.memory_space<vmem>>, vector<1x128xf32>
    %22 = arith.mulf %6, %18 : vector<1x128xf32>
    %23 = arith.subf %21, %22 : vector<1x128xf32>
    %24 = vector.broadcast %23 : vector<1x128xf32> to vector<8x128xf32>
    %25 = arith.addf %20, %24 : vector<8x128xf32>
    %c0_12 = arith.constant 0 : index
    %c0_13 = arith.constant 0 : index
    %26 = vector.load %arg4[%c0_12, %c0_13] : memref<1x128xf32, #tpu.memory_space<vmem>>, vector<1x128xf32>
    %cst_14 = arith.constant 0.000000e+00 : f32
    %27 = vector.broadcast %cst_14 : f32 to vector<8x128xf32>
    %28 = arith.maximumf %25, %27 : vector<8x128xf32>
    %29 = vector.broadcast %26 : vector<1x128xf32> to vector<8x128xf32>
    %30 = arith.mulf %29, %28 : vector<8x128xf32>
    %cst_15 = arith.constant 1.000000e+00 : f32
    %31 = vector.broadcast %cst_15 : f32 to vector<1x128xf32>
    %32 = arith.subf %31, %26 : vector<1x128xf32>
    %33 = vector.broadcast %32 : vector<1x128xf32> to vector<8x128xf32>
    %34 = arith.mulf %33, %25 : vector<8x128xf32>
    %35 = arith.addf %30, %34 : vector<8x128xf32>
    %c0_16 = arith.constant 0 : index
    %c0_17 = arith.constant 0 : index
    %36 = vector.load %arg5[%c0_16, %c0_17] : memref<8x128xf32, #tpu.memory_space<vmem>>, vector<8x128xf32>
    tpu.vector_store %arg5[%c0_16, %c0_17], %35 {strides = array<i32>} : memref<8x128xf32, #tpu.memory_space<vmem>>, vector<8x128xf32>,
    return
  }
}

module attributes {stable_mosaic.version = 11 : i64} {
  func.func @_conv_bn_add_relu_kernel(%arg0: memref<8x576xf32, #tpu.memory_space<vmem>>, %arg1: memref<576x64xf32, #tpu.memory_space<vmem>>, %arg2: memref<1x64xf32, #tpu.memory_space<vmem>>, %arg3: memref<1x64xf32, #tpu.memory_space<vmem>>, %arg4: memref<8x64xf32, #tpu.memory_space<vmem>>, %arg5: memref<8x64xf32, #tpu.memory_space<vmem>>) attributes {dimension_semantics = [], scalar_prefetch = 0 : i64, scratch_operands = 0 : i64, tpu.core_type = #tpu.core_type<tc>} {
    %c0 = arith.constant 0 : index
    %c0_0 = arith.constant 0 : index
    %0 = vector.load %arg0[%c0, %c0_0] : memref<8x576xf32, #tpu.memory_space<vmem>>, vector<8x576xf32>
    %c0_1 = arith.constant 0 : index
    %c0_2 = arith.constant 0 : index
    %1 = vector.load %arg1[%c0_1, %c0_2] : memref<576x64xf32, #tpu.memory_space<vmem>>, vector<576x64xf32>
    %cst = arith.constant dense<0.000000e+00> : vector<8x64xf32>
    %2 = tpu.matmul %0, %1, %cst {dimension_numbers = #tpu.dot_dimension_numbers<[1], [0], [0], [1], [0, 0, 1, 1], [], []>} : vector<8x576xf32>, vector<576x64xf32>, vector<8x64xf32> -> vector<8x64xf32>
    %cst_3 = arith.constant dense<0.000000e+00> : vector<64xf32>
    %3 = vector.multi_reduction <add>, %2, %cst_3 [0] : vector<8x64xf32> to vector<64xf32>
    %4 = vector.shape_cast %3 : vector<64xf32> to vector<1x64xf32>
    %cst_4 = arith.constant 5.000000e-01 : f32
    %5 = vector.broadcast %cst_4 : f32 to vector<1x64xf32>
    %6 = arith.mulf %4, %5 : vector<1x64xf32>
    %7 = arith.mulf %2, %2 : vector<8x64xf32>
    %cst_5 = arith.constant dense<0.000000e+00> : vector<64xf32>
    %8 = vector.multi_reduction <add>, %7, %cst_5 [0] : vector<8x64xf32> to vector<64xf32>
    %9 = vector.shape_cast %8 : vector<64xf32> to vector<1x64xf32>
    %cst_6 = arith.constant 5.000000e-01 : f32
    %10 = vector.broadcast %cst_6 : f32 to vector<1x64xf32>
    %11 = arith.mulf %9, %10 : vector<1x64xf32>
    %12 = arith.mulf %6, %6 : vector<1x64xf32>
    %13 = arith.subf %11, %12 : vector<1x64xf32>
    %c0_7 = arith.constant 0 : index
    %c0_8 = arith.constant 0 : index
    %14 = vector.load %arg2[%c0_7, %c0_8] : memref<1x64xf32, #tpu.memory_space<vmem>>, vector<1x64xf32>
    %cst_9 = arith.constant 9.99999974E-6 : f32
    %15 = vector.broadcast %cst_9 : f32 to vector<1x64xf32>
    %16 = arith.addf %13, %15 : vector<1x64xf32>
    %17 = math.rsqrt %16 : vector<1x64xf32>
    %18 = arith.mulf %14, %17 : vector<1x64xf32>
    %19 = vector.broadcast %18 : vector<1x64xf32> to vector<8x64xf32>
    %20 = arith.mulf %2, %19 : vector<8x64xf32>
    %c0_10 = arith.constant 0 : index
    %c0_11 = arith.constant 0 : index
    %21 = vector.load %arg3[%c0_10, %c0_11] : memref<1x64xf32, #tpu.memory_space<vmem>>, vector<1x64xf32>
    %22 = arith.mulf %6, %18 : vector<1x64xf32>
    %23 = arith.subf %21, %22 : vector<1x64xf32>
    %24 = vector.broadcast %23 : vector<1x64xf32> to vector<8x64xf32>
    %25 = arith.addf %20, %24 : vector<8x64xf32>
    %c0_12 = arith.constant 0 : index
    %c0_13 = arith.constant 0 : index
    %26 = vector.load %arg4[%c0_12, %c0_13] : memref<8x64xf32, #tpu.memory_space<vmem>>, vector<8x64xf32>
    %27 = arith.addf %25, %26 : vector<8x64xf32>
    %cst_14 = arith.constant 0.000000e+00 : f32
    %28 = vector.broadcast %cst_14 : f32 to vector<8x64xf32>
    %29 = arith.maximumf %27, %28 : vector<8x64xf32>
    %c0_15 = arith.constant 0 : index
    %c0_16 = arith.constant 0 : index
    %30 = vector.load %arg5[%c0_15, %c0_16] : memref<8x64xf32, #tpu.memory_space<vmem>>, vector<8x64xf32>
    tpu.vector_store %arg5[%c0_15, %c0_16], %29 {strides = array<i32>} : memref<8x64xf32, #tpu.memory_space<vmem>>, vector<8x64xf32>,
    return
  }
}

module attributes {stable_mosaic.version = 11 : i64} {
  func.func @_conv_bn_act_kernel(%arg0: memref<8x576xf32, #tpu.memory_space<vmem>>, %arg1: memref<576x64xf32, #tpu.memory_space<vmem>>, %arg2: memref<1x64xf32, #tpu.memory_space<vmem>>, %arg3: memref<1x64xf32, #tpu.memory_space<vmem>>, %arg4: memref<1x64xf32, #tpu.memory_space<vmem>>, %arg5: memref<8x64xf32, #tpu.memory_space<vmem>>) attributes {dimension_semantics = [], scalar_prefetch = 0 : i64, scratch_operands = 0 : i64, tpu.core_type = #tpu.core_type<tc>} {
    %c0 = arith.constant 0 : index
    %c0_0 = arith.constant 0 : index
    %0 = vector.load %arg0[%c0, %c0_0] : memref<8x576xf32, #tpu.memory_space<vmem>>, vector<8x576xf32>
    %c0_1 = arith.constant 0 : index
    %c0_2 = arith.constant 0 : index
    %1 = vector.load %arg1[%c0_1, %c0_2] : memref<576x64xf32, #tpu.memory_space<vmem>>, vector<576x64xf32>
    %cst = arith.constant dense<0.000000e+00> : vector<8x64xf32>
    %2 = tpu.matmul %0, %1, %cst {dimension_numbers = #tpu.dot_dimension_numbers<[1], [0], [0], [1], [0, 0, 1, 1], [], []>} : vector<8x576xf32>, vector<576x64xf32>, vector<8x64xf32> -> vector<8x64xf32>
    %cst_3 = arith.constant dense<0.000000e+00> : vector<64xf32>
    %3 = vector.multi_reduction <add>, %2, %cst_3 [0] : vector<8x64xf32> to vector<64xf32>
    %4 = vector.shape_cast %3 : vector<64xf32> to vector<1x64xf32>
    %cst_4 = arith.constant 5.000000e-01 : f32
    %5 = vector.broadcast %cst_4 : f32 to vector<1x64xf32>
    %6 = arith.mulf %4, %5 : vector<1x64xf32>
    %7 = arith.mulf %2, %2 : vector<8x64xf32>
    %cst_5 = arith.constant dense<0.000000e+00> : vector<64xf32>
    %8 = vector.multi_reduction <add>, %7, %cst_5 [0] : vector<8x64xf32> to vector<64xf32>
    %9 = vector.shape_cast %8 : vector<64xf32> to vector<1x64xf32>
    %cst_6 = arith.constant 5.000000e-01 : f32
    %10 = vector.broadcast %cst_6 : f32 to vector<1x64xf32>
    %11 = arith.mulf %9, %10 : vector<1x64xf32>
    %12 = arith.mulf %6, %6 : vector<1x64xf32>
    %13 = arith.subf %11, %12 : vector<1x64xf32>
    %c0_7 = arith.constant 0 : index
    %c0_8 = arith.constant 0 : index
    %14 = vector.load %arg2[%c0_7, %c0_8] : memref<1x64xf32, #tpu.memory_space<vmem>>, vector<1x64xf32>
    %cst_9 = arith.constant 9.99999974E-6 : f32
    %15 = vector.broadcast %cst_9 : f32 to vector<1x64xf32>
    %16 = arith.addf %13, %15 : vector<1x64xf32>
    %17 = math.rsqrt %16 : vector<1x64xf32>
    %18 = arith.mulf %14, %17 : vector<1x64xf32>
    %19 = vector.broadcast %18 : vector<1x64xf32> to vector<8x64xf32>
    %20 = arith.mulf %2, %19 : vector<8x64xf32>
    %c0_10 = arith.constant 0 : index
    %c0_11 = arith.constant 0 : index
    %21 = vector.load %arg3[%c0_10, %c0_11] : memref<1x64xf32, #tpu.memory_space<vmem>>, vector<1x64xf32>
    %22 = arith.mulf %6, %18 : vector<1x64xf32>
    %23 = arith.subf %21, %22 : vector<1x64xf32>
    %24 = vector.broadcast %23 : vector<1x64xf32> to vector<8x64xf32>
    %25 = arith.addf %20, %24 : vector<8x64xf32>
    %c0_12 = arith.constant 0 : index
    %c0_13 = arith.constant 0 : index
    %26 = vector.load %arg4[%c0_12, %c0_13] : memref<1x64xf32, #tpu.memory_space<vmem>>, vector<1x64xf32>
    %cst_14 = arith.constant 0.000000e+00 : f32
    %27 = vector.broadcast %cst_14 : f32 to vector<8x64xf32>
    %28 = arith.maximumf %25, %27 : vector<8x64xf32>
    %29 = vector.broadcast %26 : vector<1x64xf32> to vector<8x64xf32>
    %30 = arith.mulf %29, %28 : vector<8x64xf32>
    %cst_15 = arith.constant 1.000000e+00 : f32
    %31 = vector.broadcast %cst_15 : f32 to vector<1x64xf32>
    %32 = arith.subf %31, %26 : vector<1x64xf32>
    %33 = vector.broadcast %32 : vector<1x64xf32> to vector<8x64xf32>
    %34 = arith.mulf %33, %25 : vector<8x64xf32>
    %35 = arith.addf %30, %34 : vector<8x64xf32>
    %c0_16 = arith.constant 0 : index
    %c0_17 = arith.constant 0 : index
    %36 = vector.load %arg5[%c0_16, %c0_17] : memref<8x64xf32, #tpu.memory_space<vmem>>, vector<8x64xf32>
    tpu.vector_store %arg5[%c0_16, %c0_17], %35 {strides = array<i32>} : memref<8x64xf32, #tpu.memory_space<vmem>>, vector<8x64xf32>,
    return
  }
}

</mosaic_0001>

<bundles_post_ra>
// kernel: _lambda_.18
= control target key start
LH: loop header
LB: loop body
LE: loop exit
PB: predicated region body
PF: predicated region fallthrough
CT: control target
= control target key end

     0   :  { %vm45_vm0 = vcmask 588800   ;;  %vm239_vm1 = vcmask 64512   ;;  %s934_s1 = inlined_call_operand.vmem [shape: f32[72,8], index: 1, kind: input, shape index: {}]   ;;  %s935_s0 = inlined_call_operand.vmem [shape: f32[128,72], index: 0, kind: input, shape index: {}]   ;;  %s936_s2 = inlined_call_operand.vmem [shape: f32[1,8], index: 2, kind: input, shape index: {}, may-alias: {2,4}]   ;;  %s937_s4 = inlined_call_operand.vmem [shape: f32[1,8], index: 4, kind: input, shape index: {}, may-alias: {2,4}]   ;;  %s938_s3 = inlined_call_operand.vmem [shape: f32[1,8], index: 3, kind: input, shape index: {}]   ;;  %s939_s5 = inlined_call_operand.vmem [shape: f32[128,8], index: 5, kind: output, shape index: {}]  }
   0x1   :  { %v36_v0 = vld [vmem:[%s934_s1] sm:$0xff]  ;;  %v37_v1 = vld [vmem:[%s934_s1 + $0x8] sm:$0xff]  ;;  %v38_v2 = vld [vmem:[%s934_s1 + $0x10] sm:$0xff] }
   0x2   :  { %v566_v3 = vpack.c.bf16 %v37_v1, %v36_v0  ;;  %v39_v4 = vld [vmem:[%s934_s1 + $0x18] sm:$0xff]  ;;  %v40_v6 = vld [vmem:[%s934_s1 + $0x20] sm:$0xff]  ;;  %v41_v7 = vld [vmem:[%s934_s1 + $0x28] sm:$0xff] }
   0x3   :  { %v570_v5 = vpack.c.bf16 %v39_v4, %v38_v2  ;;  %v20_v8 = vld [vmem:[%s935_s0] sm:$0xff]  ;;  %v574_v9 = vpack.c.bf16 %v41_v7, %v40_v6  ;;  %v42_v11 = vld [vmem:[%s934_s1 + $0x30] sm:$0xff]  ;;  %v43_v12 = vld [vmem:[%s934_s1 + $0x38] sm:$0xff] }
   0x4   :  { %567 = vmatprep.subr.bf16.mxu0 %v566_v3  ;;  %582 = vmatprep.subr.bf16.mxu1 %v566_v3  ;;  %v28_v10 = vld [vmem:[%s935_s0 + $0x40] sm:$0xff]  ;;  %v578_v13 = vpack.c.bf16 %v43_v12, %v42_v11  ;;  %v21_v15 = vld [vmem:[%s935_s0 + $0x8] sm:$0xff]  ;;  %v22_v17 = vld [vmem:[%s935_s0 + $0x10] sm:$0xff] }
   0x5   :  { %569 = vmatpush3.bf16.msra.mxu0 %v566_v3  ;;  %587 = vmatpush3.bf16.msra.mxu1 %v566_v3  ;;  %v44_v14 = vld [vmem:[%s934_s1 + $0x40] sm:$0xff]  ;;  %v29_v16 = vld [vmem:[%s935_s0 + $0x48] sm:$0xff]  ;;  %v30_v18 = vld [vmem:[%s935_s0 + $0x50] sm:$0xff] }
   0x6   :  { %571 = vmatprep.subr.bf16.mxu0 %v570_v5  ;;  %542 = vmatprep.mubr.msk.f32.mxu0 %vm45_vm0, %v20_v8  ;;  %v23_v19 = vld [vmem:[%s935_s0 + $0x18] sm:$0xff]  ;;  %v24_v21 = vld [vmem:[%s935_s0 + $0x20] sm:$0xff]  ;;  %v25_v23 = vld [vmem:[%s935_s0 + $0x28] sm:$0xff] }
   0x7   :  { %583 = vmatprep.subr.bf16.mxu1 %v570_v5  ;;  %554 = vmatprep.mubr.msk.f32.mxu1 %vm45_vm0, %v28_v10  ;;  %v31_v20 = vld [vmem:[%s935_s0 + $0x58] sm:$0xff]  ;;  %v32_v22 = vld [vmem:[%s935_s0 + $0x60] sm:$0xff]  ;;  %v33_v24 = vld [vmem:[%s935_s0 + $0x68] sm:$0xff] }
   0x8   :  { %v26_v25 = vld [vmem:[%s935_s0 + $0x30] sm:$0xff]  ;;  %v27_v27 = vld [vmem:[%s935_s0 + $0x38] sm:$0xff] }
   0x9   :  { %573 = vmatpush3.bf16.msra.mxu0 %v570_v5  ;;  %588 = vmatpush3.bf16.msra.mxu1 %v570_v5  ;;  %v34_v26 = vld [vmem:[%s935_s0 + $0x70] sm:$0xff]  ;;  %v35_v28 = vld [vmem:[%s935_s0 + $0x78] sm:$0xff] }
   0xa   :  { %575 = vmatprep.subr.bf16.mxu0 %v574_v9  ;;  %584 = vmatprep.subr.bf16.mxu1 %v574_v9 }
   0xd   :  { %577 = vmatpush3.bf16.msra.mxu0 %v574_v9  ;;  %589 = vmatpush3.bf16.msra.mxu1 %v574_v9 }
   0xe   :  { %579 = vmatprep.subr.bf16.mxu0 %v578_v13  ;;  %585 = vmatprep.subr.bf16.mxu1 %v578_v13 }
  0x11   :  { %581 = vmatpush3.bf16.msra.mxu0 %v578_v13  ;;  %590 = vmatpush3.bf16.msra.mxu1 %v578_v13 }
  0x12   :  { %540 = vmatprep.subr.mxu0 %v44_v14  ;;  %586 = vmatprep.subr.mxu1 %v44_v14 }
  0x15   :  { %541 = vmatpush3.msra.mxu0 %v44_v14  ;;  %591 = vmatpush3.msra.mxu1 %v44_v14 }
  0x16   :  { %543 = vmatmul.mubr.msk.f32.vlgmr.msra.gmra.mrb[0].mxu0 %vm45_vm0, %v21_v15  ;;  %555 = vmatmul.mubr.msk.f32.vlgmr.msra.gmra.mrb[0].mxu1 %vm45_vm0, %v29_v16 }
  0x17   :  { %545 = vmatprep.mubr.msk.f32.mxu0 %vm45_vm0, %v22_v17  ;;  %557 = vmatprep.mubr.msk.f32.mxu1 %vm45_vm0, %v30_v18 }
  0x1a   :  { %546 = vmatmul.mubr.msk.f32.gmra.mrb[2].mxu0 %vm45_vm0, %v23_v19  ;;  %558 = vmatmul.mubr.msk.f32.gmra.mrb[2].mxu1 %vm45_vm0, %v31_v20 }
  0x1b   :  { %548 = vmatprep.mubr.msk.f32.mxu0 %vm45_vm0, %v24_v21  ;;  %560 = vmatprep.mubr.msk.f32.mxu1 %vm45_vm0, %v32_v22 }
  0x1e   :  { %549 = vmatmul.mubr.msk.f32.gmra.mrb[4].mxu0 %vm45_vm0, %v25_v23  ;;  %561 = vmatmul.mubr.msk.f32.gmra.mrb[4].mxu1 %vm45_vm0, %v33_v24 }
  0x1f   :  { %551 = vmatprep.mubr.msk.f32.mxu0 %vm45_vm0, %v26_v25  ;;  %563 = vmatprep.mubr.msk.f32.mxu1 %vm45_vm0, %v34_v26 }
  0x22   :  { %552 = vmatmul.mubr.msk.f32.gmra.mrb[6].mxu0 %vm45_vm0, %v27_v27  ;;  %564 = vmatmul.mubr.msk.f32.gmra.mrb[6].mxu1 %vm45_vm0, %v35_v28 }
  0xe9   :  { %v715_v29 = vpop.f32.mrb[0].mxu0  ;;  %v717_v30 = vpop.f32.mrb[0].mxu1 }
  0xea   :  { %v241_v31 = vsel %vm239_vm1, %v715_v29, 0.0  ;;  %v279_v32 = vmul.f32 %v715_v29, %v715_v29  ;;  %v723_v33 = vpop.f32.mrb[1].mxu0  ;;  %v725_v34 = vpop.f32.mrb[1].mxu1  ;;  %v287_v20 = vmul.f32 %v717_v30, %v717_v30  ;;  %v257_v25 = vsel %vm239_vm1, %v717_v30, 0.0 }
  0xeb   :  { %v240_v35 = vsel %vm239_vm1, %v723_v33, 0.0  ;;  %v278_v36 = vmul.f32 %v723_v33, %v723_v33  ;;  %v286_v6 = vmul.f32 %v725_v34, %v725_v34  ;;  %v255_v16 = vsel %vm239_vm1, %v725_v34, 0.0 }
  0xec   :  { %v295_v37 = vsel %vm239_vm1, %v279_v32, 0.0  ;;  %v242_v38 = vadd.f32 %v241_v31, %v240_v35  ;;  %v311_v31 = vsel %vm239_vm1, %v287_v20, 0.0 }
  0xed   :  { %v294_v39 = vsel %vm239_vm1, %v278_v36, 0.0  ;;  %v733_v40 = vpop.f32.mrb[2].mxu0  ;;  %v735_v41 = vpop.f32.mrb[2].mxu1  ;;  %v309_v21 = vsel %vm239_vm1, %v286_v6, 0.0 }
  0xee   :  { %v296_v42 = vadd.f32 %v295_v37, %v294_v39  ;;  %v737_v43 = vpop.f32.mrb[3].mxu0  ;;  %v739_v44 = vpop.f32.mrb[3].mxu1  ;;  %v281_v45 = vmul.f32 %v733_v40, %v733_v40  ;;  %v245_v49 = vsel %vm239_vm1, %v733_v40, 0.0  ;;  %v289_v32 = vmul.f32 %v735_v41, %v735_v41 }
  0xef   :  { %v243_v46 = vsel %vm239_vm1, %v737_v43, 0.0  ;;  %v280_v47 = vmul.f32 %v737_v43, %v737_v43  ;;  %v288_v22 = vmul.f32 %v739_v44, %v739_v44  ;;  %v259_v26 = vsel %vm239_vm1, %v739_v44, 0.0 }
  0xf0   :  { %v244_v48 = vadd.f32 %v243_v46, %v242_v38  ;;  %v299_v57 = vsel %vm239_vm1, %v281_v45, 0.0  ;;  %v261_v39 = vsel %vm239_vm1, %v735_v41, 0.0 }
  0xf1   :  { %v297_v50 = vsel %vm239_vm1, %v280_v47, 0.0  ;;  %v750_v51 = vpop.f32.mrb[4].mxu0  ;;  %v752_v52 = vpop.f32.mrb[4].mxu1  ;;  %v313_v35 = vsel %vm239_vm1, %v288_v22, 0.0  ;;  %v315_v47 = vsel %vm239_vm1, %v289_v32, 0.0 }
  0xf2   :  { %v298_v53 = vadd.f32 %v297_v50, %v296_v42  ;;  %v754_v54 = vpop.f32.mrb[5].mxu0  ;;  %v246_v55 = vadd.f32 %v245_v49, %v244_v48  ;;  %v756_v56 = vpop.f32.mrb[5].mxu1  ;;  %v283_v58 = vmul.f32 %v750_v51, %v750_v51  ;;  %v249_v63 = vsel %vm239_vm1, %v750_v51, 0.0  ;;  %v334_v32 = vld [vmem:[%s936_s2] sm:$0x1] }
  0xf3   :  { %v247_v59 = vsel %vm239_vm1, %v754_v54, 0.0  ;;  %v282_v60 = vmul.f32 %v754_v54, %v754_v54  ;;  %v290_v36 = vmul.f32 %v756_v56, %v756_v56  ;;  %v263_v42 = vsel %vm239_vm1, %v756_v56, 0.0 }
  0xf4   :  { %v248_v61 = vadd.f32 %v247_v59, %v246_v55  ;;  %v300_v62 = vadd.f32 %v299_v57, %v298_v53  ;;  %v303_v8 = vsel %vm239_vm1, %v283_v58, 0.0  ;;  %v291_v48 = vmul.f32 %v752_v52, %v752_v52 }
  0xf5   :  { %v301_v0 = vsel %vm239_vm1, %v282_v60, 0.0  ;;  %v768_v1 = vpop.f32.mrb[6].mxu0  ;;  %v770_v2 = vpop.f32.mrb[6].mxu1  ;;  %v317_v49 = vsel %vm239_vm1, %v290_v36, 0.0  ;;  %v265_v57 = vsel %vm239_vm1, %v752_v52, 0.0 }
  0xf6   :  { %v302_v3 = vadd.f32 %v301_v0, %v300_v62  ;;  %v772_v4 = vpop.f32.mrb[7].mxu0  ;;  %v250_v5 = vadd.f32 %v249_v63, %v248_v61  ;;  %v776_v7 = vpop.f32.mrb[7].mxu1  ;;  %v285_v9 = vmul.f32 %v768_v1, %v768_v1  ;;  %v253_v14 = vsel %vm239_vm1, %v768_v1, 0.0 }
  0xf7   :  { %v251_v10 = vsel %vm239_vm1, %v772_v4, 0.0  ;;  %v284_v11 = vmul.f32 %v772_v4, %v772_v4  ;;  %v292_v50 = vmul.f32 %v776_v7, %v776_v7  ;;  %v267_v58 = vsel %vm239_vm1, %v776_v7, 0.0 }
  0xf8   :  { %v252_v12 = vadd.f32 %v251_v10, %v250_v5  ;;  %v304_v13 = vadd.f32 %v303_v8, %v302_v3  ;;  %v307_v19 = vsel %vm239_vm1, %v285_v9, 0.0  ;;  %v319_v61 = vsel %vm239_vm1, %v291_v48, 0.0 }
  0xf9   :  { %v305_v15 = vsel %vm239_vm1, %v284_v11, 0.0  ;;  %v293_v62 = vmul.f32 %v770_v2, %v770_v2  ;;  %v321_v63 = vsel %vm239_vm1, %v292_v50, 0.0  ;;  %v269_v5 = vsel %vm239_vm1, %v770_v2, 0.0 }
  0xfa   :  { %v254_v17 = vadd.f32 %v253_v14, %v252_v12  ;;  %v306_v18 = vadd.f32 %v305_v15, %v304_v13 }
  0xfb   :  { %v323_v9 = vsel %vm239_vm1, %v293_v62, 0.0 }
  0xfc   :  { %v308_v23 = vadd.f32 %v307_v19, %v306_v18  ;;  %v256_v24 = vadd.f32 %v255_v16, %v254_v17 }
  0xfe   :  { %v310_v27 = vadd.f32 %v309_v21, %v308_v23  ;;  %v258_v28 = vadd.f32 %v257_v25, %v256_v24 }
 0x100   :  { %v260_v37 = vadd.f32 %v259_v26, %v258_v28  ;;  %v312_v38 = vadd.f32 %v311_v31, %v310_v27  ;;  %v339_v28 = vlaneseq }
 0x102   :  { %v314_v45 = vadd.f32 %v313_v35, %v312_v38  ;;  %v262_v46 = vadd.f32 %v261_v39, %v260_v37  ;;  %v340_v31 = vshrl.u32 %v339_v28, 7  ;;  %v385_v38 = vld [vmem:[%s937_s4] sm:$0x1] }
 0x104   :  { %v264_v53 = vadd.f32 %v263_v42, %v262_v46  ;;  %v316_v55 = vadd.f32 %v315_v47, %v314_v45  ;;  %v341_v35 = vsub.s32 0, %v340_v31  ;;  %v424_v45 = vsub.f32 1.0, %v385_v38 }
 0x106   :  { %v318_v59 = vadd.f32 %v317_v49, %v316_v55  ;;  %v266_v60 = vadd.f32 %v265_v57, %v264_v53  ;;  %v852_v62 = vrot.slane %v424_v45, %v341_v35 }
 0x108   :  { %v268_v0 = vadd.f32 %v267_v58, %v266_v60  ;;  %v320_v3 = vadd.f32 %v319_v61, %v318_v59  ;;  %v360_v58 = vld [vmem:[%s938_s3] sm:$0x1]  ;;  %v406_v61 = vrot.slane %v385_v38, %v341_v35 }
 0x10a   :  { %v270_v6 = vadd.f32 %v269_v5, %v268_v0  ;;  %v322_v8 = vadd.f32 %v321_v63, %v320_v3 }
 0x10c   :  { %v271_v10 = vrot.slane %v270_v6, 4  ;;  %v324_v11 = vadd.f32 %v323_v9, %v322_v8 }
 0x10e   :  { %v272_v12 = vadd.f32 %v271_v10, %v270_v6  ;;  %v325_v13 = vrot.slane %v324_v11, 4 }
 0x110   :  { %v273_v14 = vrot.slane %v272_v12, 2  ;;  %v326_v15 = vadd.f32 %v325_v13, %v324_v11 }
 0x112   :  { %v274_v16 = vadd.f32 %v273_v14, %v272_v12  ;;  %v327_v17 = vrot.slane %v326_v15, 2 }
 0x114   :  { %v275_v18 = vrot.slane %v274_v16, 1  ;;  %v328_v19 = vadd.f32 %v327_v17, %v326_v15 }
 0x116   :  { %v276_v20 = vadd.f32 %v275_v18, %v274_v16  ;;  %v329_v21 = vrot.slane %v328_v19, 1 }
 0x118   :  { %v277_v22 = vmul.f32 0.0078125, %v276_v20  ;;  %v330_v23 = vadd.f32 %v329_v21, %v328_v19 }
 0x11a   :  { %v331_v24 = vmul.f32 0.0078125, %v330_v23  ;;  %v332_v25 = vmul.f32 %v277_v22, %v277_v22 }
 0x11c   :  { %v333_v26 = vsub.f32 %v331_v24, %v332_v25 }
 0x11e   :  { %v335_v27 = vadd.f32 1e-05, %v333_v26 }
 0x120   :  { %592 = vrsqrt.f32 %v335_v27 }
 0x12a   :  { %v593_v36 = vpop.eup %592 }
 0x12b   :  { %v337_v37 = vmul.f32 %v593_v36, %v334_v32 }
 0x12d   :  { %v342_v39 = vrot.slane %v337_v37, %v341_v35  ;;  %v361_v42 = vmul.f32 %v337_v37, %v277_v22 }
 0x12f   :  { %v344_v46 = vmul.f32 %v342_v39, %v723_v33  ;;  %v345_v47 = vmul.f32 %v715_v29, %v342_v39  ;;  %v346_v48 = vmul.f32 %v342_v39, %v737_v43  ;;  %v347_v49 = vmul.f32 %v733_v40, %v342_v39 }
 0x130   :  { %v348_v50 = vmul.f32 %v342_v39, %v754_v54  ;;  %v349_v53 = vmul.f32 %v750_v51, %v342_v39  ;;  %v350_v55 = vmul.f32 %v342_v39, %v772_v4  ;;  %v351_v57 = vmul.f32 %v768_v1, %v342_v39 }
 0x131   :  { %v352_v33 = vmul.f32 %v342_v39, %v725_v34  ;;  %v353_v29 = vmul.f32 %v717_v30, %v342_v39  ;;  %v354_v43 = vmul.f32 %v342_v39, %v739_v44  ;;  %v355_v40 = vmul.f32 %v735_v41, %v342_v39 }
 0x132   :  { %v356_v54 = vmul.f32 %v342_v39, %v756_v56  ;;  %v357_v51 = vmul.f32 %v752_v52, %v342_v39  ;;  %v358_v4 = vmul.f32 %v342_v39, %v776_v7  ;;  %v359_v1 = vmul.f32 %v770_v2, %v342_v39 }
 0x133   :  { %v362_v59 = vsub.f32 %v360_v58, %v361_v42 }
 0x135   :  { %v367_v60 = vrot.slane %v362_v59, %v341_v35 }
 0x137   :  { %v369_v34 = vadd.f32 %v367_v60, %v344_v46  ;;  %v370_v63 = vadd.f32 %v367_v60, %v345_v47  ;;  %v371_v30 = vadd.f32 %v367_v60, %v346_v48  ;;  %v372_v0 = vadd.f32 %v367_v60, %v347_v49 }
 0x138   :  { %v373_v44 = vadd.f32 %v367_v60, %v348_v50  ;;  %v374_v3 = vadd.f32 %v367_v60, %v349_v53  ;;  %v375_v41 = vadd.f32 %v367_v60, %v350_v55  ;;  %v376_v5 = vadd.f32 %v367_v60, %v351_v57 }
 0x139   :  { %v377_v56 = vadd.f32 %v367_v60, %v352_v33  ;;  %v378_v6 = vadd.f32 %v367_v60, %v353_v29  ;;  %v379_v52 = vadd.f32 %v367_v60, %v354_v43  ;;  %v380_v8 = vadd.f32 %v367_v60, %v355_v40 }
 0x13a   :  { %v381_v7 = vadd.f32 %v367_v60, %v356_v54  ;;  %v382_v9 = vadd.f32 %v367_v60, %v357_v51  ;;  %v383_v2 = vadd.f32 %v367_v60, %v358_v4  ;;  %v384_v10 = vadd.f32 %v367_v60, %v359_v1 }
 0x13b   :  { %v386_v11 = vmax.f32 %v369_v34, 0.0  ;;  %v387_v12 = vmax.f32 %v370_v63, 0.0  ;;  %v388_v13 = vmax.f32 %v371_v30, 0.0  ;;  %v389_v14 = vmax.f32 %v372_v0, 0.0 }
 0x13c   :  { %v390_v15 = vmax.f32 %v373_v44, 0.0  ;;  %v391_v16 = vmax.f32 %v374_v3, 0.0  ;;  %v392_v17 = vmax.f32 %v375_v41, 0.0  ;;  %v393_v18 = vmax.f32 %v376_v5, 0.0 }
 0x13d   :  { %v394_v19 = vmax.f32 %v377_v56, 0.0  ;;  %v395_v20 = vmax.f32 %v378_v6, 0.0  ;;  %v396_v21 = vmax.f32 %v379_v52, 0.0  ;;  %v397_v22 = vmax.f32 %v380_v8, 0.0 }
 0x13e   :  { %v398_v23 = vmax.f32 %v381_v7, 0.0  ;;  %v399_v24 = vmax.f32 %v382_v9, 0.0  ;;  %v400_v25 = vmax.f32 %v383_v2, 0.0  ;;  %v401_v26 = vmax.f32 %v384_v10, 0.0 }
 0x13f   :  { %v408_v27 = vmul.f32 %v406_v61, %v386_v11  ;;  %v409_v28 = vmul.f32 %v406_v61, %v387_v12  ;;  %v410_v31 = vmul.f32 %v406_v61, %v388_v13  ;;  %v411_v32 = vmul.f32 %v406_v61, %v389_v14 }
 0x140   :  { %v412_v35 = vmul.f32 %v406_v61, %v390_v15  ;;  %v413_v36 = vmul.f32 %v406_v61, %v391_v16  ;;  %v414_v37 = vmul.f32 %v406_v61, %v392_v17  ;;  %v415_v38 = vmul.f32 %v406_v61, %v393_v18 }
 0x141   :  { %v416_v39 = vmul.f32 %v406_v61, %v394_v19  ;;  %v417_v42 = vmul.f32 %v406_v61, %v395_v20  ;;  %v418_v45 = vmul.f32 %v406_v61, %v396_v21  ;;  %v419_v46 = vmul.f32 %v406_v61, %v397_v22 }
 0x142   :  { %v420_v47 = vmul.f32 %v406_v61, %v398_v23  ;;  %v421_v48 = vmul.f32 %v406_v61, %v399_v24  ;;  %v422_v49 = vmul.f32 %v406_v61, %v400_v25  ;;  %v423_v50 = vmul.f32 %v406_v61, %v401_v26 }
 0x143   :  { %v431_v53 = vmul.f32 %v852_v62, %v369_v34  ;;  %v432_v55 = vmul.f32 %v852_v62, %v370_v63  ;;  %v433_v57 = vmul.f32 %v852_v62, %v371_v30  ;;  %v434_v58 = vmul.f32 %v852_v62, %v372_v0 }
 0x144   :  { %v435_v33 = vmul.f32 %v852_v62, %v373_v44  ;;  %v436_v29 = vmul.f32 %v852_v62, %v374_v3  ;;  %v437_v43 = vmul.f32 %v852_v62, %v375_v41  ;;  %v438_v40 = vmul.f32 %v852_v62, %v376_v5 }
 0x145   :  { %v439_v54 = vmul.f32 %v852_v62, %v377_v56  ;;  %v440_v51 = vmul.f32 %v852_v62, %v378_v6  ;;  %v441_v4 = vmul.f32 %v852_v62, %v379_v52  ;;  %v442_v1 = vmul.f32 %v852_v62, %v380_v8 }
 0x146   :  { %v443_v59 = vmul.f32 %v852_v62, %v381_v7  ;;  %v444_v60 = vmul.f32 %v852_v62, %v382_v9  ;;  %v445_v61 = vmul.f32 %v852_v62, %v383_v2  ;;  %v446_v34 = vmul.f32 %v852_v62, %v384_v10 }
 0x147   :  { %v447_v63 = vadd.f32 %v431_v53, %v408_v27  ;;  %v448_v30 = vadd.f32 %v432_v55, %v409_v28  ;;  %v449_v0 = vadd.f32 %v433_v57, %v410_v31  ;;  %v450_v44 = vadd.f32 %v434_v58, %v411_v32 }
 0x148   :  { %v451_v3 = vadd.f32 %v435_v33, %v412_v35  ;;  %v452_v41 = vadd.f32 %v436_v29, %v413_v36  ;;  %v453_v5 = vadd.f32 %v437_v43, %v414_v37  ;;  %v454_v56 = vadd.f32 %v438_v40, %v415_v38 }
 0x149   :  { %v455_v6 = vadd.f32 %v439_v54, %v416_v39  ;;  %v456_v52 = vadd.f32 %v440_v51, %v417_v42  ;;  %v457_v11 = vadd.f32 %v441_v4, %v418_v45  ;;  %v458_v8 = vadd.f32 %v442_v1, %v419_v46  ;;  %463 = vst.msk [vmem:[%s939_s5] sm:$0xff] %vm239_vm1, %v447_v63 }
 0x14a   :  { %464 = vst.msk [vmem:[%s939_s5 + $0x8] sm:$0xff] %vm239_vm1, %v448_v30  ;;  %465 = vst.msk [vmem:[%s939_s5 + $0x10] sm:$0xff] %vm239_vm1, %v449_v0  ;;  %v459_v62 = vadd.f32 %v443_v59, %v420_v47  ;;  %v460_v7 = vadd.f32 %v444_v60, %v421_v48  ;;  %v461_v9 = vadd.f32 %v445_v61, %v422_v49 }
 0x14b   :  { %466 = vst.msk [vmem:[%s939_s5 + $0x18] sm:$0xff] %vm239_vm1, %v450_v44  ;;  %v462_v2 = vadd.f32 %v446_v34, %v423_v50  ;;  %467 = vst.msk [vmem:[%s939_s5 + $0x20] sm:$0xff] %vm239_vm1, %v451_v3 }
 0x14c   :  { %468 = vst.msk [vmem:[%s939_s5 + $0x28] sm:$0xff] %vm239_vm1, %v452_v41  ;;  %469 = vst.msk [vmem:[%s939_s5 + $0x30] sm:$0xff] %vm239_vm1, %v453_v5 }
 0x14d   :  { %470 = vst.msk [vmem:[%s939_s5 + $0x38] sm:$0xff] %vm239_vm1, %v454_v56  ;;  %471 = vst.msk [vmem:[%s939_s5 + $0x40] sm:$0xff] %vm239_vm1, %v455_v6 }
 0x14e   :  { %472 = vst.msk [vmem:[%s939_s5 + $0x48] sm:$0xff] %vm239_vm1, %v456_v52  ;;  %473 = vst.msk [vmem:[%s939_s5 + $0x50] sm:$0xff] %vm239_vm1, %v457_v11 }
 0x14f   :  { %474 = vst.msk [vmem:[%s939_s5 + $0x58] sm:$0xff] %vm239_vm1, %v458_v8  ;;  %475 = vst.msk [vmem:[%s939_s5 + $0x60] sm:$0xff] %vm239_vm1, %v459_v62 }
 0x150   :  { %476 = vst.msk [vmem:[%s939_s5 + $0x68] sm:$0xff] %vm239_vm1, %v460_v7  ;;  %477 = vst.msk [vmem:[%s939_s5 + $0x70] sm:$0xff] %vm239_vm1, %v461_v9 }
 0x151   :  { %478 = vst.msk [vmem:[%s939_s5 + $0x78] sm:$0xff] %vm239_vm1, %v462_v2 }

// kernel: _lambda_.17
= control target key start
LH: loop header
LB: loop body
LE: loop exit
PB: predicated region body
PF: predicated region fallthrough
CT: control target
= control target key end

     0   :  { %v1685_v0 = vmov 0.0|0.0   ;;  %vm167_vm0 = vcmask 154624   ;;  %v1686_v30 = vmov 0.0   ;;  %vm360_vm1 = vcmask 1042432   ;;  %s4256_s1 = inlined_call_operand.vmem [shape: f32[147,8], index: 1, kind: input, shape index: {}]   ;;  %s4257_s0 = inlined_call_operand.vmem [shape: f32[512,147], index: 0, kind: input, shape index: {}]   ;;  %s4258_s2 = inlined_call_operand.vmem [shape: f32[1,8], index: 2, kind: input, shape index: {}, may-alias: {2,4}]   ;;  %s4259_s4 = inlined_call_operand.vmem [shape: f32[1,8], index: 4, kind: input, shape index: {}, may-alias: {2,4}]   ;;  %s4260_s3 = inlined_call_operand.vmem [shape: f32[1,8], index: 3, kind: input, shape index: {}]   ;;  %s4261_s5 = inlined_call_operand.vmem [shape: f32[512,8], index: 5, kind: output, shape index: {}]  }
   0x1   :  { %1634 = vmatprep.subr.bf16.mxu0 %v1685_v0  ;;  %v148_v1 = vld [vmem:[%s4256_s1] sm:$0xff]  ;;  %v149_v2 = vld [vmem:[%s4256_s1 + $0x8] sm:$0xff]  ;;  %v150_v3 = vld [vmem:[%s4256_s1 + $0x10] sm:$0xff]  ;;  %1661 = vmatprep.subr.bf16.mxu1 %v1685_v0  ;;  %vm749_vm2 = vcmask 64512  }
   0x2   :  { %v1635_v4 = vpack.c.bf16 %v149_v2, %v148_v1  ;;  %v151_v5 = vld [vmem:[%s4256_s1 + $0x18] sm:$0xff]  ;;  %v152_v7 = vld [vmem:[%s4256_s1 + $0x20] sm:$0xff]  ;;  %v153_v8 = vld [vmem:[%s4256_s1 + $0x28] sm:$0xff] }
   0x3   :  { %v1638_v6 = vpack.c.bf16 %v151_v5, %v150_v3  ;;  %v21_v9 = vld [vmem:[%s4257_s0 + $0x8] sm:$0xff]  ;;  %v1641_v10 = vpack.c.bf16 %v153_v8, %v152_v7  ;;  %v154_v11 = vld [vmem:[%s4256_s1 + $0x30] sm:$0xff]  ;;  %v155_v12 = vld [vmem:[%s4256_s1 + $0x38] sm:$0xff] }
   0x4   :  { %1636 = vmatpush1.bf16.msra.mxu0 %v1635_v4  ;;  %1671 = vmatpush1.bf16.msra.mxu1 %v1635_v4  ;;  %v1644_v13 = vpack.c.bf16 %v155_v12, %v154_v11  ;;  %v156_v14 = vld [vmem:[%s4256_s1 + $0x40] sm:$0xff]  ;;  %v157_v15 = vld [vmem:[%s4256_s1 + $0x48] sm:$0xff]  ;;  %v158_v17 = vld [vmem:[%s4256_s1 + $0x50] sm:$0xff] }
   0x5   :  { %1637 = vmatprep.subr.bf16.mxu0 %v1685_v0  ;;  %1662 = vmatprep.subr.bf16.mxu1 %v1685_v0  ;;  %v1647_v16 = vpack.c.bf16 %v157_v15, %v156_v14  ;;  %v159_v18 = vld [vmem:[%s4256_s1 + $0x58] sm:$0xff]  ;;  %v85_v19 = vld [vmem:[%s4257_s0 + $0x208] sm:$0xff]  ;;  %v160_v21 = vld [vmem:[%s4256_s1 + $0x60] sm:$0xff] }
   0x6   :  { %1570 = vmatprep.mubr.msk.f32.mxu0 %vm167_vm0, %v21_v9  ;;  %1602 = vmatprep.mubr.msk.f32.mxu1 %vm167_vm0, %v85_v19  ;;  %v1650_v20 = vpack.c.bf16 %v159_v18, %v158_v17  ;;  %v161_v22 = vld [vmem:[%s4256_s1 + $0x68] sm:$0xff]  ;;  %v162_v24 = vld [vmem:[%s4256_s1 + $0x70] sm:$0xff]  ;;  %v163_v25 = vld [vmem:[%s4256_s1 + $0x78] sm:$0xff] }
   0x7   :  { %v1653_v23 = vpack.c.bf16 %v161_v22, %v160_v21  ;;  %v1656_v26 = vpack.c.bf16 %v163_v25, %v162_v24  ;;  %v164_v27 = vld [vmem:[%s4256_s1 + $0x80] sm:$0xff]  ;;  %v165_v28 = vld [vmem:[%s4256_s1 + $0x88] sm:$0xff]  ;;  %v166_v31 = vld [vmem:[%s4256_s1 + $0x90] sm:$0x7] }
   0x8   :  { %1639 = vmatpush1.bf16.msra.mxu0 %v1638_v6  ;;  %1672 = vmatpush1.bf16.msra.mxu1 %v1638_v6  ;;  %v1659_v29 = vpack.c.bf16 %v165_v28, %v164_v27  ;;  %v20_v32 = vld [vmem:[%s4257_s0] sm:$0xff]  ;;  %v23_v33 = vld [vmem:[%s4257_s0 + $0x18] sm:$0xff]  ;;  %v22_v36 = vld [vmem:[%s4257_s0 + $0x10] sm:$0xff] }
   0x9   :  { %1640 = vmatprep.subr.bf16.mxu0 %v1685_v0  ;;  %1663 = vmatprep.subr.bf16.mxu1 %v1685_v0  ;;  %v84_v34 = vld [vmem:[%s4257_s0 + $0x200] sm:$0xff]  ;;  %v87_v35 = vld [vmem:[%s4257_s0 + $0x218] sm:$0xff]  ;;  %v25_v37 = vld [vmem:[%s4257_s0 + $0x28] sm:$0xff] }
   0xa   :  { %v86_v38 = vld [vmem:[%s4257_s0 + $0x210] sm:$0xff]  ;;  %v89_v39 = vld [vmem:[%s4257_s0 + $0x228] sm:$0xff]  ;;  %v24_v40 = vld [vmem:[%s4257_s0 + $0x20] sm:$0xff] }
   0xb   :  { %v27_v41 = vld [vmem:[%s4257_s0 + $0x38] sm:$0xff]  ;;  %v88_v42 = vld [vmem:[%s4257_s0 + $0x220] sm:$0xff]  ;;  %v26_v44 = vld [vmem:[%s4257_s0 + $0x30] sm:$0xff] }
   0xc   :  { %1642 = vmatpush1.bf16.msra.mxu0 %v1641_v10  ;;  %1673 = vmatpush1.bf16.msra.mxu1 %v1641_v10  ;;  %v91_v43 = vld [vmem:[%s4257_s0 + $0x238] sm:$0xff]  ;;  %v29_v45 = vld [vmem:[%s4257_s0 + $0x48] sm:$0xff]  ;;  %v90_v46 = vld [vmem:[%s4257_s0 + $0x230] sm:$0xff] }
   0xd   :  { %1643 = vmatprep.subr.bf16.mxu0 %v1685_v0  ;;  %1664 = vmatprep.subr.bf16.mxu1 %v1685_v0  ;;  %v93_v47 = vld [vmem:[%s4257_s0 + $0x248] sm:$0xff]  ;;  %v28_v48 = vld [vmem:[%s4257_s0 + $0x40] sm:$0xff]  ;;  %v31_v49 = vld [vmem:[%s4257_s0 + $0x58] sm:$0xff] }
   0xe   :  { %v92_v50 = vld [vmem:[%s4257_s0 + $0x240] sm:$0xff]  ;;  %v95_v51 = vld [vmem:[%s4257_s0 + $0x258] sm:$0xff]  ;;  %v30_v52 = vld [vmem:[%s4257_s0 + $0x50] sm:$0xff] }
   0xf   :  { %v33_v53 = vld [vmem:[%s4257_s0 + $0x68] sm:$0xff]  ;;  %v94_v54 = vld [vmem:[%s4257_s0 + $0x250] sm:$0xff]  ;;  %v32_v56 = vld [vmem:[%s4257_s0 + $0x60] sm:$0xff] }
  0x10   :  { %1645 = vmatpush1.bf16.msra.mxu0 %v1644_v13  ;;  %1674 = vmatpush1.bf16.msra.mxu1 %v1644_v13  ;;  %v97_v55 = vld [vmem:[%s4257_s0 + $0x268] sm:$0xff]  ;;  %v35_v57 = vld [vmem:[%s4257_s0 + $0x78] sm:$0xff]  ;;  %v96_v58 = vld [vmem:[%s4257_s0 + $0x260] sm:$0xff] }
  0x11   :  { %1646 = vmatprep.subr.bf16.mxu0 %v1685_v0  ;;  %1665 = vmatprep.subr.bf16.mxu1 %v1685_v0  ;;  %v99_v59 = vld [vmem:[%s4257_s0 + $0x278] sm:$0xff]  ;;  %v34_v60 = vld [vmem:[%s4257_s0 + $0x70] sm:$0xff]  ;;  %v37_v61 = vld [vmem:[%s4257_s0 + $0x88] sm:$0xff] }
  0x12   :  { %v98_v62 = vld [vmem:[%s4257_s0 + $0x270] sm:$0xff]  ;;  %v101_v63 = vld [vmem:[%s4257_s0 + $0x288] sm:$0xff]  ;;  %v39_v1 = vld [vmem:[%s4257_s0 + $0x98] sm:$0xff] }
  0x13   :  { %v100_v2 = vld [vmem:[%s4257_s0 + $0x280] sm:$0xff]  ;;  %v103_v3 = vld [vmem:[%s4257_s0 + $0x298] sm:$0xff]  ;;  %v38_v4 = vld [vmem:[%s4257_s0 + $0x90] sm:$0xff] }
  0x14   :  { %1648 = vmatpush1.bf16.msra.mxu0 %v1647_v16  ;;  %1675 = vmatpush1.bf16.msra.mxu1 %v1647_v16  ;;  %v41_v5 = vld [vmem:[%s4257_s0 + $0xa8] sm:$0xff]  ;;  %v102_v6 = vld [vmem:[%s4257_s0 + $0x290] sm:$0xff]  ;;  %v40_v8 = vld [vmem:[%s4257_s0 + $0xa0] sm:$0xff] }
  0x15   :  { %1649 = vmatprep.subr.bf16.mxu0 %v1685_v0  ;;  %1666 = vmatprep.subr.bf16.mxu1 %v1685_v0  ;;  %v105_v7 = vld [vmem:[%s4257_s0 + $0x2a8] sm:$0xff]  ;;  %v43_v9 = vld [vmem:[%s4257_s0 + $0xb8] sm:$0xff]  ;;  %v104_v10 = vld [vmem:[%s4257_s0 + $0x2a0] sm:$0xff] }
  0x16   :  { %v107_v11 = vld [vmem:[%s4257_s0 + $0x2b8] sm:$0xff]  ;;  %v42_v12 = vld [vmem:[%s4257_s0 + $0xb0] sm:$0xff]  ;;  %v45_v13 = vld [vmem:[%s4257_s0 + $0xc8] sm:$0xff] }
  0x17   :  { %v106_v14 = vld [vmem:[%s4257_s0 + $0x2b0] sm:$0xff]  ;;  %v109_v15 = vld [vmem:[%s4257_s0 + $0x2c8] sm:$0xff]  ;;  %v44_v16 = vld [vmem:[%s4257_s0 + $0xc0] sm:$0xff] }
  0x18   :  { %1651 = vmatpush1.bf16.msra.mxu0 %v1650_v20  ;;  %1676 = vmatpush1.bf16.msra.mxu1 %v1650_v20  ;;  %v47_v17 = vld [vmem:[%s4257_s0 + $0xd8] sm:$0xff]  ;;  %v108_v18 = vld [vmem:[%s4257_s0 + $0x2c0] sm:$0xff]  ;;  %v46_v20 = vld [vmem:[%s4257_s0 + $0xd0] sm:$0xff] }
  0x19   :  { %1652 = vmatprep.subr.bf16.mxu0 %v1685_v0  ;;  %1667 = vmatprep.subr.bf16.mxu1 %v1685_v0  ;;  %v111_v19 = vld [vmem:[%s4257_s0 + $0x2d8] sm:$0xff]  ;;  %v49_v21 = vld [vmem:[%s4257_s0 + $0xe8] sm:$0xff]  ;;  %v110_v22 = vld [vmem:[%s4257_s0 + $0x2d0] sm:$0xff] }
  0x1a   :  { %v48_v24 = vld [vmem:[%s4257_s0 + $0xe0] sm:$0xff]  ;;  %v51_v25 = vld [vmem:[%s4257_s0 + $0xf8] sm:$0xff]  ;;  %v50_v28 = vld [vmem:[%s4257_s0 + $0xf0] sm:$0xff] }
  0x1b   :  { %v115_v27 = vld [vmem:[%s4257_s0 + $0x2f8] sm:$0xff] }
  0x1c   :  { %1654 = vmatpush1.bf16.msra.mxu0 %v1653_v23  ;;  %1677 = vmatpush1.bf16.msra.mxu1 %v1653_v23  ;;  %v113_v23 = vld [vmem:[%s4257_s0 + $0x2e8] sm:$0xff] }
  0x1d   :  { %1655 = vmatprep.subr.bf16.mxu0 %v1685_v0  ;;  %1668 = vmatprep.subr.bf16.mxu1 %v1685_v0 }
  0x20   :  { %1657 = vmatpush1.bf16.msra.mxu0 %v1656_v26  ;;  %1678 = vmatpush1.bf16.msra.mxu1 %v1656_v26  ;;  %v112_v26 = vld [vmem:[%s4257_s0 + $0x2e0] sm:$0xff] }
  0x21   :  { %1658 = vmatprep.subr.bf16.mxu0 %v1685_v0  ;;  %1669 = vmatprep.subr.bf16.mxu1 %v1685_v0  ;;  %v36_v0 = vld [vmem:[%s4257_s0 + $0x80] sm:$0xff] }
  0x24   :  { %1660 = vmatpush1.bf16.msra.mxu0 %v1659_v29  ;;  %1679 = vmatpush1.bf16.msra.mxu1 %v1659_v29  ;;  %v53_v29 = vld [vmem:[%s4257_s0 + $0x108] sm:$0xff] }
  0x25   :  { %400 = vmatprep.subr.mxu0 %v1686_v30  ;;  %1670 = vmatprep.subr.mxu1 %v1686_v30  ;;  %v114_v30 = vld [vmem:[%s4257_s0 + $0x2f0] sm:$0xff] }
  0x28   :  { %1569 = vmatpush1.msk.msra.mxu0 %vm360_vm1, %v166_v31  ;;  %1680 = vmatpush1.msk.msra.mxu1 %vm360_vm1, %v166_v31  ;;  %v117_v31 = vld [vmem:[%s4257_s0 + $0x308] sm:$0xff] }
  0x29   :  { %429 = vmatmul.mubr.f32.vlgmr.msra.gmra.mrb[0].mxu0 %v20_v32  ;;  %589 = vmatmul.mubr.f32.vlgmr.msra.gmra.mrb[0].mxu1 %v84_v34  ;;  %v52_v32 = vld [vmem:[%s4257_s0 + $0x100] sm:$0xff] }
  0x2a   :  { %1571 = vmatprep.mubr.msk.f32.mxu0 %vm167_vm0, %v23_v33  ;;  %1603 = vmatprep.mubr.msk.f32.mxu1 %vm167_vm0, %v87_v35  ;;  %v55_v33 = vld [vmem:[%s4257_s0 + $0x118] sm:$0xff]  ;;  %v116_v34 = vld [vmem:[%s4257_s0 + $0x300] sm:$0xff] }
  0x2b   :  { %v119_v35 = vld [vmem:[%s4257_s0 + $0x318] sm:$0xff] }
  0x2d   :  { %434 = vmatmul.mubr.f32.gmra.mrb[2].mxu0 %v22_v36  ;;  %594 = vmatmul.mubr.f32.gmra.mrb[2].mxu1 %v86_v38  ;;  %v54_v36 = vld [vmem:[%s4257_s0 + $0x110] sm:$0xff] }
  0x2e   :  { %1572 = vmatprep.mubr.msk.f32.mxu0 %vm167_vm0, %v25_v37  ;;  %1604 = vmatprep.mubr.msk.f32.mxu1 %vm167_vm0, %v89_v39  ;;  %v57_v37 = vld [vmem:[%s4257_s0 + $0x128] sm:$0xff]  ;;  %v118_v38 = vld [vmem:[%s4257_s0 + $0x310] sm:$0xff] }
  0x2f   :  { %v121_v39 = vld [vmem:[%s4257_s0 + $0x328] sm:$0xff] }
  0x31   :  { %439 = vmatmul.mubr.f32.gmra.mrb[4].mxu0 %v24_v40  ;;  %599 = vmatmul.mubr.f32.gmra.mrb[4].mxu1 %v88_v42  ;;  %v56_v40 = vld [vmem:[%s4257_s0 + $0x120] sm:$0xff] }
  0x32   :  { %1573 = vmatprep.mubr.msk.f32.mxu0 %vm167_vm0, %v27_v41  ;;  %1605 = vmatprep.mubr.msk.f32.mxu1 %vm167_vm0, %v91_v43  ;;  %v59_v41 = vld [vmem:[%s4257_s0 + $0x138] sm:$0xff]  ;;  %v120_v42 = vld [vmem:[%s4257_s0 + $0x320] sm:$0xff] }
  0x33   :  { %v123_v43 = vld [vmem:[%s4257_s0 + $0x338] sm:$0xff] }
  0x35   :  { %444 = vmatmul.mubr.f32.gmra.mrb[6].mxu0 %v26_v44  ;;  %604 = vmatmul.mubr.f32.gmra.mrb[6].mxu1 %v90_v46  ;;  %v58_v44 = vld [vmem:[%s4257_s0 + $0x130] sm:$0xff] }
  0x36   :  { %1574 = vmatprep.mubr.msk.f32.mxu0 %vm167_vm0, %v29_v45  ;;  %1606 = vmatprep.mubr.msk.f32.mxu1 %vm167_vm0, %v93_v47  ;;  %v61_v45 = vld [vmem:[%s4257_s0 + $0x148] sm:$0xff]  ;;  %v122_v46 = vld [vmem:[%s4257_s0 + $0x330] sm:$0xff] }
  0x37   :  { %v125_v47 = vld [vmem:[%s4257_s0 + $0x348] sm:$0xff] }
  0x39   :  { %449 = vmatmul.mubr.f32.gmra.mrb[8].mxu0 %v28_v48  ;;  %609 = vmatmul.mubr.f32.gmra.mrb[8].mxu1 %v92_v50  ;;  %v60_v48 = vld [vmem:[%s4257_s0 + $0x140] sm:$0xff] }
  0x3a   :  { %1575 = vmatprep.mubr.msk.f32.mxu0 %vm167_vm0, %v31_v49  ;;  %1607 = vmatprep.mubr.msk.f32.mxu1 %vm167_vm0, %v95_v51  ;;  %v63_v49 = vld [vmem:[%s4257_s0 + $0x158] sm:$0xff]  ;;  %v124_v50 = vld [vmem:[%s4257_s0 + $0x340] sm:$0xff] }
  0x3b   :  { %v127_v51 = vld [vmem:[%s4257_s0 + $0x358] sm:$0xff] }
  0x3d   :  { %454 = vmatmul.mubr.f32.gmra.mrb[10].mxu0 %v30_v52  ;;  %614 = vmatmul.mubr.f32.gmra.mrb[10].mxu1 %v94_v54  ;;  %v62_v52 = vld [vmem:[%s4257_s0 + $0x150] sm:$0xff] }
  0x3e   :  { %1576 = vmatprep.mubr.msk.f32.mxu0 %vm167_vm0, %v33_v53  ;;  %1608 = vmatprep.mubr.msk.f32.mxu1 %vm167_vm0, %v97_v55  ;;  %v65_v53 = vld [vmem:[%s4257_s0 + $0x168] sm:$0xff]  ;;  %v126_v54 = vld [vmem:[%s4257_s0 + $0x350] sm:$0xff] }
  0x3f   :  { %v129_v55 = vld [vmem:[%s4257_s0 + $0x368] sm:$0xff] }
  0x41   :  { %459 = vmatmul.mubr.f32.gmra.mrb[12].mxu0 %v32_v56  ;;  %619 = vmatmul.mubr.f32.gmra.mrb[12].mxu1 %v96_v58  ;;  %v64_v56 = vld [vmem:[%s4257_s0 + $0x160] sm:$0xff] }
  0x42   :  { %1577 = vmatprep.mubr.msk.f32.mxu0 %vm167_vm0, %v35_v57  ;;  %1609 = vmatprep.mubr.msk.f32.mxu1 %vm167_vm0, %v99_v59  ;;  %v67_v57 = vld [vmem:[%s4257_s0 + $0x178] sm:$0xff]  ;;  %v128_v58 = vld [vmem:[%s4257_s0 + $0x360] sm:$0xff] }
  0x43   :  { %v131_v59 = vld [vmem:[%s4257_s0 + $0x378] sm:$0xff] }
  0x45   :  { %464 = vmatmul.mubr.f32.gmra.mrb[14].mxu0 %v34_v60  ;;  %624 = vmatmul.mubr.f32.gmra.mrb[14].mxu1 %v98_v62  ;;  %v66_v60 = vld [vmem:[%s4257_s0 + $0x170] sm:$0xff] }
  0x46   :  { %1578 = vmatprep.mubr.msk.f32.mxu0 %vm167_vm0, %v37_v61  ;;  %1610 = vmatprep.mubr.msk.f32.mxu1 %vm167_vm0, %v101_v63  ;;  %v69_v61 = vld [vmem:[%s4257_s0 + $0x188] sm:$0xff]  ;;  %v130_v62 = vld [vmem:[%s4257_s0 + $0x370] sm:$0xff] }
  0x47   :  { %v133_v63 = vld [vmem:[%s4257_s0 + $0x388] sm:$0xff] }
  0x49   :  { %469 = vmatmul.mubr.f32.gmra.mrb[16].mxu0 %v36_v0  ;;  %629 = vmatmul.mubr.f32.gmra.mrb[16].mxu1 %v100_v2  ;;  %v68_v0 = vld [vmem:[%s4257_s0 + $0x180] sm:$0xff] }
  0x4a   :  { %1579 = vmatprep.mubr.msk.f32.mxu0 %vm167_vm0, %v39_v1  ;;  %1611 = vmatprep.mubr.msk.f32.mxu1 %vm167_vm0, %v103_v3  ;;  %v71_v1 = vld [vmem:[%s4257_s0 + $0x198] sm:$0xff]  ;;  %v132_v2 = vld [vmem:[%s4257_s0 + $0x380] sm:$0xff] }
  0x4b   :  { %v135_v3 = vld [vmem:[%s4257_s0 + $0x398] sm:$0xff] }
  0x4d   :  { %474 = vmatmul.mubr.f32.gmra.mrb[18].mxu0 %v38_v4  ;;  %634 = vmatmul.mubr.f32.gmra.mrb[18].mxu1 %v102_v6  ;;  %v70_v4 = vld [vmem:[%s4257_s0 + $0x190] sm:$0xff] }
  0x4e   :  { %1580 = vmatprep.mubr.msk.f32.mxu0 %vm167_vm0, %v41_v5  ;;  %1612 = vmatprep.mubr.msk.f32.mxu1 %vm167_vm0, %v105_v7  ;;  %v73_v5 = vld [vmem:[%s4257_s0 + $0x1a8] sm:$0xff]  ;;  %v134_v6 = vld [vmem:[%s4257_s0 + $0x390] sm:$0xff] }
  0x4f   :  { %v137_v7 = vld [vmem:[%s4257_s0 + $0x3a8] sm:$0xff] }
  0x51   :  { %479 = vmatmul.mubr.f32.gmra.mrb[20].mxu0 %v40_v8  ;;  %639 = vmatmul.mubr.f32.gmra.mrb[20].mxu1 %v104_v10  ;;  %v72_v8 = vld [vmem:[%s4257_s0 + $0x1a0] sm:$0xff] }
  0x52   :  { %1581 = vmatprep.mubr.msk.f32.mxu0 %vm167_vm0, %v43_v9  ;;  %1613 = vmatprep.mubr.msk.f32.mxu1 %vm167_vm0, %v107_v11  ;;  %v75_v9 = vld [vmem:[%s4257_s0 + $0x1b8] sm:$0xff]  ;;  %v136_v10 = vld [vmem:[%s4257_s0 + $0x3a0] sm:$0xff] }
  0x53   :  { %v139_v11 = vld [vmem:[%s4257_s0 + $0x3b8] sm:$0xff] }
  0x55   :  { %484 = vmatmul.mubr.f32.gmra.mrb[22].mxu0 %v42_v12  ;;  %644 = vmatmul.mubr.f32.gmra.mrb[22].mxu1 %v106_v14  ;;  %v74_v12 = vld [vmem:[%s4257_s0 + $0x1b0] sm:$0xff] }
  0x56   :  { %1582 = vmatprep.mubr.msk.f32.mxu0 %vm167_vm0, %v45_v13  ;;  %1614 = vmatprep.mubr.msk.f32.mxu1 %vm167_vm0, %v109_v15  ;;  %v77_v13 = vld [vmem:[%s4257_s0 + $0x1c8] sm:$0xff]  ;;  %v138_v14 = vld [vmem:[%s4257_s0 + $0x3b0] sm:$0xff] }
  0x57   :  { %v141_v15 = vld [vmem:[%s4257_s0 + $0x3c8] sm:$0xff] }
  0x59   :  { %489 = vmatmul.mubr.f32.gmra.mrb[24].mxu0 %v44_v16  ;;  %649 = vmatmul.mubr.f32.gmra.mrb[24].mxu1 %v108_v18  ;;  %v76_v16 = vld [vmem:[%s4257_s0 + $0x1c0] sm:$0xff] }
  0x5a   :  { %1583 = vmatprep.mubr.msk.f32.mxu0 %vm167_vm0, %v47_v17  ;;  %1615 = vmatprep.mubr.msk.f32.mxu1 %vm167_vm0, %v111_v19  ;;  %v79_v17 = vld [vmem:[%s4257_s0 + $0x1d8] sm:$0xff]  ;;  %v140_v18 = vld [vmem:[%s4257_s0 + $0x3c0] sm:$0xff] }
  0x5b   :  { %v143_v19 = vld [vmem:[%s4257_s0 + $0x3d8] sm:$0xff] }
  0x5d   :  { %494 = vmatmul.mubr.f32.gmra.mrb[26].mxu0 %v46_v20  ;;  %654 = vmatmul.mubr.f32.gmra.mrb[26].mxu1 %v110_v22  ;;  %v78_v20 = vld [vmem:[%s4257_s0 + $0x1d0] sm:$0xff] }
  0x5e   :  { %1584 = vmatprep.mubr.msk.f32.mxu0 %vm167_vm0, %v49_v21  ;;  %1616 = vmatprep.mubr.msk.f32.mxu1 %vm167_vm0, %v113_v23  ;;  %v81_v21 = vld [vmem:[%s4257_s0 + $0x1e8] sm:$0xff]  ;;  %v142_v22 = vld [vmem:[%s4257_s0 + $0x3d0] sm:$0xff] }
  0x5f   :  { %v145_v23 = vld [vmem:[%s4257_s0 + $0x3e8] sm:$0xff] }
  0x61   :  { %499 = vmatmul.mubr.f32.gmra.mrb[28].mxu0 %v48_v24  ;;  %659 = vmatmul.mubr.f32.gmra.mrb[28].mxu1 %v112_v26  ;;  %v80_v24 = vld [vmem:[%s4257_s0 + $0x1e0] sm:$0xff] }
  0x62   :  { %1585 = vmatprep.mubr.msk.f32.mxu0 %vm167_vm0, %v51_v25  ;;  %1617 = vmatprep.mubr.msk.f32.mxu1 %vm167_vm0, %v115_v27  ;;  %v83_v25 = vld [vmem:[%s4257_s0 + $0x1f8] sm:$0xff]  ;;  %v144_v26 = vld [vmem:[%s4257_s0 + $0x3e0] sm:$0xff] }
  0x63   :  { %v147_v27 = vld [vmem:[%s4257_s0 + $0x3f8] sm:$0xff] }
  0x65   :  { %504 = vmatmul.mubr.f32.gmra.mrb[30].mxu0 %v50_v28  ;;  %664 = vmatmul.mubr.f32.gmra.mrb[30].mxu1 %v114_v30  ;;  %v82_v28 = vld [vmem:[%s4257_s0 + $0x1f0] sm:$0xff] }
  0x66   :  { %1586 = vmatprep.mubr.msk.f32.mxu0 %vm167_vm0, %v53_v29  ;;  %1618 = vmatprep.mubr.msk.f32.mxu1 %vm167_vm0, %v117_v31  ;;  %v146_v29 = vld [vmem:[%s4257_s0 + $0x3f0] sm:$0xff] }
  0x69   :  { %509 = vmatmul.mubr.f32.gmra.mrb[32].mxu0 %v52_v32  ;;  %669 = vmatmul.mubr.f32.gmra.mrb[32].mxu1 %v116_v34 }
  0x6a   :  { %1587 = vmatprep.mubr.msk.f32.mxu0 %vm167_vm0, %v55_v33  ;;  %1619 = vmatprep.mubr.msk.f32.mxu1 %vm167_vm0, %v119_v35 }
  0x6d   :  { %514 = vmatmul.mubr.f32.gmra.mrb[34].mxu0 %v54_v36  ;;  %674 = vmatmul.mubr.f32.gmra.mrb[34].mxu1 %v118_v38 }
  0x6e   :  { %1588 = vmatprep.mubr.msk.f32.mxu0 %vm167_vm0, %v57_v37  ;;  %1620 = vmatprep.mubr.msk.f32.mxu1 %vm167_vm0, %v121_v39 }
  0x71   :  { %519 = vmatmul.mubr.f32.gmra.mrb[36].mxu0 %v56_v40  ;;  %679 = vmatmul.mubr.f32.gmra.mrb[36].mxu1 %v120_v42 }
  0x72   :  { %1589 = vmatprep.mubr.msk.f32.mxu0 %vm167_vm0, %v59_v41  ;;  %1621 = vmatprep.mubr.msk.f32.mxu1 %vm167_vm0, %v123_v43 }
  0x75   :  { %524 = vmatmul.mubr.f32.gmra.mrb[38].mxu0 %v58_v44  ;;  %684 = vmatmul.mubr.f32.gmra.mrb[38].mxu1 %v122_v46 }
  0x76   :  { %1590 = vmatprep.mubr.msk.f32.mxu0 %vm167_vm0, %v61_v45  ;;  %1622 = vmatprep.mubr.msk.f32.mxu1 %vm167_vm0, %v125_v47 }
  0x79   :  { %529 = vmatmul.mubr.f32.gmra.mrb[40].mxu0 %v60_v48  ;;  %689 = vmatmul.mubr.f32.gmra.mrb[40].mxu1 %v124_v50 }
  0x7a   :  { %1591 = vmatprep.mubr.msk.f32.mxu0 %vm167_vm0, %v63_v49  ;;  %1623 = vmatprep.mubr.msk.f32.mxu1 %vm167_vm0, %v127_v51 }
  0x7d   :  { %534 = vmatmul.mubr.f32.gmra.mrb[42].mxu0 %v62_v52  ;;  %694 = vmatmul.mubr.f32.gmra.mrb[42].mxu1 %v126_v54 }
  0x7e   :  { %1592 = vmatprep.mubr.msk.f32.mxu0 %vm167_vm0, %v65_v53  ;;  %1624 = vmatprep.mubr.msk.f32.mxu1 %vm167_vm0, %v129_v55 }
  0x81   :  { %539 = vmatmul.mubr.f32.gmra.mrb[44].mxu0 %v64_v56  ;;  %699 = vmatmul.mubr.f32.gmra.mrb[44].mxu1 %v128_v58 }
  0x82   :  { %1593 = vmatprep.mubr.msk.f32.mxu0 %vm167_vm0, %v67_v57  ;;  %1625 = vmatprep.mubr.msk.f32.mxu1 %vm167_vm0, %v131_v59 }
  0x85   :  { %544 = vmatmul.mubr.f32.gmra.mrb[46].mxu0 %v66_v60  ;;  %704 = vmatmul.mubr.f32.gmra.mrb[46].mxu1 %v130_v62 }
  0x86   :  { %1594 = vmatprep.mubr.msk.f32.mxu0 %vm167_vm0, %v69_v61  ;;  %1626 = vmatprep.mubr.msk.f32.mxu1 %vm167_vm0, %v133_v63 }
  0x89   :  { %549 = vmatmul.mubr.f32.gmra.mrb[48].mxu0 %v68_v0  ;;  %709 = vmatmul.mubr.f32.gmra.mrb[48].mxu1 %v132_v2 }
  0x8a   :  { %1595 = vmatprep.mubr.msk.f32.mxu0 %vm167_vm0, %v71_v1  ;;  %1627 = vmatprep.mubr.msk.f32.mxu1 %vm167_vm0, %v135_v3 }
  0x8d   :  { %554 = vmatmul.mubr.f32.gmra.mrb[50].mxu0 %v70_v4  ;;  %714 = vmatmul.mubr.f32.gmra.mrb[50].mxu1 %v134_v6 }
  0x8e   :  { %1596 = vmatprep.mubr.msk.f32.mxu0 %vm167_vm0, %v73_v5  ;;  %1628 = vmatprep.mubr.msk.f32.mxu1 %vm167_vm0, %v137_v7 }
  0x91   :  { %559 = vmatmul.mubr.f32.gmra.mrb[52].mxu0 %v72_v8  ;;  %719 = vmatmul.mubr.f32.gmra.mrb[52].mxu1 %v136_v10 }
  0x92   :  { %1597 = vmatprep.mubr.msk.f32.mxu0 %vm167_vm0, %v75_v9  ;;  %1629 = vmatprep.mubr.msk.f32.mxu1 %vm167_vm0, %v139_v11 }
  0x95   :  { %564 = vmatmul.mubr.f32.gmra.mrb[54].mxu0 %v74_v12  ;;  %724 = vmatmul.mubr.f32.gmra.mrb[54].mxu1 %v138_v14 }
  0x96   :  { %1598 = vmatprep.mubr.msk.f32.mxu0 %vm167_vm0, %v77_v13  ;;  %1630 = vmatprep.mubr.msk.f32.mxu1 %vm167_vm0, %v141_v15 }
  0x99   :  { %569 = vmatmul.mubr.f32.gmra.mrb[56].mxu0 %v76_v16  ;;  %729 = vmatmul.mubr.f32.gmra.mrb[56].mxu1 %v140_v18 }
  0x9a   :  { %1599 = vmatprep.mubr.msk.f32.mxu0 %vm167_vm0, %v79_v17  ;;  %1631 = vmatprep.mubr.msk.f32.mxu1 %vm167_vm0, %v143_v19 }
  0x9d   :  { %574 = vmatmul.mubr.f32.gmra.mrb[58].mxu0 %v78_v20  ;;  %734 = vmatmul.mubr.f32.gmra.mrb[58].mxu1 %v142_v22 }
  0x9e   :  { %1600 = vmatprep.mubr.msk.f32.mxu0 %vm167_vm0, %v81_v21  ;;  %1632 = vmatprep.mubr.msk.f32.mxu1 %vm167_vm0, %v145_v23 }
  0xa1   :  { %579 = vmatmul.mubr.f32.gmra.mrb[60].mxu0 %v80_v24  ;;  %739 = vmatmul.mubr.f32.gmra.mrb[60].mxu1 %v144_v26 }
  0xa2   :  { %1601 = vmatprep.mubr.msk.f32.mxu0 %vm167_vm0, %v83_v25  ;;  %1633 = vmatprep.mubr.msk.f32.mxu1 %vm167_vm0, %v147_v27 }
  0xa5   :  { %584 = vmatmul.mubr.f32.gmra.mrb[62].mxu0 %v82_v28  ;;  %744 = vmatmul.mubr.f32.gmra.mrb[62].mxu1 %v146_v29 }
  0xfc   :  { %v2240_v30 = vpop.f32.mrb[0].mxu0  ;;  %v2242_v32 = vpop.f32.mrb[0].mxu1 }
  0xfd   :  { %v432_v31 = vpop.f32.mrb[1].mxu0  ;;  %4321 = vst [vmem:[#allocation2_spill] sm:$0xff] %v2242_v32  ;;  %v592_v33 = vpop.f32.mrb[1].mxu1  ;;  %v884_v34 = vmul.f32 %v2240_v30, %v2240_v30  ;;  %v750_v36 = vsel %vm749_vm2, %v2240_v30, 0.0 }
  0xff   :  { %v948_v43 = vsel %vm749_vm2, %v884_v34, 0.0 }
 0x100   :  { %v2246_v35 = vpop.f32.mrb[2].mxu0  ;;  %v2254_v40 = vpop.f32.mrb[2].mxu1 }
 0x101   :  { %v751_v37 = vsel %vm749_vm2, %v2246_v35, 0.0  ;;  %v885_v38 = vmul.f32 %v2246_v35, %v2246_v35  ;;  %v437_v39 = vpop.f32.mrb[3].mxu0  ;;  %v597_v42 = vpop.f32.mrb[3].mxu1 }
 0x102   :  { %v752_v41 = vadd.f32 %v751_v37, %v750_v36 }
 0x103   :  { %v949_v44 = vsel %vm749_vm2, %v885_v38, 0.0 }
 0x104   :  { %v950_v45 = vadd.f32 %v949_v44, %v948_v43  ;;  %v2258_v46 = vpop.f32.mrb[4].mxu0  ;;  %v2264_v50 = vpop.f32.mrb[4].mxu1 }
 0x105   :  { %v753_v47 = vsel %vm749_vm2, %v2258_v46, 0.0  ;;  %v886_v48 = vmul.f32 %v2258_v46, %v2258_v46  ;;  %v442_v49 = vpop.f32.mrb[5].mxu0  ;;  %v602_v52 = vpop.f32.mrb[5].mxu1 }
 0x106   :  { %v754_v51 = vadd.f32 %v753_v47, %v752_v41 }
 0x107   :  { %v951_v53 = vsel %vm749_vm2, %v886_v48, 0.0 }
 0x108   :  { %v952_v54 = vadd.f32 %v951_v53, %v950_v45  ;;  %v2267_v55 = vpop.f32.mrb[6].mxu0  ;;  %v2273_v59 = vpop.f32.mrb[6].mxu1 }
 0x109   :  { %v755_v56 = vsel %vm749_vm2, %v2267_v55, 0.0  ;;  %v887_v57 = vmul.f32 %v2267_v55, %v2267_v55  ;;  %v447_v58 = vpop.f32.mrb[7].mxu0  ;;  %v607_v61 = vpop.f32.mrb[7].mxu1 }
 0x10a   :  { %v756_v60 = vadd.f32 %v755_v56, %v754_v51 }
 0x10b   :  { %v953_v62 = vsel %vm749_vm2, %v887_v57, 0.0 }
 0x10c   :  { %v954_v63 = vadd.f32 %v953_v62, %v952_v54  ;;  %v2276_v0 = vpop.f32.mrb[8].mxu0  ;;  %v2282_v4 = vpop.f32.mrb[8].mxu1 }
 0x10d   :  { %v757_v1 = vsel %vm749_vm2, %v2276_v0, 0.0  ;;  %v888_v2 = vmul.f32 %v2276_v0, %v2276_v0  ;;  %v452_v3 = vpop.f32.mrb[9].mxu0  ;;  %v612_v6 = vpop.f32.mrb[9].mxu1 }
 0x10e   :  { %v758_v5 = vadd.f32 %v757_v1, %v756_v60 }
 0x10f   :  { %v955_v7 = vsel %vm749_vm2, %v888_v2, 0.0 }
 0x110   :  { %v956_v8 = vadd.f32 %v955_v7, %v954_v63  ;;  %v2285_v9 = vpop.f32.mrb[10].mxu0  ;;  %v2291_v13 = vpop.f32.mrb[10].mxu1 }
 0x111   :  { %v759_v10 = vsel %vm749_vm2, %v2285_v9, 0.0  ;;  %v889_v11 = vmul.f32 %v2285_v9, %v2285_v9  ;;  %v457_v12 = vpop.f32.mrb[11].mxu0  ;;  %v617_v15 = vpop.f32.mrb[11].mxu1 }
 0x112   :  { %v760_v14 = vadd.f32 %v759_v10, %v758_v5 }
 0x113   :  { %v957_v16 = vsel %vm749_vm2, %v889_v11, 0.0 }
 0x114   :  { %v958_v17 = vadd.f32 %v957_v16, %v956_v8  ;;  %v2294_v18 = vpop.f32.mrb[12].mxu0  ;;  %v2300_v22 = vpop.f32.mrb[12].mxu1 }
 0x115   :  { %v761_v19 = vsel %vm749_vm2, %v2294_v18, 0.0  ;;  %v890_v20 = vmul.f32 %v2294_v18, %v2294_v18  ;;  %v462_v21 = vpop.f32.mrb[13].mxu0  ;;  %v622_v24 = vpop.f32.mrb[13].mxu1 }
 0x116   :  { %v762_v23 = vadd.f32 %v761_v19, %v760_v14 }
 0x117   :  { %v959_v25 = vsel %vm749_vm2, %v890_v20, 0.0 }
 0x118   :  { %v960_v26 = vadd.f32 %v959_v25, %v958_v17  ;;  %v2303_v27 = vpop.f32.mrb[14].mxu0  ;;  %v2309_v33 = vpop.f32.mrb[14].mxu1 }
 0x119   :  { %v763_v28 = vsel %vm749_vm2, %v2303_v27, 0.0  ;;  %v891_v29 = vmul.f32 %v2303_v27, %v2303_v27  ;;  %v467_v31 = vpop.f32.mrb[15].mxu0  ;;  %v627_v36 = vpop.f32.mrb[15].mxu1 }
 0x11a   :  { %v764_v34 = vadd.f32 %v763_v28, %v762_v23 }
 0x11b   :  { %v961_v37 = vsel %vm749_vm2, %v891_v29, 0.0 }
 0x11c   :  { %v962_v38 = vadd.f32 %v961_v37, %v960_v26  ;;  %v2312_v39 = vpop.f32.mrb[16].mxu0  ;;  %v2318_v44 = vpop.f32.mrb[16].mxu1 }
 0x11d   :  { %v765_v41 = vsel %vm749_vm2, %v2312_v39, 0.0  ;;  %v892_v42 = vmul.f32 %v2312_v39, %v2312_v39  ;;  %v472_v43 = vpop.f32.mrb[17].mxu0  ;;  %v632_v47 = vpop.f32.mrb[17].mxu1 }
 0x11e   :  { %v766_v45 = vadd.f32 %v765_v41, %v764_v34 }
 0x11f   :  { %v963_v48 = vsel %vm749_vm2, %v892_v42, 0.0 }
 0x120   :  { %v964_v49 = vadd.f32 %v963_v48, %v962_v38  ;;  %v2321_v51 = vpop.f32.mrb[18].mxu0  ;;  %v2327_v56 = vpop.f32.mrb[18].mxu1 }
 0x121   :  { %v767_v52 = vsel %vm749_vm2, %v2321_v51, 0.0  ;;  %v893_v53 = vmul.f32 %v2321_v51, %v2321_v51  ;;  %v477_v54 = vpop.f32.mrb[19].mxu0  ;;  %v637_v58 = vpop.f32.mrb[19].mxu1 }
 0x122   :  { %v768_v57 = vadd.f32 %v767_v52, %v766_v45 }
 0x123   :  { %v965_v60 = vsel %vm749_vm2, %v893_v53, 0.0 }
 0x124   :  { %v966_v61 = vadd.f32 %v965_v60, %v964_v49  ;;  %v2330_v62 = vpop.f32.mrb[20].mxu0  ;;  %v2336_v3 = vpop.f32.mrb[20].mxu1 }
 0x125   :  { %v769_v63 = vsel %vm749_vm2, %v2330_v62, 0.0  ;;  %v894_v1 = vmul.f32 %v2330_v62, %v2330_v62  ;;  %v482_v2 = vpop.f32.mrb[21].mxu0  ;;  %v642_v6 = vpop.f32.mrb[21].mxu1 }
 0x126   :  { %v770_v5 = vadd.f32 %v769_v63, %v768_v57 }
 0x127   :  { %v967_v7 = vsel %vm749_vm2, %v894_v1, 0.0 }
 0x128   :  { %v968_v8 = vadd.f32 %v967_v7, %v966_v61  ;;  %v2339_v10 = vpop.f32.mrb[22].mxu0  ;;  %v2345_v15 = vpop.f32.mrb[22].mxu1 }
 0x129   :  { %v771_v11 = vsel %vm749_vm2, %v2339_v10, 0.0  ;;  %v895_v12 = vmul.f32 %v2339_v10, %v2339_v10  ;;  %v487_v14 = vpop.f32.mrb[23].mxu0  ;;  %v647_v17 = vpop.f32.mrb[23].mxu1 }
 0x12a   :  { %v772_v16 = vadd.f32 %v771_v11, %v770_v5 }
 0x12b   :  { %v969_v19 = vsel %vm749_vm2, %v895_v12, 0.0 }
 0x12c   :  { %v970_v20 = vadd.f32 %v969_v19, %v968_v8  ;;  %v2348_v21 = vpop.f32.mrb[24].mxu0  ;;  %v2354_v26 = vpop.f32.mrb[24].mxu1 }
 0x12d   :  { %v773_v23 = vsel %vm749_vm2, %v2348_v21, 0.0  ;;  %v896_v24 = vmul.f32 %v2348_v21, %v2348_v21  ;;  %v492_v25 = vpop.f32.mrb[25].mxu0  ;;  %v652_v29 = vpop.f32.mrb[25].mxu1 }
 0x12e   :  { %v774_v28 = vadd.f32 %v773_v23, %v772_v16 }
 0x12f   :  { %v971_v31 = vsel %vm749_vm2, %v896_v24, 0.0 }
 0x130   :  { %v972_v34 = vadd.f32 %v971_v31, %v970_v20  ;;  %v2357_v36 = vpop.f32.mrb[26].mxu0  ;;  %v2363_v42 = vpop.f32.mrb[26].mxu1 }
 0x131   :  { %v775_v37 = vsel %vm749_vm2, %v2357_v36, 0.0  ;;  %v897_v38 = vmul.f32 %v2357_v36, %v2357_v36  ;;  %v497_v41 = vpop.f32.mrb[27].mxu0  ;;  %v657_v45 = vpop.f32.mrb[27].mxu1 }
 0x132   :  { %v776_v43 = vadd.f32 %v775_v37, %v774_v28 }
 0x133   :  { %v973_v47 = vsel %vm749_vm2, %v897_v38, 0.0 }
 0x134   :  { %v974_v48 = vadd.f32 %v973_v47, %v972_v34  ;;  %v2366_v49 = vpop.f32.mrb[28].mxu0  ;;  %v2372_v57 = vpop.f32.mrb[28].mxu1 }
 0x135   :  { %v777_v52 = vsel %vm749_vm2, %v2366_v49, 0.0  ;;  %v898_v53 = vmul.f32 %v2366_v49, %v2366_v49  ;;  %v502_v54 = vpop.f32.mrb[29].mxu0  ;;  %v662_v60 = vpop.f32.mrb[29].mxu1 }
 0x136   :  { %v778_v58 = vadd.f32 %v777_v52, %v776_v43 }
 0x137   :  { %v975_v61 = vsel %vm749_vm2, %v898_v53, 0.0 }
 0x138   :  { %v976_v63 = vadd.f32 %v975_v61, %v974_v48  ;;  %v2375_v1 = vpop.f32.mrb[30].mxu0  ;;  %v2381_v7 = vpop.f32.mrb[30].mxu1 }
 0x139   :  { %v779_v2 = vsel %vm749_vm2, %v2375_v1, 0.0  ;;  %v899_v5 = vmul.f32 %v2375_v1, %v2375_v1  ;;  %v507_v6 = vpop.f32.mrb[31].mxu0  ;;  %v667_v11 = vpop.f32.mrb[31].mxu1 }
 0x13a   :  { %v780_v8 = vadd.f32 %v779_v2, %v778_v58 }
 0x13b   :  { %v977_v12 = vsel %vm749_vm2, %v899_v5, 0.0 }
 0x13c   :  { %v978_v14 = vadd.f32 %v977_v12, %v976_v63  ;;  %v2384_v16 = vpop.f32.mrb[32].mxu0  ;;  %v2390_v23 = vpop.f32.mrb[32].mxu1 }
 0x13d   :  { %v781_v17 = vsel %vm749_vm2, %v2384_v16, 0.0  ;;  %v900_v19 = vmul.f32 %v2384_v16, %v2384_v16  ;;  %v512_v20 = vpop.f32.mrb[33].mxu0  ;;  %v672_v25 = vpop.f32.mrb[33].mxu1 }
 0x13e   :  { %v782_v24 = vadd.f32 %v781_v17, %v780_v8 }
 0x13f   :  { %v979_v28 = vsel %vm749_vm2, %v900_v19, 0.0 }
 0x140   :  { %v980_v29 = vadd.f32 %v979_v28, %v978_v14  ;;  %v2393_v31 = vpop.f32.mrb[34].mxu0  ;;  %v2399_v41 = vpop.f32.mrb[34].mxu1 }
 0x141   :  { %4322 = vst [vmem:[#allocation3_spill] sm:$0xff] %v2393_v31  ;;  %v783_v34 = vsel %vm749_vm2, %v2393_v31, 0.0  ;;  %v901_v37 = vmul.f32 %v2393_v31, %v2393_v31  ;;  %v517_v38 = vpop.f32.mrb[35].mxu0  ;;  %v677_v45 = vpop.f32.mrb[35].mxu1 }
 0x142   :  { %v784_v43 = vadd.f32 %v783_v34, %v782_v24 }
 0x143   :  { %v981_v47 = vsel %vm749_vm2, %v901_v37, 0.0 }
 0x144   :  { %v982_v48 = vadd.f32 %v981_v47, %v980_v29  ;;  %v2402_v52 = vpop.f32.mrb[36].mxu0  ;;  %v2408_v60 = vpop.f32.mrb[36].mxu1 }
 0x145   :  { %4323 = vst [vmem:[#allocation4_spill] sm:$0xff] %v2402_v52  ;;  %v785_v53 = vsel %vm749_vm2, %v2402_v52, 0.0  ;;  %v902_v54 = vmul.f32 %v2402_v52, %v2402_v52  ;;  %v522_v58 = vpop.f32.mrb[37].mxu0  ;;  %v682_v63 = vpop.f32.mrb[37].mxu1 }
 0x146   :  { %v786_v61 = vadd.f32 %v785_v53, %v784_v43 }
 0x147   :  { %v983_v2 = vsel %vm749_vm2, %v902_v54, 0.0 }
 0x148   :  { %v984_v5 = vadd.f32 %v983_v2, %v982_v48  ;;  %v2411_v6 = vpop.f32.mrb[38].mxu0  ;;  %v2417_v14 = vpop.f32.mrb[38].mxu1 }
 0x149   :  { %4324 = vst [vmem:[#allocation5_spill] sm:$0xff] %v2411_v6  ;;  %v787_v8 = vsel %vm749_vm2, %v2411_v6, 0.0  ;;  %v903_v11 = vmul.f32 %v2411_v6, %v2411_v6  ;;  %v527_v12 = vpop.f32.mrb[39].mxu0  ;;  %v687_v19 = vpop.f32.mrb[39].mxu1 }
 0x14a   :  { %v788_v17 = vadd.f32 %v787_v8, %v786_v61 }
 0x14b   :  { %v985_v20 = vsel %vm749_vm2, %v903_v11, 0.0 }
 0x14c   :  { %v986_v24 = vadd.f32 %v985_v20, %v984_v5  ;;  %v2420_v25 = vpop.f32.mrb[40].mxu0  ;;  %v2426_v37 = vpop.f32.mrb[40].mxu1 }
 0x14d   :  { %4325 = vst [vmem:[#allocation6_spill] sm:$0xff] %v2420_v25  ;;  %v789_v28 = vsel %vm749_vm2, %v2420_v25, 0.0  ;;  %v904_v29 = vmul.f32 %v2420_v25, %v2420_v25  ;;  %v532_v34 = vpop.f32.mrb[41].mxu0  ;;  %v692_v43 = vpop.f32.mrb[41].mxu1 }
 0x14e   :  { %v790_v38 = vadd.f32 %v789_v28, %v788_v17 }
 0x14f   :  { %v987_v45 = vsel %vm749_vm2, %v904_v29, 0.0 }
 0x150   :  { %v988_v47 = vadd.f32 %v987_v45, %v986_v24  ;;  %v2429_v48 = vpop.f32.mrb[42].mxu0  ;;  %v2435_v61 = vpop.f32.mrb[42].mxu1 }
 0x151   :  { %4326 = vst [vmem:[#allocation7_spill] sm:$0xff] %v2429_v48  ;;  %v791_v53 = vsel %vm749_vm2, %v2429_v48, 0.0  ;;  %v905_v54 = vmul.f32 %v2429_v48, %v2429_v48  ;;  %v537_v58 = vpop.f32.mrb[43].mxu0  ;;  %v697_v2 = vpop.f32.mrb[43].mxu1 }
 0x152   :  { %v792_v63 = vadd.f32 %v791_v53, %v790_v38 }
 0x153   :  { %v989_v5 = vsel %vm749_vm2, %v905_v54, 0.0 }
 0x154   :  { %v990_v8 = vadd.f32 %v989_v5, %v988_v47  ;;  %v2438_v11 = vpop.f32.mrb[44].mxu0  ;;  %v2444_v20 = vpop.f32.mrb[44].mxu1 }
 0x155   :  { %4327 = vst [vmem:[#allocation8_spill] sm:$0xff] %v2438_v11  ;;  %v793_v12 = vsel %vm749_vm2, %v2438_v11, 0.0  ;;  %v906_v17 = vmul.f32 %v2438_v11, %v2438_v11  ;;  %v542_v19 = vpop.f32.mrb[45].mxu0  ;;  %v702_v28 = vpop.f32.mrb[45].mxu1 }
 0x156   :  { %v794_v24 = vadd.f32 %v793_v12, %v792_v63 }
 0x157   :  { %v991_v29 = vsel %vm749_vm2, %v906_v17, 0.0 }
 0x158   :  { %v992_v34 = vadd.f32 %v991_v29, %v990_v8  ;;  %v2447_v38 = vpop.f32.mrb[46].mxu0  ;;  %v2453_v53 = vpop.f32.mrb[46].mxu1 }
 0x159   :  { %4328 = vst [vmem:[#allocation9_spill] sm:$0xff] %v2447_v38  ;;  %v795_v43 = vsel %vm749_vm2, %v2447_v38, 0.0  ;;  %v907_v45 = vmul.f32 %v2447_v38, %v2447_v38  ;;  %v547_v47 = vpop.f32.mrb[47].mxu0  ;;  %4329 = vst [vmem:[#allocation10_spill] sm:$0xff] %v2453_v53  ;;  %v707_v58 = vpop.f32.mrb[47].mxu1 }
 0x15a   :  { %v796_v54 = vadd.f32 %v795_v43, %v794_v24 }
 0x15b   :  { %v993_v2 = vsel %vm749_vm2, %v907_v45, 0.0 }
 0x15c   :  { %v994_v63 = vadd.f32 %v993_v2, %v992_v34  ;;  %v2456_v5 = vpop.f32.mrb[48].mxu0  ;;  %v2462_v19 = vpop.f32.mrb[48].mxu1 }
 0x15d   :  { %4330 = vst [vmem:[#allocation11_spill] sm:$0xff] %v2456_v5  ;;  %v797_v8 = vsel %vm749_vm2, %v2456_v5, 0.0  ;;  %v908_v12 = vmul.f32 %v2456_v5, %v2456_v5  ;;  %v552_v17 = vpop.f32.mrb[49].mxu0  ;;  %4331 = vst [vmem:[#allocation12_spill] sm:$0xff] %v2462_v19  ;;  %v712_v29 = vpop.f32.mrb[49].mxu1 }
 0x15e   :  { %v798_v28 = vadd.f32 %v797_v8, %v796_v54 }
 0x15f   :  { %v995_v47 = vsel %vm749_vm2, %v908_v12, 0.0 }
 0x160   :  { %v996_v24 = vadd.f32 %v995_v47, %v994_v63  ;;  %v2465_v43 = vpop.f32.mrb[50].mxu0  ;;  %v2471_v2 = vpop.f32.mrb[50].mxu1 }
 0x161   :  { %4332 = vst [vmem:[#allocation13_spill] sm:$0xff] %v2465_v43  ;;  %v799_v34 = vsel %vm749_vm2, %v2465_v43, 0.0  ;;  %v909_v45 = vmul.f32 %v2465_v43, %v2465_v43  ;;  %v557_v58 = vpop.f32.mrb[51].mxu0  ;;  %4333 = vst [vmem:[#allocation14_spill] sm:$0xff] %v2471_v2  ;;  %v717_v17 = vpop.f32.mrb[51].mxu1 }
 0x162   :  { %v800_v5 = vadd.f32 %v799_v34, %v798_v28 }
 0x163   :  { %v997_v38 = vsel %vm749_vm2, %v909_v45, 0.0 }
 0x164   :  { %v998_v54 = vadd.f32 %v997_v38, %v996_v24  ;;  %v2474_v8 = vpop.f32.mrb[52].mxu0  ;;  %v2480_v47 = vpop.f32.mrb[52].mxu1 }
 0x165   :  { %4334 = vst [vmem:[#allocation15_spill] sm:$0xff] %v2474_v8  ;;  %v801_v63 = vsel %vm749_vm2, %v2474_v8, 0.0  ;;  %v910_v12 = vmul.f32 %v2474_v8, %v2474_v8  ;;  %v562_v29 = vpop.f32.mrb[53].mxu0  ;;  %4335 = vst [vmem:[#allocation16_spill] sm:$0xff] %v2480_v47  ;;  %v722_v58 = vpop.f32.mrb[53].mxu1 }
 0x166   :  { %v802_v43 = vadd.f32 %v801_v63, %v800_v5 }
 0x167   :  { %v999_v11 = vsel %vm749_vm2, %v910_v12, 0.0 }
 0x168   :  { %v1000_v28 = vadd.f32 %v999_v11, %v998_v54  ;;  %v2483_v34 = vpop.f32.mrb[54].mxu0  ;;  %v2489_v17 = vpop.f32.mrb[54].mxu1 }
 0x169   :  { %4336 = vst [vmem:[#allocation17_spill] sm:$0xff] %v2483_v34  ;;  %v803_v38 = vsel %vm749_vm2, %v2483_v34, 0.0  ;;  %v911_v24 = vmul.f32 %v2483_v34, %v2483_v34  ;;  %v567_v45 = vpop.f32.mrb[55].mxu0  ;;  %4337 = vst [vmem:[#allocation18_spill] sm:$0xff] %v2489_v17  ;;  %v727_v29 = vpop.f32.mrb[55].mxu1 }
 0x16a   :  { %v804_v8 = vadd.f32 %v803_v38, %v802_v43 }
 0x16b   :  { %v1001_v48 = vsel %vm749_vm2, %v911_v24, 0.0 }
 0x16c   :  { %v1002_v5 = vadd.f32 %v1001_v48, %v1000_v28  ;;  %v2492_v63 = vpop.f32.mrb[56].mxu0  ;;  %v2498_v58 = vpop.f32.mrb[56].mxu1 }
 0x16d   :  { %4338 = vst [vmem:[#allocation19_spill] sm:$0xff] %v2492_v63  ;;  %v805_v11 = vsel %vm749_vm2, %v2492_v63, 0.0  ;;  %v912_v54 = vmul.f32 %v2492_v63, %v2492_v63  ;;  %v572_v12 = vpop.f32.mrb[57].mxu0  ;;  %4339 = vst [vmem:[#allocation20_spill] sm:$0xff] %v2498_v58  ;;  %v732_v45 = vpop.f32.mrb[57].mxu1 }
 0x16e   :  { %v806_v34 = vadd.f32 %v805_v11, %v804_v8 }
 0x16f   :  { %v1003_v25 = vsel %vm749_vm2, %v912_v54, 0.0 }
 0x170   :  { %v1004_v43 = vadd.f32 %v1003_v25, %v1002_v5  ;;  %v2501_v38 = vpop.f32.mrb[58].mxu0  ;;  %v2507_v29 = vpop.f32.mrb[58].mxu1 }
 0x171   :  { %4340 = vst [vmem:[#allocation21_spill] sm:$0xff] %v2501_v38  ;;  %v807_v48 = vsel %vm749_vm2, %v2501_v38, 0.0  ;;  %v913_v28 = vmul.f32 %v2501_v38, %v2501_v38  ;;  %v577_v24 = vpop.f32.mrb[59].mxu0  ;;  %4341 = vst [vmem:[#allocation22_spill] sm:$0xff] %v2507_v29  ;;  %v737_v12 = vpop.f32.mrb[59].mxu1 }
 0x172   :  { %v808_v63 = vadd.f32 %v807_v48, %v806_v34 }
 0x173   :  { %v1005_v6 = vsel %vm749_vm2, %v913_v28, 0.0 }
 0x174   :  { %v1006_v8 = vadd.f32 %v1005_v6, %v1004_v43  ;;  %v2510_v11 = vpop.f32.mrb[60].mxu0  ;;  %v2516_v45 = vpop.f32.mrb[60].mxu1  ;;  %v916_v6 = vmul.f32 %v2242_v32, %v2242_v32 }
 0x175   :  { %4342 = vst [vmem:[#allocation23_spill] sm:$0xff] %v2510_v11  ;;  %v809_v25 = vsel %vm749_vm2, %v2510_v11, 0.0  ;;  %v914_v5 = vmul.f32 %v2510_v11, %v2510_v11  ;;  %v582_v54 = vpop.f32.mrb[61].mxu0  ;;  %4343 = vst [vmem:[#allocation24_spill] sm:$0xff] %v2516_v45  ;;  %v742_v24 = vpop.f32.mrb[61].mxu1 }
 0x176   :  { %v810_v38 = vadd.f32 %v809_v25, %v808_v63  ;;  %v813_v25 = vsel %vm749_vm2, %v2242_v32, 0.0  ;;  %v1011_v31 = vsel %vm749_vm2, %v916_v6, 0.0  ;;  %v817_v32 = vsel %vm749_vm2, %v2264_v50, 0.0 }
 0x177   :  { %v1007_v52 = vsel %vm749_vm2, %v914_v5, 0.0 }
 0x178   :  { %v1008_v34 = vadd.f32 %v1007_v52, %v1006_v8  ;;  %v2519_v48 = vpop.f32.mrb[62].mxu0  ;;  %v2527_v54 = vpop.f32.mrb[62].mxu1  ;;  %v917_v52 = vmul.f32 %v2254_v40, %v2254_v40 }
 0x179   :  { %4344 = vst [vmem:[#allocation25_spill] sm:$0xff] %v2519_v48  ;;  %v811_v43 = vsel %vm749_vm2, %v2519_v48, 0.0  ;;  %v915_v28 = vmul.f32 %v2519_v48, %v2519_v48  ;;  %v587_v12 = vpop.f32.mrb[63].mxu0  ;;  %4345 = vst [vmem:[#allocation26_spill] sm:$0xff] %v2527_v54  ;;  %v747_v63 = vpop.f32.mrb[63].mxu1  ;;  %v815_v48 = vsel %vm749_vm2, %v2254_v40, 0.0 }
 0x17a   :  { %v812_v11 = vadd.f32 %v811_v43, %v810_v38  ;;  %v918_v12 = vmul.f32 %v2264_v50, %v2264_v50  ;;  %v1013_v63 = vsel %vm749_vm2, %v917_v52, 0.0 }
 0x17b   :  { %v1009_v8 = vsel %vm749_vm2, %v915_v28, 0.0  ;;  %v919_v28 = vmul.f32 %v2273_v59, %v2273_v59 }
 0x17c   :  { %v814_v5 = vadd.f32 %v813_v25, %v812_v11  ;;  %v1010_v24 = vadd.f32 %v1009_v8, %v1008_v34  ;;  %v1015_v6 = vsel %vm749_vm2, %v918_v12, 0.0  ;;  %v819_v25 = vsel %vm749_vm2, %v2273_v59, 0.0 }
 0x17d   :  { %v920_v8 = vmul.f32 %v2282_v4, %v2282_v4  ;;  %v1017_v52 = vsel %vm749_vm2, %v919_v28, 0.0 }
 0x17e   :  { %v816_v38 = vadd.f32 %v815_v48, %v814_v5  ;;  %v1012_v43 = vadd.f32 %v1011_v31, %v1010_v24  ;;  %v821_v5 = vsel %vm749_vm2, %v2282_v4, 0.0  ;;  %v921_v24 = vmul.f32 %v2291_v13, %v2291_v13 }
 0x17f   :  { %v1019_v12 = vsel %vm749_vm2, %v920_v8, 0.0 }
 0x180   :  { %v818_v11 = vadd.f32 %v817_v32, %v816_v38  ;;  %v1014_v34 = vadd.f32 %v1013_v63, %v1012_v43  ;;  %v823_v43 = vsel %vm749_vm2, %v2291_v13, 0.0  ;;  %v922_v63 = vmul.f32 %v2300_v22, %v2300_v22 }
 0x181   :  { %v1021_v28 = vsel %vm749_vm2, %v921_v24, 0.0 }
 0x182   :  { %v820_v48 = vadd.f32 %v819_v25, %v818_v11  ;;  %v1016_v31 = vadd.f32 %v1015_v6, %v1014_v34  ;;  %v825_v6 = vsel %vm749_vm2, %v2300_v22, 0.0  ;;  %v923_v25 = vmul.f32 %v2309_v33, %v2309_v33 }
 0x183   :  { %v1023_v8 = vsel %vm749_vm2, %v922_v63, 0.0 }
 0x184   :  { %v822_v32 = vadd.f32 %v821_v5, %v820_v48  ;;  %v1018_v38 = vadd.f32 %v1017_v52, %v1016_v31  ;;  %v827_v52 = vsel %vm749_vm2, %v2309_v33, 0.0  ;;  %v924_v5 = vmul.f32 %v2318_v44, %v2318_v44 }
 0x185   :  { %v1025_v24 = vsel %vm749_vm2, %v923_v25, 0.0 }
 0x186   :  { %v824_v11 = vadd.f32 %v823_v43, %v822_v32  ;;  %v1020_v34 = vadd.f32 %v1019_v12, %v1018_v38  ;;  %v829_v12 = vsel %vm749_vm2, %v2318_v44, 0.0  ;;  %v925_v43 = vmul.f32 %v2327_v56, %v2327_v56 }
 0x187   :  { %v1027_v63 = vsel %vm749_vm2, %v924_v5, 0.0 }
 0x188   :  { %v826_v48 = vadd.f32 %v825_v6, %v824_v11  ;;  %v1022_v31 = vadd.f32 %v1021_v28, %v1020_v34  ;;  %v831_v28 = vsel %vm749_vm2, %v2327_v56, 0.0  ;;  %v926_v6 = vmul.f32 %v2336_v3, %v2336_v3 }
 0x189   :  { %v1029_v25 = vsel %vm749_vm2, %v925_v43, 0.0 }
 0x18a   :  { %v828_v32 = vadd.f32 %v827_v52, %v826_v48  ;;  %v1024_v38 = vadd.f32 %v1023_v8, %v1022_v31  ;;  %v833_v8 = vsel %vm749_vm2, %v2336_v3, 0.0  ;;  %v927_v52 = vmul.f32 %v2345_v15, %v2345_v15 }
 0x18b   :  { %v1031_v5 = vsel %vm749_vm2, %v926_v6, 0.0 }
 0x18c   :  { %v1026_v11 = vadd.f32 %v1025_v24, %v1024_v38  ;;  %v830_v34 = vadd.f32 %v829_v12, %v828_v32  ;;  %v835_v24 = vsel %vm749_vm2, %v2345_v15, 0.0  ;;  %v928_v12 = vmul.f32 %v2354_v26, %v2354_v26 }
 0x18d   :  { %v1033_v43 = vsel %vm749_vm2, %v927_v52, 0.0 }
 0x18e   :  { %v832_v48 = vadd.f32 %v831_v28, %v830_v34  ;;  %v1028_v31 = vadd.f32 %v1027_v63, %v1026_v11  ;;  %v837_v63 = vsel %vm749_vm2, %v2354_v26, 0.0  ;;  %v929_v28 = vmul.f32 %v2363_v42, %v2363_v42 }
 0x18f   :  { %v1035_v6 = vsel %vm749_vm2, %v928_v12, 0.0 }
 0x190   :  { %v834_v38 = vadd.f32 %v833_v8, %v832_v48  ;;  %v1030_v32 = vadd.f32 %v1029_v25, %v1028_v31  ;;  %v839_v25 = vsel %vm749_vm2, %v2363_v42, 0.0  ;;  %v930_v8 = vmul.f32 %v2372_v57, %v2372_v57 }
 0x191   :  { %v1037_v52 = vsel %vm749_vm2, %v929_v28, 0.0 }
 0x192   :  { %v836_v34 = vadd.f32 %v835_v24, %v834_v38  ;;  %v1032_v11 = vadd.f32 %v1031_v5, %v1030_v32  ;;  %v841_v5 = vsel %vm749_vm2, %v2372_v57, 0.0  ;;  %v931_v24 = vmul.f32 %v2381_v7, %v2381_v7 }
 0x193   :  { %v1039_v12 = vsel %vm749_vm2, %v930_v8, 0.0 }
 0x194   :  { %v838_v48 = vadd.f32 %v837_v63, %v836_v34  ;;  %v1034_v31 = vadd.f32 %v1033_v43, %v1032_v11  ;;  %v843_v43 = vsel %vm749_vm2, %v2381_v7, 0.0  ;;  %v932_v63 = vmul.f32 %v2390_v23, %v2390_v23 }
 0x195   :  { %v1041_v28 = vsel %vm749_vm2, %v931_v24, 0.0 }
 0x196   :  { %v840_v38 = vadd.f32 %v839_v25, %v838_v48  ;;  %v1036_v32 = vadd.f32 %v1035_v6, %v1034_v31  ;;  %v845_v6 = vsel %vm749_vm2, %v2390_v23, 0.0  ;;  %v933_v25 = vmul.f32 %v2399_v41, %v2399_v41 }
 0x197   :  { %v1043_v8 = vsel %vm749_vm2, %v932_v63, 0.0 }
 0x198   :  { %v842_v34 = vadd.f32 %v841_v5, %v840_v38  ;;  %v1038_v11 = vadd.f32 %v1037_v52, %v1036_v32  ;;  %v847_v52 = vsel %vm749_vm2, %v2399_v41, 0.0  ;;  %v934_v5 = vmul.f32 %v2408_v60, %v2408_v60 }
 0x199   :  { %v1045_v24 = vsel %vm749_vm2, %v933_v25, 0.0 }
 0x19a   :  { %v844_v48 = vadd.f32 %v843_v43, %v842_v34  ;;  %v1040_v31 = vadd.f32 %v1039_v12, %v1038_v11  ;;  %v849_v12 = vsel %vm749_vm2, %v2408_v60, 0.0  ;;  %v935_v43 = vmul.f32 %v2417_v14, %v2417_v14 }
 0x19b   :  { %v1047_v63 = vsel %vm749_vm2, %v934_v5, 0.0 }
 0x19c   :  { %v846_v38 = vadd.f32 %v845_v6, %v844_v48  ;;  %v1042_v32 = vadd.f32 %v1041_v28, %v1040_v31  ;;  %v851_v28 = vsel %vm749_vm2, %v2417_v14, 0.0  ;;  %v936_v6 = vmul.f32 %v2426_v37, %v2426_v37 }
 0x19d   :  { %v1049_v25 = vsel %vm749_vm2, %v935_v43, 0.0 }
 0x19e   :  { %v1044_v34 = vadd.f32 %v1043_v8, %v1042_v32  ;;  %v848_v11 = vadd.f32 %v847_v52, %v846_v38  ;;  %v853_v8 = vsel %vm749_vm2, %v2426_v37, 0.0  ;;  %v937_v52 = vmul.f32 %v2435_v61, %v2435_v61 }
 0x19f   :  { %v1051_v5 = vsel %vm749_vm2, %v936_v6, 0.0 }
 0x1a0   :  { %v1046_v48 = vadd.f32 %v1045_v24, %v1044_v34  ;;  %v850_v31 = vadd.f32 %v849_v12, %v848_v11  ;;  %v855_v24 = vsel %vm749_vm2, %v2435_v61, 0.0  ;;  %v938_v12 = vmul.f32 %v2444_v20, %v2444_v20 }
 0x1a1   :  { %v1053_v43 = vsel %vm749_vm2, %v937_v52, 0.0 }
 0x1a2   :  { %v1048_v32 = vadd.f32 %v1047_v63, %v1046_v48  ;;  %v852_v38 = vadd.f32 %v851_v28, %v850_v31  ;;  %v857_v63 = vsel %vm749_vm2, %v2444_v20, 0.0  ;;  %v939_v28 = vmul.f32 %v2453_v53, %v2453_v53 }
 0x1a3   :  { %v1055_v6 = vsel %vm749_vm2, %v938_v12, 0.0 }
 0x1a4   :  { %v1050_v34 = vadd.f32 %v1049_v25, %v1048_v32  ;;  %v854_v11 = vadd.f32 %v853_v8, %v852_v38  ;;  %v859_v25 = vsel %vm749_vm2, %v2453_v53, 0.0  ;;  %v940_v8 = vmul.f32 %v2462_v19, %v2462_v19 }
 0x1a5   :  { %v1057_v52 = vsel %vm749_vm2, %v939_v28, 0.0 }
 0x1a6   :  { %v1052_v48 = vadd.f32 %v1051_v5, %v1050_v34  ;;  %v856_v31 = vadd.f32 %v855_v24, %v854_v11  ;;  %v861_v5 = vsel %vm749_vm2, %v2462_v19, 0.0  ;;  %v941_v24 = vmul.f32 %v2471_v2, %v2471_v2 }
 0x1a7   :  { %v1059_v12 = vsel %vm749_vm2, %v940_v8, 0.0 }
 0x1a8   :  { %v1054_v32 = vadd.f32 %v1053_v43, %v1052_v48  ;;  %v858_v38 = vadd.f32 %v857_v63, %v856_v31  ;;  %v863_v43 = vsel %vm749_vm2, %v2471_v2, 0.0  ;;  %v942_v63 = vmul.f32 %v2480_v47, %v2480_v47 }
 0x1a9   :  { %v1061_v28 = vsel %vm749_vm2, %v941_v24, 0.0 }
 0x1aa   :  { %v1056_v34 = vadd.f32 %v1055_v6, %v1054_v32  ;;  %v860_v11 = vadd.f32 %v859_v25, %v858_v38  ;;  %v865_v6 = vsel %vm749_vm2, %v2480_v47, 0.0  ;;  %v943_v25 = vmul.f32 %v2489_v17, %v2489_v17 }
 0x1ab   :  { %v1063_v8 = vsel %vm749_vm2, %v942_v63, 0.0 }
 0x1ac   :  { %v1058_v48 = vadd.f32 %v1057_v52, %v1056_v34  ;;  %v862_v31 = vadd.f32 %v861_v5, %v860_v11  ;;  %v867_v52 = vsel %vm749_vm2, %v2489_v17, 0.0  ;;  %v944_v5 = vmul.f32 %v2498_v58, %v2498_v58 }
 0x1ad   :  { %v1065_v24 = vsel %vm749_vm2, %v943_v25, 0.0 }
 0x1ae   :  { %v1060_v32 = vadd.f32 %v1059_v12, %v1058_v48  ;;  %v864_v38 = vadd.f32 %v863_v43, %v862_v31  ;;  %v869_v12 = vsel %vm749_vm2, %v2498_v58, 0.0  ;;  %v945_v43 = vmul.f32 %v2507_v29, %v2507_v29 }
 0x1af   :  { %v1067_v63 = vsel %vm749_vm2, %v944_v5, 0.0 }
 0x1b0   :  { %v1062_v34 = vadd.f32 %v1061_v28, %v1060_v32  ;;  %v866_v11 = vadd.f32 %v865_v6, %v864_v38  ;;  %v871_v28 = vsel %vm749_vm2, %v2507_v29, 0.0  ;;  %v946_v6 = vmul.f32 %v2516_v45, %v2516_v45 }
 0x1b2   :  { %v1064_v48 = vadd.f32 %v1063_v8, %v1062_v34  ;;  %v868_v31 = vadd.f32 %v867_v52, %v866_v11  ;;  %v947_v34 = vmul.f32 %v2527_v54, %v2527_v54  ;;  %v1069_v8 = vsel %vm749_vm2, %v945_v43, 0.0 }
 0x1b3   :  { %v873_v52 = vsel %vm749_vm2, %v2516_v45, 0.0 }
 0x1b4   :  { %v1066_v32 = vadd.f32 %v1065_v24, %v1064_v48  ;;  %v870_v38 = vadd.f32 %v869_v12, %v868_v31  ;;  %v875_v48 = vsel %vm749_vm2, %v2527_v54, 0.0  ;;  %v1071_v24 = vsel %vm749_vm2, %v946_v6, 0.0 }
 0x1b5   :  { %v1073_v12 = vsel %vm749_vm2, %v947_v34, 0.0 }
 0x1b6   :  { %v1068_v25 = vadd.f32 %v1067_v63, %v1066_v32  ;;  %v872_v11 = vadd.f32 %v871_v28, %v870_v38 }
 0x1b8   :  { %v1070_v5 = vadd.f32 %v1069_v8, %v1068_v25  ;;  %v874_v31 = vadd.f32 %v873_v52, %v872_v11 }
 0x1ba   :  { %v1072_v29 = vadd.f32 %v1071_v24, %v1070_v5  ;;  %v876_v58 = vadd.f32 %v875_v48, %v874_v31  ;;  %v1089_v48 = vlaneseq }
 0x1bc   :  { %v877_v17 = vrot.slane %v876_v58, 4  ;;  %v1074_v47 = vadd.f32 %v1073_v12, %v1072_v29  ;;  %v1090_v5 = vshrl.u32 %v1089_v48, 7 }
 0x1be   :  { %v878_v32 = vadd.f32 %v877_v17, %v876_v58  ;;  %v1075_v38 = vrot.slane %v1074_v47, 4  ;;  %v1084_v17 = vld [vmem:[%s4258_s2] sm:$0x1] }
 0x1c0   :  { %v879_v63 = vrot.slane %v878_v32, 2  ;;  %v1076_v43 = vadd.f32 %v1075_v38, %v1074_v47  ;;  %v2691_v47 = vsub.s32 0, %v1090_v5  ;;  %v4346_v38 = vld [vmem:[#allocation3_spill] sm:$0xff]  ;;  %v4354_v5 = vld [vmem:[#allocation13_spill] sm:$0xff] }
 0x1c2   :  { %v880_v28 = vadd.f32 %v879_v63, %v878_v32  ;;  %v1077_v2 = vrot.slane %v1076_v43, 2  ;;  %v4347_v63 = vld [vmem:[#allocation4_spill] sm:$0xff] }
 0x1c4   :  { %v881_v45 = vrot.slane %v880_v28, 1  ;;  %v1078_v19 = vadd.f32 %v1077_v2, %v1076_v43  ;;  %v4348_v43 = vld [vmem:[#allocation5_spill] sm:$0xff] }
 0x1c6   :  { %v882_v53 = vadd.f32 %v881_v45, %v880_v28  ;;  %v1079_v54 = vrot.slane %v1078_v19, 1  ;;  %v4349_v28 = vld [vmem:[#allocation6_spill] sm:$0xff] }
 0x1c7   :  { %v4361_v45 = vld [vmem:[#allocation2_spill] sm:$0xff] }
 0x1c8   :  { %v883_v25 = vmul.f32 0.001953125, %v882_v53  ;;  %v1080_v11 = vadd.f32 %v1079_v54, %v1078_v19  ;;  %v2696_v53 = vld [vmem:[%s4259_s4] sm:$0x1] }
 0x1ca   :  { %v1081_v8 = vmul.f32 0.001953125, %v1080_v11  ;;  %v1082_v6 = vmul.f32 %v883_v25, %v883_v25  ;;  %v4351_v11 = vld [vmem:[#allocation8_spill] sm:$0xff] }
 0x1cc   :  { %v1083_v52 = vsub.f32 %v1081_v8, %v1082_v6  ;;  %v4352_v6 = vld [vmem:[#allocation9_spill] sm:$0xff] }
 0x1ce   :  { %v1085_v34 = vadd.f32 1e-05, %v1083_v52 }
 0x1d0   :  { %1683 = vrsqrt.f32 %v1085_v34  ;;  %v4353_v34 = vld [vmem:[#allocation11_spill] sm:$0xff] }
 0x1da   :  { %v1684_v58 = vpop.eup %1683 }
 0x1db   :  { %v1087_v29 = vmul.f32 %v1684_v58, %v1084_v17  ;;  %v4355_v58 = vld [vmem:[#allocation15_spill] sm:$0xff] }
 0x1dd   :  { %v2699_v19 = vrot.slane %v1087_v29, %v2691_v47  ;;  %v2701_v2 = vmul.f32 %v1087_v29, %v883_v25  ;;  %v4350_v25 = vld [vmem:[#allocation7_spill] sm:$0xff] }
 0x1df   :  { %v2706_v54 = vmul.f32 %v2699_v19, %v2240_v30  ;;  %v2710_v31 = vmul.f32 %v2699_v19, %v2246_v35  ;;  %v2714_v24 = vmul.f32 %v2699_v19, %v2258_v46  ;;  %v2718_v12 = vmul.f32 %v2699_v19, %v2267_v55 }
 0x1e0   :  { %v2722_v32 = vmul.f32 %v2699_v19, %v2276_v0  ;;  %v2726_v30 = vmul.f32 %v2699_v19, %v2285_v9  ;;  %v2730_v35 = vmul.f32 %v2699_v19, %v2294_v18  ;;  %v2734_v46 = vmul.f32 %v2699_v19, %v2303_v27 }
 0x1e1   :  { %v2738_v55 = vmul.f32 %v2699_v19, %v2312_v39  ;;  %v2742_v0 = vmul.f32 %v2699_v19, %v2321_v51  ;;  %v2746_v9 = vmul.f32 %v2699_v19, %v2330_v62  ;;  %v2750_v18 = vmul.f32 %v2699_v19, %v2339_v10 }
 0x1e2   :  { %v2754_v27 = vmul.f32 %v2699_v19, %v2348_v21  ;;  %v2758_v39 = vmul.f32 %v2699_v19, %v2357_v36  ;;  %v2762_v51 = vmul.f32 %v2699_v19, %v2366_v49  ;;  %v2766_v62 = vmul.f32 %v2699_v19, %v2375_v1 }
 0x1e3   :  { %v2770_v10 = vmul.f32 %v2699_v19, %v2384_v16  ;;  %v2774_v21 = vmul.f32 %v2699_v19, %v4346_v38  ;;  %v2778_v36 = vmul.f32 %v2699_v19, %v4347_v63  ;;  %v2782_v49 = vmul.f32 %v2699_v19, %v4348_v43  ;;  %v4356_v38 = vld [vmem:[#allocation17_spill] sm:$0xff]  ;;  %v4357_v43 = vld [vmem:[#allocation19_spill] sm:$0xff] }
 0x1e4   :  { %v2786_v1 = vmul.f32 %v2699_v19, %v4349_v28  ;;  %v2790_v16 = vmul.f32 %v2699_v19, %v4350_v25  ;;  %v2794_v8 = vmul.f32 %v2699_v19, %v4351_v11  ;;  %v2798_v52 = vmul.f32 %v2699_v19, %v4352_v6  ;;  %v4358_v25 = vld [vmem:[#allocation21_spill] sm:$0xff]  ;;  %v4359_v6 = vld [vmem:[#allocation23_spill] sm:$0xff] }
 0x1e5   :  { %v2802_v48 = vmul.f32 %v2699_v19, %v4353_v34  ;;  %v2806_v17 = vmul.f32 %v2699_v19, %v4354_v5  ;;  %v2810_v29 = vmul.f32 %v2699_v19, %v4355_v58  ;;  %v2814_v63 = vmul.f32 %v2699_v19, %v4356_v38  ;;  %v4360_v5 = vld [vmem:[#allocation25_spill] sm:$0xff] }
 0x1e6   :  { %v2818_v28 = vmul.f32 %v2699_v19, %v4357_v43  ;;  %v2822_v11 = vmul.f32 %v2699_v19, %v4358_v25  ;;  %v2826_v34 = vmul.f32 %v2699_v19, %v4359_v6  ;;  %v2830_v58 = vmul.f32 %v2699_v19, %v4360_v5 }
 0x1e7   :  { %v2834_v38 = vmul.f32 %v2699_v19, %v4361_v45  ;;  %v2838_v43 = vmul.f32 %v2699_v19, %v2254_v40  ;;  %v2842_v25 = vmul.f32 %v2699_v19, %v2264_v50  ;;  %v2846_v6 = vmul.f32 %v2699_v19, %v2273_v59 }
 0x1e8   :  { %v2850_v5 = vmul.f32 %v2699_v19, %v2282_v4  ;;  %v2854_v45 = vmul.f32 %v2699_v19, %v2291_v13  ;;  %v2858_v40 = vmul.f32 %v2699_v19, %v2300_v22  ;;  %v2862_v50 = vmul.f32 %v2699_v19, %v2309_v33 }
 0x1e9   :  { %v2866_v59 = vmul.f32 %v2699_v19, %v2318_v44  ;;  %v2870_v4 = vmul.f32 %v2699_v19, %v2327_v56  ;;  %v2874_v13 = vmul.f32 %v2699_v19, %v2336_v3  ;;  %v2878_v22 = vmul.f32 %v2699_v19, %v2345_v15 }
 0x1ea   :  { %v2882_v33 = vmul.f32 %v2699_v19, %v2354_v26  ;;  %v2886_v44 = vmul.f32 %v2699_v19, %v2363_v42  ;;  %v2890_v56 = vmul.f32 %v2699_v19, %v2372_v57  ;;  %v2894_v3 = vmul.f32 %v2699_v19, %v2381_v7 }
 0x1eb   :  { %v2898_v15 = vmul.f32 %v2699_v19, %v2390_v23  ;;  %v2902_v26 = vmul.f32 %v2699_v19, %v2399_v41  ;;  %v2906_v42 = vmul.f32 %v2699_v19, %v2408_v60  ;;  %v2910_v57 = vmul.f32 %v2699_v19, %v2417_v14  ;;  %v1158_v14 = vld [vmem:[%s4260_s3] sm:$0x1] }
 0x1ec   :  { %v2914_v7 = vmul.f32 %v2699_v19, %v2426_v37  ;;  %v2918_v23 = vmul.f32 %v2699_v19, %v2435_v61  ;;  %v2922_v41 = vmul.f32 %v2699_v19, %v2444_v20 }
 0x1ed   :  { %4362 = vst [vmem:[#allocation3_spill] sm:$0xff] %v2898_v15  ;;  %4363 = vst [vmem:[#allocation4_spill] sm:$0xff] %v2902_v26  ;;  %v4369_v26 = vld [vmem:[#allocation10_spill] sm:$0xff] }
 0x1ee   :  { %4364 = vst [vmem:[#allocation5_spill] sm:$0xff] %v2906_v42  ;;  %4365 = vst [vmem:[#allocation6_spill] sm:$0xff] %v2910_v57  ;;  %v2926_v60 = vmul.f32 %v2699_v19, %v4369_v26  ;;  %v4371_v57 = vld [vmem:[#allocation12_spill] sm:$0xff]  ;;  %v4379_v15 = vld [vmem:[#allocation22_spill] sm:$0xff] }
 0x1ef   :  { %4366 = vst [vmem:[#allocation7_spill] sm:$0xff] %v2914_v7  ;;  %4367 = vst [vmem:[#allocation8_spill] sm:$0xff] %v2918_v23  ;;  %v2933_v37 = vmul.f32 %v2699_v19, %v4371_v57  ;;  %v4373_v7 = vld [vmem:[#allocation14_spill] sm:$0xff]  ;;  %v4375_v23 = vld [vmem:[#allocation16_spill] sm:$0xff]  ;;  %v2953_v57 = vmul.f32 %v2699_v19, %v4379_v15  ;;  %v4384_v15 = vsub.f32 1.0, %v2696_v53 }
 0x1f0   :  { %4368 = vst [vmem:[#allocation9_spill] sm:$0xff] %v2922_v41  ;;  %4370 = vst [vmem:[#allocation11_spill] sm:$0xff] %v2926_v60  ;;  %v2937_v61 = vmul.f32 %v2699_v19, %v4373_v7  ;;  %v2941_v20 = vmul.f32 %v2699_v19, %v4375_v23  ;;  %v4377_v41 = vld [vmem:[#allocation18_spill] sm:$0xff]  ;;  %v4378_v60 = vld [vmem:[#allocation20_spill] sm:$0xff] }
 0x1f1   :  { %4372 = vst [vmem:[#allocation13_spill] sm:$0xff] %v2933_v37  ;;  %v2945_v26 = vmul.f32 %v2699_v19, %v4377_v41  ;;  %v2949_v42 = vmul.f32 %v2699_v19, %v4378_v60  ;;  %4380 = vst [vmem:[#allocation19_spill] sm:$0xff] %v2953_v57  ;;  %v4381_v37 = vld [vmem:[#allocation24_spill] sm:$0xff]  ;;  %v2969_v60 = vrot.slane %v2696_v53, %v2691_v47 }
 0x1f2   :  { %4374 = vst [vmem:[#allocation15_spill] sm:$0xff] %v2937_v61  ;;  %4376 = vst [vmem:[#allocation17_spill] sm:$0xff] %v2941_v20  ;;  %v2957_v7 = vmul.f32 %v2699_v19, %v4381_v37  ;;  %v4382_v61 = vld [vmem:[#allocation26_spill] sm:$0xff]  ;;  %v1160_v20 = vsub.f32 %v1158_v14, %v2701_v2  ;;  %v2974_v57 = vrot.slane %v4384_v15, %v2691_v47 }
 0x1f3   :  { %v2961_v23 = vmul.f32 %v2699_v19, %v4382_v61  ;;  %4383 = vst [vmem:[#allocation21_spill] sm:$0xff] %v2969_v60 }
 0x1f4   :  { %v2965_v41 = vrot.slane %v1160_v20, %v2691_v47  ;;  %4385 = vst [vmem:[#allocation23_spill] sm:$0xff] %v2974_v57  ;;  %v4400_v61 = vld [vmem:[#allocation4_spill] sm:$0xff] }
 0x1f5   :  { %v4402_v20 = vld [vmem:[#allocation5_spill] sm:$0xff]  ;;  %v4404_v15 = vld [vmem:[#allocation6_spill] sm:$0xff] }
 0x1f6   :  { %v2978_v37 = vadd.f32 %v2965_v41, %v2706_v54  ;;  %v2982_v19 = vadd.f32 %v2965_v41, %v2710_v31  ;;  %v2986_v2 = vadd.f32 %v2965_v41, %v2714_v24  ;;  %v2990_v14 = vadd.f32 %v2965_v41, %v2718_v12  ;;  %v4406_v57 = vld [vmem:[#allocation7_spill] sm:$0xff]  ;;  %v4408_v60 = vld [vmem:[#allocation8_spill] sm:$0xff] }
 0x1f7   :  { %v2994_v47 = vadd.f32 %v2965_v41, %v2722_v32  ;;  %v2998_v53 = vadd.f32 %v2965_v41, %v2726_v30  ;;  %v3002_v54 = vadd.f32 %v2965_v41, %v2730_v35  ;;  %v3006_v31 = vadd.f32 %v2965_v41, %v2734_v46 }
 0x1f8   :  { %v3010_v24 = vadd.f32 %v2965_v41, %v2738_v55  ;;  %v3014_v12 = vadd.f32 %v2965_v41, %v2742_v0  ;;  %v3018_v32 = vadd.f32 %v2965_v41, %v2746_v9  ;;  %v3022_v30 = vadd.f32 %v2965_v41, %v2750_v18 }
 0x1f9   :  { %v3026_v35 = vadd.f32 %v2965_v41, %v2754_v27  ;;  %v3030_v46 = vadd.f32 %v2965_v41, %v2758_v39  ;;  %v3034_v55 = vadd.f32 %v2965_v41, %v2762_v51  ;;  %v3038_v0 = vadd.f32 %v2965_v41, %v2766_v62 }
 0x1fa   :  { %v3042_v9 = vadd.f32 %v2965_v41, %v2770_v10  ;;  %v3046_v18 = vadd.f32 %v2965_v41, %v2774_v21  ;;  %v3050_v27 = vadd.f32 %v2965_v41, %v2778_v36  ;;  %v3054_v39 = vadd.f32 %v2965_v41, %v2782_v49 }
 0x1fb   :  { %v3058_v51 = vadd.f32 %v2965_v41, %v2786_v1  ;;  %v3062_v62 = vadd.f32 %v2965_v41, %v2790_v16  ;;  %v3066_v10 = vadd.f32 %v2965_v41, %v2794_v8  ;;  %v3070_v21 = vadd.f32 %v2965_v41, %v2798_v52 }
 0x1fc   :  { %v3074_v36 = vadd.f32 %v2965_v41, %v2802_v48  ;;  %v3078_v49 = vadd.f32 %v2965_v41, %v2806_v17  ;;  %v3082_v1 = vadd.f32 %v2965_v41, %v2810_v29  ;;  %v3086_v16 = vadd.f32 %v2965_v41, %v2814_v63 }
 0x1fd   :  { %v3090_v8 = vadd.f32 %v2965_v41, %v2818_v28  ;;  %v3094_v52 = vadd.f32 %v2965_v41, %v2822_v11  ;;  %v3098_v48 = vadd.f32 %v2965_v41, %v2826_v34  ;;  %v3102_v17 = vadd.f32 %v2965_v41, %v2830_v58 }
 0x1fe   :  { %v3106_v29 = vadd.f32 %v2965_v41, %v2834_v38  ;;  %v3110_v63 = vadd.f32 %v2965_v41, %v2838_v43  ;;  %v3114_v28 = vadd.f32 %v2965_v41, %v2842_v25  ;;  %v3118_v11 = vadd.f32 %v2965_v41, %v2846_v6 }
 0x1ff   :  { %v3122_v34 = vadd.f32 %v2965_v41, %v2850_v5  ;;  %v3126_v58 = vadd.f32 %v2965_v41, %v2854_v45  ;;  %v3130_v38 = vadd.f32 %v2965_v41, %v2858_v40  ;;  %v3134_v43 = vadd.f32 %v2965_v41, %v2862_v50 }
 0x200   :  { %4386 = vst [vmem:[#allocation25_spill] sm:$0xff] %v3118_v11  ;;  %v3138_v25 = vadd.f32 %v2965_v41, %v2866_v59  ;;  %v3142_v6 = vadd.f32 %v2965_v41, %v2870_v4  ;;  %v3146_v5 = vadd.f32 %v2965_v41, %v2874_v13  ;;  %v3150_v45 = vadd.f32 %v2965_v41, %v2878_v22  ;;  %v4398_v13 = vld [vmem:[#allocation3_spill] sm:$0xff] }
 0x201   :  { %4387 = vst [vmem:[#allocation2_spill] sm:$0xff] %v3122_v34  ;;  %4388 = vst [vmem:[#allocation10_spill] sm:$0xff] %v3126_v58  ;;  %v3154_v40 = vadd.f32 %v2965_v41, %v2882_v33  ;;  %v3158_v50 = vadd.f32 %v2965_v41, %v2886_v44  ;;  %v3162_v59 = vadd.f32 %v2965_v41, %v2890_v56 }
 0x202   :  { %4389 = vst [vmem:[#allocation12_spill] sm:$0xff] %v3130_v38  ;;  %4390 = vst [vmem:[#allocation14_spill] sm:$0xff] %v3134_v43  ;;  %v3166_v4 = vadd.f32 %v2965_v41, %v2894_v3  ;;  %v3170_v22 = vadd.f32 %v2965_v41, %v4398_v13  ;;  %v3174_v33 = vadd.f32 %v2965_v41, %v4400_v61 }
 0x203   :  { %4391 = vst [vmem:[#allocation16_spill] sm:$0xff] %v3138_v25  ;;  %4392 = vst [vmem:[#allocation18_spill] sm:$0xff] %v3142_v6  ;;  %v3178_v44 = vadd.f32 %v2965_v41, %v4402_v20  ;;  %v3182_v56 = vadd.f32 %v2965_v41, %v4404_v15  ;;  %v3186_v3 = vadd.f32 %v2965_v41, %v4406_v57 }
 0x204   :  { %4393 = vst [vmem:[#allocation20_spill] sm:$0xff] %v3150_v45  ;;  %4394 = vst [vmem:[#allocation22_spill] sm:$0xff] %v3154_v40  ;;  %v3190_v13 = vadd.f32 %v2965_v41, %v4408_v60 }
 0x205   :  { %4395 = vst [vmem:[#allocation24_spill] sm:$0xff] %v3158_v50  ;;  %4396 = vst [vmem:[#allocation26_spill] sm:$0xff] %v3162_v59 }
 0x206   :  { %4397 = vst [vmem:[#allocation27_spill] sm:$0xff] %v3166_v4  ;;  %4399 = vst [vmem:[#allocation3_spill] sm:$0xff] %v3170_v22  ;;  %v4409_v22 = vld [vmem:[#allocation9_spill] sm:$0xff] }
 0x207   :  { %4401 = vst [vmem:[#allocation4_spill] sm:$0xff] %v3174_v33  ;;  %4403 = vst [vmem:[#allocation5_spill] sm:$0xff] %v3178_v44  ;;  %v3194_v61 = vadd.f32 %v2965_v41, %v4409_v22  ;;  %v4411_v33 = vld [vmem:[#allocation11_spill] sm:$0xff]  ;;  %v4413_v44 = vld [vmem:[#allocation13_spill] sm:$0xff]  ;;  %v3214_v22 = vadd.f32 %v2965_v41, %v2945_v26  ;;  %v4440_v26 = vmax.f32 %v2990_v14, 0.0 }
 0x208   :  { %4405 = vst [vmem:[#allocation6_spill] sm:$0xff] %v3182_v56  ;;  %4407 = vst [vmem:[#allocation7_spill] sm:$0xff] %v3186_v3  ;;  %v3198_v20 = vadd.f32 %v2965_v41, %v4411_v33  ;;  %v3202_v15 = vadd.f32 %v2965_v41, %v4413_v44  ;;  %v4414_v56 = vld [vmem:[#allocation15_spill] sm:$0xff]  ;;  %v4415_v3 = vld [vmem:[#allocation17_spill] sm:$0xff]  ;;  %v3218_v33 = vadd.f32 %v2965_v41, %v2949_v42  ;;  %v4442_v42 = vmax.f32 %v2994_v47, 0.0 }
 0x209   :  { %4410 = vst [vmem:[#allocation8_spill] sm:$0xff] %v3194_v61  ;;  %v3206_v57 = vadd.f32 %v2965_v41, %v4414_v56  ;;  %v3210_v60 = vadd.f32 %v2965_v41, %v4415_v3  ;;  %4417 = vst [vmem:[#allocation13_spill] sm:$0xff] %v3214_v22  ;;  %v3226_v56 = vadd.f32 %v2965_v41, %v2957_v7  ;;  %v4434_v61 = vld [vmem:[#allocation21_spill] sm:$0xff] }
 0x20a   :  { %4412 = vst [vmem:[#allocation9_spill] sm:$0xff] %v3198_v20  ;;  %4418 = vst [vmem:[#allocation15_spill] sm:$0xff] %v3218_v33  ;;  %v4419_v20 = vld [vmem:[#allocation19_spill] sm:$0xff]  ;;  %v3230_v3 = vadd.f32 %v2965_v41, %v2961_v23  ;;  %v4430_v38 = vmov %v3218_v33  ;;  %v4433_v33 = vmax.f32 %v2978_v37, 0.0  ;;  %v4438_v23 = vmax.f32 %v2986_v2, 0.0 }
 0x20b   :  { %4416 = vst [vmem:[#allocation11_spill] sm:$0xff] %v3210_v60  ;;  %v3222_v44 = vadd.f32 %v2965_v41, %v4419_v20  ;;  %4421 = vst [vmem:[#allocation19_spill] sm:$0xff] %v3226_v56  ;;  %v4429_v60 = vmov %v3214_v22  ;;  %v4432_v25 = vmov %v3226_v56  ;;  %v3314_v22 = vmul.f32 %v4434_v61, %v4440_v26 }
 0x20c   :  { %v3299_v20 = vmul.f32 %v4434_v61, %v4433_v33  ;;  %v3309_v41 = vmul.f32 %v4434_v61, %v4438_v23  ;;  %v3319_v33 = vmul.f32 %v4434_v61, %v4442_v42  ;;  %v4444_v56 = vmax.f32 %v2998_v53, 0.0 }
 0x20d   :  { %4420 = vst [vmem:[#allocation17_spill] sm:$0xff] %v3222_v44  ;;  %v4431_v43 = vmov %v3222_v44  ;;  %v4436_v44 = vmax.f32 %v2982_v19, 0.0  ;;  %4441 = vst [vmem:[#allocation13_spill] sm:$0xff] %v3314_v22  ;;  %v4450_v22 = vmax.f32 %v3010_v24, 0.0 }
 0x20e   :  { %4443 = vst [vmem:[#allocation17_spill] sm:$0xff] %v3319_v33  ;;  %v4452_v33 = vmax.f32 %v3014_v12, 0.0 }
 0x20f   :  { %v4426_v6 = vld [vmem:[#allocation7_spill] sm:$0xff]  ;;  %v3304_v7 = vmul.f32 %v4434_v61, %v4436_v44  ;;  %v3324_v44 = vmul.f32 %v4434_v61, %v4444_v56  ;;  %v3339_v42 = vmul.f32 %v4434_v61, %v4450_v22 }
 0x210   :  { %4435 = vst [vmem:[#allocation7_spill] sm:$0xff] %v3299_v20  ;;  %v3344_v56 = vmul.f32 %v4434_v61, %v4452_v33 }
 0x211   :  { %v4427_v40 = vld [vmem:[#allocation9_spill] sm:$0xff]  ;;  %4445 = vst [vmem:[#allocation19_spill] sm:$0xff] %v3324_v44  ;;  %4451 = vst [vmem:[#allocation29_spill] sm:$0xff] %v3339_v42  ;;  %v4454_v44 = vmax.f32 %v3018_v32, 0.0  ;;  %v4460_v42 = vmax.f32 %v3030_v46, 0.0 }
 0x212   :  { %v4428_v4 = vld [vmem:[#allocation11_spill] sm:$0xff]  ;;  %4437 = vst [vmem:[#allocation9_spill] sm:$0xff] %v3304_v7  ;;  %v4446_v7 = vmax.f32 %v3002_v54, 0.0  ;;  %4453 = vst [vmem:[#allocation30_spill] sm:$0xff] %v3344_v56  ;;  %v4462_v56 = vmax.f32 %v3034_v55, 0.0 }
 0x213   :  { %4439 = vst [vmem:[#allocation11_spill] sm:$0xff] %v3309_v41  ;;  %v4448_v41 = vmax.f32 %v3006_v31, 0.0  ;;  %v3364_v33 = vmul.f32 %v4434_v61, %v4460_v42 }
 0x214   :  { %v3329_v23 = vmul.f32 %v4434_v61, %v4446_v7  ;;  %v3349_v7 = vmul.f32 %v4434_v61, %v4454_v44  ;;  %v3369_v44 = vmul.f32 %v4434_v61, %v4462_v56 }
 0x215   :  { %v3334_v26 = vmul.f32 %v4434_v61, %v4448_v41  ;;  %4461 = vst [vmem:[#allocation34_spill] sm:$0xff] %v3364_v33  ;;  %v4470_v33 = vmax.f32 %v3050_v27, 0.0 }
 0x216   :  { %4447 = vst [vmem:[#allocation21_spill] sm:$0xff] %v3329_v23  ;;  %4455 = vst [vmem:[#allocation31_spill] sm:$0xff] %v3349_v7  ;;  %v4456_v23 = vmax.f32 %v3022_v30, 0.0  ;;  %v4464_v7 = vmax.f32 %v3038_v0, 0.0 }
 0x217   :  { %4449 = vst [vmem:[#allocation28_spill] sm:$0xff] %v3334_v26  ;;  %v4458_v26 = vmax.f32 %v3026_v35, 0.0  ;;  %4463 = vst [vmem:[#allocation35_spill] sm:$0xff] %v3369_v44  ;;  %v3389_v56 = vmul.f32 %v4434_v61, %v4470_v33  ;;  %v4472_v44 = vmax.f32 %v3054_v39, 0.0 }
 0x218   :  { %v3354_v41 = vmul.f32 %v4434_v61, %v4456_v23  ;;  %v3374_v23 = vmul.f32 %v4434_v61, %v4464_v7 }
 0x219   :  { %v3359_v22 = vmul.f32 %v4434_v61, %v4458_v26  ;;  %4471 = vst [vmem:[#allocation39_spill] sm:$0xff] %v3389_v56  ;;  %v3394_v7 = vmul.f32 %v4434_v61, %v4472_v44  ;;  %v4480_v56 = vmax.f32 %v3070_v21, 0.0 }
 0x21a   :  { %4457 = vst [vmem:[#allocation32_spill] sm:$0xff] %v3354_v41  ;;  %4465 = vst [vmem:[#allocation36_spill] sm:$0xff] %v3374_v23  ;;  %v4466_v41 = vmax.f32 %v3042_v9, 0.0  ;;  %v4474_v23 = vmax.f32 %v3058_v51, 0.0 }
 0x21b   :  { %4459 = vst [vmem:[#allocation33_spill] sm:$0xff] %v3359_v22  ;;  %v4468_v22 = vmax.f32 %v3046_v18, 0.0  ;;  %4473 = vst [vmem:[#allocation40_spill] sm:$0xff] %v3394_v7  ;;  %v3414_v44 = vmul.f32 %v4434_v61, %v4480_v56  ;;  %v4482_v7 = vmax.f32 %v3074_v36, 0.0 }
 0x21c   :  { %v3379_v26 = vmul.f32 %v4434_v61, %v4466_v41  ;;  %v3399_v41 = vmul.f32 %v4434_v61, %v4474_v23 }
 0x21d   :  { %v3384_v42 = vmul.f32 %v4434_v61, %v4468_v22  ;;  %4481 = vst [vmem:[#allocation44_spill] sm:$0xff] %v3414_v44  ;;  %v3419_v23 = vmul.f32 %v4434_v61, %v4482_v7  ;;  %v4490_v44 = vmax.f32 %v3090_v8, 0.0 }
 0x21e   :  { %4467 = vst [vmem:[#allocation37_spill] sm:$0xff] %v3379_v26  ;;  %4475 = vst [vmem:[#allocation41_spill] sm:$0xff] %v3399_v41  ;;  %v4476_v26 = vmax.f32 %v3062_v62, 0.0  ;;  %v4484_v41 = vmax.f32 %v3078_v49, 0.0 }
 0x21f   :  { %4469 = vst [vmem:[#allocation38_spill] sm:$0xff] %v3384_v42  ;;  %v4478_v42 = vmax.f32 %v3066_v10, 0.0  ;;  %4483 = vst [vmem:[#allocation45_spill] sm:$0xff] %v3419_v23  ;;  %v3439_v7 = vmul.f32 %v4434_v61, %v4490_v44  ;;  %v4492_v23 = vmax.f32 %v3094_v52, 0.0 }
 0x220   :  { %v3404_v22 = vmul.f32 %v4434_v61, %v4476_v26  ;;  %v3424_v26 = vmul.f32 %v4434_v61, %v4484_v41 }
 0x221   :  { %v3409_v33 = vmul.f32 %v4434_v61, %v4478_v42  ;;  %4491 = vst [vmem:[#allocation49_spill] sm:$0xff] %v3439_v7  ;;  %v3444_v41 = vmul.f32 %v4434_v61, %v4492_v23  ;;  %v4500_v7 = vmax.f32 %v3110_v63, 0.0 }
 0x222   :  { %4477 = vst [vmem:[#allocation42_spill] sm:$0xff] %v3404_v22  ;;  %4485 = vst [vmem:[#allocation46_spill] sm:$0xff] %v3424_v26  ;;  %v4486_v22 = vmax.f32 %v3082_v1, 0.0  ;;  %v4494_v26 = vmax.f32 %v3098_v48, 0.0 }
 0x223   :  { %4479 = vst [vmem:[#allocation43_spill] sm:$0xff] %v3409_v33  ;;  %v4488_v33 = vmax.f32 %v3086_v16, 0.0  ;;  %4493 = vst [vmem:[#allocation50_spill] sm:$0xff] %v3444_v41  ;;  %v3464_v23 = vmul.f32 %v4434_v61, %v4500_v7  ;;  %v4502_v41 = vmax.f32 %v3114_v28, 0.0 }
 0x224   :  { %v3429_v42 = vmul.f32 %v4434_v61, %v4486_v22  ;;  %v3449_v22 = vmul.f32 %v4434_v61, %v4494_v26 }
 0x225   :  { %v3434_v56 = vmul.f32 %v4434_v61, %v4488_v33  ;;  %4501 = vst [vmem:[#allocation54_spill] sm:$0xff] %v3464_v23  ;;  %v3469_v26 = vmul.f32 %v4434_v61, %v4502_v41  ;;  %v4510_v23 = vld [vmem:[#allocation12_spill] sm:$0xff] }
 0x226   :  { %4487 = vst [vmem:[#allocation47_spill] sm:$0xff] %v3429_v42  ;;  %4495 = vst [vmem:[#allocation51_spill] sm:$0xff] %v3449_v22  ;;  %v4496_v42 = vmax.f32 %v3102_v17, 0.0  ;;  %v4504_v22 = vmax.f32 %v3118_v11, 0.0  ;;  %v4511_v20 = vmax.f32 %v4510_v23, 0.0 }
 0x227   :  { %4489 = vst [vmem:[#allocation48_spill] sm:$0xff] %v3434_v56  ;;  %v4498_v56 = vmax.f32 %v3106_v29, 0.0  ;;  %4503 = vst [vmem:[#allocation55_spill] sm:$0xff] %v3469_v26  ;;  %v4513_v26 = vld [vmem:[#allocation14_spill] sm:$0xff] }
 0x228   :  { %v3454_v33 = vmul.f32 %v4434_v61, %v4496_v42  ;;  %v3474_v42 = vmul.f32 %v4434_v61, %v4504_v22  ;;  %v3489_v41 = vmul.f32 %v4434_v61, %v4511_v20  ;;  %v4514_v11 = vmax.f32 %v4513_v26, 0.0 }
 0x229   :  { %v3459_v44 = vmul.f32 %v4434_v61, %v4498_v56 }
 0x22a   :  { %4497 = vst [vmem:[#allocation52_spill] sm:$0xff] %v3454_v33  ;;  %4505 = vst [vmem:[#allocation56_spill] sm:$0xff] %v3474_v42  ;;  %v4506_v33 = vmax.f32 %v3122_v34, 0.0  ;;  %v3494_v22 = vmul.f32 %v4434_v61, %v4514_v11  ;;  %v4516_v42 = vld [vmem:[#allocation16_spill] sm:$0xff] }
 0x22b   :  { %4499 = vst [vmem:[#allocation53_spill] sm:$0xff] %v3459_v44  ;;  %v4508_v44 = vmax.f32 %v3126_v58, 0.0  ;;  %4512 = vst [vmem:[#allocation12_spill] sm:$0xff] %v3489_v41  ;;  %v4517_v34 = vmax.f32 %v4516_v42, 0.0  ;;  %v4524_v41 = vmax.f32 %v3150_v45, 0.0 }
 0x22c   :  { %v3479_v56 = vmul.f32 %v4434_v61, %v4506_v33  ;;  %4515 = vst [vmem:[#allocation14_spill] sm:$0xff] %v3494_v22  ;;  %v4526_v22 = vld [vmem:[#allocation22_spill] sm:$0xff] }
 0x22d   :  { %v3484_v7 = vmul.f32 %v4434_v61, %v4508_v44  ;;  %v3499_v33 = vmul.f32 %v4434_v61, %v4517_v34  ;;  %v3514_v11 = vmul.f32 %v4434_v61, %v4524_v41  ;;  %v4527_v42 = vmax.f32 %v4526_v22, 0.0 }
 0x22e   :  { %4507 = vst [vmem:[#allocation57_spill] sm:$0xff] %v3479_v56  ;;  %v4519_v56 = vld [vmem:[#allocation18_spill] sm:$0xff] }
 0x22f   :  { %4509 = vst [vmem:[#allocation58_spill] sm:$0xff] %v3484_v7  ;;  %4518 = vst [vmem:[#allocation59_spill] sm:$0xff] %v3499_v33  ;;  %v4520_v58 = vmax.f32 %v4519_v56, 0.0  ;;  %v4522_v7 = vmax.f32 %v3146_v5, 0.0  ;;  %v3519_v34 = vmul.f32 %v4434_v61, %v4527_v42  ;;  %v4529_v33 = vmax.f32 %v3158_v50, 0.0 }
 0x230   :  { %4525 = vst [vmem:[#allocation61_spill] sm:$0xff] %v3514_v11  ;;  %v4536_v11 = vld [vmem:[#allocation3_spill] sm:$0xff] }
 0x231   :  { %v3504_v44 = vmul.f32 %v4434_v61, %v4520_v58  ;;  %v3509_v20 = vmul.f32 %v4434_v61, %v4522_v7  ;;  %4528 = vst [vmem:[#allocation62_spill] sm:$0xff] %v3519_v34  ;;  %v3524_v58 = vmul.f32 %v4434_v61, %v4529_v33  ;;  %v4537_v22 = vmax.f32 %v4536_v11, 0.0  ;;  %v4539_v34 = vld [vmem:[#allocation4_spill] sm:$0xff] }
 0x232   :  { %v4540_v50 = vmax.f32 %v4539_v34, 0.0 }
 0x233   :  { %4521 = vst [vmem:[#allocation18_spill] sm:$0xff] %v3504_v44  ;;  %4523 = vst [vmem:[#allocation60_spill] sm:$0xff] %v3509_v20  ;;  %v4531_v44 = vmax.f32 %v3162_v59, 0.0  ;;  %v4533_v20 = vld [vmem:[#allocation27_spill] sm:$0xff]  ;;  %v3539_v42 = vmul.f32 %v4434_v61, %v4537_v22 }
 0x234   :  { %4530 = vst [vmem:[#allocation63_spill] sm:$0xff] %v3524_v58  ;;  %v4534_v45 = vmax.f32 %v4533_v20, 0.0  ;;  %v3544_v33 = vmul.f32 %v4434_v61, %v4540_v50  ;;  %v4542_v58 = vld [vmem:[#allocation5_spill] sm:$0xff] }
 0x235   :  { %v3529_v7 = vmul.f32 %v4434_v61, %v4531_v44  ;;  %4538 = vst [vmem:[#allocation3_spill] sm:$0xff] %v3539_v42  ;;  %v4543_v59 = vmax.f32 %v4542_v58, 0.0  ;;  %v4550_v42 = vmax.f32 %v3190_v13, 0.0 }
 0x236   :  { %v3534_v41 = vmul.f32 %v4434_v61, %v4534_v45  ;;  %4541 = vst [vmem:[#allocation4_spill] sm:$0xff] %v3544_v33  ;;  %v4552_v33 = vld [vmem:[#allocation8_spill] sm:$0xff] }
 0x237   :  { %4532 = vst [vmem:[#allocation64_spill] sm:$0xff] %v3529_v7  ;;  %v3549_v44 = vmul.f32 %v4434_v61, %v4543_v59  ;;  %v4545_v7 = vld [vmem:[#allocation6_spill] sm:$0xff]  ;;  %v3564_v50 = vmul.f32 %v4434_v61, %v4550_v42  ;;  %v4553_v58 = vmax.f32 %v4552_v33, 0.0 }
 0x238   :  { %4535 = vst [vmem:[#allocation65_spill] sm:$0xff] %v3534_v41  ;;  %v4546_v20 = vmax.f32 %v4545_v7, 0.0  ;;  %v4548_v41 = vmax.f32 %v4426_v6, 0.0 }
 0x239   :  { %4544 = vst [vmem:[#allocation66_spill] sm:$0xff] %v3549_v44  ;;  %4551 = vst [vmem:[#allocation68_spill] sm:$0xff] %v3564_v50  ;;  %v3569_v59 = vmul.f32 %v4434_v61, %v4553_v58  ;;  %v4555_v44 = vmax.f32 %v4427_v40, 0.0  ;;  %v4561_v50 = vmax.f32 %v4428_v4, 0.0 }
 0x23a   :  { %v3554_v45 = vmul.f32 %v4434_v61, %v4546_v20  ;;  %v3559_v22 = vmul.f32 %v4434_v61, %v4548_v41 }
 0x23b   :  { %4554 = vst [vmem:[#allocation8_spill] sm:$0xff] %v3569_v59  ;;  %v3574_v20 = vmul.f32 %v4434_v61, %v4555_v44  ;;  %v3589_v58 = vmul.f32 %v4434_v61, %v4561_v50  ;;  %v4563_v59 = vmax.f32 %v4429_v60, 0.0 }
 0x23c   :  { %4547 = vst [vmem:[#allocation6_spill] sm:$0xff] %v3554_v45  ;;  %4549 = vst [vmem:[#allocation67_spill] sm:$0xff] %v3559_v22  ;;  %v4557_v45 = vmax.f32 %v3202_v15, 0.0  ;;  %v4559_v22 = vmax.f32 %v3206_v57, 0.0 }
 0x23d   :  { %4556 = vst [vmem:[#allocation69_spill] sm:$0xff] %v3574_v20  ;;  %4562 = vst [vmem:[#allocation72_spill] sm:$0xff] %v3589_v58  ;;  %v3594_v44 = vmul.f32 %v4434_v61, %v4563_v59  ;;  %v4565_v20 = vmax.f32 %v4430_v38, 0.0  ;;  %v4571_v58 = vmax.f32 %v3230_v3, 0.0 }
 0x23e   :  { %v3579_v41 = vmul.f32 %v4434_v61, %v4557_v45  ;;  %v3584_v42 = vmul.f32 %v4434_v61, %v4559_v22 }
 0x23f   :  { %4564 = vst [vmem:[#allocation73_spill] sm:$0xff] %v3594_v44  ;;  %v3599_v45 = vmul.f32 %v4434_v61, %v4565_v20  ;;  %v3614_v59 = vmul.f32 %v4434_v61, %v4571_v58  ;;  %v4573_v44 = vld [vmem:[#allocation23_spill] sm:$0xff]  ;;  %v4574_v58 = vld [vmem:[#allocation25_spill] sm:$0xff] }
 0x240   :  { %4558 = vst [vmem:[#allocation70_spill] sm:$0xff] %v3579_v41  ;;  %4560 = vst [vmem:[#allocation71_spill] sm:$0xff] %v3584_v42  ;;  %v4567_v41 = vmax.f32 %v4431_v43, 0.0  ;;  %v4569_v42 = vmax.f32 %v4432_v25, 0.0  ;;  %v3618_v38 = vmul.f32 %v4573_v44, %v2978_v37  ;;  %v3622_v20 = vmul.f32 %v4573_v44, %v2982_v19 }
 0x241   :  { %4566 = vst [vmem:[#allocation74_spill] sm:$0xff] %v3599_v45  ;;  %4572 = vst [vmem:[#allocation77_spill] sm:$0xff] %v3614_v59  ;;  %v3638_v37 = vmul.f32 %v4573_v44, %v2998_v53  ;;  %v3642_v19 = vmul.f32 %v4573_v44, %v3002_v54  ;;  %v3658_v53 = vmul.f32 %v4573_v44, %v3018_v32  ;;  %v4575_v59 = vld [vmem:[#allocation2_spill] sm:$0xff]  ;;  %v4582_v45 = vld [vmem:[#allocation20_spill] sm:$0xff] }
 0x242   :  { %v3604_v22 = vmul.f32 %v4434_v61, %v4567_v41  ;;  %v3609_v50 = vmul.f32 %v4434_v61, %v4569_v42  ;;  %v3626_v41 = vmul.f32 %v4573_v44, %v2986_v2  ;;  %v3630_v42 = vmul.f32 %v4573_v44, %v2990_v14 }
 0x243   :  { %v3634_v61 = vmul.f32 %v4573_v44, %v2994_v47  ;;  %v3646_v2 = vmul.f32 %v4573_v44, %v3006_v31  ;;  %v3650_v14 = vmul.f32 %v4573_v44, %v3010_v24  ;;  %v3654_v47 = vmul.f32 %v4573_v44, %v3014_v12 }
 0x244   :  { %4568 = vst [vmem:[#allocation75_spill] sm:$0xff] %v3604_v22  ;;  %4570 = vst [vmem:[#allocation76_spill] sm:$0xff] %v3609_v50  ;;  %v3662_v54 = vmul.f32 %v4573_v44, %v3022_v30  ;;  %v3666_v31 = vmul.f32 %v4573_v44, %v3026_v35  ;;  %v3670_v24 = vmul.f32 %v4573_v44, %v3030_v46  ;;  %v4576_v50 = vld [vmem:[#allocation10_spill] sm:$0xff]  ;;  %v4579_v22 = vld [vmem:[#allocation16_spill] sm:$0xff] }
 0x245   :  { %v3674_v12 = vmul.f32 %v4573_v44, %v3034_v55  ;;  %v3678_v32 = vmul.f32 %v4573_v44, %v3038_v0  ;;  %v3682_v30 = vmul.f32 %v4573_v44, %v3042_v9  ;;  %v3686_v35 = vmul.f32 %v4573_v44, %v3046_v18 }
 0x246   :  { %v3690_v46 = vmul.f32 %v4573_v44, %v3050_v27  ;;  %v3694_v55 = vmul.f32 %v4573_v44, %v3054_v39  ;;  %v3698_v0 = vmul.f32 %v4573_v44, %v3058_v51  ;;  %v3702_v9 = vmul.f32 %v4573_v44, %v3062_v62 }
 0x247   :  { %v3706_v18 = vmul.f32 %v4573_v44, %v3066_v10  ;;  %v3710_v27 = vmul.f32 %v4573_v44, %v3070_v21  ;;  %v3714_v39 = vmul.f32 %v4573_v44, %v3074_v36  ;;  %v3718_v51 = vmul.f32 %v4573_v44, %v3078_v49 }
 0x248   :  { %v3722_v62 = vmul.f32 %v4573_v44, %v3082_v1  ;;  %v3726_v10 = vmul.f32 %v4573_v44, %v3086_v16  ;;  %v3730_v21 = vmul.f32 %v4573_v44, %v3090_v8  ;;  %v3734_v36 = vmul.f32 %v4573_v44, %v3094_v52 }
 0x249   :  { %v3738_v49 = vmul.f32 %v4573_v44, %v3098_v48  ;;  %v3742_v1 = vmul.f32 %v4573_v44, %v3102_v17  ;;  %v3746_v16 = vmul.f32 %v4573_v44, %v3106_v29  ;;  %v3750_v8 = vmul.f32 %v4573_v44, %v3110_v63 }
 0x24a   :  { %v3754_v52 = vmul.f32 %v4573_v44, %v3114_v28  ;;  %v3758_v48 = vmul.f32 %v4573_v44, %v4574_v58  ;;  %v3762_v17 = vmul.f32 %v4573_v44, %v4575_v59  ;;  %v3766_v29 = vmul.f32 %v4573_v44, %v4576_v50 }
 0x24b   :  { %v3770_v63 = vmul.f32 %v4573_v44, %v4510_v23  ;;  %v3774_v28 = vmul.f32 %v4573_v44, %v4513_v26  ;;  %v3778_v58 = vmul.f32 %v4573_v44, %v4579_v22  ;;  %v3782_v59 = vmul.f32 %v4573_v44, %v4519_v56 }
 0x24c   :  { %v3786_v50 = vmul.f32 %v4573_v44, %v3146_v5  ;;  %v3790_v23 = vmul.f32 %v4573_v44, %v4582_v45  ;;  %v3810_v45 = vmul.f32 %v4573_v44, %v4536_v11  ;;  %v3830_v11 = vmul.f32 %v4573_v44, %v3190_v13 }
 0x24d   :  { %4577 = vst [vmem:[#allocation23_spill] sm:$0xff] %v3770_v63  ;;  %4578 = vst [vmem:[#allocation25_spill] sm:$0xff] %v3774_v28  ;;  %v4583_v63 = vld [vmem:[#allocation22_spill] sm:$0xff]  ;;  %v4585_v28 = vld [vmem:[#allocation24_spill] sm:$0xff]  ;;  %v3850_v13 = vmul.f32 %v4573_v44, %v4428_v4  ;;  %v3870_v4 = vmul.f32 %v4573_v44, %v3230_v3 }
 0x24e   :  { %4580 = vst [vmem:[#allocation2_spill] sm:$0xff] %v3778_v58  ;;  %4581 = vst [vmem:[#allocation10_spill] sm:$0xff] %v3782_v59  ;;  %v3794_v26 = vmul.f32 %v4573_v44, %v4583_v63  ;;  %v3798_v22 = vmul.f32 %v4573_v44, %v4585_v28  ;;  %v4586_v58 = vld [vmem:[#allocation26_spill] sm:$0xff]  ;;  %v4587_v59 = vld [vmem:[#allocation27_spill] sm:$0xff]  ;;  %v3814_v63 = vmul.f32 %v4573_v44, %v4539_v34 }
 0x24f   :  { %v3802_v56 = vmul.f32 %v4573_v44, %v4586_v58  ;;  %v3806_v5 = vmul.f32 %v4573_v44, %v4587_v59  ;;  %v3822_v58 = vmul.f32 %v4573_v44, %v4545_v7  ;;  %v3826_v59 = vmul.f32 %v4573_v44, %v4426_v6  ;;  %4593 = vst [vmem:[#allocation27_spill] sm:$0xff] %v3850_v13  ;;  %v4600_v13 = vld [vmem:[#allocation7_spill] sm:$0xff]  ;;  %v4606_v3 = vld [vmem:[#allocation21_spill] sm:$0xff] }
 0x250   :  { %4584 = vst [vmem:[#allocation16_spill] sm:$0xff] %v3794_v26  ;;  %v4588_v26 = vld [vmem:[#allocation5_spill] sm:$0xff]  ;;  %v3834_v34 = vmul.f32 %v4573_v44, %v4552_v33  ;;  %v3842_v7 = vmul.f32 %v4573_v44, %v3202_v15  ;;  %v3846_v6 = vmul.f32 %v4573_v44, %v3206_v57  ;;  %v3854_v33 = vmul.f32 %v4573_v44, %v4429_v60 }
 0x251   :  { %v3818_v28 = vmul.f32 %v4573_v44, %v4588_v26  ;;  %v3838_v26 = vmul.f32 %v4573_v44, %v4427_v40  ;;  %v3862_v15 = vmul.f32 %v4573_v44, %v4431_v43  ;;  %v3866_v57 = vmul.f32 %v4573_v44, %v4432_v25  ;;  %4599 = vst [vmem:[#allocation80_spill] sm:$0xff] %v3870_v4  ;;  %v4607_v4 = vld [vmem:[#allocation28_spill] sm:$0xff] }
 0x252   :  { %4589 = vst [vmem:[#allocation20_spill] sm:$0xff] %v3834_v34  ;;  %4591 = vst [vmem:[#allocation24_spill] sm:$0xff] %v3842_v7  ;;  %v4595_v34 = vld [vmem:[#allocation15_spill] sm:$0xff]  ;;  %v1437_v60 = vadd.f32 %v3618_v38, %v4600_v13  ;;  %v4603_v7 = vld [vmem:[#allocation13_spill] sm:$0xff]  ;;  %v1444_v38 = vadd.f32 %v3646_v2, %v4607_v4 }
 0x253   :  { %4590 = vst [vmem:[#allocation22_spill] sm:$0xff] %v3838_v26  ;;  %4592 = vst [vmem:[#allocation26_spill] sm:$0xff] %v3846_v6  ;;  %v3858_v40 = vmul.f32 %v4573_v44, %v4595_v34  ;;  %v4602_v34 = vld [vmem:[#allocation11_spill] sm:$0xff]  ;;  %v1440_v43 = vadd.f32 %v3630_v42, %v4603_v7  ;;  %v1443_v44 = vadd.f32 %v3642_v19, %v4606_v3  ;;  %v4608_v13 = vld [vmem:[#allocation29_spill] sm:$0xff] }
 0x254   :  { %4594 = vst [vmem:[#allocation5_spill] sm:$0xff] %v3854_v33  ;;  %4597 = vst [vmem:[#allocation78_spill] sm:$0xff] %v3862_v15  ;;  %v4601_v33 = vld [vmem:[#allocation9_spill] sm:$0xff]  ;;  %v4611_v7 = vld [vmem:[#allocation32_spill] sm:$0xff] }
 0x255   :  { %4596 = vst [vmem:[#allocation15_spill] sm:$0xff] %v3858_v40  ;;  %4598 = vst [vmem:[#allocation79_spill] sm:$0xff] %v3866_v57  ;;  %v1438_v6 = vadd.f32 %v3622_v20, %v4601_v33  ;;  %v1439_v40 = vadd.f32 %v3626_v41, %v4602_v34  ;;  %v4604_v15 = vld [vmem:[#allocation17_spill] sm:$0xff]  ;;  %v4605_v57 = vld [vmem:[#allocation19_spill] sm:$0xff]  ;;  %v1445_v20 = vadd.f32 %v3650_v14, %v4608_v13 }
 0x256   :  { %v1441_v25 = vadd.f32 %v3634_v61, %v4604_v15  ;;  %v1442_v26 = vadd.f32 %v3638_v37, %v4605_v57  ;;  %v4609_v33 = vld [vmem:[#allocation30_spill] sm:$0xff]  ;;  %v4610_v34 = vld [vmem:[#allocation31_spill] sm:$0xff]  ;;  %v1448_v61 = vadd.f32 %v3662_v54, %v4611_v7  ;;  %1501 = vst.msk [vmem:[%s4261_s5] sm:$0xff] %vm749_vm2, %v1437_v60  ;;  %1504 = vst.msk [vmem:[%s4261_s5 + $0x18] sm:$0xff] %vm749_vm2, %v1440_v43 }
 0x257   :  { %v1446_v41 = vadd.f32 %v3654_v47, %v4609_v33  ;;  %v1447_v42 = vadd.f32 %v3658_v53, %v4610_v34  ;;  %1502 = vst.msk [vmem:[%s4261_s5 + $0x8] sm:$0xff] %vm749_vm2, %v1438_v6  ;;  %1503 = vst.msk [vmem:[%s4261_s5 + $0x10] sm:$0xff] %vm749_vm2, %v1439_v40  ;;  %v4612_v37 = vld [vmem:[#allocation33_spill] sm:$0xff]  ;;  %v4613_v2 = vld [vmem:[#allocation34_spill] sm:$0xff] }
 0x258   :  { %v1449_v19 = vadd.f32 %v3666_v31, %v4612_v37  ;;  %v1450_v14 = vadd.f32 %v3670_v24, %v4613_v2  ;;  %v4614_v47 = vld [vmem:[#allocation35_spill] sm:$0xff]  ;;  %v4615_v54 = vld [vmem:[#allocation36_spill] sm:$0xff]  ;;  %1505 = vst.msk [vmem:[%s4261_s5 + $0x20] sm:$0xff] %vm749_vm2, %v1441_v25  ;;  %1506 = vst.msk [vmem:[%s4261_s5 + $0x28] sm:$0xff] %vm749_vm2, %v1442_v26 }
 0x259   :  { %v1451_v53 = vadd.f32 %v3674_v12, %v4614_v47  ;;  %v1452_v6 = vadd.f32 %v3678_v32, %v4615_v54  ;;  %1507 = vst.msk [vmem:[%s4261_s5 + $0x30] sm:$0xff] %vm749_vm2, %v1443_v44  ;;  %1508 = vst.msk [vmem:[%s4261_s5 + $0x38] sm:$0xff] %vm749_vm2, %v1444_v38  ;;  %v4616_v31 = vld [vmem:[#allocation37_spill] sm:$0xff]  ;;  %v4617_v12 = vld [vmem:[#allocation38_spill] sm:$0xff] }
 0x25a   :  { %v1453_v24 = vadd.f32 %v3682_v30, %v4616_v31  ;;  %v1454_v32 = vadd.f32 %v3686_v35, %v4617_v12  ;;  %v4618_v40 = vld [vmem:[#allocation39_spill] sm:$0xff]  ;;  %v4619_v26 = vld [vmem:[#allocation40_spill] sm:$0xff]  ;;  %1509 = vst.msk [vmem:[%s4261_s5 + $0x40] sm:$0xff] %vm749_vm2, %v1445_v20  ;;  %1510 = vst.msk [vmem:[%s4261_s5 + $0x48] sm:$0xff] %vm749_vm2, %v1446_v41 }
 0x25b   :  { %v1455_v15 = vadd.f32 %v3690_v46, %v4618_v40  ;;  %v1456_v57 = vadd.f32 %v3694_v55, %v4619_v26  ;;  %1511 = vst.msk [vmem:[%s4261_s5 + $0x50] sm:$0xff] %vm749_vm2, %v1447_v42  ;;  %1512 = vst.msk [vmem:[%s4261_s5 + $0x58] sm:$0xff] %vm749_vm2, %v1448_v61  ;;  %v4620_v30 = vld [vmem:[#allocation41_spill] sm:$0xff]  ;;  %v4621_v46 = vld [vmem:[#allocation42_spill] sm:$0xff] }
 0x25c   :  { %v1457_v35 = vadd.f32 %v3698_v0, %v4620_v30  ;;  %v1458_v55 = vadd.f32 %v3702_v9, %v4621_v46  ;;  %v4622_v4 = vld [vmem:[#allocation43_spill] sm:$0xff]  ;;  %v4623_v43 = vld [vmem:[#allocation44_spill] sm:$0xff]  ;;  %1513 = vst.msk [vmem:[%s4261_s5 + $0x60] sm:$0xff] %vm749_vm2, %v1449_v19  ;;  %1514 = vst.msk [vmem:[%s4261_s5 + $0x68] sm:$0xff] %vm749_vm2, %v1450_v14 }
 0x25d   :  { %v1459_v60 = vadd.f32 %v3706_v18, %v4622_v4  ;;  %v1460_v25 = vadd.f32 %v3710_v27, %v4623_v43  ;;  %1515 = vst.msk [vmem:[%s4261_s5 + $0x70] sm:$0xff] %vm749_vm2, %v1451_v53  ;;  %1516 = vst.msk [vmem:[%s4261_s5 + $0x78] sm:$0xff] %vm749_vm2, %v1452_v6  ;;  %v4624_v0 = vld [vmem:[#allocation45_spill] sm:$0xff]  ;;  %v4625_v18 = vld [vmem:[#allocation46_spill] sm:$0xff] }
 0x25e   :  { %v1461_v9 = vadd.f32 %v3714_v39, %v4624_v0  ;;  %v1462_v27 = vadd.f32 %v3718_v51, %v4625_v18  ;;  %v4626_v3 = vld [vmem:[#allocation47_spill] sm:$0xff]  ;;  %v4627_v38 = vld [vmem:[#allocation48_spill] sm:$0xff]  ;;  %1517 = vst.msk [vmem:[%s4261_s5 + $0x80] sm:$0xff] %vm749_vm2, %v1453_v24  ;;  %1518 = vst.msk [vmem:[%s4261_s5 + $0x88] sm:$0xff] %vm749_vm2, %v1454_v32 }
 0x25f   :  { %v1463_v44 = vadd.f32 %v3722_v62, %v4626_v3  ;;  %v1464_v13 = vadd.f32 %v3726_v10, %v4627_v38  ;;  %1519 = vst.msk [vmem:[%s4261_s5 + $0x90] sm:$0xff] %vm749_vm2, %v1455_v15  ;;  %1520 = vst.msk [vmem:[%s4261_s5 + $0x98] sm:$0xff] %vm749_vm2, %v1456_v57  ;;  %v4628_v39 = vld [vmem:[#allocation49_spill] sm:$0xff]  ;;  %v4629_v62 = vld [vmem:[#allocation50_spill] sm:$0xff] }
 0x260   :  { %v1465_v51 = vadd.f32 %v3730_v21, %v4628_v39  ;;  %v1466_v10 = vadd.f32 %v3734_v36, %v4629_v62  ;;  %v4630_v20 = vld [vmem:[#allocation51_spill] sm:$0xff]  ;;  %v4631_v41 = vld [vmem:[#allocation52_spill] sm:$0xff]  ;;  %1521 = vst.msk [vmem:[%s4261_s5 + $0xa0] sm:$0xff] %vm749_vm2, %v1457_v35  ;;  %1522 = vst.msk [vmem:[%s4261_s5 + $0xa8] sm:$0xff] %vm749_vm2, %v1458_v55 }
 0x261   :  { %v1467_v33 = vadd.f32 %v3738_v49, %v4630_v20  ;;  %v1468_v34 = vadd.f32 %v3742_v1, %v4631_v41  ;;  %1523 = vst.msk [vmem:[%s4261_s5 + $0xb0] sm:$0xff] %vm749_vm2, %v1459_v60  ;;  %1524 = vst.msk [vmem:[%s4261_s5 + $0xb8] sm:$0xff] %vm749_vm2, %v1460_v25  ;;  %v4632_v21 = vld [vmem:[#allocation53_spill] sm:$0xff]  ;;  %v4633_v49 = vld [vmem:[#allocation54_spill] sm:$0xff] }
 0x262   :  { %v1469_v36 = vadd.f32 %v3746_v16, %v4632_v21  ;;  %v1470_v1 = vadd.f32 %v3750_v8, %v4633_v49  ;;  %v4634_v42 = vld [vmem:[#allocation55_spill] sm:$0xff]  ;;  %v4635_v61 = vld [vmem:[#allocation56_spill] sm:$0xff]  ;;  %1525 = vst.msk [vmem:[%s4261_s5 + $0xc0] sm:$0xff] %vm749_vm2, %v1461_v9  ;;  %1526 = vst.msk [vmem:[%s4261_s5 + $0xc8] sm:$0xff] %vm749_vm2, %v1462_v27 }
 0x263   :  { %v1471_v7 = vadd.f32 %v3754_v52, %v4634_v42  ;;  %v1472_v37 = vadd.f32 %v3758_v48, %v4635_v61  ;;  %1527 = vst.msk [vmem:[%s4261_s5 + $0xd0] sm:$0xff] %vm749_vm2, %v1463_v44  ;;  %1528 = vst.msk [vmem:[%s4261_s5 + $0xd8] sm:$0xff] %vm749_vm2, %v1464_v13  ;;  %v4636_v16 = vld [vmem:[#allocation57_spill] sm:$0xff]  ;;  %v4637_v52 = vld [vmem:[#allocation58_spill] sm:$0xff] }
 0x264   :  { %v1473_v8 = vadd.f32 %v3762_v17, %v4636_v16  ;;  %v1474_v48 = vadd.f32 %v3766_v29, %v4637_v52  ;;  %v4638_v19 = vld [vmem:[#allocation12_spill] sm:$0xff]  ;;  %v4639_v2 = vld [vmem:[#allocation23_spill] sm:$0xff]  ;;  %v4640_v47 = vld [vmem:[#allocation14_spill] sm:$0xff]  ;;  %1529 = vst.msk [vmem:[%s4261_s5 + $0xe0] sm:$0xff] %vm749_vm2, %v1465_v51 }
 0x265   :  { %v1475_v14 = vadd.f32 %v4639_v2, %v4638_v19  ;;  %v4641_v53 = vld [vmem:[#allocation25_spill] sm:$0xff]  ;;  %1530 = vst.msk [vmem:[%s4261_s5 + $0xe8] sm:$0xff] %vm749_vm2, %v1466_v10  ;;  %1531 = vst.msk [vmem:[%s4261_s5 + $0xf0] sm:$0xff] %vm749_vm2, %v1467_v33  ;;  %v4642_v17 = vld [vmem:[#allocation59_spill] sm:$0xff] }
 0x266   :  { %v1476_v54 = vadd.f32 %v4641_v53, %v4640_v47  ;;  %1532 = vst.msk [vmem:[%s4261_s5 + $0xf8] sm:$0xff] %vm749_vm2, %v1468_v34  ;;  %v4643_v29 = vld [vmem:[#allocation2_spill] sm:$0xff]  ;;  %v4646_v32 = vld [vmem:[#allocation60_spill] sm:$0xff]  ;;  %v4647_v15 = vld [vmem:[#allocation61_spill] sm:$0xff] }
 0x267   :  { %v1477_v6 = vadd.f32 %v4643_v29, %v4642_v17  ;;  %v4644_v31 = vld [vmem:[#allocation18_spill] sm:$0xff]  ;;  %v1479_v40 = vadd.f32 %v3786_v50, %v4646_v32  ;;  %v1480_v26 = vadd.f32 %v3790_v23, %v4647_v15  ;;  %1533 = vst.msk [vmem:[%s4261_s5 + $0x100] sm:$0xff] %vm749_vm2, %v1469_v36  ;;  %1534 = vst.msk [vmem:[%s4261_s5 + $0x108] sm:$0xff] %vm749_vm2, %v1470_v1  ;;  %v4649_v23 = vld [vmem:[#allocation16_spill] sm:$0xff] }
 0x268   :  { %v4645_v24 = vld [vmem:[#allocation10_spill] sm:$0xff]  ;;  %1535 = vst.msk [vmem:[%s4261_s5 + $0x110] sm:$0xff] %vm749_vm2, %v1471_v7  ;;  %1536 = vst.msk [vmem:[%s4261_s5 + $0x118] sm:$0xff] %vm749_vm2, %v1472_v37  ;;  %v4650_v30 = vld [vmem:[#allocation63_spill] sm:$0xff] }
 0x269   :  { %v1478_v12 = vadd.f32 %v4645_v24, %v4644_v31  ;;  %v4648_v50 = vld [vmem:[#allocation62_spill] sm:$0xff]  ;;  %v1482_v35 = vadd.f32 %v3798_v22, %v4650_v30  ;;  %v4651_v46 = vld [vmem:[#allocation64_spill] sm:$0xff]  ;;  %v4652_v4 = vld [vmem:[#allocation65_spill] sm:$0xff]  ;;  %1537 = vst.msk [vmem:[%s4261_s5 + $0x120] sm:$0xff] %vm749_vm2, %v1473_v8 }
 0x26a   :  { %v1481_v57 = vadd.f32 %v4649_v23, %v4648_v50  ;;  %v1483_v55 = vadd.f32 %v3802_v56, %v4651_v46  ;;  %v1484_v60 = vadd.f32 %v3806_v5, %v4652_v4  ;;  %1538 = vst.msk [vmem:[%s4261_s5 + $0x128] sm:$0xff] %vm749_vm2, %v1474_v48  ;;  %1539 = vst.msk [vmem:[%s4261_s5 + $0x130] sm:$0xff] %vm749_vm2, %v1475_v14  ;;  %v4653_v22 = vld [vmem:[#allocation3_spill] sm:$0xff]  ;;  %v4654_v5 = vld [vmem:[#allocation4_spill] sm:$0xff] }
 0x26b   :  { %1540 = vst.msk [vmem:[%s4261_s5 + $0x138] sm:$0xff] %vm749_vm2, %v1476_v54  ;;  %v1485_v56 = vadd.f32 %v3810_v45, %v4653_v22  ;;  %v1486_v43 = vadd.f32 %v3814_v63, %v4654_v5  ;;  %v4655_v25 = vld [vmem:[#allocation66_spill] sm:$0xff]  ;;  %1541 = vst.msk [vmem:[%s4261_s5 + $0x140] sm:$0xff] %vm749_vm2, %v1477_v6  ;;  %v4657_v45 = vld [vmem:[#allocation67_spill] sm:$0xff] }
 0x26c   :  { %v1487_v0 = vadd.f32 %v3818_v28, %v4655_v25  ;;  %v4656_v9 = vld [vmem:[#allocation6_spill] sm:$0xff]  ;;  %1542 = vst.msk [vmem:[%s4261_s5 + $0x148] sm:$0xff] %vm749_vm2, %v1478_v12  ;;  %1543 = vst.msk [vmem:[%s4261_s5 + $0x150] sm:$0xff] %vm749_vm2, %v1479_v40  ;;  %v1489_v63 = vadd.f32 %v3826_v59, %v4657_v45  ;;  %v4658_v28 = vld [vmem:[#allocation68_spill] sm:$0xff] }
 0x26d   :  { %v1488_v18 = vadd.f32 %v3822_v58, %v4656_v9  ;;  %1544 = vst.msk [vmem:[%s4261_s5 + $0x158] sm:$0xff] %vm749_vm2, %v1480_v26  ;;  %v1490_v58 = vadd.f32 %v3830_v11, %v4658_v28  ;;  %v4659_v27 = vld [vmem:[#allocation8_spill] sm:$0xff]  ;;  %v4661_v38 = vld [vmem:[#allocation69_spill] sm:$0xff]  ;;  %v4662_v13 = vld [vmem:[#allocation22_spill] sm:$0xff] }
 0x26e   :  { %v4660_v3 = vld [vmem:[#allocation20_spill] sm:$0xff]  ;;  %v1492_v39 = vadd.f32 %v4662_v13, %v4661_v38  ;;  %1545 = vst.msk [vmem:[%s4261_s5 + $0x160] sm:$0xff] %vm749_vm2, %v1481_v57  ;;  %1546 = vst.msk [vmem:[%s4261_s5 + $0x168] sm:$0xff] %vm749_vm2, %v1482_v35  ;;  %v4663_v59 = vld [vmem:[#allocation70_spill] sm:$0xff] }
 0x26f   :  { %v1491_v44 = vadd.f32 %v4660_v3, %v4659_v27  ;;  %1547 = vst.msk [vmem:[%s4261_s5 + $0x170] sm:$0xff] %vm749_vm2, %v1483_v55  ;;  %1548 = vst.msk [vmem:[%s4261_s5 + $0x178] sm:$0xff] %vm749_vm2, %v1484_v60  ;;  %v4664_v11 = vld [vmem:[#allocation24_spill] sm:$0xff]  ;;  %v4665_v62 = vld [vmem:[#allocation71_spill] sm:$0xff] }
 0x270   :  { %v1493_v51 = vadd.f32 %v4664_v11, %v4663_v59  ;;  %v4666_v10 = vld [vmem:[#allocation26_spill] sm:$0xff]  ;;  %v4667_v33 = vld [vmem:[#allocation72_spill] sm:$0xff]  ;;  %v4668_v41 = vld [vmem:[#allocation27_spill] sm:$0xff]  ;;  %1549 = vst.msk [vmem:[%s4261_s5 + $0x180] sm:$0xff] %vm749_vm2, %v1485_v56 }
 0x271   :  { %v1494_v20 = vadd.f32 %v4666_v10, %v4665_v62  ;;  %v1495_v34 = vadd.f32 %v4668_v41, %v4667_v33  ;;  %v4669_v21 = vld [vmem:[#allocation73_spill] sm:$0xff]  ;;  %1550 = vst.msk [vmem:[%s4261_s5 + $0x188] sm:$0xff] %vm749_vm2, %v1486_v43  ;;  %1551 = vst.msk [vmem:[%s4261_s5 + $0x190] sm:$0xff] %vm749_vm2, %v1487_v0  ;;  %v4671_v1 = vld [vmem:[#allocation74_spill] sm:$0xff] }
 0x272   :  { %v4670_v36 = vld [vmem:[#allocation5_spill] sm:$0xff]  ;;  %1552 = vst.msk [vmem:[%s4261_s5 + $0x198] sm:$0xff] %vm749_vm2, %v1488_v18  ;;  %v4672_v42 = vld [vmem:[#allocation15_spill] sm:$0xff]  ;;  %v4674_v37 = vld [vmem:[#allocation78_spill] sm:$0xff] }
 0x273   :  { %v1496_v49 = vadd.f32 %v4670_v36, %v4669_v21  ;;  %v1497_v7 = vadd.f32 %v4672_v42, %v4671_v1  ;;  %v4673_v61 = vld [vmem:[#allocation75_spill] sm:$0xff]  ;;  %v4675_v8 = vld [vmem:[#allocation76_spill] sm:$0xff]  ;;  %v4677_v19 = vld [vmem:[#allocation77_spill] sm:$0xff]  ;;  %1553 = vst.msk [vmem:[%s4261_s5 + $0x1a0] sm:$0xff] %vm749_vm2, %v1489_v63 }
 0x274   :  { %v1498_v16 = vadd.f32 %v4674_v37, %v4673_v61  ;;  %v4676_v52 = vld [vmem:[#allocation79_spill] sm:$0xff]  ;;  %v4678_v2 = vld [vmem:[#allocation80_spill] sm:$0xff]  ;;  %1554 = vst.msk [vmem:[%s4261_s5 + $0x1a8] sm:$0xff] %vm749_vm2, %v1490_v58  ;;  %1555 = vst.msk [vmem:[%s4261_s5 + $0x1b0] sm:$0xff] %vm749_vm2, %v1491_v44 }
 0x275   :  { %v1499_v48 = vadd.f32 %v4676_v52, %v4675_v8  ;;  %v1500_v14 = vadd.f32 %v4678_v2, %v4677_v19  ;;  %1556 = vst.msk [vmem:[%s4261_s5 + $0x1b8] sm:$0xff] %vm749_vm2, %v1492_v39  ;;  %1557 = vst.msk [vmem:[%s4261_s5 + $0x1c0] sm:$0xff] %vm749_vm2, %v1493_v51 }
 0x276   :  { %1558 = vst.msk [vmem:[%s4261_s5 + $0x1c8] sm:$0xff] %vm749_vm2, %v1494_v20  ;;  %1559 = vst.msk [vmem:[%s4261_s5 + $0x1d0] sm:$0xff] %vm749_vm2, %v1495_v34 }
 0x277   :  { %1560 = vst.msk [vmem:[%s4261_s5 + $0x1d8] sm:$0xff] %vm749_vm2, %v1496_v49  ;;  %1561 = vst.msk [vmem:[%s4261_s5 + $0x1e0] sm:$0xff] %vm749_vm2, %v1497_v7 }
 0x278   :  { %1562 = vst.msk [vmem:[%s4261_s5 + $0x1e8] sm:$0xff] %vm749_vm2, %v1498_v16  ;;  %1563 = vst.msk [vmem:[%s4261_s5 + $0x1f0] sm:$0xff] %vm749_vm2, %v1499_v48 }
 0x279   :  { %1564 = vst.msk [vmem:[%s4261_s5 + $0x1f8] sm:$0xff] %vm749_vm2, %v1500_v14 }

// kernel: _lambda_.19
= control target key start
LH: loop header
LB: loop body
LE: loop exit
PB: predicated region body
PF: predicated region fallthrough
CT: control target
= control target key end

     0   :  { %vm45_vm0 = vcmask 588800   ;;  %vm239_vm1 = vcmask 64512   ;;  %s931_s1 = inlined_call_operand.vmem [shape: f32[72,8], index: 1, kind: input, shape index: {}]   ;;  %s932_s0 = inlined_call_operand.vmem [shape: f32[128,72], index: 0, kind: input, shape index: {}]   ;;  %s933_s2 = inlined_call_operand.vmem [shape: f32[1,8], index: 2, kind: input, shape index: {}]   ;;  %s934_s3 = inlined_call_operand.vmem [shape: f32[1,8], index: 3, kind: input, shape index: {}]   ;;  %s935_s4 = inlined_call_operand.vmem [shape: f32[128,8], index: 4, kind: input, shape index: {}]   ;;  %s936_s5 = inlined_call_operand.vmem [shape: f32[128,8], index: 5, kind: output, shape index: {}]  }
   0x1   :  { %v36_v0 = vld [vmem:[%s931_s1] sm:$0xff]  ;;  %v37_v1 = vld [vmem:[%s931_s1 + $0x8] sm:$0xff]  ;;  %v38_v2 = vld [vmem:[%s931_s1 + $0x10] sm:$0xff] }
   0x2   :  { %v536_v3 = vpack.c.bf16 %v37_v1, %v36_v0  ;;  %v39_v4 = vld [vmem:[%s931_s1 + $0x18] sm:$0xff]  ;;  %v40_v6 = vld [vmem:[%s931_s1 + $0x20] sm:$0xff]  ;;  %v41_v7 = vld [vmem:[%s931_s1 + $0x28] sm:$0xff] }
   0x3   :  { %v540_v5 = vpack.c.bf16 %v39_v4, %v38_v2  ;;  %v20_v8 = vld [vmem:[%s932_s0] sm:$0xff]  ;;  %v544_v9 = vpack.c.bf16 %v41_v7, %v40_v6  ;;  %v42_v11 = vld [vmem:[%s931_s1 + $0x30] sm:$0xff]  ;;  %v43_v12 = vld [vmem:[%s931_s1 + $0x38] sm:$0xff] }
   0x4   :  { %537 = vmatprep.subr.bf16.mxu0 %v536_v3  ;;  %552 = vmatprep.subr.bf16.mxu1 %v536_v3  ;;  %v28_v10 = vld [vmem:[%s932_s0 + $0x40] sm:$0xff]  ;;  %v548_v13 = vpack.c.bf16 %v43_v12, %v42_v11  ;;  %v21_v15 = vld [vmem:[%s932_s0 + $0x8] sm:$0xff]  ;;  %v22_v17 = vld [vmem:[%s932_s0 + $0x10] sm:$0xff] }
   0x5   :  { %539 = vmatpush3.bf16.msra.mxu0 %v536_v3  ;;  %557 = vmatpush3.bf16.msra.mxu1 %v536_v3  ;;  %v44_v14 = vld [vmem:[%s931_s1 + $0x40] sm:$0xff]  ;;  %v29_v16 = vld [vmem:[%s932_s0 + $0x48] sm:$0xff]  ;;  %v30_v18 = vld [vmem:[%s932_s0 + $0x50] sm:$0xff] }
   0x6   :  { %541 = vmatprep.subr.bf16.mxu0 %v540_v5  ;;  %512 = vmatprep.mubr.msk.f32.mxu0 %vm45_vm0, %v20_v8  ;;  %v23_v19 = vld [vmem:[%s932_s0 + $0x18] sm:$0xff]  ;;  %v24_v21 = vld [vmem:[%s932_s0 + $0x20] sm:$0xff]  ;;  %v25_v23 = vld [vmem:[%s932_s0 + $0x28] sm:$0xff] }
   0x7   :  { %553 = vmatprep.subr.bf16.mxu1 %v540_v5  ;;  %524 = vmatprep.mubr.msk.f32.mxu1 %vm45_vm0, %v28_v10  ;;  %v31_v20 = vld [vmem:[%s932_s0 + $0x58] sm:$0xff]  ;;  %v32_v22 = vld [vmem:[%s932_s0 + $0x60] sm:$0xff]  ;;  %v33_v24 = vld [vmem:[%s932_s0 + $0x68] sm:$0xff] }
   0x8   :  { %v26_v25 = vld [vmem:[%s932_s0 + $0x30] sm:$0xff]  ;;  %v27_v27 = vld [vmem:[%s932_s0 + $0x38] sm:$0xff] }
   0x9   :  { %543 = vmatpush3.bf16.msra.mxu0 %v540_v5  ;;  %558 = vmatpush3.bf16.msra.mxu1 %v540_v5  ;;  %v34_v26 = vld [vmem:[%s932_s0 + $0x70] sm:$0xff]  ;;  %v35_v28 = vld [vmem:[%s932_s0 + $0x78] sm:$0xff] }
   0xa   :  { %545 = vmatprep.subr.bf16.mxu0 %v544_v9  ;;  %554 = vmatprep.subr.bf16.mxu1 %v544_v9 }
   0xd   :  { %547 = vmatpush3.bf16.msra.mxu0 %v544_v9  ;;  %559 = vmatpush3.bf16.msra.mxu1 %v544_v9 }
   0xe   :  { %549 = vmatprep.subr.bf16.mxu0 %v548_v13  ;;  %555 = vmatprep.subr.bf16.mxu1 %v548_v13 }
  0x11   :  { %551 = vmatpush3.bf16.msra.mxu0 %v548_v13  ;;  %560 = vmatpush3.bf16.msra.mxu1 %v548_v13 }
  0x12   :  { %510 = vmatprep.subr.mxu0 %v44_v14  ;;  %556 = vmatprep.subr.mxu1 %v44_v14 }
  0x15   :  { %511 = vmatpush3.msra.mxu0 %v44_v14  ;;  %561 = vmatpush3.msra.mxu1 %v44_v14 }
  0x16   :  { %513 = vmatmul.mubr.msk.f32.vlgmr.msra.gmra.mrb[0].mxu0 %vm45_vm0, %v21_v15  ;;  %525 = vmatmul.mubr.msk.f32.vlgmr.msra.gmra.mrb[0].mxu1 %vm45_vm0, %v29_v16 }
  0x17   :  { %515 = vmatprep.mubr.msk.f32.mxu0 %vm45_vm0, %v22_v17  ;;  %527 = vmatprep.mubr.msk.f32.mxu1 %vm45_vm0, %v30_v18 }
  0x1a   :  { %516 = vmatmul.mubr.msk.f32.gmra.mrb[2].mxu0 %vm45_vm0, %v23_v19  ;;  %528 = vmatmul.mubr.msk.f32.gmra.mrb[2].mxu1 %vm45_vm0, %v31_v20 }
  0x1b   :  { %518 = vmatprep.mubr.msk.f32.mxu0 %vm45_vm0, %v24_v21  ;;  %530 = vmatprep.mubr.msk.f32.mxu1 %vm45_vm0, %v32_v22 }
  0x1e   :  { %519 = vmatmul.mubr.msk.f32.gmra.mrb[4].mxu0 %vm45_vm0, %v25_v23  ;;  %531 = vmatmul.mubr.msk.f32.gmra.mrb[4].mxu1 %vm45_vm0, %v33_v24 }
  0x1f   :  { %521 = vmatprep.mubr.msk.f32.mxu0 %vm45_vm0, %v26_v25  ;;  %533 = vmatprep.mubr.msk.f32.mxu1 %vm45_vm0, %v34_v26 }
  0x22   :  { %522 = vmatmul.mubr.msk.f32.gmra.mrb[6].mxu0 %vm45_vm0, %v27_v27  ;;  %534 = vmatmul.mubr.msk.f32.gmra.mrb[6].mxu1 %vm45_vm0, %v35_v28 }
  0xe9   :  { %v685_v29 = vpop.f32.mrb[0].mxu0  ;;  %v687_v30 = vpop.f32.mrb[0].mxu1 }
  0xea   :  { %v241_v31 = vsel %vm239_vm1, %v685_v29, 0.0  ;;  %v279_v32 = vmul.f32 %v685_v29, %v685_v29  ;;  %v693_v33 = vpop.f32.mrb[1].mxu0  ;;  %v695_v34 = vpop.f32.mrb[1].mxu1  ;;  %v287_v20 = vmul.f32 %v687_v30, %v687_v30  ;;  %v257_v25 = vsel %vm239_vm1, %v687_v30, 0.0 }
  0xeb   :  { %v240_v35 = vsel %vm239_vm1, %v693_v33, 0.0  ;;  %v278_v36 = vmul.f32 %v693_v33, %v693_v33  ;;  %v286_v6 = vmul.f32 %v695_v34, %v695_v34  ;;  %v255_v16 = vsel %vm239_vm1, %v695_v34, 0.0 }
  0xec   :  { %v295_v37 = vsel %vm239_vm1, %v279_v32, 0.0  ;;  %v242_v38 = vadd.f32 %v241_v31, %v240_v35  ;;  %v311_v31 = vsel %vm239_vm1, %v287_v20, 0.0 }
  0xed   :  { %v294_v39 = vsel %vm239_vm1, %v278_v36, 0.0  ;;  %v703_v40 = vpop.f32.mrb[2].mxu0  ;;  %v705_v41 = vpop.f32.mrb[2].mxu1  ;;  %v309_v21 = vsel %vm239_vm1, %v286_v6, 0.0 }
  0xee   :  { %v296_v42 = vadd.f32 %v295_v37, %v294_v39  ;;  %v707_v43 = vpop.f32.mrb[3].mxu0  ;;  %v709_v44 = vpop.f32.mrb[3].mxu1  ;;  %v281_v45 = vmul.f32 %v703_v40, %v703_v40  ;;  %v245_v49 = vsel %vm239_vm1, %v703_v40, 0.0  ;;  %v289_v32 = vmul.f32 %v705_v41, %v705_v41 }
  0xef   :  { %v243_v46 = vsel %vm239_vm1, %v707_v43, 0.0  ;;  %v280_v47 = vmul.f32 %v707_v43, %v707_v43  ;;  %v288_v22 = vmul.f32 %v709_v44, %v709_v44  ;;  %v259_v26 = vsel %vm239_vm1, %v709_v44, 0.0 }
  0xf0   :  { %v244_v48 = vadd.f32 %v243_v46, %v242_v38  ;;  %v299_v57 = vsel %vm239_vm1, %v281_v45, 0.0  ;;  %v261_v39 = vsel %vm239_vm1, %v705_v41, 0.0 }
  0xf1   :  { %v297_v50 = vsel %vm239_vm1, %v280_v47, 0.0  ;;  %v720_v51 = vpop.f32.mrb[4].mxu0  ;;  %v722_v52 = vpop.f32.mrb[4].mxu1  ;;  %v313_v35 = vsel %vm239_vm1, %v288_v22, 0.0  ;;  %v315_v47 = vsel %vm239_vm1, %v289_v32, 0.0 }
  0xf2   :  { %v298_v53 = vadd.f32 %v297_v50, %v296_v42  ;;  %v724_v54 = vpop.f32.mrb[5].mxu0  ;;  %v246_v55 = vadd.f32 %v245_v49, %v244_v48  ;;  %v726_v56 = vpop.f32.mrb[5].mxu1  ;;  %v283_v58 = vmul.f32 %v720_v51, %v720_v51  ;;  %v249_v63 = vsel %vm239_vm1, %v720_v51, 0.0  ;;  %v334_v32 = vld [vmem:[%s933_s2] sm:$0x1] }
  0xf3   :  { %v247_v59 = vsel %vm239_vm1, %v724_v54, 0.0  ;;  %v282_v60 = vmul.f32 %v724_v54, %v724_v54  ;;  %v290_v36 = vmul.f32 %v726_v56, %v726_v56  ;;  %v263_v42 = vsel %vm239_vm1, %v726_v56, 0.0 }
  0xf4   :  { %v248_v61 = vadd.f32 %v247_v59, %v246_v55  ;;  %v300_v62 = vadd.f32 %v299_v57, %v298_v53  ;;  %v303_v8 = vsel %vm239_vm1, %v283_v58, 0.0  ;;  %v291_v48 = vmul.f32 %v722_v52, %v722_v52 }
  0xf5   :  { %v301_v0 = vsel %vm239_vm1, %v282_v60, 0.0  ;;  %v738_v1 = vpop.f32.mrb[6].mxu0  ;;  %v740_v2 = vpop.f32.mrb[6].mxu1  ;;  %v317_v49 = vsel %vm239_vm1, %v290_v36, 0.0  ;;  %v265_v57 = vsel %vm239_vm1, %v722_v52, 0.0 }
  0xf6   :  { %v302_v3 = vadd.f32 %v301_v0, %v300_v62  ;;  %v742_v4 = vpop.f32.mrb[7].mxu0  ;;  %v250_v5 = vadd.f32 %v249_v63, %v248_v61  ;;  %v746_v7 = vpop.f32.mrb[7].mxu1  ;;  %v285_v9 = vmul.f32 %v738_v1, %v738_v1  ;;  %v253_v14 = vsel %vm239_vm1, %v738_v1, 0.0 }
  0xf7   :  { %v251_v10 = vsel %vm239_vm1, %v742_v4, 0.0  ;;  %v284_v11 = vmul.f32 %v742_v4, %v742_v4  ;;  %v292_v50 = vmul.f32 %v746_v7, %v746_v7  ;;  %v267_v58 = vsel %vm239_vm1, %v746_v7, 0.0 }
  0xf8   :  { %v252_v12 = vadd.f32 %v251_v10, %v250_v5  ;;  %v304_v13 = vadd.f32 %v303_v8, %v302_v3  ;;  %v307_v19 = vsel %vm239_vm1, %v285_v9, 0.0  ;;  %v319_v61 = vsel %vm239_vm1, %v291_v48, 0.0 }
  0xf9   :  { %v305_v15 = vsel %vm239_vm1, %v284_v11, 0.0  ;;  %v293_v62 = vmul.f32 %v740_v2, %v740_v2  ;;  %v321_v63 = vsel %vm239_vm1, %v292_v50, 0.0  ;;  %v269_v5 = vsel %vm239_vm1, %v740_v2, 0.0 }
  0xfa   :  { %v254_v17 = vadd.f32 %v253_v14, %v252_v12  ;;  %v306_v18 = vadd.f32 %v305_v15, %v304_v13 }
  0xfb   :  { %v323_v9 = vsel %vm239_vm1, %v293_v62, 0.0 }
  0xfc   :  { %v308_v23 = vadd.f32 %v307_v19, %v306_v18  ;;  %v256_v24 = vadd.f32 %v255_v16, %v254_v17 }
  0xfe   :  { %v310_v27 = vadd.f32 %v309_v21, %v308_v23  ;;  %v258_v28 = vadd.f32 %v257_v25, %v256_v24 }
 0x100   :  { %v260_v37 = vadd.f32 %v259_v26, %v258_v28  ;;  %v312_v38 = vadd.f32 %v311_v31, %v310_v27  ;;  %v339_v28 = vlaneseq }
 0x102   :  { %v314_v45 = vadd.f32 %v313_v35, %v312_v38  ;;  %v262_v46 = vadd.f32 %v261_v39, %v260_v37  ;;  %v340_v31 = vshrl.u32 %v339_v28, 7 }
 0x104   :  { %v264_v53 = vadd.f32 %v263_v42, %v262_v46  ;;  %v316_v55 = vadd.f32 %v315_v47, %v314_v45  ;;  %v341_v35 = vsub.s32 0, %v340_v31 }
 0x106   :  { %v318_v59 = vadd.f32 %v317_v49, %v316_v55  ;;  %v266_v60 = vadd.f32 %v265_v57, %v264_v53  ;;  %v360_v55 = vld [vmem:[%s934_s3] sm:$0x1] }
 0x108   :  { %v268_v0 = vadd.f32 %v267_v58, %v266_v60  ;;  %v320_v3 = vadd.f32 %v319_v61, %v318_v59 }
 0x10a   :  { %v270_v6 = vadd.f32 %v269_v5, %v268_v0  ;;  %v322_v8 = vadd.f32 %v321_v63, %v320_v3  ;;  %v389_v63 = vld [vmem:[%s935_s4 + $0x20] sm:$0xff]  ;;  %v390_v0 = vld [vmem:[%s935_s4 + $0x28] sm:$0xff]  ;;  %v391_v3 = vld [vmem:[%s935_s4 + $0x30] sm:$0xff] }
 0x10c   :  { %v271_v10 = vrot.slane %v270_v6, 4  ;;  %v324_v11 = vadd.f32 %v323_v9, %v322_v8 }
 0x10e   :  { %v272_v12 = vadd.f32 %v271_v10, %v270_v6  ;;  %v325_v13 = vrot.slane %v324_v11, 4  ;;  %v392_v10 = vld [vmem:[%s935_s4 + $0x38] sm:$0xff] }
 0x110   :  { %v273_v14 = vrot.slane %v272_v12, 2  ;;  %v326_v15 = vadd.f32 %v325_v13, %v324_v11  ;;  %v393_v11 = vld [vmem:[%s935_s4 + $0x40] sm:$0xff] }
 0x112   :  { %v274_v16 = vadd.f32 %v273_v14, %v272_v12  ;;  %v327_v17 = vrot.slane %v326_v15, 2  ;;  %v394_v12 = vld [vmem:[%s935_s4 + $0x48] sm:$0xff] }
 0x114   :  { %v275_v18 = vrot.slane %v274_v16, 1  ;;  %v328_v19 = vadd.f32 %v327_v17, %v326_v15  ;;  %v395_v17 = vld [vmem:[%s935_s4 + $0x50] sm:$0xff] }
 0x116   :  { %v276_v20 = vadd.f32 %v275_v18, %v274_v16  ;;  %v329_v21 = vrot.slane %v328_v19, 1  ;;  %v396_v18 = vld [vmem:[%s935_s4 + $0x58] sm:$0xff] }
 0x118   :  { %v277_v22 = vmul.f32 0.0078125, %v276_v20  ;;  %v330_v23 = vadd.f32 %v329_v21, %v328_v19  ;;  %v397_v19 = vld [vmem:[%s935_s4 + $0x60] sm:$0xff]  ;;  %v398_v20 = vld [vmem:[%s935_s4 + $0x68] sm:$0xff]  ;;  %v399_v21 = vld [vmem:[%s935_s4 + $0x70] sm:$0xff] }
 0x11a   :  { %v331_v24 = vmul.f32 0.0078125, %v330_v23  ;;  %v332_v25 = vmul.f32 %v277_v22, %v277_v22 }
 0x11c   :  { %v333_v26 = vsub.f32 %v331_v24, %v332_v25 }
 0x11e   :  { %v335_v27 = vadd.f32 1e-05, %v333_v26 }
 0x120   :  { %562 = vrsqrt.f32 %v335_v27 }
 0x12a   :  { %v563_v36 = vpop.eup %562 }
 0x12b   :  { %v337_v37 = vmul.f32 %v563_v36, %v334_v32 }
 0x12d   :  { %v342_v38 = vrot.slane %v337_v37, %v341_v35  ;;  %v361_v39 = vmul.f32 %v337_v37, %v277_v22  ;;  %v400_v22 = vld [vmem:[%s935_s4 + $0x78] sm:$0xff] }
 0x12f   :  { %v344_v42 = vmul.f32 %v342_v38, %v693_v33  ;;  %v345_v45 = vmul.f32 %v685_v29, %v342_v38  ;;  %v346_v46 = vmul.f32 %v342_v38, %v707_v43  ;;  %v347_v47 = vmul.f32 %v703_v40, %v342_v38 }
 0x130   :  { %v348_v48 = vmul.f32 %v342_v38, %v724_v54  ;;  %v349_v49 = vmul.f32 %v720_v51, %v342_v38  ;;  %v350_v50 = vmul.f32 %v342_v38, %v742_v4  ;;  %v351_v53 = vmul.f32 %v738_v1, %v342_v38 }
 0x131   :  { %v352_v33 = vmul.f32 %v342_v38, %v695_v34  ;;  %v353_v29 = vmul.f32 %v687_v30, %v342_v38  ;;  %v354_v43 = vmul.f32 %v342_v38, %v709_v44  ;;  %v355_v40 = vmul.f32 %v705_v41, %v342_v38  ;;  %v385_v34 = vld [vmem:[%s935_s4] sm:$0xff]  ;;  %v386_v41 = vld [vmem:[%s935_s4 + $0x8] sm:$0xff] }
 0x132   :  { %v356_v54 = vmul.f32 %v342_v38, %v726_v56  ;;  %v357_v51 = vmul.f32 %v722_v52, %v342_v38  ;;  %v358_v4 = vmul.f32 %v342_v38, %v746_v7  ;;  %v359_v1 = vmul.f32 %v740_v2, %v342_v38  ;;  %v387_v52 = vld [vmem:[%s935_s4 + $0x10] sm:$0xff]  ;;  %v388_v56 = vld [vmem:[%s935_s4 + $0x18] sm:$0xff] }
 0x133   :  { %v362_v57 = vsub.f32 %v360_v55, %v361_v39 }
 0x135   :  { %v367_v58 = vrot.slane %v362_v57, %v341_v35 }
 0x137   :  { %v369_v59 = vadd.f32 %v367_v58, %v344_v42  ;;  %v370_v30 = vadd.f32 %v367_v58, %v345_v45  ;;  %v371_v60 = vadd.f32 %v367_v58, %v346_v46  ;;  %v372_v44 = vadd.f32 %v367_v58, %v347_v47 }
 0x138   :  { %v373_v2 = vadd.f32 %v367_v58, %v348_v48  ;;  %v374_v7 = vadd.f32 %v367_v58, %v349_v49  ;;  %v375_v61 = vadd.f32 %v367_v58, %v350_v50  ;;  %v376_v62 = vadd.f32 %v367_v58, %v351_v53 }
 0x139   :  { %v377_v5 = vadd.f32 %v367_v58, %v352_v33  ;;  %v378_v6 = vadd.f32 %v367_v58, %v353_v29  ;;  %v379_v8 = vadd.f32 %v367_v58, %v354_v43  ;;  %v380_v9 = vadd.f32 %v367_v58, %v355_v40 }
 0x13a   :  { %v381_v13 = vadd.f32 %v367_v58, %v356_v54  ;;  %v382_v14 = vadd.f32 %v367_v58, %v357_v51  ;;  %v383_v15 = vadd.f32 %v367_v58, %v358_v4  ;;  %v384_v16 = vadd.f32 %v367_v58, %v359_v1 }
 0x13b   :  { %v401_v23 = vadd.f32 %v385_v34, %v369_v59  ;;  %v402_v24 = vadd.f32 %v386_v41, %v370_v30  ;;  %v403_v25 = vadd.f32 %v387_v52, %v371_v60  ;;  %v404_v26 = vadd.f32 %v388_v56, %v372_v44 }
 0x13c   :  { %v405_v27 = vadd.f32 %v389_v63, %v373_v2  ;;  %v406_v28 = vadd.f32 %v390_v0, %v374_v7  ;;  %v407_v31 = vadd.f32 %v391_v3, %v375_v61  ;;  %v408_v32 = vadd.f32 %v392_v10, %v376_v62 }
 0x13d   :  { %v409_v35 = vadd.f32 %v393_v11, %v377_v5  ;;  %v410_v36 = vadd.f32 %v394_v12, %v378_v6  ;;  %v411_v37 = vadd.f32 %v395_v17, %v379_v8  ;;  %v412_v38 = vadd.f32 %v396_v18, %v380_v9 }
 0x13e   :  { %v413_v39 = vadd.f32 %v397_v19, %v381_v13  ;;  %v414_v42 = vadd.f32 %v398_v20, %v382_v14  ;;  %v415_v45 = vadd.f32 %v399_v21, %v383_v15  ;;  %v416_v46 = vadd.f32 %v400_v22, %v384_v16 }
 0x13f   :  { %v417_v47 = vmax.f32 %v401_v23, 0.0  ;;  %v418_v48 = vmax.f32 %v402_v24, 0.0  ;;  %v419_v49 = vmax.f32 %v403_v25, 0.0  ;;  %v420_v50 = vmax.f32 %v404_v26, 0.0 }
 0x140   :  { %v421_v53 = vmax.f32 %v405_v27, 0.0  ;;  %v422_v55 = vmax.f32 %v406_v28, 0.0  ;;  %v423_v33 = vmax.f32 %v407_v31, 0.0  ;;  %v424_v29 = vmax.f32 %v408_v32, 0.0 }
 0x141   :  { %v425_v43 = vmax.f32 %v409_v35, 0.0  ;;  %v426_v40 = vmax.f32 %v410_v36, 0.0  ;;  %v427_v54 = vmax.f32 %v411_v37, 0.0  ;;  %v428_v51 = vmax.f32 %v412_v38, 0.0  ;;  %433 = vst.msk [vmem:[%s936_s5] sm:$0xff] %vm239_vm1, %v417_v47  ;;  %434 = vst.msk [vmem:[%s936_s5 + $0x8] sm:$0xff] %vm239_vm1, %v418_v48 }
 0x142   :  { %435 = vst.msk [vmem:[%s936_s5 + $0x10] sm:$0xff] %vm239_vm1, %v419_v49  ;;  %436 = vst.msk [vmem:[%s936_s5 + $0x18] sm:$0xff] %vm239_vm1, %v420_v50  ;;  %v429_v4 = vmax.f32 %v413_v39, 0.0  ;;  %v430_v1 = vmax.f32 %v414_v42, 0.0  ;;  %v431_v57 = vmax.f32 %v415_v45, 0.0  ;;  %v432_v58 = vmax.f32 %v416_v46, 0.0 }
 0x143   :  { %437 = vst.msk [vmem:[%s936_s5 + $0x20] sm:$0xff] %vm239_vm1, %v421_v53  ;;  %438 = vst.msk [vmem:[%s936_s5 + $0x28] sm:$0xff] %vm239_vm1, %v422_v55 }
 0x144   :  { %439 = vst.msk [vmem:[%s936_s5 + $0x30] sm:$0xff] %vm239_vm1, %v423_v33  ;;  %440 = vst.msk [vmem:[%s936_s5 + $0x38] sm:$0xff] %vm239_vm1, %v424_v29 }
 0x145   :  { %441 = vst.msk [vmem:[%s936_s5 + $0x40] sm:$0xff] %vm239_vm1, %v425_v43  ;;  %442 = vst.msk [vmem:[%s936_s5 + $0x48] sm:$0xff] %vm239_vm1, %v426_v40 }
 0x146   :  { %443 = vst.msk [vmem:[%s936_s5 + $0x50] sm:$0xff] %vm239_vm1, %v427_v54  ;;  %444 = vst.msk [vmem:[%s936_s5 + $0x58] sm:$0xff] %vm239_vm1, %v428_v51 }
 0x147   :  { %445 = vst.msk [vmem:[%s936_s5 + $0x60] sm:$0xff] %vm239_vm1, %v429_v4  ;;  %446 = vst.msk [vmem:[%s936_s5 + $0x68] sm:$0xff] %vm239_vm1, %v430_v1 }
 0x148   :  { %447 = vst.msk [vmem:[%s936_s5 + $0x70] sm:$0xff] %vm239_vm1, %v431_v57  ;;  %448 = vst.msk [vmem:[%s936_s5 + $0x78] sm:$0xff] %vm239_vm1, %v432_v58 }

// kernel: _lambda_.22
= control target key start
LH: loop header
LB: loop body
LE: loop exit
PB: predicated region body
PF: predicated region fallthrough
CT: control target
= control target key end

     0   :  { %vm33_vm0 = vcmask 588800   ;;  %vm131_vm1 = vcmask 261120   ;;  %v171_v56 = vlaneseq  ;;  %s406_s1 = inlined_call_operand.vmem [shape: f32[72,32], index: 1, kind: input, shape index: {}]   ;;  %s407_s0 = inlined_call_operand.vmem [shape: f32[32,72], index: 0, kind: input, shape index: {}]   ;;  %s408_s2 = inlined_call_operand.vmem [shape: f32[1,32], index: 2, kind: input, shape index: {}]   ;;  %s409_s4 = inlined_call_operand.vmem [shape: f32[1,32], index: 4, kind: input, shape index: {}]   ;;  %s410_s3 = inlined_call_operand.vmem [shape: f32[1,32], index: 3, kind: input, shape index: {}]   ;;  %s411_s5 = inlined_call_operand.vmem [shape: f32[32,32], index: 5, kind: output, shape index: {}]  }
   0x1   :  { %v24_v0 = vld [vmem:[%s406_s1] sm:$0xff]  ;;  %v25_v1 = vld [vmem:[%s406_s1 + $0x8] sm:$0xff]  ;;  %v26_v2 = vld [vmem:[%s406_s1 + $0x10] sm:$0xff] }
   0x2   :  { %v272_v3 = vpack.c.bf16 %v25_v1, %v24_v0  ;;  %v27_v4 = vld [vmem:[%s406_s1 + $0x18] sm:$0xff]  ;;  %v28_v6 = vld [vmem:[%s406_s1 + $0x20] sm:$0xff]  ;;  %v29_v7 = vld [vmem:[%s406_s1 + $0x28] sm:$0xff]  ;;  %v172_v57 = vshrl.u32 %v171_v56, 7 }
   0x3   :  { %v276_v5 = vpack.c.bf16 %v27_v4, %v26_v2  ;;  %v20_v8 = vld [vmem:[%s407_s0] sm:$0xff]  ;;  %v22_v9 = vld [vmem:[%s407_s0 + $0x10] sm:$0xff]  ;;  %v280_v10 = vpack.c.bf16 %v29_v7, %v28_v6  ;;  %v31_v12 = vld [vmem:[%s406_s1 + $0x38] sm:$0xff] }
   0x4   :  { %273 = vmatprep.subr.bf16.mxu0 %v272_v3  ;;  %288 = vmatprep.subr.bf16.mxu1 %v272_v3  ;;  %v30_v11 = vld [vmem:[%s406_s1 + $0x30] sm:$0xff]  ;;  %v32_v14 = vld [vmem:[%s406_s1 + $0x40] sm:$0xff]  ;;  %v21_v15 = vld [vmem:[%s407_s0 + $0x8] sm:$0xff]  ;;  %v173_v59 = vsub.s32 0, %v172_v57 }
   0x5   :  { %275 = vmatpush3.bf16.msra.mxu0 %v272_v3  ;;  %293 = vmatpush3.bf16.msra.mxu1 %v272_v3  ;;  %v284_v13 = vpack.c.bf16 %v31_v12, %v30_v11  ;;  %v23_v16 = vld [vmem:[%s407_s0 + $0x18] sm:$0xff]  ;;  %v166_v58 = vld [vmem:[%s408_s2] sm:$0x1] }
   0x6   :  { %277 = vmatprep.subr.bf16.mxu0 %v276_v5  ;;  %289 = vmatprep.subr.bf16.mxu1 %v276_v5  ;;  %v193_v62 = vld [vmem:[%s409_s4] sm:$0x1] }
   0x7   :  { %266 = vmatprep.mubr.msk.f32.mxu0 %vm33_vm0, %v20_v8  ;;  %269 = vmatprep.mubr.msk.f32.mxu1 %vm33_vm0, %v22_v9  ;;  %v180_v0 = vld [vmem:[%s410_s3] sm:$0x1]  ;;  %v208_v2 = vsub.f32 1.0, %v193_v62  ;;  %v202_v9 = vrot.slane %v193_v62, %v173_v59 }
   0x9   :  { %279 = vmatpush3.bf16.msra.mxu0 %v276_v5  ;;  %294 = vmatpush3.bf16.msra.mxu1 %v276_v5 }
   0xa   :  { %281 = vmatprep.subr.bf16.mxu0 %v280_v10  ;;  %290 = vmatprep.subr.bf16.mxu1 %v280_v10 }
   0xd   :  { %283 = vmatpush3.bf16.msra.mxu0 %v280_v10  ;;  %295 = vmatpush3.bf16.msra.mxu1 %v280_v10  ;;  %v213_v10 = vrot.slane %v208_v2, %v173_v59 }
   0xe   :  { %285 = vmatprep.subr.bf16.mxu0 %v284_v13  ;;  %291 = vmatprep.subr.bf16.mxu1 %v284_v13 }
  0x11   :  { %287 = vmatpush3.bf16.msra.mxu0 %v284_v13  ;;  %296 = vmatpush3.bf16.msra.mxu1 %v284_v13 }
  0x12   :  { %264 = vmatprep.subr.mxu0 %v32_v14  ;;  %292 = vmatprep.subr.mxu1 %v32_v14 }
  0x15   :  { %265 = vmatpush3.msra.mxu0 %v32_v14  ;;  %297 = vmatpush3.msra.mxu1 %v32_v14 }
  0x16   :  { %267 = vmatmul.mubr.msk.f32.vlgmr.msra.gmra.mrb[0].mxu0 %vm33_vm0, %v21_v15  ;;  %270 = vmatmul.mubr.msk.f32.vlgmr.msra.gmra.mrb[0].mxu1 %vm33_vm0, %v23_v16 }
  0xe9   :  { %v268_v17 = vpop.f32.mrb[0].mxu0  ;;  %v271_v18 = vpop.f32.mrb[0].mxu1 }
  0xea   :  { %v133_v19 = vsel %vm131_vm1, %v268_v17, 0.0  ;;  %v147_v20 = vmul.f32 %v268_v17, %v268_v17  ;;  %v112_v21 = vpop.f32.mrb[1].mxu0  ;;  %v122_v22 = vpop.f32.mrb[1].mxu1  ;;  %v149_v30 = vmul.f32 %v271_v18, %v271_v18  ;;  %v137_v34 = vsel %vm131_vm1, %v271_v18, 0.0 }
  0xeb   :  { %v132_v23 = vsel %vm131_vm1, %v112_v21, 0.0  ;;  %v146_v24 = vmul.f32 %v112_v21, %v112_v21  ;;  %v135_v25 = vsel %vm131_vm1, %v122_v22, 0.0  ;;  %v148_v26 = vmul.f32 %v122_v22, %v122_v22 }
  0xec   :  { %v151_v27 = vsel %vm131_vm1, %v147_v20, 0.0  ;;  %v134_v28 = vadd.f32 %v133_v19, %v132_v23  ;;  %v155_v37 = vsel %vm131_vm1, %v149_v30, 0.0 }
  0xed   :  { %v150_v29 = vsel %vm131_vm1, %v146_v24, 0.0  ;;  %v153_v31 = vsel %vm131_vm1, %v148_v26, 0.0 }
  0xee   :  { %v152_v32 = vadd.f32 %v151_v27, %v150_v29  ;;  %v136_v33 = vadd.f32 %v135_v25, %v134_v28 }
  0xf0   :  { %v138_v35 = vadd.f32 %v137_v34, %v136_v33  ;;  %v154_v36 = vadd.f32 %v153_v31, %v152_v32 }
  0xf2   :  { %v139_v38 = vrot.slane %v138_v35, 4  ;;  %v156_v39 = vadd.f32 %v155_v37, %v154_v36 }
  0xf4   :  { %v140_v40 = vadd.f32 %v139_v38, %v138_v35  ;;  %v157_v41 = vrot.slane %v156_v39, 4 }
  0xf6   :  { %v141_v42 = vrot.slane %v140_v40, 2  ;;  %v158_v43 = vadd.f32 %v157_v41, %v156_v39 }
  0xf8   :  { %v142_v44 = vadd.f32 %v141_v42, %v140_v40  ;;  %v159_v45 = vrot.slane %v158_v43, 2 }
  0xfa   :  { %v143_v46 = vrot.slane %v142_v44, 1  ;;  %v160_v47 = vadd.f32 %v159_v45, %v158_v43 }
  0xfc   :  { %v144_v48 = vadd.f32 %v143_v46, %v142_v44  ;;  %v161_v49 = vrot.slane %v160_v47, 1 }
  0xfe   :  { %v145_v50 = vmul.f32 0.03125, %v144_v48  ;;  %v162_v51 = vadd.f32 %v161_v49, %v160_v47 }
 0x100   :  { %v163_v52 = vmul.f32 0.03125, %v162_v51  ;;  %v164_v53 = vmul.f32 %v145_v50, %v145_v50 }
 0x102   :  { %v165_v54 = vsub.f32 %v163_v52, %v164_v53 }
 0x104   :  { %v167_v55 = vadd.f32 1e-05, %v165_v54 }
 0x106   :  { %298 = vrsqrt.f32 %v167_v55 }
 0x110   :  { %v299_v60 = vpop.eup %298 }
 0x111   :  { %v169_v61 = vmul.f32 %v299_v60, %v166_v58 }
 0x113   :  { %v174_v63 = vrot.slane %v169_v61, %v173_v59  ;;  %v181_v1 = vmul.f32 %v169_v61, %v145_v50 }
 0x115   :  { %v176_v3 = vmul.f32 %v174_v63, %v112_v21  ;;  %v177_v4 = vmul.f32 %v268_v17, %v174_v63  ;;  %v178_v5 = vmul.f32 %v174_v63, %v122_v22  ;;  %v179_v6 = vmul.f32 %v271_v18, %v174_v63 }
 0x116   :  { %v182_v7 = vsub.f32 %v180_v0, %v181_v1 }
 0x118   :  { %v187_v8 = vrot.slane %v182_v7, %v173_v59 }
 0x11a   :  { %v189_v11 = vadd.f32 %v187_v8, %v176_v3  ;;  %v190_v12 = vadd.f32 %v187_v8, %v177_v4  ;;  %v191_v13 = vadd.f32 %v187_v8, %v178_v5  ;;  %v192_v14 = vadd.f32 %v187_v8, %v179_v6 }
 0x11c   :  { %v194_v15 = vmax.f32 %v189_v11, 0.0  ;;  %v195_v16 = vmax.f32 %v190_v12, 0.0  ;;  %v196_v19 = vmax.f32 %v191_v13, 0.0  ;;  %v197_v20 = vmax.f32 %v192_v14, 0.0 }
 0x11d   :  { %v215_v23 = vmul.f32 %v213_v10, %v189_v11  ;;  %v216_v24 = vmul.f32 %v213_v10, %v190_v12  ;;  %v217_v25 = vmul.f32 %v213_v10, %v191_v13  ;;  %v218_v26 = vmul.f32 %v213_v10, %v192_v14 }
 0x11e   :  { %v204_v21 = vmul.f32 %v202_v9, %v194_v15  ;;  %v205_v17 = vmul.f32 %v202_v9, %v195_v16  ;;  %v206_v22 = vmul.f32 %v202_v9, %v196_v19  ;;  %v207_v18 = vmul.f32 %v202_v9, %v197_v20 }
 0x120   :  { %v219_v27 = vadd.f32 %v215_v23, %v204_v21  ;;  %v220_v28 = vadd.f32 %v216_v24, %v205_v17  ;;  %v221_v29 = vadd.f32 %v217_v25, %v206_v22  ;;  %v222_v30 = vadd.f32 %v218_v26, %v207_v18 }
 0x122   :  { %223 = vst.msk [vmem:[%s411_s5] sm:$0xff] %vm131_vm1, %v219_v27  ;;  %224 = vst.msk [vmem:[%s411_s5 + $0x8] sm:$0xff] %vm131_vm1, %v220_v28 }
 0x123   :  { %225 = vst.msk [vmem:[%s411_s5 + $0x10] sm:$0xff] %vm131_vm1, %v221_v29  ;;  %226 = vst.msk [vmem:[%s411_s5 + $0x18] sm:$0xff] %vm131_vm1, %v222_v30 }

// kernel: _lambda_.23
= control target key start
LH: loop header
LB: loop body
LE: loop exit
PB: predicated region body
PF: predicated region fallthrough
CT: control target
= control target key end

     0   :  { %v277_v0 = vmov 0.0|0.0   ;;  %vm46_vm0 = vcmask 130048   ;;  %s450_s1 = inlined_call_operand.vmem [shape: f32[144,16], index: 1, kind: input, shape index: {}]   ;;  %s451_s0 = inlined_call_operand.vmem [shape: f32[32,144], index: 0, kind: input, shape index: {}]   ;;  %s452_s2 = inlined_call_operand.vmem [shape: f32[1,16], index: 2, kind: input, shape index: {}]   ;;  %s453_s3 = inlined_call_operand.vmem [shape: f32[1,16], index: 3, kind: input, shape index: {}]   ;;  %s454_s4 = inlined_call_operand.vmem [shape: f32[32,16], index: 4, kind: input, shape index: {}]   ;;  %s455_s5 = inlined_call_operand.vmem [shape: f32[32,16], index: 5, kind: output, shape index: {}]  }
   0x1   :  { %229 = vmatprep.subr.bf16.mxu0 %v277_v0  ;;  %v28_v1 = vld [vmem:[%s450_s1] sm:$0xff]  ;;  %v29_v2 = vld [vmem:[%s450_s1 + $0x8] sm:$0xff]  ;;  %256 = vmatprep.subr.bf16.mxu1 %v277_v0  ;;  %v30_v3 = vld [vmem:[%s450_s1 + $0x10] sm:$0xff] }
   0x2   :  { %v230_v4 = vpack.c.bf16 %v29_v2, %v28_v1  ;;  %v31_v5 = vld [vmem:[%s450_s1 + $0x18] sm:$0xff]  ;;  %v32_v7 = vld [vmem:[%s450_s1 + $0x20] sm:$0xff]  ;;  %v33_v8 = vld [vmem:[%s450_s1 + $0x28] sm:$0xff] }
   0x3   :  { %v233_v6 = vpack.c.bf16 %v31_v5, %v30_v3  ;;  %v21_v9 = vld [vmem:[%s451_s0 + $0x8] sm:$0xff]  ;;  %v236_v11 = vpack.c.bf16 %v33_v8, %v32_v7  ;;  %v34_v12 = vld [vmem:[%s450_s1 + $0x30] sm:$0xff]  ;;  %v35_v13 = vld [vmem:[%s450_s1 + $0x38] sm:$0xff] }
   0x4   :  { %231 = vmatpush1.bf16.msra.mxu0 %v230_v4  ;;  %265 = vmatpush1.bf16.msra.mxu1 %v230_v4  ;;  %v25_v10 = vld [vmem:[%s451_s0 + $0x28] sm:$0xff]  ;;  %v239_v14 = vpack.c.bf16 %v35_v13, %v34_v12  ;;  %v36_v15 = vld [vmem:[%s450_s1 + $0x40] sm:$0xff]  ;;  %v38_v18 = vld [vmem:[%s450_s1 + $0x50] sm:$0xff] }
   0x5   :  { %232 = vmatprep.subr.bf16.mxu0 %v277_v0  ;;  %257 = vmatprep.subr.bf16.mxu1 %v277_v0  ;;  %v37_v16 = vld [vmem:[%s450_s1 + $0x48] sm:$0xff]  ;;  %v39_v19 = vld [vmem:[%s450_s1 + $0x58] sm:$0xff]  ;;  %v40_v21 = vld [vmem:[%s450_s1 + $0x60] sm:$0xff] }
   0x6   :  { %225 = vmatprep.mubr.msk.f32.mxu0 %vm46_vm0, %v21_v9  ;;  %227 = vmatprep.mubr.msk.f32.mxu1 %vm46_vm0, %v25_v10  ;;  %v242_v17 = vpack.c.bf16 %v37_v16, %v36_v15  ;;  %v245_v20 = vpack.c.bf16 %v39_v19, %v38_v18  ;;  %v41_v22 = vld [vmem:[%s450_s1 + $0x68] sm:$0xff]  ;;  %v42_v24 = vld [vmem:[%s450_s1 + $0x70] sm:$0xff]  ;;  %v43_v25 = vld [vmem:[%s450_s1 + $0x78] sm:$0xff]  ;;  %v183_v15 = vlaneseq }
   0x7   :  { %v248_v23 = vpack.c.bf16 %v41_v22, %v40_v21  ;;  %v251_v26 = vpack.c.bf16 %v43_v25, %v42_v24  ;;  %v44_v27 = vld [vmem:[%s450_s1 + $0x80] sm:$0xff]  ;;  %v45_v28 = vld [vmem:[%s450_s1 + $0x88] sm:$0xff]  ;;  %v23_v32 = vld [vmem:[%s451_s0 + $0x18] sm:$0xff] }
   0x8   :  { %234 = vmatpush1.bf16.msra.mxu0 %v233_v6  ;;  %266 = vmatpush1.bf16.msra.mxu1 %v233_v6  ;;  %v254_v29 = vpack.c.bf16 %v45_v28, %v44_v27  ;;  %v20_v30 = vld [vmem:[%s451_s0] sm:$0xff]  ;;  %v27_v33 = vld [vmem:[%s451_s0 + $0x38] sm:$0xff]  ;;  %v22_v34 = vld [vmem:[%s451_s0 + $0x10] sm:$0xff]  ;;  %v184_v16 = vshrl.u32 %v183_v15, 7 }
   0x9   :  { %235 = vmatprep.subr.bf16.mxu0 %v277_v0  ;;  %258 = vmatprep.subr.bf16.mxu1 %v277_v0  ;;  %v24_v31 = vld [vmem:[%s451_s0 + $0x20] sm:$0xff]  ;;  %v26_v35 = vld [vmem:[%s451_s0 + $0x30] sm:$0xff] }
   0xa   :  { %v185_v18 = vsub.s32 0, %v184_v16  ;;  %v192_v22 = vld [vmem:[%s453_s3] sm:$0x1] }
   0xc   :  { %237 = vmatpush1.bf16.msra.mxu0 %v236_v11  ;;  %267 = vmatpush1.bf16.msra.mxu1 %v236_v11 }
   0xd   :  { %238 = vmatprep.subr.bf16.mxu0 %v277_v0  ;;  %259 = vmatprep.subr.bf16.mxu1 %v277_v0 }
  0x10   :  { %240 = vmatpush1.bf16.msra.mxu0 %v239_v14  ;;  %268 = vmatpush1.bf16.msra.mxu1 %v239_v14 }
  0x11   :  { %241 = vmatprep.subr.bf16.mxu0 %v277_v0  ;;  %260 = vmatprep.subr.bf16.mxu1 %v277_v0 }
  0x14   :  { %243 = vmatpush1.bf16.msra.mxu0 %v242_v17  ;;  %269 = vmatpush1.bf16.msra.mxu1 %v242_v17  ;;  %v178_v17 = vld [vmem:[%s452_s2] sm:$0x1] }
  0x15   :  { %244 = vmatprep.subr.bf16.mxu0 %v277_v0  ;;  %261 = vmatprep.subr.bf16.mxu1 %v277_v0 }
  0x18   :  { %246 = vmatpush1.bf16.msra.mxu0 %v245_v20  ;;  %270 = vmatpush1.bf16.msra.mxu1 %v245_v20 }
  0x19   :  { %247 = vmatprep.subr.bf16.mxu0 %v277_v0  ;;  %262 = vmatprep.subr.bf16.mxu1 %v277_v0 }
  0x1c   :  { %249 = vmatpush1.bf16.msra.mxu0 %v248_v23  ;;  %271 = vmatpush1.bf16.msra.mxu1 %v248_v23 }
  0x1d   :  { %250 = vmatprep.subr.bf16.mxu0 %v277_v0  ;;  %263 = vmatprep.subr.bf16.mxu1 %v277_v0 }
  0x20   :  { %252 = vmatpush1.bf16.msra.mxu0 %v251_v26  ;;  %272 = vmatpush1.bf16.msra.mxu1 %v251_v26 }
  0x21   :  { %253 = vmatprep.subr.bf16.mxu0 %v277_v0  ;;  %264 = vmatprep.subr.bf16.mxu1 %v277_v0 }
  0x24   :  { %255 = vmatpush1.bf16.msra.mxu0 %v254_v29  ;;  %273 = vmatpush1.bf16.msra.mxu1 %v254_v29 }
  0x27   :  { %124 = vmatmul.mubr.f32.vlgmr.msra.gmra.mrb[0].mxu0 %v20_v30  ;;  %134 = vmatmul.mubr.f32.vlgmr.msra.gmra.mrb[0].mxu1 %v24_v31  ;;  %v205_v30 = vld [vmem:[%s454_s4] sm:$0xff]  ;;  %v206_v31 = vld [vmem:[%s454_s4 + $0x8] sm:$0xff] }
  0x28   :  { %226 = vmatprep.mubr.msk.f32.mxu0 %vm46_vm0, %v23_v32  ;;  %228 = vmatprep.mubr.msk.f32.mxu1 %vm46_vm0, %v27_v33  ;;  %v207_v32 = vld [vmem:[%s454_s4 + $0x10] sm:$0xff]  ;;  %v208_v33 = vld [vmem:[%s454_s4 + $0x18] sm:$0xff] }
  0x2b   :  { %129 = vmatmul.mubr.f32.gmra.mrb[2].mxu0 %v22_v34  ;;  %139 = vmatmul.mubr.f32.gmra.mrb[2].mxu1 %v26_v35 }
  0xfa   :  { %v125_v36 = vpop.f32.mrb[0].mxu0  ;;  %v135_v37 = vpop.f32.mrb[0].mxu1 }
  0xfb   :  { %v127_v38 = vpop.f32.mrb[1].mxu0  ;;  %v137_v39 = vpop.f32.mrb[1].mxu1  ;;  %v158_v40 = vmul.f32 %v125_v36, %v125_v36  ;;  %v144_v41 = vsel %vm46_vm0, %v125_v36, 0.0  ;;  %v160_v44 = vmul.f32 %v135_v37, %v135_v37  ;;  %v147_v52 = vsel %vm46_vm0, %v135_v37, 0.0 }
  0xfd   :  { %v162_v51 = vsel %vm46_vm0, %v158_v40, 0.0  ;;  %v165_v57 = vsel %vm46_vm0, %v160_v44, 0.0 }
  0xfe   :  { %v130_v42 = vpop.f32.mrb[2].mxu0  ;;  %v140_v43 = vpop.f32.mrb[2].mxu1 }
  0xff   :  { %v145_v45 = vsel %vm46_vm0, %v130_v42, 0.0  ;;  %v159_v46 = vmul.f32 %v130_v42, %v130_v42  ;;  %v132_v47 = vpop.f32.mrb[3].mxu0  ;;  %v161_v48 = vmul.f32 %v140_v43, %v140_v43  ;;  %v142_v49 = vpop.f32.mrb[3].mxu1  ;;  %v149_v54 = vsel %vm46_vm0, %v140_v43, 0.0 }
 0x100   :  { %v146_v50 = vadd.f32 %v145_v45, %v144_v41 }
 0x101   :  { %v163_v53 = vsel %vm46_vm0, %v159_v46, 0.0  ;;  %v167_v58 = vsel %vm46_vm0, %v161_v48, 0.0 }
 0x102   :  { %v164_v55 = vadd.f32 %v163_v53, %v162_v51  ;;  %v148_v56 = vadd.f32 %v147_v52, %v146_v50 }
 0x104   :  { %v150_v59 = vadd.f32 %v149_v54, %v148_v56  ;;  %v166_v60 = vadd.f32 %v165_v57, %v164_v55 }
 0x106   :  { %v151_v61 = vrot.slane %v150_v59, 4  ;;  %v168_v62 = vadd.f32 %v167_v58, %v166_v60 }
 0x108   :  { %v152_v63 = vadd.f32 %v151_v61, %v150_v59  ;;  %v169_v0 = vrot.slane %v168_v62, 4 }
 0x10a   :  { %v153_v1 = vrot.slane %v152_v63, 2  ;;  %v170_v2 = vadd.f32 %v169_v0, %v168_v62 }
 0x10c   :  { %v154_v3 = vadd.f32 %v153_v1, %v152_v63  ;;  %v171_v4 = vrot.slane %v170_v2, 2 }
 0x10e   :  { %v155_v5 = vrot.slane %v154_v3, 1  ;;  %v172_v6 = vadd.f32 %v171_v4, %v170_v2 }
 0x110   :  { %v156_v7 = vadd.f32 %v155_v5, %v154_v3  ;;  %v173_v8 = vrot.slane %v172_v6, 1 }
 0x112   :  { %v157_v9 = vmul.f32 0.03125, %v156_v7  ;;  %v174_v10 = vadd.f32 %v173_v8, %v172_v6 }
 0x114   :  { %v175_v11 = vmul.f32 0.03125, %v174_v10  ;;  %v176_v12 = vmul.f32 %v157_v9, %v157_v9 }
 0x116   :  { %v177_v13 = vsub.f32 %v175_v11, %v176_v12 }
 0x118   :  { %v179_v14 = vadd.f32 1e-05, %v177_v13 }
 0x11a   :  { %275 = vrsqrt.f32 %v179_v14 }
 0x124   :  { %v276_v19 = vpop.eup %275 }
 0x125   :  { %v181_v20 = vmul.f32 %v276_v19, %v178_v17 }
 0x127   :  { %v186_v21 = vrot.slane %v181_v20, %v185_v18  ;;  %v193_v23 = vmul.f32 %v181_v20, %v157_v9 }
 0x129   :  { %v188_v24 = vmul.f32 %v186_v21, %v125_v36  ;;  %v189_v25 = vmul.f32 %v186_v21, %v130_v42  ;;  %v190_v26 = vmul.f32 %v186_v21, %v135_v37  ;;  %v191_v27 = vmul.f32 %v186_v21, %v140_v43 }
 0x12a   :  { %v194_v28 = vsub.f32 %v192_v22, %v193_v23 }
 0x12c   :  { %v199_v29 = vrot.slane %v194_v28, %v185_v18 }
 0x12e   :  { %v201_v34 = vadd.f32 %v199_v29, %v188_v24  ;;  %v202_v35 = vadd.f32 %v199_v29, %v189_v25  ;;  %v203_v36 = vadd.f32 %v199_v29, %v190_v26  ;;  %v204_v37 = vadd.f32 %v199_v29, %v191_v27 }
 0x130   :  { %v209_v38 = vadd.f32 %v205_v30, %v201_v34  ;;  %v210_v39 = vadd.f32 %v206_v31, %v202_v35  ;;  %v211_v40 = vadd.f32 %v207_v32, %v203_v36  ;;  %v212_v41 = vadd.f32 %v208_v33, %v204_v37 }
 0x132   :  { %v213_v42 = vmax.f32 %v209_v38, 0.0  ;;  %v214_v43 = vmax.f32 %v210_v39, 0.0  ;;  %v215_v44 = vmax.f32 %v211_v40, 0.0  ;;  %v216_v45 = vmax.f32 %v212_v41, 0.0 }
 0x134   :  { %217 = vst.msk [vmem:[%s455_s5] sm:$0xff] %vm46_vm0, %v213_v42  ;;  %218 = vst.msk [vmem:[%s455_s5 + $0x8] sm:$0xff] %vm46_vm0, %v214_v43 }
 0x135   :  { %219 = vst.msk [vmem:[%s455_s5 + $0x10] sm:$0xff] %vm46_vm0, %v215_v44  ;;  %220 = vst.msk [vmem:[%s455_s5 + $0x18] sm:$0xff] %vm46_vm0, %v216_v45 }

// kernel: _lambda_.24
= control target key start
LH: loop header
LB: loop body
LE: loop exit
PB: predicated region body
PF: predicated region fallthrough
CT: control target
= control target key end

     0   :  { %v295_v0 = vmov 0.0|0.0   ;;  %vm46_vm0 = vcmask 130048   ;;  %s459_s1 = inlined_call_operand.vmem [shape: f32[144,16], index: 1, kind: input, shape index: {}]   ;;  %s460_s0 = inlined_call_operand.vmem [shape: f32[32,144], index: 0, kind: input, shape index: {}]   ;;  %s461_s2 = inlined_call_operand.vmem [shape: f32[1,16], index: 2, kind: input, shape index: {}, may-alias: {2,4}]   ;;  %s462_s4 = inlined_call_operand.vmem [shape: f32[1,16], index: 4, kind: input, shape index: {}, may-alias: {2,4}]   ;;  %s463_s3 = inlined_call_operand.vmem [shape: f32[1,16], index: 3, kind: input, shape index: {}]   ;;  %s464_s5 = inlined_call_operand.vmem [shape: f32[32,16], index: 5, kind: output, shape index: {}]  }
   0x1   :  { %247 = vmatprep.subr.bf16.mxu0 %v295_v0  ;;  %v28_v1 = vld [vmem:[%s459_s1] sm:$0xff]  ;;  %v29_v2 = vld [vmem:[%s459_s1 + $0x8] sm:$0xff]  ;;  %274 = vmatprep.subr.bf16.mxu1 %v295_v0  ;;  %v30_v3 = vld [vmem:[%s459_s1 + $0x10] sm:$0xff] }
   0x2   :  { %v248_v4 = vpack.c.bf16 %v29_v2, %v28_v1  ;;  %v31_v5 = vld [vmem:[%s459_s1 + $0x18] sm:$0xff]  ;;  %v32_v7 = vld [vmem:[%s459_s1 + $0x20] sm:$0xff]  ;;  %v33_v8 = vld [vmem:[%s459_s1 + $0x28] sm:$0xff] }
   0x3   :  { %v251_v6 = vpack.c.bf16 %v31_v5, %v30_v3  ;;  %v21_v9 = vld [vmem:[%s460_s0 + $0x8] sm:$0xff]  ;;  %v254_v11 = vpack.c.bf16 %v33_v8, %v32_v7  ;;  %v34_v12 = vld [vmem:[%s459_s1 + $0x30] sm:$0xff]  ;;  %v35_v13 = vld [vmem:[%s459_s1 + $0x38] sm:$0xff] }
   0x4   :  { %249 = vmatpush1.bf16.msra.mxu0 %v248_v4  ;;  %283 = vmatpush1.bf16.msra.mxu1 %v248_v4  ;;  %v25_v10 = vld [vmem:[%s460_s0 + $0x28] sm:$0xff]  ;;  %v257_v14 = vpack.c.bf16 %v35_v13, %v34_v12  ;;  %v36_v15 = vld [vmem:[%s459_s1 + $0x40] sm:$0xff]  ;;  %v38_v18 = vld [vmem:[%s459_s1 + $0x50] sm:$0xff] }
   0x5   :  { %250 = vmatprep.subr.bf16.mxu0 %v295_v0  ;;  %275 = vmatprep.subr.bf16.mxu1 %v295_v0  ;;  %v37_v16 = vld [vmem:[%s459_s1 + $0x48] sm:$0xff]  ;;  %v39_v19 = vld [vmem:[%s459_s1 + $0x58] sm:$0xff]  ;;  %v40_v21 = vld [vmem:[%s459_s1 + $0x60] sm:$0xff] }
   0x6   :  { %243 = vmatprep.mubr.msk.f32.mxu0 %vm46_vm0, %v21_v9  ;;  %245 = vmatprep.mubr.msk.f32.mxu1 %vm46_vm0, %v25_v10  ;;  %v260_v17 = vpack.c.bf16 %v37_v16, %v36_v15  ;;  %v263_v20 = vpack.c.bf16 %v39_v19, %v38_v18  ;;  %v41_v22 = vld [vmem:[%s459_s1 + $0x68] sm:$0xff]  ;;  %v42_v24 = vld [vmem:[%s459_s1 + $0x70] sm:$0xff]  ;;  %v43_v25 = vld [vmem:[%s459_s1 + $0x78] sm:$0xff]  ;;  %v183_v15 = vlaneseq }
   0x7   :  { %v266_v23 = vpack.c.bf16 %v41_v22, %v40_v21  ;;  %v269_v26 = vpack.c.bf16 %v43_v25, %v42_v24  ;;  %v44_v27 = vld [vmem:[%s459_s1 + $0x80] sm:$0xff]  ;;  %v45_v28 = vld [vmem:[%s459_s1 + $0x88] sm:$0xff]  ;;  %v23_v32 = vld [vmem:[%s460_s0 + $0x18] sm:$0xff] }
   0x8   :  { %252 = vmatpush1.bf16.msra.mxu0 %v251_v6  ;;  %284 = vmatpush1.bf16.msra.mxu1 %v251_v6  ;;  %v272_v29 = vpack.c.bf16 %v45_v28, %v44_v27  ;;  %v20_v30 = vld [vmem:[%s460_s0] sm:$0xff]  ;;  %v27_v33 = vld [vmem:[%s460_s0 + $0x38] sm:$0xff]  ;;  %v22_v34 = vld [vmem:[%s460_s0 + $0x10] sm:$0xff]  ;;  %v184_v16 = vshrl.u32 %v183_v15, 7 }
   0x9   :  { %253 = vmatprep.subr.bf16.mxu0 %v295_v0  ;;  %276 = vmatprep.subr.bf16.mxu1 %v295_v0  ;;  %v24_v31 = vld [vmem:[%s460_s0 + $0x20] sm:$0xff]  ;;  %v26_v35 = vld [vmem:[%s460_s0 + $0x30] sm:$0xff] }
   0xa   :  { %v185_v18 = vsub.s32 0, %v184_v16  ;;  %v205_v21 = vld [vmem:[%s462_s4] sm:$0x1] }
   0xb   :  { %v220_v25 = vsub.f32 1.0, %v205_v21 }
   0xc   :  { %255 = vmatpush1.bf16.msra.mxu0 %v254_v11  ;;  %285 = vmatpush1.bf16.msra.mxu1 %v254_v11 }
   0xd   :  { %256 = vmatprep.subr.bf16.mxu0 %v295_v0  ;;  %277 = vmatprep.subr.bf16.mxu1 %v295_v0 }
  0x10   :  { %258 = vmatpush1.bf16.msra.mxu0 %v257_v14  ;;  %286 = vmatpush1.bf16.msra.mxu1 %v257_v14 }
  0x11   :  { %259 = vmatprep.subr.bf16.mxu0 %v295_v0  ;;  %278 = vmatprep.subr.bf16.mxu1 %v295_v0 }
  0x14   :  { %261 = vmatpush1.bf16.msra.mxu0 %v260_v17  ;;  %287 = vmatpush1.bf16.msra.mxu1 %v260_v17  ;;  %v178_v17 = vld [vmem:[%s461_s2] sm:$0x1] }
  0x15   :  { %262 = vmatprep.subr.bf16.mxu0 %v295_v0  ;;  %279 = vmatprep.subr.bf16.mxu1 %v295_v0 }
  0x18   :  { %264 = vmatpush1.bf16.msra.mxu0 %v263_v20  ;;  %288 = vmatpush1.bf16.msra.mxu1 %v263_v20 }
  0x19   :  { %265 = vmatprep.subr.bf16.mxu0 %v295_v0  ;;  %280 = vmatprep.subr.bf16.mxu1 %v295_v0 }
  0x1c   :  { %267 = vmatpush1.bf16.msra.mxu0 %v266_v23  ;;  %289 = vmatpush1.bf16.msra.mxu1 %v266_v23  ;;  %v192_v23 = vld [vmem:[%s463_s3] sm:$0x1] }
  0x1d   :  { %268 = vmatprep.subr.bf16.mxu0 %v295_v0  ;;  %281 = vmatprep.subr.bf16.mxu1 %v295_v0 }
  0x20   :  { %270 = vmatpush1.bf16.msra.mxu0 %v269_v26  ;;  %290 = vmatpush1.bf16.msra.mxu1 %v269_v26 }
  0x21   :  { %271 = vmatprep.subr.bf16.mxu0 %v295_v0  ;;  %282 = vmatprep.subr.bf16.mxu1 %v295_v0 }
  0x24   :  { %273 = vmatpush1.bf16.msra.mxu0 %v272_v29  ;;  %291 = vmatpush1.bf16.msra.mxu1 %v272_v29 }
  0x27   :  { %124 = vmatmul.mubr.f32.vlgmr.msra.gmra.mrb[0].mxu0 %v20_v30  ;;  %134 = vmatmul.mubr.f32.vlgmr.msra.gmra.mrb[0].mxu1 %v24_v31 }
  0x28   :  { %244 = vmatprep.mubr.msk.f32.mxu0 %vm46_vm0, %v23_v32  ;;  %246 = vmatprep.mubr.msk.f32.mxu1 %vm46_vm0, %v27_v33  ;;  %v214_v32 = vrot.slane %v205_v21, %v185_v18  ;;  %v225_v33 = vrot.slane %v220_v25, %v185_v18 }
  0x2b   :  { %129 = vmatmul.mubr.f32.gmra.mrb[2].mxu0 %v22_v34  ;;  %139 = vmatmul.mubr.f32.gmra.mrb[2].mxu1 %v26_v35 }
  0xfa   :  { %v125_v36 = vpop.f32.mrb[0].mxu0  ;;  %v135_v37 = vpop.f32.mrb[0].mxu1 }
  0xfb   :  { %v127_v38 = vpop.f32.mrb[1].mxu0  ;;  %v137_v39 = vpop.f32.mrb[1].mxu1  ;;  %v158_v40 = vmul.f32 %v125_v36, %v125_v36  ;;  %v144_v41 = vsel %vm46_vm0, %v125_v36, 0.0  ;;  %v160_v44 = vmul.f32 %v135_v37, %v135_v37  ;;  %v147_v52 = vsel %vm46_vm0, %v135_v37, 0.0 }
  0xfd   :  { %v162_v51 = vsel %vm46_vm0, %v158_v40, 0.0  ;;  %v165_v57 = vsel %vm46_vm0, %v160_v44, 0.0 }
  0xfe   :  { %v130_v42 = vpop.f32.mrb[2].mxu0  ;;  %v140_v43 = vpop.f32.mrb[2].mxu1 }
  0xff   :  { %v145_v45 = vsel %vm46_vm0, %v130_v42, 0.0  ;;  %v159_v46 = vmul.f32 %v130_v42, %v130_v42  ;;  %v132_v47 = vpop.f32.mrb[3].mxu0  ;;  %v161_v48 = vmul.f32 %v140_v43, %v140_v43  ;;  %v142_v49 = vpop.f32.mrb[3].mxu1  ;;  %v149_v54 = vsel %vm46_vm0, %v140_v43, 0.0 }
 0x100   :  { %v146_v50 = vadd.f32 %v145_v45, %v144_v41 }
 0x101   :  { %v163_v53 = vsel %vm46_vm0, %v159_v46, 0.0  ;;  %v167_v58 = vsel %vm46_vm0, %v161_v48, 0.0 }
 0x102   :  { %v164_v55 = vadd.f32 %v163_v53, %v162_v51  ;;  %v148_v56 = vadd.f32 %v147_v52, %v146_v50 }
 0x104   :  { %v150_v59 = vadd.f32 %v149_v54, %v148_v56  ;;  %v166_v60 = vadd.f32 %v165_v57, %v164_v55 }
 0x106   :  { %v151_v61 = vrot.slane %v150_v59, 4  ;;  %v168_v62 = vadd.f32 %v167_v58, %v166_v60 }
 0x108   :  { %v152_v63 = vadd.f32 %v151_v61, %v150_v59  ;;  %v169_v0 = vrot.slane %v168_v62, 4 }
 0x10a   :  { %v153_v1 = vrot.slane %v152_v63, 2  ;;  %v170_v2 = vadd.f32 %v169_v0, %v168_v62 }
 0x10c   :  { %v154_v3 = vadd.f32 %v153_v1, %v152_v63  ;;  %v171_v4 = vrot.slane %v170_v2, 2 }
 0x10e   :  { %v155_v5 = vrot.slane %v154_v3, 1  ;;  %v172_v6 = vadd.f32 %v171_v4, %v170_v2 }
 0x110   :  { %v156_v7 = vadd.f32 %v155_v5, %v154_v3  ;;  %v173_v8 = vrot.slane %v172_v6, 1 }
 0x112   :  { %v157_v9 = vmul.f32 0.03125, %v156_v7  ;;  %v174_v10 = vadd.f32 %v173_v8, %v172_v6 }
 0x114   :  { %v175_v11 = vmul.f32 0.03125, %v174_v10  ;;  %v176_v12 = vmul.f32 %v157_v9, %v157_v9 }
 0x116   :  { %v177_v13 = vsub.f32 %v175_v11, %v176_v12 }
 0x118   :  { %v179_v14 = vadd.f32 1e-05, %v177_v13 }
 0x11a   :  { %293 = vrsqrt.f32 %v179_v14 }
 0x124   :  { %v294_v19 = vpop.eup %293 }
 0x125   :  { %v181_v20 = vmul.f32 %v294_v19, %v178_v17 }
 0x127   :  { %v186_v22 = vrot.slane %v181_v20, %v185_v18  ;;  %v193_v24 = vmul.f32 %v181_v20, %v157_v9 }
 0x129   :  { %v188_v26 = vmul.f32 %v186_v22, %v125_v36  ;;  %v189_v27 = vmul.f32 %v186_v22, %v130_v42  ;;  %v190_v28 = vmul.f32 %v186_v22, %v135_v37  ;;  %v191_v29 = vmul.f32 %v186_v22, %v140_v43 }
 0x12a   :  { %v194_v30 = vsub.f32 %v192_v23, %v193_v24 }
 0x12c   :  { %v199_v31 = vrot.slane %v194_v30, %v185_v18 }
 0x12e   :  { %v201_v34 = vadd.f32 %v199_v31, %v188_v26  ;;  %v202_v35 = vadd.f32 %v199_v31, %v189_v27  ;;  %v203_v38 = vadd.f32 %v199_v31, %v190_v28  ;;  %v204_v39 = vadd.f32 %v199_v31, %v191_v29 }
 0x130   :  { %v206_v40 = vmax.f32 %v201_v34, 0.0  ;;  %v207_v41 = vmax.f32 %v202_v35, 0.0  ;;  %v208_v44 = vmax.f32 %v203_v38, 0.0  ;;  %v209_v45 = vmax.f32 %v204_v39, 0.0 }
 0x131   :  { %v227_v46 = vmul.f32 %v225_v33, %v201_v34  ;;  %v228_v47 = vmul.f32 %v225_v33, %v202_v35  ;;  %v229_v48 = vmul.f32 %v225_v33, %v203_v38  ;;  %v230_v49 = vmul.f32 %v225_v33, %v204_v39 }
 0x132   :  { %v216_v36 = vmul.f32 %v214_v32, %v206_v40  ;;  %v217_v42 = vmul.f32 %v214_v32, %v207_v41  ;;  %v218_v37 = vmul.f32 %v214_v32, %v208_v44  ;;  %v219_v43 = vmul.f32 %v214_v32, %v209_v45 }
 0x134   :  { %v231_v50 = vadd.f32 %v227_v46, %v216_v36  ;;  %v232_v51 = vadd.f32 %v228_v47, %v217_v42  ;;  %v233_v52 = vadd.f32 %v229_v48, %v218_v37  ;;  %v234_v53 = vadd.f32 %v230_v49, %v219_v43 }
 0x136   :  { %235 = vst.msk [vmem:[%s464_s5] sm:$0xff] %vm46_vm0, %v231_v50  ;;  %236 = vst.msk [vmem:[%s464_s5 + $0x8] sm:$0xff] %vm46_vm0, %v232_v51 }
 0x137   :  { %237 = vst.msk [vmem:[%s464_s5 + $0x10] sm:$0xff] %vm46_vm0, %v233_v52  ;;  %238 = vst.msk [vmem:[%s464_s5 + $0x18] sm:$0xff] %vm46_vm0, %v234_v53 }

// kernel: _lambda_.26
= control target key start
LH: loop header
LB: loop body
LE: loop exit
PB: predicated region body
PF: predicated region fallthrough
CT: control target
= control target key end

     0   :  { %v209_v0 = vmov 0.0|0.0   ;;  %vm40_vm0 = vcmask 130048   ;;  %vm114_vm1 = vcmask 523264   ;;  %v139_v52 = vlaneseq  ;;  %s315_s1 = inlined_call_operand.vmem [shape: f32[144,64], index: 1, kind: input, shape index: {}]   ;;  %s316_s0 = inlined_call_operand.vmem [shape: f32[8,144], index: 0, kind: input, shape index: {}]   ;;  %s317_s2 = inlined_call_operand.vmem [shape: f32[1,64], index: 2, kind: input, shape index: {}]   ;;  %s318_s3 = inlined_call_operand.vmem [shape: f32[1,64], index: 3, kind: input, shape index: {}]   ;;  %s319_s4 = inlined_call_operand.vmem [shape: f32[1,64], index: 4, kind: input, shape index: {}]   ;;  %s320_s5 = inlined_call_operand.vmem [shape: f32[8,64], index: 5, kind: output, shape index: {}]  }
   0x1   :  { %179 = vmatprep.subr.bf16.mxu0 %v209_v0  ;;  %v22_v1 = vld [vmem:[%s315_s1] sm:$0xff]  ;;  %v23_v2 = vld [vmem:[%s315_s1 + $0x8] sm:$0xff]  ;;  %v24_v3 = vld [vmem:[%s315_s1 + $0x10] sm:$0xff] }
   0x2   :  { %v180_v4 = vpack.c.bf16 %v23_v2, %v22_v1  ;;  %v25_v5 = vld [vmem:[%s315_s1 + $0x18] sm:$0xff]  ;;  %v26_v7 = vld [vmem:[%s315_s1 + $0x20] sm:$0xff]  ;;  %v27_v8 = vld [vmem:[%s315_s1 + $0x28] sm:$0xff]  ;;  %v140_v53 = vshrl.u32 %v139_v52, 7 }
   0x3   :  { %v183_v6 = vpack.c.bf16 %v25_v5, %v24_v3  ;;  %v21_v9 = vld [vmem:[%s316_s0 + $0x8] sm:$0xff]  ;;  %v186_v10 = vpack.c.bf16 %v27_v8, %v26_v7  ;;  %v28_v11 = vld [vmem:[%s315_s1 + $0x30] sm:$0xff]  ;;  %v29_v12 = vld [vmem:[%s315_s1 + $0x38] sm:$0xff] }
   0x4   :  { %181 = vmatpush1.bf16.msra.mxu0 %v180_v4  ;;  %178 = vmatprep.mubr.msk.f32.mxu0 %vm40_vm0, %v21_v9  ;;  %v189_v13 = vpack.c.bf16 %v29_v12, %v28_v11  ;;  %v30_v14 = vld [vmem:[%s315_s1 + $0x40] sm:$0xff]  ;;  %v31_v15 = vld [vmem:[%s315_s1 + $0x48] sm:$0xff]  ;;  %v32_v17 = vld [vmem:[%s315_s1 + $0x50] sm:$0xff]  ;;  %v141_v55 = vsub.s32 0, %v140_v53 }
   0x5   :  { %182 = vmatprep.subr.bf16.mxu0 %v209_v0  ;;  %v192_v16 = vpack.c.bf16 %v31_v15, %v30_v14  ;;  %v33_v18 = vld [vmem:[%s315_s1 + $0x58] sm:$0xff]  ;;  %v34_v20 = vld [vmem:[%s315_s1 + $0x60] sm:$0xff]  ;;  %v35_v21 = vld [vmem:[%s315_s1 + $0x68] sm:$0xff] }
   0x6   :  { %v195_v19 = vpack.c.bf16 %v33_v18, %v32_v17  ;;  %v198_v22 = vpack.c.bf16 %v35_v21, %v34_v20  ;;  %v36_v23 = vld [vmem:[%s315_s1 + $0x70] sm:$0xff]  ;;  %v37_v24 = vld [vmem:[%s315_s1 + $0x78] sm:$0xff]  ;;  %v38_v26 = vld [vmem:[%s315_s1 + $0x80] sm:$0xff] }
   0x7   :  { %v201_v25 = vpack.c.bf16 %v37_v24, %v36_v23  ;;  %v39_v27 = vld [vmem:[%s315_s1 + $0x88] sm:$0xff]  ;;  %v20_v29 = vld [vmem:[%s316_s0] sm:$0xff] }
   0x8   :  { %184 = vmatpush1.bf16.msra.mxu0 %v183_v6  ;;  %v204_v28 = vpack.c.bf16 %v39_v27, %v38_v26  ;;  %v134_v54 = vld [vmem:[%s317_s2] sm:$0x1] }
   0x9   :  { %185 = vmatprep.subr.bf16.mxu0 %v209_v0  ;;  %v145_v58 = vld [vmem:[%s318_s3] sm:$0x1] }
   0xa   :  { %v155_v59 = vld [vmem:[%s319_s4] sm:$0x1] }
   0xb   :  { %v164_v63 = vsub.f32 1.0, %v155_v59  ;;  %v161_v3 = vrot.slane %v155_v59, %v141_v55 }
   0xc   :  { %187 = vmatpush1.bf16.msra.mxu0 %v186_v10 }
   0xd   :  { %188 = vmatprep.subr.bf16.mxu0 %v209_v0  ;;  %v169_v4 = vrot.slane %v164_v63, %v141_v55 }
  0x10   :  { %190 = vmatpush1.bf16.msra.mxu0 %v189_v13 }
  0x11   :  { %191 = vmatprep.subr.bf16.mxu0 %v209_v0 }
  0x14   :  { %193 = vmatpush1.bf16.msra.mxu0 %v192_v16 }
  0x15   :  { %194 = vmatprep.subr.bf16.mxu0 %v209_v0 }
  0x18   :  { %196 = vmatpush1.bf16.msra.mxu0 %v195_v19 }
  0x19   :  { %197 = vmatprep.subr.bf16.mxu0 %v209_v0 }
  0x1c   :  { %199 = vmatpush1.bf16.msra.mxu0 %v198_v22 }
  0x1d   :  { %200 = vmatprep.subr.bf16.mxu0 %v209_v0 }
  0x20   :  { %202 = vmatpush1.bf16.msra.mxu0 %v201_v25 }
  0x21   :  { %203 = vmatprep.subr.bf16.mxu0 %v209_v0 }
  0x24   :  { %205 = vmatpush1.bf16.msra.mxu0 %v204_v28 }
  0x27   :  { %109 = vmatmul.mubr.f32.vlgmr.msra.gmra.mrb[0].mxu0 %v20_v29 }
  0xfa   :  { %v110_v30 = vpop.f32.mrb[0].mxu0 }
  0xfb   :  { %v115_v31 = vsel %vm114_vm1, %v110_v30, 0.0  ;;  %v123_v32 = vmul.f32 %v110_v30, %v110_v30  ;;  %v112_v33 = vpop.f32.mrb[1].mxu0 }
  0xfc   :  { %v116_v34 = vrot.slane %v115_v31, 4 }
  0xfd   :  { %v124_v35 = vsel %vm114_vm1, %v123_v32, 0.0 }
  0xfe   :  { %v117_v36 = vadd.f32 %v116_v34, %v115_v31  ;;  %v125_v37 = vrot.slane %v124_v35, 4 }
 0x100   :  { %v118_v38 = vrot.slane %v117_v36, 2  ;;  %v126_v39 = vadd.f32 %v125_v37, %v124_v35 }
 0x102   :  { %v119_v40 = vadd.f32 %v118_v38, %v117_v36  ;;  %v127_v41 = vrot.slane %v126_v39, 2 }
 0x104   :  { %v120_v42 = vrot.slane %v119_v40, 1  ;;  %v128_v43 = vadd.f32 %v127_v41, %v126_v39 }
 0x106   :  { %v121_v44 = vadd.f32 %v120_v42, %v119_v40  ;;  %v129_v45 = vrot.slane %v128_v43, 1 }
 0x108   :  { %v122_v46 = vmul.f32 0.125, %v121_v44  ;;  %v130_v47 = vadd.f32 %v129_v45, %v128_v43 }
 0x10a   :  { %v131_v48 = vmul.f32 0.125, %v130_v47  ;;  %v132_v49 = vmul.f32 %v122_v46, %v122_v46 }
 0x10c   :  { %v133_v50 = vsub.f32 %v131_v48, %v132_v49 }
 0x10e   :  { %v135_v51 = vadd.f32 1e-05, %v133_v50 }
 0x110   :  { %207 = vrsqrt.f32 %v135_v51 }
 0x11a   :  { %v208_v56 = vpop.eup %207 }
 0x11b   :  { %v137_v57 = vmul.f32 %v208_v56, %v134_v54 }
 0x11d   :  { %v142_v60 = vrot.slane %v137_v57, %v141_v55  ;;  %v146_v61 = vmul.f32 %v137_v57, %v122_v46 }
 0x11f   :  { %v147_v62 = vsub.f32 %v145_v58, %v146_v61  ;;  %v144_v0 = vmul.f32 %v142_v60, %v110_v30 }
 0x121   :  { %v152_v1 = vrot.slane %v147_v62, %v141_v55 }
 0x123   :  { %v154_v2 = vadd.f32 %v152_v1, %v144_v0 }
 0x125   :  { %v156_v5 = vmax.f32 %v154_v2, 0.0  ;;  %v171_v7 = vmul.f32 %v169_v4, %v154_v2 }
 0x127   :  { %v163_v6 = vmul.f32 %v161_v3, %v156_v5 }
 0x129   :  { %v172_v8 = vadd.f32 %v171_v7, %v163_v6 }
 0x12b   :  { %173 = vst.msk [vmem:[%s320_s5] sm:$0xff] %vm114_vm1, %v172_v8 }

// kernel: _lambda_.27
= control target key start
LH: loop header
LB: loop body
LE: loop exit
PB: predicated region body
PF: predicated region fallthrough
CT: control target
= control target key end

     0   :  { %v346_v3 = vmov 0.0|0.0   ;;  %vm347_vm0 = vmmov 0   ;;  %v348_v4 = vmov 0.0   ;;  %vm59_vm1 = vcmask 261120   ;;  %s512_s1 = inlined_call_operand.vmem [shape: f32[288,32], index: 1, kind: input, shape index: {}]   ;;  %s513_s0 = inlined_call_operand.vmem [shape: f32[8,288], index: 0, kind: input, shape index: {}]   ;;  %s514_s2 = inlined_call_operand.vmem [shape: f32[1,32], index: 2, kind: input, shape index: {}]   ;;  %s515_s3 = inlined_call_operand.vmem [shape: f32[1,32], index: 3, kind: input, shape index: {}]   ;;  %s516_s4 = inlined_call_operand.vmem [shape: f32[8,32], index: 4, kind: input, shape index: {}]   ;;  %s517_s5 = inlined_call_operand.vmem [shape: f32[8,32], index: 5, kind: output, shape index: {}]  }
   0x1   :  { %v39_v0 = vld [vmem:[%s512_s1 + $0x80] sm:$0xff]  ;;  %v40_v1 = vld [vmem:[%s512_s1 + $0x88] sm:$0xff]  ;;  %335 = vmatprep.subr.bf16.mxu1 %v346_v3  ;;  %300 = vmatprep.mubr.msk.f32.mxu1 %vm347_vm0, %v348_v4  ;;  %v41_v7 = vld [vmem:[%s512_s1 + $0x90] sm:$0xff] }
   0x2   :  { %v23_v2 = vld [vmem:[%s512_s1] sm:$0xff]  ;;  %v303_v5 = vpack.c.bf16 %v40_v1, %v39_v0  ;;  %v24_v6 = vld [vmem:[%s512_s1 + $0x8] sm:$0xff]  ;;  %v42_v8 = vld [vmem:[%s512_s1 + $0x98] sm:$0xff] }
   0x3   :  { %v305_v9 = vpack.c.bf16 %v24_v6, %v23_v2  ;;  %v307_v10 = vpack.c.bf16 %v42_v8, %v41_v7  ;;  %v25_v11 = vld [vmem:[%s512_s1 + $0x10] sm:$0xff]  ;;  %v26_v12 = vld [vmem:[%s512_s1 + $0x18] sm:$0xff]  ;;  %v43_v13 = vld [vmem:[%s512_s1 + $0xa0] sm:$0xff] }
   0x4   :  { %304 = vmatprep.subr.bf16.mxu0 %v303_v5  ;;  %v44_v14 = vld [vmem:[%s512_s1 + $0xa8] sm:$0xff]  ;;  %v309_v15 = vpack.c.bf16 %v26_v12, %v25_v11  ;;  %v27_v17 = vld [vmem:[%s512_s1 + $0x20] sm:$0xff]  ;;  %v45_v19 = vld [vmem:[%s512_s1 + $0xb0] sm:$0xff] }
   0x5   :  { %306 = vmatpush3.bf16.msra.mxu0 %v305_v9  ;;  %v311_v16 = vpack.c.bf16 %v44_v14, %v43_v13  ;;  %v28_v18 = vld [vmem:[%s512_s1 + $0x28] sm:$0xff]  ;;  %v46_v20 = vld [vmem:[%s512_s1 + $0xb8] sm:$0xff]  ;;  %v29_v22 = vld [vmem:[%s512_s1 + $0x30] sm:$0xff] }
   0x6   :  { %308 = vmatprep.subr.bf16.mxu0 %v307_v10  ;;  %v313_v21 = vpack.c.bf16 %v28_v18, %v27_v17  ;;  %v315_v23 = vpack.c.bf16 %v46_v20, %v45_v19  ;;  %v30_v24 = vld [vmem:[%s512_s1 + $0x38] sm:$0xff]  ;;  %v55_v25 = vld [vmem:[%s512_s1 + $0x100] sm:$0xff]  ;;  %v56_v26 = vld [vmem:[%s512_s1 + $0x108] sm:$0xff] }
   0x7   :  { %v47_v27 = vld [vmem:[%s512_s1 + $0xc0] sm:$0xff]  ;;  %v48_v28 = vld [vmem:[%s512_s1 + $0xc8] sm:$0xff]  ;;  %v336_v29 = vpack.c.bf16 %v56_v26, %v55_v25  ;;  %v57_v31 = vld [vmem:[%s512_s1 + $0x110] sm:$0xff]  ;;  %v317_v32 = vpack.c.bf16 %v30_v24, %v29_v22 }
   0x8   :  { %v21_v30 = vld [vmem:[%s513_s0 + $0x8] sm:$0xff]  ;;  %v58_v33 = vld [vmem:[%s512_s1 + $0x118] sm:$0xff]  ;;  %v319_v34 = vpack.c.bf16 %v48_v28, %v47_v27  ;;  %v31_v35 = vld [vmem:[%s512_s1 + $0x40] sm:$0xff] }
   0x9   :  { %310 = vmatpush3.bf16.msra.mxu0 %v309_v15  ;;  %337 = vmatpush3.bf16.msra.mxu1 %v336_v29  ;;  %v32_v36 = vld [vmem:[%s512_s1 + $0x48] sm:$0xff]  ;;  %v339_v37 = vpack.c.bf16 %v58_v33, %v57_v31  ;;  %v49_v38 = vld [vmem:[%s512_s1 + $0xd0] sm:$0xff]  ;;  %v50_v39 = vld [vmem:[%s512_s1 + $0xd8] sm:$0xff] }
   0xa   :  { %312 = vmatprep.subr.bf16.mxu0 %v311_v16  ;;  %338 = vmatprep.subr.bf16.mxu1 %v346_v3  ;;  %v321_v40 = vpack.c.bf16 %v32_v36, %v31_v35  ;;  %v22_v41 = vld [vmem:[%s513_s0 + $0x10] sm:$0xff]  ;;  %v323_v42 = vpack.c.bf16 %v50_v39, %v49_v38  ;;  %v34_v44 = vld [vmem:[%s512_s1 + $0x58] sm:$0xff]  ;;  %v51_v45 = vld [vmem:[%s512_s1 + $0xe0] sm:$0xff] }
   0xb   :  { %127 = vmatprep.mubr.f32.mxu0 %v21_v30  ;;  %v33_v43 = vld [vmem:[%s512_s1 + $0x50] sm:$0xff]  ;;  %v52_v46 = vld [vmem:[%s512_s1 + $0xe8] sm:$0xff]  ;;  %v35_v49 = vld [vmem:[%s512_s1 + $0x60] sm:$0xff] }
   0xc   :  { %v325_v47 = vpack.c.bf16 %v34_v44, %v33_v43  ;;  %v327_v48 = vpack.c.bf16 %v52_v46, %v51_v45  ;;  %v36_v50 = vld [vmem:[%s512_s1 + $0x68] sm:$0xff]  ;;  %v53_v51 = vld [vmem:[%s512_s1 + $0xf0] sm:$0xff]  ;;  %v54_v52 = vld [vmem:[%s512_s1 + $0xf8] sm:$0xff] }
   0xd   :  { %314 = vmatpush3.bf16.msra.mxu0 %v313_v21  ;;  %340 = vmatpush3.bf16.msra.mxu1 %v339_v37  ;;  %v329_v53 = vpack.c.bf16 %v36_v50, %v35_v49  ;;  %v331_v54 = vpack.c.bf16 %v54_v52, %v53_v51  ;;  %v37_v55 = vld [vmem:[%s512_s1 + $0x70] sm:$0xff]  ;;  %v38_v56 = vld [vmem:[%s512_s1 + $0x78] sm:$0xff]  ;;  %v20_v58 = vld [vmem:[%s513_s0] sm:$0xff]  ;;  %v227_v21 = vlaneseq }
   0xe   :  { %316 = vmatprep.subr.bf16.mxu0 %v315_v23  ;;  %v333_v57 = vpack.c.bf16 %v38_v56, %v37_v55  ;;  %v222_v23 = vld [vmem:[%s514_s2] sm:$0x1] }
   0xf   :  { %v228_v22 = vshrl.u32 %v227_v21, 7  ;;  %v233_v27 = vld [vmem:[%s515_s3] sm:$0x1] }
  0x10   :  { %301 = vmatmul.mubr.msk.f32.vlgmr.msra.gmra.mrb[0].mxu1 %vm59_vm1, %v22_v41  ;;  %v243_v33 = vld [vmem:[%s516_s4] sm:$0xff] }
  0x11   :  { %318 = vmatpush3.bf16.msra.mxu0 %v317_v32  ;;  %v229_v24 = vsub.s32 0, %v228_v22 }
  0x12   :  { %320 = vmatprep.subr.bf16.mxu0 %v319_v34 }
  0x15   :  { %322 = vmatpush3.bf16.msra.mxu0 %v321_v40 }
  0x16   :  { %324 = vmatprep.subr.bf16.mxu0 %v323_v42 }
  0x19   :  { %326 = vmatpush3.bf16.msra.mxu0 %v325_v47 }
  0x1a   :  { %328 = vmatprep.subr.bf16.mxu0 %v327_v48 }
  0x1d   :  { %330 = vmatpush3.bf16.msra.mxu0 %v329_v53 }
  0x1e   :  { %332 = vmatprep.subr.bf16.mxu0 %v331_v54 }
  0x21   :  { %334 = vmatpush3.bf16.msra.mxu0 %v333_v57 }
  0x24   :  { %128 = vmatmul.mubr.f32.vlgmr.msra.gmra.mrb[0].mxu0 %v20_v58 }
  0xe3   :  { %v199_v59 = vpop.f32.mrb[0].mxu1 }
  0xe4   :  { %v302_v60 = vpop.f32.mrb[1].mxu1 }
  0xf7   :  { %v284_v61 = vpop.f32.mrb[0].mxu0 }
  0xf8   :  { %v285_v62 = vpop.f32.mrb[1].mxu0 }
  0xf9   :  { %v286_v63 = vadd.f32 %v285_v62, %v284_v61 }
  0xfb   :  { %v200_v0 = vadd.f32 %v286_v63, %v199_v59 }
  0xfd   :  { %v203_v1 = vsel %vm59_vm1, %v200_v0, 0.0  ;;  %v211_v2 = vmul.f32 %v200_v0, %v200_v0 }
  0xfe   :  { %v204_v3 = vrot.slane %v203_v1, 4 }
  0xff   :  { %v212_v4 = vsel %vm59_vm1, %v211_v2, 0.0 }
 0x100   :  { %v205_v5 = vadd.f32 %v204_v3, %v203_v1  ;;  %v213_v6 = vrot.slane %v212_v4, 4 }
 0x102   :  { %v206_v7 = vrot.slane %v205_v5, 2  ;;  %v214_v8 = vadd.f32 %v213_v6, %v212_v4 }
 0x104   :  { %v207_v9 = vadd.f32 %v206_v7, %v205_v5  ;;  %v215_v10 = vrot.slane %v214_v8, 2 }
 0x106   :  { %v208_v11 = vrot.slane %v207_v9, 1  ;;  %v216_v12 = vadd.f32 %v215_v10, %v214_v8 }
 0x108   :  { %v209_v13 = vadd.f32 %v208_v11, %v207_v9  ;;  %v217_v14 = vrot.slane %v216_v12, 1 }
 0x10a   :  { %v210_v15 = vmul.f32 0.125, %v209_v13  ;;  %v218_v16 = vadd.f32 %v217_v14, %v216_v12 }
 0x10c   :  { %v219_v17 = vmul.f32 0.125, %v218_v16  ;;  %v220_v18 = vmul.f32 %v210_v15, %v210_v15 }
 0x10e   :  { %v221_v19 = vsub.f32 %v219_v17, %v220_v18 }
 0x110   :  { %v223_v20 = vadd.f32 1e-05, %v221_v19 }
 0x112   :  { %344 = vrsqrt.f32 %v223_v20 }
 0x11c   :  { %v345_v25 = vpop.eup %344 }
 0x11d   :  { %v225_v26 = vmul.f32 %v345_v25, %v222_v23 }
 0x11f   :  { %v230_v28 = vrot.slane %v225_v26, %v229_v24  ;;  %v234_v29 = vmul.f32 %v225_v26, %v210_v15 }
 0x121   :  { %v235_v30 = vsub.f32 %v233_v27, %v234_v29  ;;  %v232_v31 = vmul.f32 %v230_v28, %v200_v0 }
 0x123   :  { %v240_v32 = vrot.slane %v235_v30, %v229_v24 }
 0x125   :  { %v242_v34 = vadd.f32 %v240_v32, %v232_v31 }
 0x127   :  { %v244_v35 = vadd.f32 %v243_v33, %v242_v34 }
 0x129   :  { %v245_v36 = vmax.f32 %v244_v35, 0.0 }
 0x12b   :  { %246 = vst.msk [vmem:[%s517_s5] sm:$0xff] %vm59_vm1, %v245_v36 }

// kernel: _lambda_.30
= control target key start
LH: loop header
LB: loop body
LE: loop exit
PB: predicated region body
PF: predicated region fallthrough
CT: control target
= control target key end

     0   :  { %v359_v3 = vmov 0.0|0.0   ;;  %vm360_vm0 = vmmov 0   ;;  %v361_v4 = vmov 0.0   ;;  %vm59_vm1 = vcmask 261120   ;;  %s521_s1 = inlined_call_operand.vmem [shape: f32[288,128], index: 1, kind: input, shape index: {}]   ;;  %s522_s0 = inlined_call_operand.vmem [shape: f32[8,288], index: 0, kind: input, shape index: {}]   ;;  %s523_s2 = inlined_call_operand.vmem [shape: f32[1,128], index: 2, kind: input, shape index: {}]   ;;  %s524_s3 = inlined_call_operand.vmem [shape: f32[1,128], index: 3, kind: input, shape index: {}]   ;;  %s525_s4 = inlined_call_operand.vmem [shape: f32[1,128], index: 4, kind: input, shape index: {}]   ;;  %s526_s5 = inlined_call_operand.vmem [shape: f32[8,128], index: 5, kind: output, shape index: {}]  }
   0x1   :  { %v39_v0 = vld [vmem:[%s521_s1 + $0x80] sm:$0xff]  ;;  %v40_v1 = vld [vmem:[%s521_s1 + $0x88] sm:$0xff]  ;;  %348 = vmatprep.subr.bf16.mxu1 %v359_v3  ;;  %313 = vmatprep.mubr.msk.f32.mxu1 %vm360_vm0, %v361_v4  ;;  %v41_v7 = vld [vmem:[%s521_s1 + $0x90] sm:$0xff] }
   0x2   :  { %v23_v2 = vld [vmem:[%s521_s1] sm:$0xff]  ;;  %v316_v5 = vpack.c.bf16 %v40_v1, %v39_v0  ;;  %v24_v6 = vld [vmem:[%s521_s1 + $0x8] sm:$0xff]  ;;  %v42_v8 = vld [vmem:[%s521_s1 + $0x98] sm:$0xff] }
   0x3   :  { %v318_v9 = vpack.c.bf16 %v24_v6, %v23_v2  ;;  %v320_v10 = vpack.c.bf16 %v42_v8, %v41_v7  ;;  %v25_v11 = vld [vmem:[%s521_s1 + $0x10] sm:$0xff]  ;;  %v26_v12 = vld [vmem:[%s521_s1 + $0x18] sm:$0xff]  ;;  %v43_v13 = vld [vmem:[%s521_s1 + $0xa0] sm:$0xff] }
   0x4   :  { %317 = vmatprep.subr.bf16.mxu0 %v316_v5  ;;  %v44_v14 = vld [vmem:[%s521_s1 + $0xa8] sm:$0xff]  ;;  %v322_v15 = vpack.c.bf16 %v26_v12, %v25_v11  ;;  %v27_v17 = vld [vmem:[%s521_s1 + $0x20] sm:$0xff]  ;;  %v45_v19 = vld [vmem:[%s521_s1 + $0xb0] sm:$0xff] }
   0x5   :  { %319 = vmatpush3.bf16.msra.mxu0 %v318_v9  ;;  %v324_v16 = vpack.c.bf16 %v44_v14, %v43_v13  ;;  %v28_v18 = vld [vmem:[%s521_s1 + $0x28] sm:$0xff]  ;;  %v46_v20 = vld [vmem:[%s521_s1 + $0xb8] sm:$0xff]  ;;  %v29_v22 = vld [vmem:[%s521_s1 + $0x30] sm:$0xff] }
   0x6   :  { %321 = vmatprep.subr.bf16.mxu0 %v320_v10  ;;  %v326_v21 = vpack.c.bf16 %v28_v18, %v27_v17  ;;  %v328_v23 = vpack.c.bf16 %v46_v20, %v45_v19  ;;  %v30_v24 = vld [vmem:[%s521_s1 + $0x38] sm:$0xff]  ;;  %v55_v25 = vld [vmem:[%s521_s1 + $0x100] sm:$0xff]  ;;  %v56_v26 = vld [vmem:[%s521_s1 + $0x108] sm:$0xff]  ;;  %v225_v19 = vlaneseq }
   0x7   :  { %v47_v27 = vld [vmem:[%s521_s1 + $0xc0] sm:$0xff]  ;;  %v48_v28 = vld [vmem:[%s521_s1 + $0xc8] sm:$0xff]  ;;  %v349_v29 = vpack.c.bf16 %v56_v26, %v55_v25  ;;  %v57_v31 = vld [vmem:[%s521_s1 + $0x110] sm:$0xff]  ;;  %v330_v32 = vpack.c.bf16 %v30_v24, %v29_v22 }
   0x8   :  { %v21_v30 = vld [vmem:[%s522_s0 + $0x8] sm:$0xff]  ;;  %v58_v33 = vld [vmem:[%s521_s1 + $0x118] sm:$0xff]  ;;  %v332_v34 = vpack.c.bf16 %v48_v28, %v47_v27  ;;  %v31_v35 = vld [vmem:[%s521_s1 + $0x40] sm:$0xff]  ;;  %v226_v20 = vshrl.u32 %v225_v19, 7 }
   0x9   :  { %323 = vmatpush3.bf16.msra.mxu0 %v322_v15  ;;  %350 = vmatpush3.bf16.msra.mxu1 %v349_v29  ;;  %v32_v36 = vld [vmem:[%s521_s1 + $0x48] sm:$0xff]  ;;  %v352_v37 = vpack.c.bf16 %v58_v33, %v57_v31  ;;  %v49_v38 = vld [vmem:[%s521_s1 + $0xd0] sm:$0xff]  ;;  %v50_v39 = vld [vmem:[%s521_s1 + $0xd8] sm:$0xff] }
   0xa   :  { %325 = vmatprep.subr.bf16.mxu0 %v324_v16  ;;  %351 = vmatprep.subr.bf16.mxu1 %v359_v3  ;;  %v334_v40 = vpack.c.bf16 %v32_v36, %v31_v35  ;;  %v22_v41 = vld [vmem:[%s522_s0 + $0x10] sm:$0xff]  ;;  %v336_v42 = vpack.c.bf16 %v50_v39, %v49_v38  ;;  %v34_v44 = vld [vmem:[%s521_s1 + $0x58] sm:$0xff]  ;;  %v51_v45 = vld [vmem:[%s521_s1 + $0xe0] sm:$0xff]  ;;  %v227_v22 = vsub.s32 0, %v226_v20 }
   0xb   :  { %127 = vmatprep.mubr.f32.mxu0 %v21_v30  ;;  %v33_v43 = vld [vmem:[%s521_s1 + $0x50] sm:$0xff]  ;;  %v52_v46 = vld [vmem:[%s521_s1 + $0xe8] sm:$0xff]  ;;  %v35_v49 = vld [vmem:[%s521_s1 + $0x60] sm:$0xff] }
   0xc   :  { %v338_v47 = vpack.c.bf16 %v34_v44, %v33_v43  ;;  %v340_v48 = vpack.c.bf16 %v52_v46, %v51_v45  ;;  %v36_v50 = vld [vmem:[%s521_s1 + $0x68] sm:$0xff]  ;;  %v53_v51 = vld [vmem:[%s521_s1 + $0xf0] sm:$0xff]  ;;  %v54_v52 = vld [vmem:[%s521_s1 + $0xf8] sm:$0xff] }
   0xd   :  { %327 = vmatpush3.bf16.msra.mxu0 %v326_v21  ;;  %353 = vmatpush3.bf16.msra.mxu1 %v352_v37  ;;  %v342_v53 = vpack.c.bf16 %v36_v50, %v35_v49  ;;  %v344_v54 = vpack.c.bf16 %v54_v52, %v53_v51  ;;  %v37_v55 = vld [vmem:[%s521_s1 + $0x70] sm:$0xff]  ;;  %v38_v56 = vld [vmem:[%s521_s1 + $0x78] sm:$0xff]  ;;  %v20_v58 = vld [vmem:[%s522_s0] sm:$0xff] }
   0xe   :  { %329 = vmatprep.subr.bf16.mxu0 %v328_v23  ;;  %v346_v57 = vpack.c.bf16 %v38_v56, %v37_v55  ;;  %v220_v21 = vld [vmem:[%s523_s2] sm:$0x1] }
   0xf   :  { %v231_v25 = vld [vmem:[%s524_s3] sm:$0x1] }
  0x10   :  { %314 = vmatmul.mubr.msk.f32.vlgmr.msra.gmra.mrb[0].mxu1 %vm59_vm1, %v22_v41  ;;  %v241_v26 = vld [vmem:[%s525_s4] sm:$0x1] }
  0x11   :  { %331 = vmatpush3.bf16.msra.mxu0 %v330_v32  ;;  %v250_v30 = vsub.f32 1.0, %v241_v26 }
  0x12   :  { %333 = vmatprep.subr.bf16.mxu0 %v332_v34  ;;  %v247_v34 = vrot.slane %v241_v26, %v227_v22 }
  0x13   :  { %v255_v35 = vrot.slane %v250_v30, %v227_v22 }
  0x15   :  { %335 = vmatpush3.bf16.msra.mxu0 %v334_v40 }
  0x16   :  { %337 = vmatprep.subr.bf16.mxu0 %v336_v42 }
  0x19   :  { %339 = vmatpush3.bf16.msra.mxu0 %v338_v47 }
  0x1a   :  { %341 = vmatprep.subr.bf16.mxu0 %v340_v48 }
  0x1d   :  { %343 = vmatpush3.bf16.msra.mxu0 %v342_v53 }
  0x1e   :  { %345 = vmatprep.subr.bf16.mxu0 %v344_v54 }
  0x21   :  { %347 = vmatpush3.bf16.msra.mxu0 %v346_v57 }
  0x24   :  { %128 = vmatmul.mubr.f32.vlgmr.msra.gmra.mrb[0].mxu0 %v20_v58 }
  0xe3   :  { %v199_v59 = vpop.f32.mrb[0].mxu1 }
  0xe4   :  { %v315_v60 = vpop.f32.mrb[1].mxu1 }
  0xf7   :  { %v297_v61 = vpop.f32.mrb[0].mxu0 }
  0xf8   :  { %v298_v62 = vpop.f32.mrb[1].mxu0 }
  0xf9   :  { %v299_v63 = vadd.f32 %v298_v62, %v297_v61 }
  0xfb   :  { %v200_v0 = vadd.f32 %v299_v63, %v199_v59 }
  0xfd   :  { %v203_v1 = vrot.slane %v200_v0, 4  ;;  %v210_v2 = vmul.f32 %v200_v0, %v200_v0 }
  0xff   :  { %v204_v3 = vadd.f32 %v203_v1, %v200_v0  ;;  %v211_v4 = vrot.slane %v210_v2, 4 }
 0x101   :  { %v205_v5 = vrot.slane %v204_v3, 2  ;;  %v212_v6 = vadd.f32 %v211_v4, %v210_v2 }
 0x103   :  { %v206_v7 = vadd.f32 %v205_v5, %v204_v3  ;;  %v213_v8 = vrot.slane %v212_v6, 2 }
 0x105   :  { %v207_v9 = vrot.slane %v206_v7, 1  ;;  %v214_v10 = vadd.f32 %v213_v8, %v212_v6 }
 0x107   :  { %v208_v11 = vadd.f32 %v207_v9, %v206_v7  ;;  %v215_v12 = vrot.slane %v214_v10, 1 }
 0x109   :  { %v209_v13 = vmul.f32 0.5, %v208_v11  ;;  %v216_v14 = vadd.f32 %v215_v12, %v214_v10 }
 0x10b   :  { %v217_v15 = vmul.f32 0.5, %v216_v14  ;;  %v218_v16 = vmul.f32 %v209_v13, %v209_v13 }
 0x10d   :  { %v219_v17 = vsub.f32 %v217_v15, %v218_v16 }
 0x10f   :  { %v221_v18 = vadd.f32 1e-05, %v219_v17 }
 0x111   :  { %357 = vrsqrt.f32 %v221_v18 }
 0x11b   :  { %v358_v23 = vpop.eup %357 }
 0x11c   :  { %v223_v24 = vmul.f32 %v358_v23, %v220_v21 }
 0x11e   :  { %v228_v27 = vrot.slane %v223_v24, %v227_v22  ;;  %v232_v28 = vmul.f32 %v223_v24, %v209_v13 }
 0x120   :  { %v233_v29 = vsub.f32 %v231_v25, %v232_v28  ;;  %v230_v31 = vmul.f32 %v228_v27, %v200_v0 }
 0x122   :  { %v238_v32 = vrot.slane %v233_v29, %v227_v22 }
 0x124   :  { %v240_v33 = vadd.f32 %v238_v32, %v230_v31 }
 0x126   :  { %v242_v36 = vmax.f32 %v240_v33, 0.0  ;;  %v257_v38 = vmul.f32 %v255_v35, %v240_v33 }
 0x128   :  { %v249_v37 = vmul.f32 %v247_v34, %v242_v36 }
 0x12a   :  { %v258_v39 = vadd.f32 %v257_v38, %v249_v37 }
 0x12c   :  { %259 = vst [vmem:[%s526_s5] sm:$0xff] %v258_v39 }

// kernel: _lambda_.28
= control target key start
LH: loop header
LB: loop body
LE: loop exit
PB: predicated region body
PF: predicated region fallthrough
CT: control target
= control target key end

     0   :  { %v361_v3 = vmov 0.0|0.0   ;;  %vm362_vm0 = vmmov 0   ;;  %v363_v4 = vmov 0.0   ;;  %vm59_vm1 = vcmask 261120   ;;  %s527_s1 = inlined_call_operand.vmem [shape: f32[288,32], index: 1, kind: input, shape index: {}]   ;;  %s528_s0 = inlined_call_operand.vmem [shape: f32[8,288], index: 0, kind: input, shape index: {}]   ;;  %s529_s2 = inlined_call_operand.vmem [shape: f32[1,32], index: 2, kind: input, shape index: {}, may-alias: {2,4}]   ;;  %s530_s3 = inlined_call_operand.vmem [shape: f32[1,32], index: 3, kind: input, shape index: {}]   ;;  %s531_s4 = inlined_call_operand.vmem [shape: f32[1,32], index: 4, kind: input, shape index: {}, may-alias: {2,4}]   ;;  %s532_s5 = inlined_call_operand.vmem [shape: f32[8,32], index: 5, kind: output, shape index: {}]  }
   0x1   :  { %v39_v0 = vld [vmem:[%s527_s1 + $0x80] sm:$0xff]  ;;  %v40_v1 = vld [vmem:[%s527_s1 + $0x88] sm:$0xff]  ;;  %350 = vmatprep.subr.bf16.mxu1 %v361_v3  ;;  %315 = vmatprep.mubr.msk.f32.mxu1 %vm362_vm0, %v363_v4  ;;  %v41_v7 = vld [vmem:[%s527_s1 + $0x90] sm:$0xff] }
   0x2   :  { %v23_v2 = vld [vmem:[%s527_s1] sm:$0xff]  ;;  %v318_v5 = vpack.c.bf16 %v40_v1, %v39_v0  ;;  %v24_v6 = vld [vmem:[%s527_s1 + $0x8] sm:$0xff]  ;;  %v42_v8 = vld [vmem:[%s527_s1 + $0x98] sm:$0xff] }
   0x3   :  { %v320_v9 = vpack.c.bf16 %v24_v6, %v23_v2  ;;  %v322_v10 = vpack.c.bf16 %v42_v8, %v41_v7  ;;  %v25_v11 = vld [vmem:[%s527_s1 + $0x10] sm:$0xff]  ;;  %v26_v12 = vld [vmem:[%s527_s1 + $0x18] sm:$0xff]  ;;  %v43_v13 = vld [vmem:[%s527_s1 + $0xa0] sm:$0xff] }
   0x4   :  { %319 = vmatprep.subr.bf16.mxu0 %v318_v5  ;;  %v44_v14 = vld [vmem:[%s527_s1 + $0xa8] sm:$0xff]  ;;  %v324_v15 = vpack.c.bf16 %v26_v12, %v25_v11  ;;  %v27_v17 = vld [vmem:[%s527_s1 + $0x20] sm:$0xff]  ;;  %v45_v19 = vld [vmem:[%s527_s1 + $0xb0] sm:$0xff] }
   0x5   :  { %321 = vmatpush3.bf16.msra.mxu0 %v320_v9  ;;  %v326_v16 = vpack.c.bf16 %v44_v14, %v43_v13  ;;  %v28_v18 = vld [vmem:[%s527_s1 + $0x28] sm:$0xff]  ;;  %v46_v20 = vld [vmem:[%s527_s1 + $0xb8] sm:$0xff]  ;;  %v29_v22 = vld [vmem:[%s527_s1 + $0x30] sm:$0xff] }
   0x6   :  { %323 = vmatprep.subr.bf16.mxu0 %v322_v10  ;;  %v328_v21 = vpack.c.bf16 %v28_v18, %v27_v17  ;;  %v330_v23 = vpack.c.bf16 %v46_v20, %v45_v19  ;;  %v30_v24 = vld [vmem:[%s527_s1 + $0x38] sm:$0xff]  ;;  %v55_v25 = vld [vmem:[%s527_s1 + $0x100] sm:$0xff]  ;;  %v56_v26 = vld [vmem:[%s527_s1 + $0x108] sm:$0xff] }
   0x7   :  { %v47_v27 = vld [vmem:[%s527_s1 + $0xc0] sm:$0xff]  ;;  %v48_v28 = vld [vmem:[%s527_s1 + $0xc8] sm:$0xff]  ;;  %v351_v29 = vpack.c.bf16 %v56_v26, %v55_v25  ;;  %v57_v31 = vld [vmem:[%s527_s1 + $0x110] sm:$0xff]  ;;  %v332_v32 = vpack.c.bf16 %v30_v24, %v29_v22 }
   0x8   :  { %v21_v30 = vld [vmem:[%s528_s0 + $0x8] sm:$0xff]  ;;  %v58_v33 = vld [vmem:[%s527_s1 + $0x118] sm:$0xff]  ;;  %v334_v34 = vpack.c.bf16 %v48_v28, %v47_v27  ;;  %v31_v35 = vld [vmem:[%s527_s1 + $0x40] sm:$0xff] }
   0x9   :  { %325 = vmatpush3.bf16.msra.mxu0 %v324_v15  ;;  %352 = vmatpush3.bf16.msra.mxu1 %v351_v29  ;;  %v32_v36 = vld [vmem:[%s527_s1 + $0x48] sm:$0xff]  ;;  %v354_v37 = vpack.c.bf16 %v58_v33, %v57_v31  ;;  %v49_v38 = vld [vmem:[%s527_s1 + $0xd0] sm:$0xff]  ;;  %v50_v39 = vld [vmem:[%s527_s1 + $0xd8] sm:$0xff] }
   0xa   :  { %327 = vmatprep.subr.bf16.mxu0 %v326_v16  ;;  %353 = vmatprep.subr.bf16.mxu1 %v361_v3  ;;  %v336_v40 = vpack.c.bf16 %v32_v36, %v31_v35  ;;  %v22_v41 = vld [vmem:[%s528_s0 + $0x10] sm:$0xff]  ;;  %v338_v42 = vpack.c.bf16 %v50_v39, %v49_v38  ;;  %v34_v44 = vld [vmem:[%s527_s1 + $0x58] sm:$0xff]  ;;  %v51_v45 = vld [vmem:[%s527_s1 + $0xe0] sm:$0xff] }
   0xb   :  { %127 = vmatprep.mubr.f32.mxu0 %v21_v30  ;;  %v33_v43 = vld [vmem:[%s527_s1 + $0x50] sm:$0xff]  ;;  %v52_v46 = vld [vmem:[%s527_s1 + $0xe8] sm:$0xff]  ;;  %v35_v49 = vld [vmem:[%s527_s1 + $0x60] sm:$0xff] }
   0xc   :  { %v340_v47 = vpack.c.bf16 %v34_v44, %v33_v43  ;;  %v342_v48 = vpack.c.bf16 %v52_v46, %v51_v45  ;;  %v36_v50 = vld [vmem:[%s527_s1 + $0x68] sm:$0xff]  ;;  %v53_v51 = vld [vmem:[%s527_s1 + $0xf0] sm:$0xff]  ;;  %v54_v52 = vld [vmem:[%s527_s1 + $0xf8] sm:$0xff] }
   0xd   :  { %329 = vmatpush3.bf16.msra.mxu0 %v328_v21  ;;  %355 = vmatpush3.bf16.msra.mxu1 %v354_v37  ;;  %v344_v53 = vpack.c.bf16 %v36_v50, %v35_v49  ;;  %v346_v54 = vpack.c.bf16 %v54_v52, %v53_v51  ;;  %v37_v55 = vld [vmem:[%s527_s1 + $0x70] sm:$0xff]  ;;  %v38_v56 = vld [vmem:[%s527_s1 + $0x78] sm:$0xff]  ;;  %v20_v58 = vld [vmem:[%s528_s0] sm:$0xff]  ;;  %v227_v21 = vlaneseq }
   0xe   :  { %331 = vmatprep.subr.bf16.mxu0 %v330_v23  ;;  %v348_v57 = vpack.c.bf16 %v38_v56, %v37_v55  ;;  %v222_v23 = vld [vmem:[%s529_s2] sm:$0x1] }
   0xf   :  { %v228_v22 = vshrl.u32 %v227_v21, 7  ;;  %v233_v27 = vld [vmem:[%s530_s3] sm:$0x1] }
  0x10   :  { %316 = vmatmul.mubr.msk.f32.vlgmr.msra.gmra.mrb[0].mxu1 %vm59_vm1, %v22_v41  ;;  %v243_v28 = vld [vmem:[%s531_s4] sm:$0x1] }
  0x11   :  { %333 = vmatpush3.bf16.msra.mxu0 %v332_v32  ;;  %v229_v24 = vsub.s32 0, %v228_v22  ;;  %v252_v32 = vsub.f32 1.0, %v243_v28 }
  0x12   :  { %335 = vmatprep.subr.bf16.mxu0 %v334_v34 }
  0x13   :  { %v249_v36 = vrot.slane %v243_v28, %v229_v24  ;;  %v257_v37 = vrot.slane %v252_v32, %v229_v24 }
  0x15   :  { %337 = vmatpush3.bf16.msra.mxu0 %v336_v40 }
  0x16   :  { %339 = vmatprep.subr.bf16.mxu0 %v338_v42 }
  0x19   :  { %341 = vmatpush3.bf16.msra.mxu0 %v340_v47 }
  0x1a   :  { %343 = vmatprep.subr.bf16.mxu0 %v342_v48 }
  0x1d   :  { %345 = vmatpush3.bf16.msra.mxu0 %v344_v53 }
  0x1e   :  { %347 = vmatprep.subr.bf16.mxu0 %v346_v54 }
  0x21   :  { %349 = vmatpush3.bf16.msra.mxu0 %v348_v57 }
  0x24   :  { %128 = vmatmul.mubr.f32.vlgmr.msra.gmra.mrb[0].mxu0 %v20_v58 }
  0xe3   :  { %v199_v59 = vpop.f32.mrb[0].mxu1 }
  0xe4   :  { %v317_v60 = vpop.f32.mrb[1].mxu1 }
  0xf7   :  { %v299_v61 = vpop.f32.mrb[0].mxu0 }
  0xf8   :  { %v300_v62 = vpop.f32.mrb[1].mxu0 }
  0xf9   :  { %v301_v63 = vadd.f32 %v300_v62, %v299_v61 }
  0xfb   :  { %v200_v0 = vadd.f32 %v301_v63, %v199_v59 }
  0xfd   :  { %v203_v1 = vsel %vm59_vm1, %v200_v0, 0.0  ;;  %v211_v2 = vmul.f32 %v200_v0, %v200_v0 }
  0xfe   :  { %v204_v3 = vrot.slane %v203_v1, 4 }
  0xff   :  { %v212_v4 = vsel %vm59_vm1, %v211_v2, 0.0 }
 0x100   :  { %v205_v5 = vadd.f32 %v204_v3, %v203_v1  ;;  %v213_v6 = vrot.slane %v212_v4, 4 }
 0x102   :  { %v206_v7 = vrot.slane %v205_v5, 2  ;;  %v214_v8 = vadd.f32 %v213_v6, %v212_v4 }
 0x104   :  { %v207_v9 = vadd.f32 %v206_v7, %v205_v5  ;;  %v215_v10 = vrot.slane %v214_v8, 2 }
 0x106   :  { %v208_v11 = vrot.slane %v207_v9, 1  ;;  %v216_v12 = vadd.f32 %v215_v10, %v214_v8 }
 0x108   :  { %v209_v13 = vadd.f32 %v208_v11, %v207_v9  ;;  %v217_v14 = vrot.slane %v216_v12, 1 }
 0x10a   :  { %v210_v15 = vmul.f32 0.125, %v209_v13  ;;  %v218_v16 = vadd.f32 %v217_v14, %v216_v12 }
 0x10c   :  { %v219_v17 = vmul.f32 0.125, %v218_v16  ;;  %v220_v18 = vmul.f32 %v210_v15, %v210_v15 }
 0x10e   :  { %v221_v19 = vsub.f32 %v219_v17, %v220_v18 }
 0x110   :  { %v223_v20 = vadd.f32 1e-05, %v221_v19 }
 0x112   :  { %359 = vrsqrt.f32 %v223_v20 }
 0x11c   :  { %v360_v25 = vpop.eup %359 }
 0x11d   :  { %v225_v26 = vmul.f32 %v360_v25, %v222_v23 }
 0x11f   :  { %v230_v29 = vrot.slane %v225_v26, %v229_v24  ;;  %v234_v30 = vmul.f32 %v225_v26, %v210_v15 }
 0x121   :  { %v235_v31 = vsub.f32 %v233_v27, %v234_v30  ;;  %v232_v33 = vmul.f32 %v230_v29, %v200_v0 }
 0x123   :  { %v240_v34 = vrot.slane %v235_v31, %v229_v24 }
 0x125   :  { %v242_v35 = vadd.f32 %v240_v34, %v232_v33 }
 0x127   :  { %v244_v38 = vmax.f32 %v242_v35, 0.0  ;;  %v259_v40 = vmul.f32 %v257_v37, %v242_v35 }
 0x129   :  { %v251_v39 = vmul.f32 %v249_v36, %v244_v38 }
 0x12b   :  { %v260_v41 = vadd.f32 %v259_v40, %v251_v39 }
 0x12d   :  { %261 = vst.msk [vmem:[%s532_s5] sm:$0xff] %vm59_vm1, %v260_v41 }

// kernel: _lambda_.31
= control target key start
LH: loop header
LB: loop body
LE: loop exit
PB: predicated region body
PF: predicated region fallthrough
CT: control target
= control target key end

     0   :  { %vm540_vm0 = vmmov 0   ;;  %vm97_vm1 = vcmask 523264   ;;  %s819_s1 = inlined_call_operand.vmem [shape: f32[576,64], index: 1, kind: input, shape index: {}]   ;;  %s820_s0 = inlined_call_operand.vmem [shape: f32[8,576], index: 0, kind: input, shape index: {}]   ;;  %s821_s2 = inlined_call_operand.vmem [shape: f32[1,64], index: 2, kind: input, shape index: {}]   ;;  %s822_s3 = inlined_call_operand.vmem [shape: f32[1,64], index: 3, kind: input, shape index: {}]   ;;  %s823_s4 = inlined_call_operand.vmem [shape: f32[8,64], index: 4, kind: input, shape index: {}]   ;;  %s824_s5 = inlined_call_operand.vmem [shape: f32[8,64], index: 5, kind: output, shape index: {}]  }
   0x1   :  { %v41_v0 = vld [vmem:[%s819_s1 + $0x80] sm:$0xff]  ;;  %v42_v1 = vld [vmem:[%s819_s1 + $0x88] sm:$0xff]  ;;  %v43_v11 = vld [vmem:[%s819_s1 + $0x90] sm:$0xff] }
   0x2   :  { %v73_v2 = vld [vmem:[%s819_s1 + $0x180] sm:$0xff]  ;;  %v458_v3 = vpack.c.bf16 %v42_v1, %v41_v0  ;;  %v74_v4 = vld [vmem:[%s819_s1 + $0x188] sm:$0xff]  ;;  %v44_v13 = vld [vmem:[%s819_s1 + $0x98] sm:$0xff] }
   0x3   :  { %v25_v5 = vld [vmem:[%s819_s1] sm:$0xff]  ;;  %v26_v6 = vld [vmem:[%s819_s1 + $0x8] sm:$0xff]  ;;  %v490_v7 = vpack.c.bf16 %v74_v4, %v73_v2  ;;  %v75_v14 = vld [vmem:[%s819_s1 + $0x190] sm:$0xff]  ;;  %v462_v16 = vpack.c.bf16 %v44_v13, %v43_v11 }
   0x4   :  { %v460_v8 = vpack.c.bf16 %v26_v6, %v25_v5  ;;  %v57_v9 = vld [vmem:[%s819_s1 + $0x100] sm:$0xff]  ;;  %v58_v10 = vld [vmem:[%s819_s1 + $0x108] sm:$0xff]  ;;  %459 = vmatprep.subr.bf16.mxu0 %v458_v3  ;;  %v76_v15 = vld [vmem:[%s819_s1 + $0x198] sm:$0xff] }
   0x5   :  { %v492_v12 = vpack.c.bf16 %v58_v10, %v57_v9  ;;  %491 = vmatprep.subr.bf16.mxu1 %v490_v7  ;;  %v494_v17 = vpack.c.bf16 %v76_v15, %v75_v14  ;;  %v27_v18 = vld [vmem:[%s819_s1 + $0x10] sm:$0xff]  ;;  %v28_v19 = vld [vmem:[%s819_s1 + $0x18] sm:$0xff]  ;;  %v45_v23 = vld [vmem:[%s819_s1 + $0xa0] sm:$0xff] }
   0x6   :  { %461 = vmatpush3.bf16.msra.mxu0 %v460_v8  ;;  %v59_v20 = vld [vmem:[%s819_s1 + $0x110] sm:$0xff]  ;;  %v464_v21 = vpack.c.bf16 %v28_v19, %v27_v18  ;;  %v60_v22 = vld [vmem:[%s819_s1 + $0x118] sm:$0xff]  ;;  %v46_v24 = vld [vmem:[%s819_s1 + $0xa8] sm:$0xff] }
   0x7   :  { %493 = vmatpush3.bf16.msra.mxu1 %v492_v12  ;;  %463 = vmatprep.subr.bf16.mxu0 %v462_v16  ;;  %v496_v25 = vpack.c.bf16 %v60_v22, %v59_v20  ;;  %v466_v26 = vpack.c.bf16 %v46_v24, %v45_v23  ;;  %v77_v27 = vld [vmem:[%s819_s1 + $0x1a0] sm:$0xff]  ;;  %v78_v28 = vld [vmem:[%s819_s1 + $0x1a8] sm:$0xff]  ;;  %v47_v35 = vld [vmem:[%s819_s1 + $0xb0] sm:$0xff] }
   0x8   :  { %495 = vmatprep.subr.bf16.mxu1 %v494_v17  ;;  %v29_v29 = vld [vmem:[%s819_s1 + $0x20] sm:$0xff]  ;;  %v498_v30 = vpack.c.bf16 %v78_v28, %v77_v27  ;;  %v30_v31 = vld [vmem:[%s819_s1 + $0x28] sm:$0xff]  ;;  %v48_v36 = vld [vmem:[%s819_s1 + $0xb8] sm:$0xff] }
   0x9   :  { %v61_v32 = vld [vmem:[%s819_s1 + $0x120] sm:$0xff]  ;;  %v62_v33 = vld [vmem:[%s819_s1 + $0x128] sm:$0xff]  ;;  %v468_v34 = vpack.c.bf16 %v30_v31, %v29_v29  ;;  %v79_v37 = vld [vmem:[%s819_s1 + $0x1b0] sm:$0xff]  ;;  %v470_v39 = vpack.c.bf16 %v48_v36, %v47_v35 }
   0xa   :  { %465 = vmatpush3.bf16.msra.mxu0 %v464_v21  ;;  %v500_v38 = vpack.c.bf16 %v62_v33, %v61_v32  ;;  %v80_v40 = vld [vmem:[%s819_s1 + $0x1b8] sm:$0xff]  ;;  %v31_v41 = vld [vmem:[%s819_s1 + $0x30] sm:$0xff]  ;;  %v49_v46 = vld [vmem:[%s819_s1 + $0xc0] sm:$0xff] }
   0xb   :  { %497 = vmatpush3.bf16.msra.mxu1 %v496_v25  ;;  %467 = vmatprep.subr.bf16.mxu0 %v466_v26  ;;  %v32_v42 = vld [vmem:[%s819_s1 + $0x38] sm:$0xff]  ;;  %v502_v43 = vpack.c.bf16 %v80_v40, %v79_v37  ;;  %v63_v44 = vld [vmem:[%s819_s1 + $0x130] sm:$0xff]  ;;  %v50_v47 = vld [vmem:[%s819_s1 + $0xc8] sm:$0xff] }
   0xc   :  { %499 = vmatprep.subr.bf16.mxu1 %v498_v30  ;;  %v64_v45 = vld [vmem:[%s819_s1 + $0x138] sm:$0xff]  ;;  %v81_v48 = vld [vmem:[%s819_s1 + $0x1c0] sm:$0xff]  ;;  %v82_v49 = vld [vmem:[%s819_s1 + $0x1c8] sm:$0xff]  ;;  %v472_v50 = vpack.c.bf16 %v32_v42, %v31_v41  ;;  %v474_v52 = vpack.c.bf16 %v50_v47, %v49_v46 }
   0xd   :  { %v504_v51 = vpack.c.bf16 %v64_v45, %v63_v44  ;;  %v33_v53 = vld [vmem:[%s819_s1 + $0x40] sm:$0xff]  ;;  %v34_v54 = vld [vmem:[%s819_s1 + $0x48] sm:$0xff]  ;;  %v506_v56 = vpack.c.bf16 %v82_v49, %v81_v48  ;;  %v51_v58 = vld [vmem:[%s819_s1 + $0xd0] sm:$0xff]  ;;  %v541_v45 = vmov 0.0  }
   0xe   :  { %469 = vmatpush3.bf16.msra.mxu0 %v468_v34  ;;  %v65_v55 = vld [vmem:[%s819_s1 + $0x140] sm:$0xff]  ;;  %v66_v57 = vld [vmem:[%s819_s1 + $0x148] sm:$0xff]  ;;  %v52_v59 = vld [vmem:[%s819_s1 + $0xd8] sm:$0xff]  ;;  %v476_v62 = vpack.c.bf16 %v34_v54, %v33_v53 }
   0xf   :  { %501 = vmatpush3.bf16.msra.mxu1 %v500_v38  ;;  %471 = vmatprep.subr.bf16.mxu0 %v470_v39  ;;  %v83_v60 = vld [vmem:[%s819_s1 + $0x1d0] sm:$0xff]  ;;  %v84_v61 = vld [vmem:[%s819_s1 + $0x1d8] sm:$0xff]  ;;  %v508_v63 = vpack.c.bf16 %v66_v57, %v65_v55  ;;  %v478_v0 = vpack.c.bf16 %v52_v59, %v51_v58  ;;  %v53_v6 = vld [vmem:[%s819_s1 + $0xe0] sm:$0xff]  ;;  %v539_v39 = vmov 0.0|0.0  }
  0x10   :  { %503 = vmatprep.subr.bf16.mxu1 %v502_v43  ;;  %v35_v1 = vld [vmem:[%s819_s1 + $0x50] sm:$0xff]  ;;  %v36_v2 = vld [vmem:[%s819_s1 + $0x58] sm:$0xff]  ;;  %v510_v4 = vpack.c.bf16 %v84_v61, %v83_v60  ;;  %v54_v7 = vld [vmem:[%s819_s1 + $0xe8] sm:$0xff] }
  0x11   :  { %v67_v3 = vld [vmem:[%s819_s1 + $0x150] sm:$0xff]  ;;  %v68_v5 = vld [vmem:[%s819_s1 + $0x158] sm:$0xff]  ;;  %v85_v8 = vld [vmem:[%s819_s1 + $0x1e0] sm:$0xff]  ;;  %v480_v10 = vpack.c.bf16 %v36_v2, %v35_v1  ;;  %v482_v14 = vpack.c.bf16 %v54_v7, %v53_v6 }
  0x12   :  { %473 = vmatpush3.bf16.msra.mxu0 %v472_v50  ;;  %v86_v9 = vld [vmem:[%s819_s1 + $0x1e8] sm:$0xff]  ;;  %v37_v11 = vld [vmem:[%s819_s1 + $0x60] sm:$0xff]  ;;  %v512_v13 = vpack.c.bf16 %v68_v5, %v67_v3  ;;  %v23_v17 = vld [vmem:[%s820_s0 + $0x18] sm:$0xff] }
  0x13   :  { %505 = vmatpush3.bf16.msra.mxu1 %v504_v51  ;;  %475 = vmatprep.subr.bf16.mxu0 %v474_v52  ;;  %v38_v12 = vld [vmem:[%s819_s1 + $0x68] sm:$0xff]  ;;  %v69_v15 = vld [vmem:[%s819_s1 + $0x160] sm:$0xff]  ;;  %v514_v18 = vpack.c.bf16 %v86_v9, %v85_v8  ;;  %v55_v20 = vld [vmem:[%s819_s1 + $0xf0] sm:$0xff] }
  0x14   :  { %507 = vmatprep.subr.bf16.mxu1 %v506_v56  ;;  %v21_v16 = vld [vmem:[%s820_s0 + $0x8] sm:$0xff]  ;;  %v56_v21 = vld [vmem:[%s819_s1 + $0xf8] sm:$0xff]  ;;  %v87_v22 = vld [vmem:[%s819_s1 + $0x1f0] sm:$0xff]  ;;  %235 = vmatprep.mubr.f32.mxu1 %v23_v17  ;;  %v484_v24 = vpack.c.bf16 %v38_v12, %v37_v11  ;;  %v335_v17 = vlaneseq }
  0x15   :  { %v70_v19 = vld [vmem:[%s819_s1 + $0x168] sm:$0xff]  ;;  %165 = vmatprep.mubr.f32.mxu0 %v21_v16  ;;  %v88_v23 = vld [vmem:[%s819_s1 + $0x1f8] sm:$0xff]  ;;  %v486_v26 = vpack.c.bf16 %v56_v21, %v55_v20  ;;  %v39_v27 = vld [vmem:[%s819_s1 + $0x70] sm:$0xff] }
  0x16   :  { %477 = vmatpush3.bf16.msra.mxu0 %v476_v62  ;;  %v516_v25 = vpack.c.bf16 %v70_v19, %v69_v15  ;;  %v40_v28 = vld [vmem:[%s819_s1 + $0x78] sm:$0xff]  ;;  %v518_v29 = vpack.c.bf16 %v88_v23, %v87_v22  ;;  %v71_v30 = vld [vmem:[%s819_s1 + $0x170] sm:$0xff]  ;;  %v89_v34 = vld [vmem:[%s819_s1 + $0x200] sm:$0xff] }
  0x17   :  { %509 = vmatpush3.bf16.msra.mxu1 %v508_v63  ;;  %479 = vmatprep.subr.bf16.mxu0 %v478_v0  ;;  %v72_v31 = vld [vmem:[%s819_s1 + $0x178] sm:$0xff]  ;;  %v488_v32 = vpack.c.bf16 %v40_v28, %v39_v27  ;;  %v90_v35 = vld [vmem:[%s819_s1 + $0x208] sm:$0xff]  ;;  %v20_v36 = vld [vmem:[%s820_s0] sm:$0xff] }
  0x18   :  { %511 = vmatprep.subr.bf16.mxu1 %v510_v4  ;;  %v520_v33 = vpack.c.bf16 %v72_v31, %v71_v30  ;;  %v523_v37 = vpack.c.bf16 %v90_v35, %v89_v34  ;;  %v22_v38 = vld [vmem:[%s820_s0 + $0x10] sm:$0xff]  ;;  %v92_v41 = vld [vmem:[%s819_s1 + $0x218] sm:$0xff]  ;;  %v93_v43 = vld [vmem:[%s819_s1 + $0x220] sm:$0xff] }
  0x19   :  { %v91_v40 = vld [vmem:[%s819_s1 + $0x210] sm:$0xff]  ;;  %v94_v44 = vld [vmem:[%s819_s1 + $0x228] sm:$0xff]  ;;  %v96_v48 = vld [vmem:[%s819_s1 + $0x238] sm:$0xff] }
  0x1a   :  { %481 = vmatpush3.bf16.msra.mxu0 %v480_v10  ;;  %v526_v42 = vpack.c.bf16 %v92_v41, %v91_v40  ;;  %v529_v46 = vpack.c.bf16 %v94_v44, %v93_v43  ;;  %v95_v47 = vld [vmem:[%s819_s1 + $0x230] sm:$0xff]  ;;  %v24_v50 = vld [vmem:[%s820_s0 + $0x20] sm:$0xff] }
  0x1b   :  { %513 = vmatpush3.bf16.msra.mxu1 %v512_v13  ;;  %483 = vmatprep.subr.bf16.mxu0 %v482_v14  ;;  %v532_v49 = vpack.c.bf16 %v96_v48, %v95_v47  ;;  %v330_v19 = vld [vmem:[%s821_s2] sm:$0x1] }
  0x1c   :  { %515 = vmatprep.subr.bf16.mxu1 %v514_v18  ;;  %v336_v18 = vshrl.u32 %v335_v17, 7  ;;  %v341_v23 = vld [vmem:[%s822_s3] sm:$0x1] }
  0x1e   :  { %485 = vmatpush3.bf16.msra.mxu0 %v484_v24  ;;  %v337_v20 = vsub.s32 0, %v336_v18 }
  0x1f   :  { %517 = vmatpush3.bf16.msra.mxu1 %v516_v25  ;;  %487 = vmatprep.subr.bf16.mxu0 %v486_v26 }
  0x20   :  { %519 = vmatprep.subr.bf16.mxu1 %v518_v29  ;;  %v351_v29 = vld [vmem:[%s823_s4] sm:$0xff] }
  0x22   :  { %489 = vmatpush3.bf16.msra.mxu0 %v488_v32 }
  0x23   :  { %521 = vmatpush3.bf16.msra.mxu1 %v520_v33  ;;  %522 = vmatprep.subr.bf16.mxu0 %v539_v39 }
  0x25   :  { %166 = vmatmul.mubr.f32.vlgmr.msra.gmra.mrb[0].mxu0 %v20_v36 }
  0x26   :  { %236 = vmatmul.mubr.f32.vlgmr.msra.gmra.mrb[0].mxu1 %v22_v38  ;;  %524 = vmatpush3.bf16.msra.mxu0 %v523_v37 }
  0x27   :  { %525 = vmatprep.subr.bf16.mxu0 %v539_v39  ;;  %455 = vmatprep.mubr.msk.f32.mxu0 %vm540_vm0, %v541_v45 }
  0x2a   :  { %527 = vmatpush3.bf16.msra.mxu0 %v526_v42 }
  0x2b   :  { %528 = vmatprep.subr.bf16.mxu0 %v539_v39 }
  0x2e   :  { %530 = vmatpush3.bf16.msra.mxu0 %v529_v46 }
  0x2f   :  { %531 = vmatprep.subr.bf16.mxu0 %v539_v39 }
  0x32   :  { %533 = vmatpush3.bf16.msra.mxu0 %v532_v49 }
  0x35   :  { %456 = vmatmul.mubr.msk.f32.vlgmr.msra.gmra.mrb[2].mxu0 %vm97_vm1, %v24_v50 }
  0xf8   :  { %v392_v51 = vpop.f32.mrb[0].mxu0 }
  0xf9   :  { %v427_v52 = vpop.f32.mrb[0].mxu1  ;;  %v393_v53 = vpop.f32.mrb[1].mxu0 }
  0xfa   :  { %v394_v54 = vadd.f32 %v393_v53, %v392_v51  ;;  %v428_v55 = vpop.f32.mrb[1].mxu1 }
  0xfb   :  { %v429_v56 = vadd.f32 %v428_v55, %v427_v52 }
  0xfd   :  { %v238_v57 = vadd.f32 %v429_v56, %v394_v54 }
 0x108   :  { %v307_v58 = vpop.f32.mrb[2].mxu0 }
 0x109   :  { %v308_v59 = vadd.f32 %v307_v58, %v238_v57  ;;  %v457_v60 = vpop.f32.mrb[3].mxu0 }
 0x10b   :  { %v311_v61 = vsel %vm97_vm1, %v308_v59, 0.0  ;;  %v319_v62 = vmul.f32 %v308_v59, %v308_v59 }
 0x10c   :  { %v312_v63 = vrot.slane %v311_v61, 4 }
 0x10d   :  { %v320_v0 = vsel %vm97_vm1, %v319_v62, 0.0 }
 0x10e   :  { %v313_v1 = vadd.f32 %v312_v63, %v311_v61  ;;  %v321_v2 = vrot.slane %v320_v0, 4 }
 0x110   :  { %v314_v3 = vrot.slane %v313_v1, 2  ;;  %v322_v4 = vadd.f32 %v321_v2, %v320_v0 }
 0x112   :  { %v315_v5 = vadd.f32 %v314_v3, %v313_v1  ;;  %v323_v6 = vrot.slane %v322_v4, 2 }
 0x114   :  { %v316_v7 = vrot.slane %v315_v5, 1  ;;  %v324_v8 = vadd.f32 %v323_v6, %v322_v4 }
 0x116   :  { %v317_v9 = vadd.f32 %v316_v7, %v315_v5  ;;  %v325_v10 = vrot.slane %v324_v8, 1 }
 0x118   :  { %v318_v11 = vmul.f32 0.5, %v317_v9  ;;  %v326_v12 = vadd.f32 %v325_v10, %v324_v8 }
 0x11a   :  { %v327_v13 = vmul.f32 0.5, %v326_v12  ;;  %v328_v14 = vmul.f32 %v318_v11, %v318_v11 }
 0x11c   :  { %v329_v15 = vsub.f32 %v327_v13, %v328_v14 }
 0x11e   :  { %v331_v16 = vadd.f32 1e-05, %v329_v15 }
 0x120   :  { %537 = vrsqrt.f32 %v331_v16 }
 0x12a   :  { %v538_v21 = vpop.eup %537 }
 0x12b   :  { %v333_v22 = vmul.f32 %v538_v21, %v330_v19 }
 0x12d   :  { %v338_v24 = vrot.slane %v333_v22, %v337_v20  ;;  %v342_v25 = vmul.f32 %v333_v22, %v318_v11 }
 0x12f   :  { %v343_v26 = vsub.f32 %v341_v23, %v342_v25  ;;  %v340_v27 = vmul.f32 %v338_v24, %v308_v59 }
 0x131   :  { %v348_v28 = vrot.slane %v343_v26, %v337_v20 }
 0x133   :  { %v350_v30 = vadd.f32 %v348_v28, %v340_v27 }
 0x135   :  { %v352_v31 = vadd.f32 %v351_v29, %v350_v30 }
 0x137   :  { %v353_v32 = vmax.f32 %v352_v31, 0.0 }
 0x139   :  { %354 = vst.msk [vmem:[%s824_s5] sm:$0xff] %vm97_vm1, %v353_v32 }

// kernel: _lambda_.32
= control target key start
LH: loop header
LB: loop body
LE: loop exit
PB: predicated region body
PF: predicated region fallthrough
CT: control target
= control target key end

     0   :  { %vm555_vm0 = vmmov 0   ;;  %vm97_vm1 = vcmask 523264   ;;  %s834_s1 = inlined_call_operand.vmem [shape: f32[576,64], index: 1, kind: input, shape index: {}]   ;;  %s835_s0 = inlined_call_operand.vmem [shape: f32[8,576], index: 0, kind: input, shape index: {}]   ;;  %s836_s2 = inlined_call_operand.vmem [shape: f32[1,64], index: 2, kind: input, shape index: {}, may-alias: {2,4}]   ;;  %s837_s3 = inlined_call_operand.vmem [shape: f32[1,64], index: 3, kind: input, shape index: {}]   ;;  %s838_s4 = inlined_call_operand.vmem [shape: f32[1,64], index: 4, kind: input, shape index: {}, may-alias: {2,4}]   ;;  %s839_s5 = inlined_call_operand.vmem [shape: f32[8,64], index: 5, kind: output, shape index: {}]  }
   0x1   :  { %v41_v0 = vld [vmem:[%s834_s1 + $0x80] sm:$0xff]  ;;  %v42_v1 = vld [vmem:[%s834_s1 + $0x88] sm:$0xff]  ;;  %v43_v11 = vld [vmem:[%s834_s1 + $0x90] sm:$0xff] }
   0x2   :  { %v73_v2 = vld [vmem:[%s834_s1 + $0x180] sm:$0xff]  ;;  %v473_v3 = vpack.c.bf16 %v42_v1, %v41_v0  ;;  %v74_v4 = vld [vmem:[%s834_s1 + $0x188] sm:$0xff]  ;;  %v44_v13 = vld [vmem:[%s834_s1 + $0x98] sm:$0xff] }
   0x3   :  { %v25_v5 = vld [vmem:[%s834_s1] sm:$0xff]  ;;  %v26_v6 = vld [vmem:[%s834_s1 + $0x8] sm:$0xff]  ;;  %v505_v7 = vpack.c.bf16 %v74_v4, %v73_v2  ;;  %v75_v14 = vld [vmem:[%s834_s1 + $0x190] sm:$0xff]  ;;  %v477_v16 = vpack.c.bf16 %v44_v13, %v43_v11 }
   0x4   :  { %v475_v8 = vpack.c.bf16 %v26_v6, %v25_v5  ;;  %v57_v9 = vld [vmem:[%s834_s1 + $0x100] sm:$0xff]  ;;  %v58_v10 = vld [vmem:[%s834_s1 + $0x108] sm:$0xff]  ;;  %474 = vmatprep.subr.bf16.mxu0 %v473_v3  ;;  %v76_v15 = vld [vmem:[%s834_s1 + $0x198] sm:$0xff] }
   0x5   :  { %v507_v12 = vpack.c.bf16 %v58_v10, %v57_v9  ;;  %506 = vmatprep.subr.bf16.mxu1 %v505_v7  ;;  %v509_v17 = vpack.c.bf16 %v76_v15, %v75_v14  ;;  %v27_v18 = vld [vmem:[%s834_s1 + $0x10] sm:$0xff]  ;;  %v28_v19 = vld [vmem:[%s834_s1 + $0x18] sm:$0xff]  ;;  %v45_v23 = vld [vmem:[%s834_s1 + $0xa0] sm:$0xff] }
   0x6   :  { %476 = vmatpush3.bf16.msra.mxu0 %v475_v8  ;;  %v59_v20 = vld [vmem:[%s834_s1 + $0x110] sm:$0xff]  ;;  %v479_v21 = vpack.c.bf16 %v28_v19, %v27_v18  ;;  %v60_v22 = vld [vmem:[%s834_s1 + $0x118] sm:$0xff]  ;;  %v46_v24 = vld [vmem:[%s834_s1 + $0xa8] sm:$0xff] }
   0x7   :  { %508 = vmatpush3.bf16.msra.mxu1 %v507_v12  ;;  %478 = vmatprep.subr.bf16.mxu0 %v477_v16  ;;  %v511_v25 = vpack.c.bf16 %v60_v22, %v59_v20  ;;  %v481_v26 = vpack.c.bf16 %v46_v24, %v45_v23  ;;  %v77_v27 = vld [vmem:[%s834_s1 + $0x1a0] sm:$0xff]  ;;  %v78_v28 = vld [vmem:[%s834_s1 + $0x1a8] sm:$0xff]  ;;  %v47_v35 = vld [vmem:[%s834_s1 + $0xb0] sm:$0xff] }
   0x8   :  { %510 = vmatprep.subr.bf16.mxu1 %v509_v17  ;;  %v29_v29 = vld [vmem:[%s834_s1 + $0x20] sm:$0xff]  ;;  %v513_v30 = vpack.c.bf16 %v78_v28, %v77_v27  ;;  %v30_v31 = vld [vmem:[%s834_s1 + $0x28] sm:$0xff]  ;;  %v48_v36 = vld [vmem:[%s834_s1 + $0xb8] sm:$0xff] }
   0x9   :  { %v61_v32 = vld [vmem:[%s834_s1 + $0x120] sm:$0xff]  ;;  %v62_v33 = vld [vmem:[%s834_s1 + $0x128] sm:$0xff]  ;;  %v483_v34 = vpack.c.bf16 %v30_v31, %v29_v29  ;;  %v79_v37 = vld [vmem:[%s834_s1 + $0x1b0] sm:$0xff]  ;;  %v485_v39 = vpack.c.bf16 %v48_v36, %v47_v35 }
   0xa   :  { %480 = vmatpush3.bf16.msra.mxu0 %v479_v21  ;;  %v515_v38 = vpack.c.bf16 %v62_v33, %v61_v32  ;;  %v80_v40 = vld [vmem:[%s834_s1 + $0x1b8] sm:$0xff]  ;;  %v31_v41 = vld [vmem:[%s834_s1 + $0x30] sm:$0xff]  ;;  %v49_v46 = vld [vmem:[%s834_s1 + $0xc0] sm:$0xff] }
   0xb   :  { %512 = vmatpush3.bf16.msra.mxu1 %v511_v25  ;;  %482 = vmatprep.subr.bf16.mxu0 %v481_v26  ;;  %v32_v42 = vld [vmem:[%s834_s1 + $0x38] sm:$0xff]  ;;  %v517_v43 = vpack.c.bf16 %v80_v40, %v79_v37  ;;  %v63_v44 = vld [vmem:[%s834_s1 + $0x130] sm:$0xff]  ;;  %v50_v47 = vld [vmem:[%s834_s1 + $0xc8] sm:$0xff] }
   0xc   :  { %514 = vmatprep.subr.bf16.mxu1 %v513_v30  ;;  %v64_v45 = vld [vmem:[%s834_s1 + $0x138] sm:$0xff]  ;;  %v81_v48 = vld [vmem:[%s834_s1 + $0x1c0] sm:$0xff]  ;;  %v82_v49 = vld [vmem:[%s834_s1 + $0x1c8] sm:$0xff]  ;;  %v487_v50 = vpack.c.bf16 %v32_v42, %v31_v41  ;;  %v489_v52 = vpack.c.bf16 %v50_v47, %v49_v46 }
   0xd   :  { %v519_v51 = vpack.c.bf16 %v64_v45, %v63_v44  ;;  %v33_v53 = vld [vmem:[%s834_s1 + $0x40] sm:$0xff]  ;;  %v34_v54 = vld [vmem:[%s834_s1 + $0x48] sm:$0xff]  ;;  %v521_v56 = vpack.c.bf16 %v82_v49, %v81_v48  ;;  %v51_v58 = vld [vmem:[%s834_s1 + $0xd0] sm:$0xff]  ;;  %v556_v45 = vmov 0.0  }
   0xe   :  { %484 = vmatpush3.bf16.msra.mxu0 %v483_v34  ;;  %v65_v55 = vld [vmem:[%s834_s1 + $0x140] sm:$0xff]  ;;  %v66_v57 = vld [vmem:[%s834_s1 + $0x148] sm:$0xff]  ;;  %v52_v59 = vld [vmem:[%s834_s1 + $0xd8] sm:$0xff]  ;;  %v491_v62 = vpack.c.bf16 %v34_v54, %v33_v53 }
   0xf   :  { %516 = vmatpush3.bf16.msra.mxu1 %v515_v38  ;;  %486 = vmatprep.subr.bf16.mxu0 %v485_v39  ;;  %v83_v60 = vld [vmem:[%s834_s1 + $0x1d0] sm:$0xff]  ;;  %v84_v61 = vld [vmem:[%s834_s1 + $0x1d8] sm:$0xff]  ;;  %v523_v63 = vpack.c.bf16 %v66_v57, %v65_v55  ;;  %v493_v0 = vpack.c.bf16 %v52_v59, %v51_v58  ;;  %v53_v6 = vld [vmem:[%s834_s1 + $0xe0] sm:$0xff]  ;;  %v554_v39 = vmov 0.0|0.0  }
  0x10   :  { %518 = vmatprep.subr.bf16.mxu1 %v517_v43  ;;  %v35_v1 = vld [vmem:[%s834_s1 + $0x50] sm:$0xff]  ;;  %v36_v2 = vld [vmem:[%s834_s1 + $0x58] sm:$0xff]  ;;  %v525_v4 = vpack.c.bf16 %v84_v61, %v83_v60  ;;  %v54_v7 = vld [vmem:[%s834_s1 + $0xe8] sm:$0xff] }
  0x11   :  { %v67_v3 = vld [vmem:[%s834_s1 + $0x150] sm:$0xff]  ;;  %v68_v5 = vld [vmem:[%s834_s1 + $0x158] sm:$0xff]  ;;  %v85_v8 = vld [vmem:[%s834_s1 + $0x1e0] sm:$0xff]  ;;  %v495_v10 = vpack.c.bf16 %v36_v2, %v35_v1  ;;  %v497_v14 = vpack.c.bf16 %v54_v7, %v53_v6 }
  0x12   :  { %488 = vmatpush3.bf16.msra.mxu0 %v487_v50  ;;  %v86_v9 = vld [vmem:[%s834_s1 + $0x1e8] sm:$0xff]  ;;  %v37_v11 = vld [vmem:[%s834_s1 + $0x60] sm:$0xff]  ;;  %v527_v13 = vpack.c.bf16 %v68_v5, %v67_v3  ;;  %v23_v17 = vld [vmem:[%s835_s0 + $0x18] sm:$0xff] }
  0x13   :  { %520 = vmatpush3.bf16.msra.mxu1 %v519_v51  ;;  %490 = vmatprep.subr.bf16.mxu0 %v489_v52  ;;  %v38_v12 = vld [vmem:[%s834_s1 + $0x68] sm:$0xff]  ;;  %v69_v15 = vld [vmem:[%s834_s1 + $0x160] sm:$0xff]  ;;  %v529_v18 = vpack.c.bf16 %v86_v9, %v85_v8  ;;  %v55_v20 = vld [vmem:[%s834_s1 + $0xf0] sm:$0xff] }
  0x14   :  { %522 = vmatprep.subr.bf16.mxu1 %v521_v56  ;;  %v21_v16 = vld [vmem:[%s835_s0 + $0x8] sm:$0xff]  ;;  %v56_v21 = vld [vmem:[%s834_s1 + $0xf8] sm:$0xff]  ;;  %v87_v22 = vld [vmem:[%s834_s1 + $0x1f0] sm:$0xff]  ;;  %235 = vmatprep.mubr.f32.mxu1 %v23_v17  ;;  %v499_v24 = vpack.c.bf16 %v38_v12, %v37_v11  ;;  %v335_v17 = vlaneseq }
  0x15   :  { %v70_v19 = vld [vmem:[%s834_s1 + $0x168] sm:$0xff]  ;;  %165 = vmatprep.mubr.f32.mxu0 %v21_v16  ;;  %v88_v23 = vld [vmem:[%s834_s1 + $0x1f8] sm:$0xff]  ;;  %v501_v26 = vpack.c.bf16 %v56_v21, %v55_v20  ;;  %v39_v27 = vld [vmem:[%s834_s1 + $0x70] sm:$0xff] }
  0x16   :  { %492 = vmatpush3.bf16.msra.mxu0 %v491_v62  ;;  %v531_v25 = vpack.c.bf16 %v70_v19, %v69_v15  ;;  %v40_v28 = vld [vmem:[%s834_s1 + $0x78] sm:$0xff]  ;;  %v533_v29 = vpack.c.bf16 %v88_v23, %v87_v22  ;;  %v71_v30 = vld [vmem:[%s834_s1 + $0x170] sm:$0xff]  ;;  %v89_v34 = vld [vmem:[%s834_s1 + $0x200] sm:$0xff] }
  0x17   :  { %524 = vmatpush3.bf16.msra.mxu1 %v523_v63  ;;  %494 = vmatprep.subr.bf16.mxu0 %v493_v0  ;;  %v72_v31 = vld [vmem:[%s834_s1 + $0x178] sm:$0xff]  ;;  %v503_v32 = vpack.c.bf16 %v40_v28, %v39_v27  ;;  %v90_v35 = vld [vmem:[%s834_s1 + $0x208] sm:$0xff]  ;;  %v20_v36 = vld [vmem:[%s835_s0] sm:$0xff] }
  0x18   :  { %526 = vmatprep.subr.bf16.mxu1 %v525_v4  ;;  %v535_v33 = vpack.c.bf16 %v72_v31, %v71_v30  ;;  %v538_v37 = vpack.c.bf16 %v90_v35, %v89_v34  ;;  %v22_v38 = vld [vmem:[%s835_s0 + $0x10] sm:$0xff]  ;;  %v92_v41 = vld [vmem:[%s834_s1 + $0x218] sm:$0xff]  ;;  %v93_v43 = vld [vmem:[%s834_s1 + $0x220] sm:$0xff] }
  0x19   :  { %v91_v40 = vld [vmem:[%s834_s1 + $0x210] sm:$0xff]  ;;  %v94_v44 = vld [vmem:[%s834_s1 + $0x228] sm:$0xff]  ;;  %v96_v48 = vld [vmem:[%s834_s1 + $0x238] sm:$0xff] }
  0x1a   :  { %496 = vmatpush3.bf16.msra.mxu0 %v495_v10  ;;  %v541_v42 = vpack.c.bf16 %v92_v41, %v91_v40  ;;  %v544_v46 = vpack.c.bf16 %v94_v44, %v93_v43  ;;  %v95_v47 = vld [vmem:[%s834_s1 + $0x230] sm:$0xff]  ;;  %v24_v50 = vld [vmem:[%s835_s0 + $0x20] sm:$0xff] }
  0x1b   :  { %528 = vmatpush3.bf16.msra.mxu1 %v527_v13  ;;  %498 = vmatprep.subr.bf16.mxu0 %v497_v14  ;;  %v547_v49 = vpack.c.bf16 %v96_v48, %v95_v47  ;;  %v330_v19 = vld [vmem:[%s836_s2] sm:$0x1] }
  0x1c   :  { %530 = vmatprep.subr.bf16.mxu1 %v529_v18  ;;  %v336_v18 = vshrl.u32 %v335_v17, 7  ;;  %v341_v23 = vld [vmem:[%s837_s3] sm:$0x1] }
  0x1e   :  { %500 = vmatpush3.bf16.msra.mxu0 %v499_v24  ;;  %v337_v20 = vsub.s32 0, %v336_v18  ;;  %v351_v24 = vld [vmem:[%s838_s4] sm:$0x1] }
  0x1f   :  { %532 = vmatpush3.bf16.msra.mxu1 %v531_v25  ;;  %502 = vmatprep.subr.bf16.mxu0 %v501_v26  ;;  %v360_v28 = vsub.f32 1.0, %v351_v24 }
  0x20   :  { %534 = vmatprep.subr.bf16.mxu1 %v533_v29 }
  0x22   :  { %504 = vmatpush3.bf16.msra.mxu0 %v503_v32  ;;  %v357_v32 = vrot.slane %v351_v24, %v337_v20 }
  0x23   :  { %536 = vmatpush3.bf16.msra.mxu1 %v535_v33  ;;  %537 = vmatprep.subr.bf16.mxu0 %v554_v39  ;;  %v365_v33 = vrot.slane %v360_v28, %v337_v20 }
  0x25   :  { %166 = vmatmul.mubr.f32.vlgmr.msra.gmra.mrb[0].mxu0 %v20_v36 }
  0x26   :  { %236 = vmatmul.mubr.f32.vlgmr.msra.gmra.mrb[0].mxu1 %v22_v38  ;;  %539 = vmatpush3.bf16.msra.mxu0 %v538_v37 }
  0x27   :  { %540 = vmatprep.subr.bf16.mxu0 %v554_v39  ;;  %470 = vmatprep.mubr.msk.f32.mxu0 %vm555_vm0, %v556_v45 }
  0x2a   :  { %542 = vmatpush3.bf16.msra.mxu0 %v541_v42 }
  0x2b   :  { %543 = vmatprep.subr.bf16.mxu0 %v554_v39 }
  0x2e   :  { %545 = vmatpush3.bf16.msra.mxu0 %v544_v46 }
  0x2f   :  { %546 = vmatprep.subr.bf16.mxu0 %v554_v39 }
  0x32   :  { %548 = vmatpush3.bf16.msra.mxu0 %v547_v49 }
  0x35   :  { %471 = vmatmul.mubr.msk.f32.vlgmr.msra.gmra.mrb[2].mxu0 %vm97_vm1, %v24_v50 }
  0xf8   :  { %v407_v51 = vpop.f32.mrb[0].mxu0 }
  0xf9   :  { %v442_v52 = vpop.f32.mrb[0].mxu1  ;;  %v408_v53 = vpop.f32.mrb[1].mxu0 }
  0xfa   :  { %v409_v54 = vadd.f32 %v408_v53, %v407_v51  ;;  %v443_v55 = vpop.f32.mrb[1].mxu1 }
  0xfb   :  { %v444_v56 = vadd.f32 %v443_v55, %v442_v52 }
  0xfd   :  { %v238_v57 = vadd.f32 %v444_v56, %v409_v54 }
 0x108   :  { %v307_v58 = vpop.f32.mrb[2].mxu0 }
 0x109   :  { %v308_v59 = vadd.f32 %v307_v58, %v238_v57  ;;  %v472_v60 = vpop.f32.mrb[3].mxu0 }
 0x10b   :  { %v311_v61 = vsel %vm97_vm1, %v308_v59, 0.0  ;;  %v319_v62 = vmul.f32 %v308_v59, %v308_v59 }
 0x10c   :  { %v312_v63 = vrot.slane %v311_v61, 4 }
 0x10d   :  { %v320_v0 = vsel %vm97_vm1, %v319_v62, 0.0 }
 0x10e   :  { %v313_v1 = vadd.f32 %v312_v63, %v311_v61  ;;  %v321_v2 = vrot.slane %v320_v0, 4 }
 0x110   :  { %v314_v3 = vrot.slane %v313_v1, 2  ;;  %v322_v4 = vadd.f32 %v321_v2, %v320_v0 }
 0x112   :  { %v315_v5 = vadd.f32 %v314_v3, %v313_v1  ;;  %v323_v6 = vrot.slane %v322_v4, 2 }
 0x114   :  { %v316_v7 = vrot.slane %v315_v5, 1  ;;  %v324_v8 = vadd.f32 %v323_v6, %v322_v4 }
 0x116   :  { %v317_v9 = vadd.f32 %v316_v7, %v315_v5  ;;  %v325_v10 = vrot.slane %v324_v8, 1 }
 0x118   :  { %v318_v11 = vmul.f32 0.5, %v317_v9  ;;  %v326_v12 = vadd.f32 %v325_v10, %v324_v8 }
 0x11a   :  { %v327_v13 = vmul.f32 0.5, %v326_v12  ;;  %v328_v14 = vmul.f32 %v318_v11, %v318_v11 }
 0x11c   :  { %v329_v15 = vsub.f32 %v327_v13, %v328_v14 }
 0x11e   :  { %v331_v16 = vadd.f32 1e-05, %v329_v15 }
 0x120   :  { %552 = vrsqrt.f32 %v331_v16 }
 0x12a   :  { %v553_v21 = vpop.eup %552 }
 0x12b   :  { %v333_v22 = vmul.f32 %v553_v21, %v330_v19 }
 0x12d   :  { %v338_v25 = vrot.slane %v333_v22, %v337_v20  ;;  %v342_v26 = vmul.f32 %v333_v22, %v318_v11 }
 0x12f   :  { %v343_v27 = vsub.f32 %v341_v23, %v342_v26  ;;  %v340_v29 = vmul.f32 %v338_v25, %v308_v59 }
 0x131   :  { %v348_v30 = vrot.slane %v343_v27, %v337_v20 }
 0x133   :  { %v350_v31 = vadd.f32 %v348_v30, %v340_v29 }
 0x135   :  { %v352_v34 = vmax.f32 %v350_v31, 0.0  ;;  %v367_v36 = vmul.f32 %v365_v33, %v350_v31 }
 0x137   :  { %v359_v35 = vmul.f32 %v357_v32, %v352_v34 }
 0x139   :  { %v368_v37 = vadd.f32 %v367_v36, %v359_v35 }
 0x13b   :  { %369 = vst.msk [vmem:[%s839_s5] sm:$0xff] %vm97_vm1, %v368_v37 }

</bundles_post_ra>
